<compile_context>
chip_gen: v7x
topology: tpu7x:2x2x1
jax: 0.10.0
libtpu: 0.0.40
codegen_flags: <defaults>
</compile_context>

<pallas_src>
import functools

import jax
import jax.numpy as jnp
from jax.experimental import pallas as pl
from jax.experimental.pallas import tpu as pltpu

EPS = 1e-5                       # nn.BatchNorm2d default eps
_TM = 256                        # rows per M-tile (multiple of 8)
_VMEM_LIMIT = 32 * 1024 * 1024   # safe scoped-VMEM cap on v5e / v6e / v7x


def _round_up(x, m):
    return (x + m - 1) // m * m


def _cparams():
    return pltpu.CompilerParams(dimension_semantics=("parallel",),
                                vmem_limit_bytes=_VMEM_LIMIT)


# --------------------------------- kernels -------------------------------- #

def _conv1x1_stats_kernel(x_ref, w_ref, y_ref, sum_ref, ssq_ref):
    # x_ref: (TM, Cin) bf16   w_ref: (Cin, Co) bf16
    # y_ref: (TM, Co) f32     sum/ssq: (1, 1, Co) f32 per-tile partial stats
    y = jnp.dot(x_ref[...], w_ref[...], preferred_element_type=jnp.float32)
    y_ref[...] = y
    sum_ref[...] = jnp.sum(y, axis=0).reshape(1, 1, -1)
    ssq_ref[...] = jnp.sum(y * y, axis=0).reshape(1, 1, -1)


def _conv3x3_stats_kernel(y1_ref, s_ref, b_ref, w_ref, y2_ref, sum_ref,
                          ssq_ref, zp_ref):
    # y1_ref: (1, H, W, C) f32  raw conv1 output (one image)
    # s/b   : (1, C) f32        folded BN1 scale / shift
    # w_ref : (9, C, Co) bf16   3x3 taps flattened
    # y2_ref: (1, H, W, Co) f32 ; sum/ssq: (1, 1, Co) f32 per-image stats
    # zp_ref: (H+2, W+2, C) f32 VMEM scratch -- zero halo built in-kernel
    _, H, W, C = y1_ref.shape
    Co = w_ref.shape[-1]
    z = jnp.maximum(y1_ref[0] * s_ref[...] + b_ref[...], 0.0)   # BN1+ReLU, f32
    zp_ref[...] = jnp.zeros_like(zp_ref)
    zp_ref[1:H + 1, 1:W + 1, :] = z
    acc = jnp.zeros((H * W, Co), jnp.float32)
    for dy in range(3):
        for dx in range(3):
            patch = zp_ref[dy:dy + H, dx:dx + W, :].reshape(H * W, C)
            acc = acc + jnp.dot(patch.astype(jnp.bfloat16),
                                w_ref[dy * 3 + dx],
                                preferred_element_type=jnp.float32)
    y2_ref[...] = acc.reshape(1, H, W, Co)
    sum_ref[...] = jnp.sum(acc, axis=0).reshape(1, 1, -1)
    ssq_ref[...] = jnp.sum(acc * acc, axis=0).reshape(1, 1, -1)


def _conv1x1_bn_relu_stats_kernel(y2_ref, s_ref, b_ref, w_ref, y3_ref,
                                  sum_ref, ssq_ref, *, tm, m_valid, need_mask):
    # y2_ref: (TM, C) f32 raw conv2 rows ; s/b: (1, C) folded BN2 scale/shift
    # w_ref : (C, Co) bf16 ; y3_ref: (TM, Co) f32 ; sum/ssq: (1, 1, Co) f32
    z = jnp.maximum(y2_ref[...] * s_ref[...] + b_ref[...], 0.0)  # BN2+ReLU f32
    if need_mask:
        # Zero rows that are pure M-padding so the BN3 stats stay exact.
        row = pl.program_id(0) * tm + jax.lax.broadcasted_iota(
            jnp.int32, z.shape, 0)
        z = jnp.where(row < m_valid, z, 0.0)
    y = jnp.dot(z.astype(jnp.bfloat16), w_ref[...],
                preferred_element_type=jnp.float32)
    y3_ref[...] = y
    sum_ref[...] = jnp.sum(y, axis=0).reshape(1, 1, -1)
    ssq_ref[...] = jnp.sum(y * y, axis=0).reshape(1, 1, -1)


def _bn_add_relu_kernel(y3_ref, id_ref, s_ref, b_ref, o_ref):
    # BN3 apply + residual add + ReLU (all f32, pure VPU).
    o_ref[...] = jnp.maximum(
        y3_ref[...] * s_ref[...] + b_ref[...] + id_ref[...], 0.0)


# ---------------------------- pallas_call wrappers ------------------------ #

def _conv1x1_stats(x_bf16, w_bf16, tm):
    mp, cin = x_bf16.shape
    co = w_bf16.shape[1]
    gm = mp // tm
    return pl.pallas_call(
        _conv1x1_stats_kernel,
        grid=(gm,),
        in_specs=[pl.BlockSpec((tm, cin), lambda i: (i, 0)),
                  pl.BlockSpec((cin, co), lambda i: (0, 0))],
        out_specs=[pl.BlockSpec((tm, co), lambda i: (i, 0)),
                   pl.BlockSpec((1, 1, co), lambda i: (i, 0, 0)),
                   pl.BlockSpec((1, 1, co), lambda i: (i, 0, 0))],
        out_shape=(jax.ShapeDtypeStruct((mp, co), jnp.float32),
                   jax.ShapeDtypeStruct((gm, 1, co), jnp.float32),
                   jax.ShapeDtypeStruct((gm, 1, co), jnp.float32)),
        compiler_params=_cparams(),
        cost_estimate=pl.CostEstimate(
            flops=2 * mp * cin * co, transcendentals=0,
            bytes_accessed=mp * cin * 2 + cin * co * 2 + mp * co * 4),
    )(x_bf16, w_bf16)


def _conv3x3_stats(y1_nhwc, scale1, shift1, w9_bf16):
    n, h, w, c = y1_nhwc.shape
    co = w9_bf16.shape[-1]
    return pl.pallas_call(
        _conv3x3_stats_kernel,
        grid=(n,),
        in_specs=[pl.BlockSpec((1, h, w, c), lambda i: (i, 0, 0, 0)),
                  pl.BlockSpec((1, c), lambda i: (0, 0)),
                  pl.BlockSpec((1, c), lambda i: (0, 0)),
                  pl.BlockSpec((9, c, co), lambda i: (0, 0, 0))],
        out_specs=[pl.BlockSpec((1, h, w, co), lambda i: (i, 0, 0, 0)),
                   pl.BlockSpec((1, 1, co), lambda i: (i, 0, 0)),
                   pl.BlockSpec((1, 1, co), lambda i: (i, 0, 0))],
        out_shape=(jax.ShapeDtypeStruct((n, h, w, co), jnp.float32),
                   jax.ShapeDtypeStruct((n, 1, co), jnp.float32),
                   jax.ShapeDtypeStruct((n, 1, co), jnp.float32)),
        scratch_shapes=[pltpu.VMEM((h + 2, w + 2, c), jnp.float32)],
        compiler_params=_cparams(),
        cost_estimate=pl.CostEstimate(
            flops=2 * n * h * w * 9 * c * co, transcendentals=0,
            bytes_accessed=n * h * w * (c + co) * 4 + 9 * c * co * 2),
    )(y1_nhwc, scale1, shift1, w9_bf16)


def _conv1x1_bn_relu_stats(y2d, scale2, shift2, w_bf16, tm, m_valid):
    mp, c = y2d.shape
    co = w_bf16.shape[1]
    gm = mp // tm
    kernel = functools.partial(_conv1x1_bn_relu_stats_kernel, tm=tm,
                               m_valid=m_valid, need_mask=(mp != m_valid))
    return pl.pallas_call(
        kernel,
        grid=(gm,),
        in_specs=[pl.BlockSpec((tm, c), lambda i: (i, 0)),
                  pl.BlockSpec((1, c), lambda i: (0, 0)),
                  pl.BlockSpec((1, c), lambda i: (0, 0)),
                  pl.BlockSpec((c, co), lambda i: (0, 0))],
        out_specs=[pl.BlockSpec((tm, co), lambda i: (i, 0)),
                   pl.BlockSpec((1, 1, co), lambda i: (i, 0, 0)),
                   pl.BlockSpec((1, 1, co), lambda i: (i, 0, 0))],
        out_shape=(jax.ShapeDtypeStruct((mp, co), jnp.float32),
                   jax.ShapeDtypeStruct((gm, 1, co), jnp.float32),
                   jax.ShapeDtypeStruct((gm, 1, co), jnp.float32)),
        compiler_params=_cparams(),
        cost_estimate=pl.CostEstimate(
            flops=2 * mp * c * co, transcendentals=0,
            bytes_accessed=mp * c * 4 + c * co * 2 + mp * co * 4),
    )(y2d, scale2, shift2, w_bf16)


def _bn_add_relu(y3, identity, scale3, shift3, tm):
    mp, co = y3.shape
    gm = mp // tm
    return pl.pallas_call(
        _bn_add_relu_kernel,
        grid=(gm,),
        in_specs=[pl.BlockSpec((tm, co), lambda i: (i, 0)),
                  pl.BlockSpec((tm, co), lambda i: (i, 0)),
                  pl.BlockSpec((1, co), lambda i: (0, 0)),
                  pl.BlockSpec((1, co), lambda i: (0, 0))],
        out_specs=pl.BlockSpec((tm, co), lambda i: (i, 0)),
        out_shape=jax.ShapeDtypeStruct((mp, co), jnp.float32),
        compiler_params=_cparams(),
        cost_estimate=pl.CostEstimate(
            flops=3 * mp * co, transcendentals=0,
            bytes_accessed=3 * mp * co * 4),
    )(y3, identity, scale3, shift3)


# --------------------------------- module --------------------------------- #

def _fold_bn(sums, sumsqs, count, gamma, beta):
    # Global training-mode BN stats from one-pass partial sums; fold into
    # scale/shift so the apply is a single fused multiply-add in the consumer.
    s = jnp.sum(sums, axis=0)        # (1, C)
    q = jnp.sum(sumsqs, axis=0)      # (1, C)
    mean = s / count
    var = q / count - mean * mean
    scale = gamma * jax.lax.rsqrt(var + EPS)
    shift = beta - mean * scale
    return scale, shift


def init_bottleneck_params(key, inplanes, planes, base_width=64, groups=1):
    expansion = 4
    width = int(planes * (base_width / 64.0)) * groups
    out_planes = planes * expansion
    ks = jax.random.split(key, 9)
    return {
        "w1": 0.1 * jax.random.normal(ks[0], (inplanes, width), jnp.float32),
        "g1": 1.0 + 0.1 * jax.random.normal(ks[1], (1, width), jnp.float32),
        "b1": 0.1 * jax.random.normal(ks[2], (1, width), jnp.float32),
        "w2": 0.1 * jax.random.normal(ks[3], (3, 3, width, width), jnp.float32),
        "g2": 1.0 + 0.1 * jax.random.normal(ks[4], (1, width), jnp.float32),
        "b2": 0.1 * jax.random.normal(ks[5], (1, width), jnp.float32),
        "w3": 0.1 * jax.random.normal(ks[6], (width, out_planes), jnp.float32),
        "g3": 1.0 + 0.1 * jax.random.normal(ks[7], (1, out_planes), jnp.float32),
        "b3": 0.1 * jax.random.normal(ks[8], (1, out_planes), jnp.float32),
    }


@jax.jit
def bottleneck_forward(x_nchw, params):
    x = jnp.transpose(x_nchw, (0, 2, 3, 1)).astype(jnp.float32)  # NCHW -> NHWC
    n, h, w, cin = x.shape
    width = params["w1"].shape[1]
    cout = params["w3"].shape[1]
    m = n * h * w
    tm = min(_TM, _round_up(m, 8))
    mp = _round_up(m, tm)

    x2d = x.reshape(m, cin)
    if mp != m:
        x2d = jnp.pad(x2d, ((0, mp - m), (0, 0)))   # zero rows: stats-safe

    w1 = params["w1"].astype(jnp.bfloat16)
    w2 = params["w2"].reshape(9, width, width).astype(jnp.bfloat16)
    w3 = params["w3"].astype(jnp.bfloat16)

    # K1: conv1 (1x1) + one-pass batch stats of its output
    y1, s1, q1 = _conv1x1_stats(x2d.astype(jnp.bfloat16), w1, tm)
    scale1, shift1 = _fold_bn(s1, q1, m, params["g1"], params["b1"])

    # K2: BN1-apply + ReLU (fused) -> conv2 (3x3, pad 1) + stats
    y1_nhwc = y1[:m].reshape(n, h, w, width)
    y2, s2, q2 = _conv3x3_stats(y1_nhwc, scale1, shift1, w2)
    scale2, shift2 = _fold_bn(s2, q2, m, params["g2"], params["b2"])

    # K3: BN2-apply + ReLU (fused) -> conv3 (1x1) + stats
    y2d = y2.reshape(m, width)
    if mp != m:
        y2d = jnp.pad(y2d, ((0, mp - m), (0, 0)))
    y3, s3, q3 = _conv1x1_bn_relu_stats(y2d, scale2, shift2, w3, tm, m)
    scale3, shift3 = _fold_bn(s3, q3, m, params["g3"], params["b3"])

    # K4: BN3-apply + identity add + ReLU
    out2d = _bn_add_relu(y3, x2d, scale3, shift3, tm)
    out = out2d[:m].reshape(n, h, w, cout)
    return jnp.transpose(out, (0, 3, 1, 2))  # NHWC -> NCHW


# ----------------------------- pure-JAX reference ------------------------- #

def _ref_bn(y, g, b):
    mean = jnp.mean(y, axis=(0, 1, 2), keepdims=True)
    var = jnp.mean((y - mean) ** 2, axis=(0, 1, 2), keepdims=True)
    return (y - mean) * jax.lax.rsqrt(var + EPS) * g[None] + b[None]


def bottleneck_reference(x_nchw, params):
    # Mirrors the kernel's bf16-input / f32-accumulate matmul policy.
    x = jnp.transpose(x_nchw, (0, 2, 3, 1)).astype(jnp.float32)
    dn = ("NHWC", "HWIO", "NHWC")

    def conv(z, wk, pad):
        return jax.lax.conv_general_dilated(
            z.astype(jnp.bfloat16), wk.astype(jnp.bfloat16), (1, 1), pad,
            dimension_numbers=dn, preferred_element_type=jnp.float32)

    y = conv(x, params["w1"][None, None], "VALID")
    y = jnp.maximum(_ref_bn(y, params["g1"], params["b1"]), 0.0)
    y = conv(y, params["w2"], "SAME")
    y = jnp.maximum(_ref_bn(y, params["g2"], params["b2"]), 0.0)
    y = conv(y, params["w3"][None, None], "VALID")
    y = _ref_bn(y, params["g3"], params["b3"])
    y = jnp.maximum(y + x, 0.0)
    return jnp.transpose(y, (0, 3, 1, 2))


if __name__ == "__main__":
    # Module defaults: stride=1, groups=1, dilation=1, downsample=None, so the
    # identity add requires inplanes == planes * expansion.
    N, planes, H, W = 2, 16, 14, 14
    inplanes = planes * 4  # 64
    key = jax.random.PRNGKey(0)
    kx, kp = jax.random.split(key)
    x = jax.random.normal(kx, (N, inplanes, H, W), jnp.float32)  # NCHW input
    params = init_bottleneck_params(kp, inplanes, planes)

    out = bottleneck_forward(x, params)
    out = jax.block_until_ready(out)

    ref = bottleneck_reference(x, params)
    assert out.shape == (N, planes * 4, H, W), out.shape
    err = float(jnp.max(jnp.abs(out - ref)))
    assert err < 2e-2, err

    print("KERNEL_OK")
</pallas_src>

<mosaic_0001>
module attributes {stable_mosaic.version = 11 : i64} {
  func.func @_conv1x1_stats_kernel(%arg0: i32, %arg1: memref<256x64xbf16, #tpu.memory_space<vmem>>, %arg2: memref<64x16xbf16, #tpu.memory_space<vmem>>, %arg3: memref<256x16xf32, #tpu.memory_space<vmem>>, %arg4: memref<1x1x16xf32, #tpu.memory_space<vmem>>, %arg5: memref<1x1x16xf32, #tpu.memory_space<vmem>>) attributes {dimension_semantics = [#tpu.dimension_semantics<parallel>], iteration_bounds = array<i64: 2>, scalar_prefetch = 0 : i64, scratch_operands = 0 : i64, tpu.core_type = #tpu.core_type<tc>, window_params = [{transform_indices = @transform_0, window_bounds = array<i64: 256, 64>}, {pipeline_mode = #tpu.pipeline_mode<synchronous>, transform_indices = @transform_1, window_bounds = array<i64: 64, 16>}, {transform_indices = @transform_2, window_bounds = array<i64: 256, 16>}, {transform_indices = @transform_3, window_bounds = array<i64: 1, 1, 16>}, {transform_indices = @transform_4, window_bounds = array<i64: 1, 1, 16>}]} {
    %c0 = arith.constant 0 : index
    %c0_0 = arith.constant 0 : index
    %0 = vector.load %arg1[%c0, %c0_0] : memref<256x64xbf16, #tpu.memory_space<vmem>>, vector<256x64xbf16>
    %c0_1 = arith.constant 0 : index
    %c0_2 = arith.constant 0 : index
    %1 = vector.load %arg2[%c0_1, %c0_2] : memref<64x16xbf16, #tpu.memory_space<vmem>>, vector<64x16xbf16>
    %cst = arith.constant dense<0.000000e+00> : vector<256x16xf32>
    %2 = tpu.matmul %0, %1, %cst {dimension_numbers = #tpu.dot_dimension_numbers<[1], [0], [0], [1], [0, 0, 1, 1], [], []>} : vector<256x64xbf16>, vector<64x16xbf16>, vector<256x16xf32> -> vector<256x16xf32>
    %c0_3 = arith.constant 0 : index
    %c0_4 = arith.constant 0 : index
    %3 = vector.load %arg3[%c0_3, %c0_4] : memref<256x16xf32, #tpu.memory_space<vmem>>, vector<256x16xf32>
    tpu.vector_store %arg3[%c0_3, %c0_4], %2 {strides = array<i32>} : memref<256x16xf32, #tpu.memory_space<vmem>>, vector<256x16xf32>,
    %cst_5 = arith.constant dense<0.000000e+00> : vector<16xf32>
    %4 = vector.multi_reduction <add>, %2, %cst_5 [0] : vector<256x16xf32> to vector<16xf32>
    %5 = vector.shape_cast %4 : vector<16xf32> to vector<1x1x16xf32>
    %c0_6 = arith.constant 0 : index
    %c0_7 = arith.constant 0 : index
    %c0_8 = arith.constant 0 : index
    %6 = vector.load %arg4[%c0_6, %c0_7, %c0_8] : memref<1x1x16xf32, #tpu.memory_space<vmem>>, vector<1x1x16xf32>
    tpu.vector_store %arg4[%c0_6, %c0_7, %c0_8], %5 {strides = array<i32>} : memref<1x1x16xf32, #tpu.memory_space<vmem>>, vector<1x1x16xf32>,
    %7 = arith.mulf %2, %2 : vector<256x16xf32>
    %cst_9 = arith.constant dense<0.000000e+00> : vector<16xf32>
    %8 = vector.multi_reduction <add>, %7, %cst_9 [0] : vector<256x16xf32> to vector<16xf32>
    %9 = vector.shape_cast %8 : vector<16xf32> to vector<1x1x16xf32>
    %c0_10 = arith.constant 0 : index
    %c0_11 = arith.constant 0 : index
    %c0_12 = arith.constant 0 : index
    %10 = vector.load %arg5[%c0_10, %c0_11, %c0_12] : memref<1x1x16xf32, #tpu.memory_space<vmem>>, vector<1x1x16xf32>
    tpu.vector_store %arg5[%c0_10, %c0_11, %c0_12], %9 {strides = array<i32>} : memref<1x1x16xf32, #tpu.memory_space<vmem>>, vector<1x1x16xf32>,
    return
  }
  func.func @transform_0(%arg0: i32) -> (i32, i32) {
    %c0_i32 = arith.constant 0 : i32
    %c0_i32_0 = arith.constant 0 : i32
    return %arg0, %c0_i32 : i32, i32
  }
  func.func @transform_1(%arg0: i32) -> (i32, i32) {
    %c0_i32 = arith.constant 0 : i32
    %c0_i32_0 = arith.constant 0 : i32
    %c0_i32_1 = arith.constant 0 : i32
    return %c0_i32, %c0_i32_0 : i32, i32
  }
  func.func @transform_2(%arg0: i32) -> (i32, i32) {
    %c0_i32 = arith.constant 0 : i32
    %c0_i32_0 = arith.constant 0 : i32
    return %arg0, %c0_i32 : i32, i32
  }
  func.func @transform_3(%arg0: i32) -> (i32, i32, i32) {
    %c0_i32 = arith.constant 0 : i32
    %c0_i32_0 = arith.constant 0 : i32
    %c0_i32_1 = arith.constant 0 : i32
    return %arg0, %c0_i32, %c0_i32_0 : i32, i32, i32
  }
  func.func @transform_4(%arg0: i32) -> (i32, i32, i32) {
    %c0_i32 = arith.constant 0 : i32
    %c0_i32_0 = arith.constant 0 : i32
    %c0_i32_1 = arith.constant 0 : i32
    return %arg0, %c0_i32, %c0_i32_0 : i32, i32, i32
  }
}

module attributes {stable_mosaic.version = 11 : i64} {
  func.func @_conv3x3_stats_kernel(%arg0: i32, %arg1: memref<1x14x14x16xf32, #tpu.memory_space<vmem>>, %arg2: memref<1x16xf32, #tpu.memory_space<vmem>>, %arg3: memref<1x16xf32, #tpu.memory_space<vmem>>, %arg4: memref<9x16x16xbf16, #tpu.memory_space<vmem>>, %arg5: memref<1x14x14x16xf32, #tpu.memory_space<vmem>>, %arg6: memref<1x1x16xf32, #tpu.memory_space<vmem>>, %arg7: memref<1x1x16xf32, #tpu.memory_space<vmem>>, %arg8: memref<16x16x16xf32, #tpu.memory_space<vmem>>) attributes {dimension_semantics = [#tpu.dimension_semantics<parallel>], iteration_bounds = array<i64: 2>, scalar_prefetch = 0 : i64, scratch_operands = 1 : i64, tpu.core_type = #tpu.core_type<tc>, window_params = [{transform_indices = @transform_0, window_bounds = array<i64: 1, 14, 14, 16>}, {pipeline_mode = #tpu.pipeline_mode<synchronous>, transform_indices = @transform_1, window_bounds = array<i64: 1, 16>}, {pipeline_mode = #tpu.pipeline_mode<synchronous>, transform_indices = @transform_2, window_bounds = array<i64: 1, 16>}, {pipeline_mode = #tpu.pipeline_mode<synchronous>, transform_indices = @transform_3, window_bounds = array<i64: 9, 16, 16>}, {transform_indices = @transform_4, window_bounds = array<i64: 1, 14, 14, 16>}, {transform_indices = @transform_5, window_bounds = array<i64: 1, 1, 16>}, {transform_indices = @transform_6, window_bounds = array<i64: 1, 1, 16>}]} {
    %c0 = arith.constant 0 : index
    %c0_0 = arith.constant 0 : index
    %c0_1 = arith.constant 0 : index
    %c0_2 = arith.constant 0 : index
    %0 = vector.load %arg1[%c0, %c0_0, %c0_1, %c0_2] : memref<1x14x14x16xf32, #tpu.memory_space<vmem>>, vector<1x14x14x16xf32>
    %1 = vector.shape_cast %0 : vector<1x14x14x16xf32> to vector<14x14x16xf32>
    %c0_3 = arith.constant 0 : index
    %c0_4 = arith.constant 0 : index
    %2 = vector.load %arg2[%c0_3, %c0_4] : memref<1x16xf32, #tpu.memory_space<vmem>>, vector<1x16xf32>
    %3 = vector.shape_cast %2 : vector<1x16xf32> to vector<1x1x16xf32>
    %4 = vector.broadcast %3 : vector<1x1x16xf32> to vector<14x14x16xf32>
    %5 = arith.mulf %1, %4 : vector<14x14x16xf32>
    %c0_5 = arith.constant 0 : index
    %c0_6 = arith.constant 0 : index
    %6 = vector.load %arg3[%c0_5, %c0_6] : memref<1x16xf32, #tpu.memory_space<vmem>>, vector<1x16xf32>
    %7 = vector.shape_cast %6 : vector<1x16xf32> to vector<1x1x16xf32>
    %8 = vector.broadcast %7 : vector<1x1x16xf32> to vector<14x14x16xf32>
    %9 = arith.addf %5, %8 : vector<14x14x16xf32>
    %cst = arith.constant 0.000000e+00 : f32
    %10 = vector.broadcast %cst : f32 to vector<14x14x16xf32>
    %11 = arith.maximumf %9, %10 : vector<14x14x16xf32>
    %cst_7 = arith.constant 0.000000e+00 : f32
    %12 = vector.broadcast %cst_7 : f32 to vector<16x16x16xf32>
    %c0_8 = arith.constant 0 : index
    %c0_9 = arith.constant 0 : index
    %c0_10 = arith.constant 0 : index
    %13 = vector.load %arg8[%c0_8, %c0_9, %c0_10] : memref<16x16x16xf32, #tpu.memory_space<vmem>>, vector<16x16x16xf32>
    tpu.vector_store %arg8[%c0_8, %c0_9, %c0_10], %12 {strides = array<i32>} : memref<16x16x16xf32, #tpu.memory_space<vmem>>, vector<16x16x16xf32>,
    %c1 = arith.constant 1 : index
    %c1_11 = arith.constant 1 : index
    %c0_12 = arith.constant 0 : index
    %14 = vector.load %arg8[%c1, %c1_11, %c0_12] : memref<16x16x16xf32, #tpu.memory_space<vmem>>, vector<14x14x16xf32>
    tpu.vector_store %arg8[%c1, %c1_11, %c0_12], %11 {strides = array<i32>} : memref<16x16x16xf32, #tpu.memory_space<vmem>>, vector<14x14x16xf32>,
    %cst_13 = arith.constant 0.000000e+00 : f32
    %15 = vector.broadcast %cst_13 : f32 to vector<196x16xf32>
    %c0_14 = arith.constant 0 : index
    %c0_15 = arith.constant 0 : index
    %c0_16 = arith.constant 0 : index
    %16 = vector.load %arg8[%c0_14, %c0_15, %c0_16] : memref<16x16x16xf32, #tpu.memory_space<vmem>>, vector<14x14x16xf32>
    %17 = vector.shape_cast %16 : vector<14x14x16xf32> to vector<196x16xf32>
    %18 = arith.truncf %17 : vector<196x16xf32> to vector<196x16xbf16>
    %c0_17 = arith.constant 0 : index
    %c0_18 = arith.constant 0 : index
    %c0_19 = arith.constant 0 : index
    %19 = vector.load %arg4[%c0_17, %c0_18, %c0_19] : memref<9x16x16xbf16, #tpu.memory_space<vmem>>, vector<1x16x16xbf16>
    %20 = vector.shape_cast %19 : vector<1x16x16xbf16> to vector<16x16xbf16>
    %cst_20 = arith.constant dense<0.000000e+00> : vector<196x16xf32>
    %21 = tpu.matmul %18, %20, %cst_20 {dimension_numbers = #tpu.dot_dimension_numbers<[1], [0], [0], [1], [0, 0, 1, 1], [], []>} : vector<196x16xbf16>, vector<16x16xbf16>, vector<196x16xf32> -> vector<196x16xf32>
    %22 = arith.addf %15, %21 : vector<196x16xf32>
    %c0_21 = arith.constant 0 : index
    %c1_22 = arith.constant 1 : index
    %c0_23 = arith.constant 0 : index
    %23 = vector.load %arg8[%c0_21, %c1_22, %c0_23] : memref<16x16x16xf32, #tpu.memory_space<vmem>>, vector<14x14x16xf32>
    %24 = vector.shape_cast %23 : vector<14x14x16xf32> to vector<196x16xf32>
    %25 = arith.truncf %24 : vector<196x16xf32> to vector<196x16xbf16>
    %c1_24 = arith.constant 1 : index
    %c0_25 = arith.constant 0 : index
    %c0_26 = arith.constant 0 : index
    %26 = vector.load %arg4[%c1_24, %c0_25, %c0_26] : memref<9x16x16xbf16, #tpu.memory_space<vmem>>, vector<1x16x16xbf16>
    %27 = vector.shape_cast %26 : vector<1x16x16xbf16> to vector<16x16xbf16>
    %cst_27 = arith.constant dense<0.000000e+00> : vector<196x16xf32>
    %28 = tpu.matmul %25, %27, %cst_27 {dimension_numbers = #tpu.dot_dimension_numbers<[1], [0], [0], [1], [0, 0, 1, 1], [], []>} : vector<196x16xbf16>, vector<16x16xbf16>, vector<196x16xf32> -> vector<196x16xf32>
    %29 = arith.addf %22, %28 : vector<196x16xf32>
    %c0_28 = arith.constant 0 : index
    %c2 = arith.constant 2 : index
    %c0_29 = arith.constant 0 : index
    %30 = vector.load %arg8[%c0_28, %c2, %c0_29] : memref<16x16x16xf32, #tpu.memory_space<vmem>>, vector<14x14x16xf32>
    %31 = vector.shape_cast %30 : vector<14x14x16xf32> to vector<196x16xf32>
    %32 = arith.truncf %31 : vector<196x16xf32> to vector<196x16xbf16>
    %c2_30 = arith.constant 2 : index
    %c0_31 = arith.constant 0 : index
    %c0_32 = arith.constant 0 : index
    %33 = vector.load %arg4[%c2_30, %c0_31, %c0_32] : memref<9x16x16xbf16, #tpu.memory_space<vmem>>, vector<1x16x16xbf16>
    %34 = vector.shape_cast %33 : vector<1x16x16xbf16> to vector<16x16xbf16>
    %cst_33 = arith.constant dense<0.000000e+00> : vector<196x16xf32>
    %35 = tpu.matmul %32, %34, %cst_33 {dimension_numbers = #tpu.dot_dimension_numbers<[1], [0], [0], [1], [0, 0, 1, 1], [], []>} : vector<196x16xbf16>, vector<16x16xbf16>, vector<196x16xf32> -> vector<196x16xf32>
    %36 = arith.addf %29, %35 : vector<196x16xf32>
    %c1_34 = arith.constant 1 : index
    %c0_35 = arith.constant 0 : index
    %c0_36 = arith.constant 0 : index
    %37 = vector.load %arg8[%c1_34, %c0_35, %c0_36] : memref<16x16x16xf32, #tpu.memory_space<vmem>>, vector<14x14x16xf32>
    %38 = vector.shape_cast %37 : vector<14x14x16xf32> to vector<196x16xf32>
    %39 = arith.truncf %38 : vector<196x16xf32> to vector<196x16xbf16>
    %c3 = arith.constant 3 : index
    %c0_37 = arith.constant 0 : index
    %c0_38 = arith.constant 0 : index
    %40 = vector.load %arg4[%c3, %c0_37, %c0_38] : memref<9x16x16xbf16, #tpu.memory_space<vmem>>, vector<1x16x16xbf16>
    %41 = vector.shape_cast %40 : vector<1x16x16xbf16> to vector<16x16xbf16>
    %cst_39 = arith.constant dense<0.000000e+00> : vector<196x16xf32>
    %42 = tpu.matmul %39, %41, %cst_39 {dimension_numbers = #tpu.dot_dimension_numbers<[1], [0], [0], [1], [0, 0, 1, 1], [], []>} : vector<196x16xbf16>, vector<16x16xbf16>, vector<196x16xf32> -> vector<196x16xf32>
    %43 = arith.addf %36, %42 : vector<196x16xf32>
    %c1_40 = arith.constant 1 : index
    %c1_41 = arith.constant 1 : index
    %c0_42 = arith.constant 0 : index
    %44 = vector.load %arg8[%c1_40, %c1_41, %c0_42] : memref<16x16x16xf32, #tpu.memory_space<vmem>>, vector<14x14x16xf32>
    %45 = vector.shape_cast %44 : vector<14x14x16xf32> to vector<196x16xf32>
    %46 = arith.truncf %45 : vector<196x16xf32> to vector<196x16xbf16>
    %c4 = arith.constant 4 : index
    %c0_43 = arith.constant 0 : index
    %c0_44 = arith.constant 0 : index
    %47 = vector.load %arg4[%c4, %c0_43, %c0_44] : memref<9x16x16xbf16, #tpu.memory_space<vmem>>, vector<1x16x16xbf16>
    %48 = vector.shape_cast %47 : vector<1x16x16xbf16> to vector<16x16xbf16>
    %cst_45 = arith.constant dense<0.000000e+00> : vector<196x16xf32>
    %49 = tpu.matmul %46, %48, %cst_45 {dimension_numbers = #tpu.dot_dimension_numbers<[1], [0], [0], [1], [0, 0, 1, 1], [], []>} : vector<196x16xbf16>, vector<16x16xbf16>, vector<196x16xf32> -> vector<196x16xf32>
    %50 = arith.addf %43, %49 : vector<196x16xf32>
    %c1_46 = arith.constant 1 : index
    %c2_47 = arith.constant 2 : index
    %c0_48 = arith.constant 0 : index
    %51 = vector.load %arg8[%c1_46, %c2_47, %c0_48] : memref<16x16x16xf32, #tpu.memory_space<vmem>>, vector<14x14x16xf32>
    %52 = vector.shape_cast %51 : vector<14x14x16xf32> to vector<196x16xf32>
    %53 = arith.truncf %52 : vector<196x16xf32> to vector<196x16xbf16>
    %c5 = arith.constant 5 : index
    %c0_49 = arith.constant 0 : index
    %c0_50 = arith.constant 0 : index
    %54 = vector.load %arg4[%c5, %c0_49, %c0_50] : memref<9x16x16xbf16, #tpu.memory_space<vmem>>, vector<1x16x16xbf16>
    %55 = vector.shape_cast %54 : vector<1x16x16xbf16> to vector<16x16xbf16>
    %cst_51 = arith.constant dense<0.000000e+00> : vector<196x16xf32>
    %56 = tpu.matmul %53, %55, %cst_51 {dimension_numbers = #tpu.dot_dimension_numbers<[1], [0], [0], [1], [0, 0, 1, 1], [], []>} : vector<196x16xbf16>, vector<16x16xbf16>, vector<196x16xf32> -> vector<196x16xf32>
    %57 = arith.addf %50, %56 : vector<196x16xf32>
    %c2_52 = arith.constant 2 : index
    %c0_53 = arith.constant 0 : index
    %c0_54 = arith.constant 0 : index
    %58 = vector.load %arg8[%c2_52, %c0_53, %c0_54] : memref<16x16x16xf32, #tpu.memory_space<vmem>>, vector<14x14x16xf32>
    %59 = vector.shape_cast %58 : vector<14x14x16xf32> to vector<196x16xf32>
    %60 = arith.truncf %59 : vector<196x16xf32> to vector<196x16xbf16>
    %c6 = arith.constant 6 : index
    %c0_55 = arith.constant 0 : index
    %c0_56 = arith.constant 0 : index
    %61 = vector.load %arg4[%c6, %c0_55, %c0_56] : memref<9x16x16xbf16, #tpu.memory_space<vmem>>, vector<1x16x16xbf16>
    %62 = vector.shape_cast %61 : vector<1x16x16xbf16> to vector<16x16xbf16>
    %cst_57 = arith.constant dense<0.000000e+00> : vector<196x16xf32>
    %63 = tpu.matmul %60, %62, %cst_57 {dimension_numbers = #tpu.dot_dimension_numbers<[1], [0], [0], [1], [0, 0, 1, 1], [], []>} : vector<196x16xbf16>, vector<16x16xbf16>, vector<196x16xf32> -> vector<196x16xf32>
    %64 = arith.addf %57, %63 : vector<196x16xf32>
    %c2_58 = arith.constant 2 : index
    %c1_59 = arith.constant 1 : index
    %c0_60 = arith.constant 0 : index
    %65 = vector.load %arg8[%c2_58, %c1_59, %c0_60] : memref<16x16x16xf32, #tpu.memory_space<vmem>>, vector<14x14x16xf32>
    %66 = vector.shape_cast %65 : vector<14x14x16xf32> to vector<196x16xf32>
    %67 = arith.truncf %66 : vector<196x16xf32> to vector<196x16xbf16>
    %c7 = arith.constant 7 : index
    %c0_61 = arith.constant 0 : index
    %c0_62 = arith.constant 0 : index
    %68 = vector.load %arg4[%c7, %c0_61, %c0_62] : memref<9x16x16xbf16, #tpu.memory_space<vmem>>, vector<1x16x16xbf16>
    %69 = vector.shape_cast %68 : vector<1x16x16xbf16> to vector<16x16xbf16>
    %cst_63 = arith.constant dense<0.000000e+00> : vector<196x16xf32>
    %70 = tpu.matmul %67, %69, %cst_63 {dimension_numbers = #tpu.dot_dimension_numbers<[1], [0], [0], [1], [0, 0, 1, 1], [], []>} : vector<196x16xbf16>, vector<16x16xbf16>, vector<196x16xf32> -> vector<196x16xf32>
    %71 = arith.addf %64, %70 : vector<196x16xf32>
    %c2_64 = arith.constant 2 : index
    %c2_65 = arith.constant 2 : index
    %c0_66 = arith.constant 0 : index
    %72 = vector.load %arg8[%c2_64, %c2_65, %c0_66] : memref<16x16x16xf32, #tpu.memory_space<vmem>>, vector<14x14x16xf32>
    %73 = vector.shape_cast %72 : vector<14x14x16xf32> to vector<196x16xf32>
    %74 = arith.truncf %73 : vector<196x16xf32> to vector<196x16xbf16>
    %c8 = arith.constant 8 : index
    %c0_67 = arith.constant 0 : index
    %c0_68 = arith.constant 0 : index
    %75 = vector.load %arg4[%c8, %c0_67, %c0_68] : memref<9x16x16xbf16, #tpu.memory_space<vmem>>, vector<1x16x16xbf16>
    %76 = vector.shape_cast %75 : vector<1x16x16xbf16> to vector<16x16xbf16>
    %cst_69 = arith.constant dense<0.000000e+00> : vector<196x16xf32>
    %77 = tpu.matmul %74, %76, %cst_69 {dimension_numbers = #tpu.dot_dimension_numbers<[1], [0], [0], [1], [0, 0, 1, 1], [], []>} : vector<196x16xbf16>, vector<16x16xbf16>, vector<196x16xf32> -> vector<196x16xf32>
    %78 = arith.addf %71, %77 : vector<196x16xf32>
    %79 = vector.shape_cast %78 : vector<196x16xf32> to vector<1x14x14x16xf32>
    %c0_70 = arith.constant 0 : index
    %c0_71 = arith.constant 0 : index
    %c0_72 = arith.constant 0 : index
    %c0_73 = arith.constant 0 : index
    %80 = vector.load %arg5[%c0_70, %c0_71, %c0_72, %c0_73] : memref<1x14x14x16xf32, #tpu.memory_space<vmem>>, vector<1x14x14x16xf32>
    tpu.vector_store %arg5[%c0_70, %c0_71, %c0_72, %c0_73], %79 {strides = array<i32>} : memref<1x14x14x16xf32, #tpu.memory_space<vmem>>, vector<1x14x14x16xf32>,
    %cst_74 = arith.constant dense<0.000000e+00> : vector<16xf32>
    %81 = vector.multi_reduction <add>, %78, %cst_74 [0] : vector<196x16xf32> to vector<16xf32>
    %82 = vector.shape_cast %81 : vector<16xf32> to vector<1x1x16xf32>
    %c0_75 = arith.constant 0 : index
    %c0_76 = arith.constant 0 : index
    %c0_77 = arith.constant 0 : index
    %83 = vector.load %arg6[%c0_75, %c0_76, %c0_77] : memref<1x1x16xf32, #tpu.memory_space<vmem>>, vector<1x1x16xf32>
    tpu.vector_store %arg6[%c0_75, %c0_76, %c0_77], %82 {strides = array<i32>} : memref<1x1x16xf32, #tpu.memory_space<vmem>>, vector<1x1x16xf32>,
    %84 = arith.mulf %78, %78 : vector<196x16xf32>
    %cst_78 = arith.constant dense<0.000000e+00> : vector<16xf32>
    %85 = vector.multi_reduction <add>, %84, %cst_78 [0] : vector<196x16xf32> to vector<16xf32>
    %86 = vector.shape_cast %85 : vector<16xf32> to vector<1x1x16xf32>
    %c0_79 = arith.constant 0 : index
    %c0_80 = arith.constant 0 : index
    %c0_81 = arith.constant 0 : index
    %87 = vector.load %arg7[%c0_79, %c0_80, %c0_81] : memref<1x1x16xf32, #tpu.memory_space<vmem>>, vector<1x1x16xf32>
    tpu.vector_store %arg7[%c0_79, %c0_80, %c0_81], %86 {strides = array<i32>} : memref<1x1x16xf32, #tpu.memory_space<vmem>>, vector<1x1x16xf32>,
    return
  }
  func.func @transform_0(%arg0: i32) -> (i32, i32, i32, i32) {
    %c0_i32 = arith.constant 0 : i32
    %c0_i32_0 = arith.constant 0 : i32
    %c0_i32_1 = arith.constant 0 : i32
    %c0_i32_2 = arith.constant 0 : i32
    return %arg0, %c0_i32, %c0_i32_0, %c0_i32_1 : i32, i32, i32, i32
  }
  func.func @transform_1(%arg0: i32) -> (i32, i32) {
    %c0_i32 = arith.constant 0 : i32
    %c0_i32_0 = arith.constant 0 : i32
    %c0_i32_1 = arith.constant 0 : i32
    return %c0_i32, %c0_i32_0 : i32, i32
  }
  func.func @transform_2(%arg0: i32) -> (i32, i32) {
    %c0_i32 = arith.constant 0 : i32
    %c0_i32_0 = arith.constant 0 : i32
    %c0_i32_1 = arith.constant 0 : i32
    return %c0_i32, %c0_i32_0 : i32, i32
  }
  func.func @transform_3(%arg0: i32) -> (i32, i32, i32) {
    %c0_i32 = arith.constant 0 : i32
    %c0_i32_0 = arith.constant 0 : i32
    %c0_i32_1 = arith.constant 0 : i32
    %c0_i32_2 = arith.constant 0 : i32
    return %c0_i32, %c0_i32_0, %c0_i32_1 : i32, i32, i32
  }
  func.func @transform_4(%arg0: i32) -> (i32, i32, i32, i32) {
    %c0_i32 = arith.constant 0 : i32
    %c0_i32_0 = arith.constant 0 : i32
    %c0_i32_1 = arith.constant 0 : i32
    %c0_i32_2 = arith.constant 0 : i32
    return %arg0, %c0_i32, %c0_i32_0, %c0_i32_1 : i32, i32, i32, i32
  }
  func.func @transform_5(%arg0: i32) -> (i32, i32, i32) {
    %c0_i32 = arith.constant 0 : i32
    %c0_i32_0 = arith.constant 0 : i32
    %c0_i32_1 = arith.constant 0 : i32
    return %arg0, %c0_i32, %c0_i32_0 : i32, i32, i32
  }
  func.func @transform_6(%arg0: i32) -> (i32, i32, i32) {
    %c0_i32 = arith.constant 0 : i32
    %c0_i32_0 = arith.constant 0 : i32
    %c0_i32_1 = arith.constant 0 : i32
    return %arg0, %c0_i32, %c0_i32_0 : i32, i32, i32
  }
}

module attributes {stable_mosaic.version = 11 : i64} {
  func.func @_conv1x1_bn_relu_stats_kernel(%arg0: i32, %arg1: memref<256x16xf32, #tpu.memory_space<vmem>>, %arg2: memref<1x16xf32, #tpu.memory_space<vmem>>, %arg3: memref<1x16xf32, #tpu.memory_space<vmem>>, %arg4: memref<16x64xbf16, #tpu.memory_space<vmem>>, %arg5: memref<256x64xf32, #tpu.memory_space<vmem>>, %arg6: memref<1x1x64xf32, #tpu.memory_space<vmem>>, %arg7: memref<1x1x64xf32, #tpu.memory_space<vmem>>) attributes {dimension_semantics = [#tpu.dimension_semantics<parallel>], iteration_bounds = array<i64: 2>, scalar_prefetch = 0 : i64, scratch_operands = 0 : i64, tpu.core_type = #tpu.core_type<tc>, window_params = [{transform_indices = @transform_0, window_bounds = array<i64: 256, 16>}, {pipeline_mode = #tpu.pipeline_mode<synchronous>, transform_indices = @transform_1, window_bounds = array<i64: 1, 16>}, {pipeline_mode = #tpu.pipeline_mode<synchronous>, transform_indices = @transform_2, window_bounds = array<i64: 1, 16>}, {pipeline_mode = #tpu.pipeline_mode<synchronous>, transform_indices = @transform_3, window_bounds = array<i64: 16, 64>}, {transform_indices = @transform_4, window_bounds = array<i64: 256, 64>}, {transform_indices = @transform_5, window_bounds = array<i64: 1, 1, 64>}, {transform_indices = @transform_6, window_bounds = array<i64: 1, 1, 64>}]} {
    %c0 = arith.constant 0 : index
    %c0_0 = arith.constant 0 : index
    %0 = vector.load %arg1[%c0, %c0_0] : memref<256x16xf32, #tpu.memory_space<vmem>>, vector<256x16xf32>
    %c0_1 = arith.constant 0 : index
    %c0_2 = arith.constant 0 : index
    %1 = vector.load %arg2[%c0_1, %c0_2] : memref<1x16xf32, #tpu.memory_space<vmem>>, vector<1x16xf32>
    %2 = vector.broadcast %1 : vector<1x16xf32> to vector<256x16xf32>
    %3 = arith.mulf %0, %2 : vector<256x16xf32>
    %c0_3 = arith.constant 0 : index
    %c0_4 = arith.constant 0 : index
    %4 = vector.load %arg3[%c0_3, %c0_4] : memref<1x16xf32, #tpu.memory_space<vmem>>, vector<1x16xf32>
    %5 = vector.broadcast %4 : vector<1x16xf32> to vector<256x16xf32>
    %6 = arith.addf %3, %5 : vector<256x16xf32>
    %cst = arith.constant 0.000000e+00 : f32
    %7 = vector.broadcast %cst : f32 to vector<256x16xf32>
    %8 = arith.maximumf %6, %7 : vector<256x16xf32>
    %c256_i32 = arith.constant 256 : i32
    %9 = arith.muli %arg0, %c256_i32 : i32
    %10 = tpu.iota {dimensions = array<i32: 0>} : vector<256x16xi32>
    %11 = vector.broadcast %9 : i32 to vector<256x16xi32>
    %12 = arith.addi %11, %10 : vector<256x16xi32>
    %c392_i32 = arith.constant 392 : i32
    %13 = vector.broadcast %c392_i32 : i32 to vector<256x16xi32>
    %14 = arith.cmpi slt, %12, %13 : vector<256x16xi32>
    %cst_5 = arith.constant 0.000000e+00 : f32
    %15 = vector.broadcast %cst_5 : f32 to vector<256x16xf32>
    %16 = arith.select %14, %8, %15 : vector<256x16xi1>, vector<256x16xf32>
    %17 = arith.truncf %16 : vector<256x16xf32> to vector<256x16xbf16>
    %c0_6 = arith.constant 0 : index
    %c0_7 = arith.constant 0 : index
    %18 = vector.load %arg4[%c0_6, %c0_7] : memref<16x64xbf16, #tpu.memory_space<vmem>>, vector<16x64xbf16>
    %cst_8 = arith.constant dense<0.000000e+00> : vector<256x64xf32>
    %19 = tpu.matmul %17, %18, %cst_8 {dimension_numbers = #tpu.dot_dimension_numbers<[1], [0], [0], [1], [0, 0, 1, 1], [], []>} : vector<256x16xbf16>, vector<16x64xbf16>, vector<256x64xf32> -> vector<256x64xf32>
    %c0_9 = arith.constant 0 : index
    %c0_10 = arith.constant 0 : index
    %20 = vector.load %arg5[%c0_9, %c0_10] : memref<256x64xf32, #tpu.memory_space<vmem>>, vector<256x64xf32>
    tpu.vector_store %arg5[%c0_9, %c0_10], %19 {strides = array<i32>} : memref<256x64xf32, #tpu.memory_space<vmem>>, vector<256x64xf32>,
    %cst_11 = arith.constant dense<0.000000e+00> : vector<64xf32>
    %21 = vector.multi_reduction <add>, %19, %cst_11 [0] : vector<256x64xf32> to vector<64xf32>
    %22 = vector.shape_cast %21 : vector<64xf32> to vector<1x1x64xf32>
    %c0_12 = arith.constant 0 : index
    %c0_13 = arith.constant 0 : index
    %c0_14 = arith.constant 0 : index
    %23 = vector.load %arg6[%c0_12, %c0_13, %c0_14] : memref<1x1x64xf32, #tpu.memory_space<vmem>>, vector<1x1x64xf32>
    tpu.vector_store %arg6[%c0_12, %c0_13, %c0_14], %22 {strides = array<i32>} : memref<1x1x64xf32, #tpu.memory_space<vmem>>, vector<1x1x64xf32>,
    %24 = arith.mulf %19, %19 : vector<256x64xf32>
    %cst_15 = arith.constant dense<0.000000e+00> : vector<64xf32>
    %25 = vector.multi_reduction <add>, %24, %cst_15 [0] : vector<256x64xf32> to vector<64xf32>
    %26 = vector.shape_cast %25 : vector<64xf32> to vector<1x1x64xf32>
    %c0_16 = arith.constant 0 : index
    %c0_17 = arith.constant 0 : index
    %c0_18 = arith.constant 0 : index
    %27 = vector.load %arg7[%c0_16, %c0_17, %c0_18] : memref<1x1x64xf32, #tpu.memory_space<vmem>>, vector<1x1x64xf32>
    tpu.vector_store %arg7[%c0_16, %c0_17, %c0_18], %26 {strides = array<i32>} : memref<1x1x64xf32, #tpu.memory_space<vmem>>, vector<1x1x64xf32>,
    return
  }
  func.func @transform_0(%arg0: i32) -> (i32, i32) {
    %c0_i32 = arith.constant 0 : i32
    %c0_i32_0 = arith.constant 0 : i32
    return %arg0, %c0_i32 : i32, i32
  }
  func.func @transform_1(%arg0: i32) -> (i32, i32) {
    %c0_i32 = arith.constant 0 : i32
    %c0_i32_0 = arith.constant 0 : i32
    %c0_i32_1 = arith.constant 0 : i32
    return %c0_i32, %c0_i32_0 : i32, i32
  }
  func.func @transform_2(%arg0: i32) -> (i32, i32) {
    %c0_i32 = arith.constant 0 : i32
    %c0_i32_0 = arith.constant 0 : i32
    %c0_i32_1 = arith.constant 0 : i32
    return %c0_i32, %c0_i32_0 : i32, i32
  }
  func.func @transform_3(%arg0: i32) -> (i32, i32) {
    %c0_i32 = arith.constant 0 : i32
    %c0_i32_0 = arith.constant 0 : i32
    %c0_i32_1 = arith.constant 0 : i32
    return %c0_i32, %c0_i32_0 : i32, i32
  }
  func.func @transform_4(%arg0: i32) -> (i32, i32) {
    %c0_i32 = arith.constant 0 : i32
    %c0_i32_0 = arith.constant 0 : i32
    return %arg0, %c0_i32 : i32, i32
  }
  func.func @transform_5(%arg0: i32) -> (i32, i32, i32) {
    %c0_i32 = arith.constant 0 : i32
    %c0_i32_0 = arith.constant 0 : i32
    %c0_i32_1 = arith.constant 0 : i32
    return %arg0, %c0_i32, %c0_i32_0 : i32, i32, i32
  }
  func.func @transform_6(%arg0: i32) -> (i32, i32, i32) {
    %c0_i32 = arith.constant 0 : i32
    %c0_i32_0 = arith.constant 0 : i32
    %c0_i32_1 = arith.constant 0 : i32
    return %arg0, %c0_i32, %c0_i32_0 : i32, i32, i32
  }
}

module attributes {stable_mosaic.version = 11 : i64} {
  func.func @_bn_add_relu_kernel(%arg0: i32, %arg1: memref<256x64xf32, #tpu.memory_space<vmem>>, %arg2: memref<256x64xf32, #tpu.memory_space<vmem>>, %arg3: memref<1x64xf32, #tpu.memory_space<vmem>>, %arg4: memref<1x64xf32, #tpu.memory_space<vmem>>, %arg5: memref<256x64xf32, #tpu.memory_space<vmem>>) attributes {dimension_semantics = [#tpu.dimension_semantics<parallel>], iteration_bounds = array<i64: 2>, scalar_prefetch = 0 : i64, scratch_operands = 0 : i64, tpu.core_type = #tpu.core_type<tc>, window_params = [{transform_indices = @transform_0, window_bounds = array<i64: 256, 64>}, {transform_indices = @transform_1, window_bounds = array<i64: 256, 64>}, {pipeline_mode = #tpu.pipeline_mode<synchronous>, transform_indices = @transform_2, window_bounds = array<i64: 1, 64>}, {pipeline_mode = #tpu.pipeline_mode<synchronous>, transform_indices = @transform_3, window_bounds = array<i64: 1, 64>}, {transform_indices = @transform_4, window_bounds = array<i64: 256, 64>}]} {
    %c0 = arith.constant 0 : index
    %c0_0 = arith.constant 0 : index
    %0 = vector.load %arg1[%c0, %c0_0] : memref<256x64xf32, #tpu.memory_space<vmem>>, vector<256x64xf32>
    %c0_1 = arith.constant 0 : index
    %c0_2 = arith.constant 0 : index
    %1 = vector.load %arg3[%c0_1, %c0_2] : memref<1x64xf32, #tpu.memory_space<vmem>>, vector<1x64xf32>
    %2 = vector.broadcast %1 : vector<1x64xf32> to vector<256x64xf32>
    %3 = arith.mulf %0, %2 : vector<256x64xf32>
    %c0_3 = arith.constant 0 : index
    %c0_4 = arith.constant 0 : index
    %4 = vector.load %arg4[%c0_3, %c0_4] : memref<1x64xf32, #tpu.memory_space<vmem>>, vector<1x64xf32>
    %5 = vector.broadcast %4 : vector<1x64xf32> to vector<256x64xf32>
    %6 = arith.addf %3, %5 : vector<256x64xf32>
    %c0_5 = arith.constant 0 : index
    %c0_6 = arith.constant 0 : index
    %7 = vector.load %arg2[%c0_5, %c0_6] : memref<256x64xf32, #tpu.memory_space<vmem>>, vector<256x64xf32>
    %8 = arith.addf %6, %7 : vector<256x64xf32>
    %cst = arith.constant 0.000000e+00 : f32
    %9 = vector.broadcast %cst : f32 to vector<256x64xf32>
    %10 = arith.maximumf %8, %9 : vector<256x64xf32>
    %c0_7 = arith.constant 0 : index
    %c0_8 = arith.constant 0 : index
    %11 = vector.load %arg5[%c0_7, %c0_8] : memref<256x64xf32, #tpu.memory_space<vmem>>, vector<256x64xf32>
    tpu.vector_store %arg5[%c0_7, %c0_8], %10 {strides = array<i32>} : memref<256x64xf32, #tpu.memory_space<vmem>>, vector<256x64xf32>,
    return
  }
  func.func @transform_0(%arg0: i32) -> (i32, i32) {
    %c0_i32 = arith.constant 0 : i32
    %c0_i32_0 = arith.constant 0 : i32
    return %arg0, %c0_i32 : i32, i32
  }
  func.func @transform_1(%arg0: i32) -> (i32, i32) {
    %c0_i32 = arith.constant 0 : i32
    %c0_i32_0 = arith.constant 0 : i32
    return %arg0, %c0_i32 : i32, i32
  }
  func.func @transform_2(%arg0: i32) -> (i32, i32) {
    %c0_i32 = arith.constant 0 : i32
    %c0_i32_0 = arith.constant 0 : i32
    %c0_i32_1 = arith.constant 0 : i32
    return %c0_i32, %c0_i32_0 : i32, i32
  }
  func.func @transform_3(%arg0: i32) -> (i32, i32) {
    %c0_i32 = arith.constant 0 : i32
    %c0_i32_0 = arith.constant 0 : i32
    %c0_i32_1 = arith.constant 0 : i32
    return %c0_i32, %c0_i32_0 : i32, i32
  }
  func.func @transform_4(%arg0: i32) -> (i32, i32) {
    %c0_i32 = arith.constant 0 : i32
    %c0_i32_0 = arith.constant 0 : i32
    return %arg0, %c0_i32 : i32, i32
  }
}

</mosaic_0001>

<bundles_post_ra>
// kernel: bottleneck_forward.4
= control target key start
LH: loop header
LB: loop body
LE: loop exit
PB: predicated region body
PF: predicated region fallthrough
CT: control target
= control target key end

     0   :  { %s1061_s15 = smov 0   ;;  %s1368_s0 = inlined_call_operand.vmem [shape: bf16[512,64], index: 0, kind: input, shape index: {}]   ;;  %s1369_s1 = inlined_call_operand.vmem [shape: bf16[64,16], index: 1, kind: input, shape index: {}]   ;;  %s1370_s2 = inlined_call_operand.vmem [shape: f32[512,16], index: 2, kind: output, shape index: {0}]   ;;  %s1371_s3 = inlined_call_operand.vmem [shape: f32[2,1,16], index: 3, kind: output, shape index: {1}]   ;;  %s1372_s4 = inlined_call_operand.vmem [shape: f32[2,1,16], index: 4, kind: output, shape index: {2}]  }
   0x1 LB: > { %s1067_s16 = sadd.s32 4294967295, %s1034_s15   ;;  %p889_p0 = scmp.ge.s32.totalorder %s1034_s15, 1  ;;  %s1034_s15 = sphi %s1061_s15, %s15_s15  }
   0x2   : > { %p168_p1 = scmp.lt.s32.totalorder %s1034_s15, 3 }
   0x4   : > { %p169_p2 = pnand %p889_p0, %p168_p1 }
   0x5   : > { %v1008_v0 = vld [vmem:[%s1369_s1] sm:$0xff] (!%p169_p2)   ;;  %s890_s19 = sshll.u32 (!%p169_p2), %s1067_s16, 5  ;;  %v1009_v1 = vld [vmem:[%s1369_s1 + $0x8] sm:$0xff] (!%p169_p2)   ;;  %v1010_v2 = vld [vmem:[%s1369_s1 + $0x10] sm:$0xff] (!%p169_p2)   ;;  %vm363_vm0 = vcmask (!%p169_p2), 523264   ;;  %vm573_vm1 = vcmask (!%p169_p2), 130048  }
   0x6   : > { %172 = sbr.rel (%p169_p2) target bundleno = 315 (0x13b), region = 28  ;;  %p201_p3 = scmp.lt.s32.totalorder (!%p169_p2), %s890_s19, 63  ;;  %952 = vmatprep.subr.bf16.mxu0 (!%p169_p2), %v1008_v0  ;;  %992 = vmatprep.subr.bf16.mxu1 (!%p169_p2), %v1008_v0  ;;  %v1011_v4 = vld [vmem:[%s1369_s1 + $0x18] sm:$0xff] (!%p169_p2)   ;;  %vm675_vm2 = vcmask (!%p169_p2), 122880  }
   0x7   : > { %953 = vmatpush3.bf16.msra.mxu0 (!%p169_p2), %v1008_v0  ;;  %996 = vmatpush3.bf16.msra.mxu1 (!%p169_p2), %v1008_v0  ;;  %p212_p4 = scmp.lt.s32.totalorder (!%p169_p2), %s1067_s16, 1 }
   0x8   : > { %954 = vmatprep.subr.bf16.mxu0 (!%p169_p2), %v1009_v1  ;;  %993 = vmatprep.subr.bf16.mxu1 (!%p169_p2), %v1009_v1 }
   0xb   : > { %955 = vmatpush3.bf16.msra.mxu0 (!%p169_p2), %v1009_v1  ;;  %997 = vmatpush3.bf16.msra.mxu1 (!%p169_p2), %v1009_v1 }
   0xc   : > { %956 = vmatprep.subr.bf16.mxu0 (!%p169_p2), %v1010_v2  ;;  %994 = vmatprep.subr.bf16.mxu1 (!%p169_p2), %v1010_v2 }
   0xd   : > { %s1374_s19 = smov (!%p201_p3, %s890_s19), 63  ;;  %s1376_s16 = smov (!%p212_p4, %s1067_s16), 1 }
   0xe   : > { %s891_s24 = sshll.u32 %s1374_s19, 2  ;;  %s893_s30 = sshll.u32 %s1374_s19, 3 }
   0xf   : > { %s1087_s27 = scalar_lea.vmem %s1368_s0, %s891_s24  ;;  %957 = vmatpush3.bf16.msra.mxu0 %v1010_v2  ;;  %998 = vmatpush3.bf16.msra.mxu1 %v1010_v2  ;;  %s1128_s7 = scalar_lea.vmem %s1370_s2, %s893_s30 }
  0x10   : > { %v1012_v3 = vld [vmem:[%s1087_s27] sm:$0xff]   ;;  %958 = vmatprep.subr.bf16.mxu0 %v1011_v4  ;;  %995 = vmatprep.subr.bf16.mxu1 %v1011_v4  ;;  %v1013_v5 = vld [vmem:[%s1087_s27 + $0x8] sm:$0xff]   ;;  %v1014_v6 = vld [vmem:[%s1087_s27 + $0x10] sm:$0xff]   ;;  %s214_s10 = scalar_lea.vmem %s1371_s3, %s1376_s16  ;;  %s217_s13 = scalar_lea.vmem %s1372_s4, %s1376_s16 }
  0x11   : > { %960 = vmatprep.mubr.msk.bf16.mxu0 %vm363_vm0, %v1012_v3  ;;  %v1020_v7 = vld [vmem:[%s1087_s27 + $0x40] sm:$0xff]   ;;  %v1021_v8 = vld [vmem:[%s1087_s27 + $0x48] sm:$0xff]   ;;  %v1022_v9 = vld [vmem:[%s1087_s27 + $0x50] sm:$0xff]  }
  0x12   : > { %976 = vmatprep.mubr.msk.bf16.mxu1 %vm363_vm0, %v1020_v7  ;;  %v1015_v10 = vld [vmem:[%s1087_s27 + $0x18] sm:$0xff]   ;;  %v1016_v12 = vld [vmem:[%s1087_s27 + $0x20] sm:$0xff]   ;;  %v1017_v14 = vld [vmem:[%s1087_s27 + $0x28] sm:$0xff]  }
  0x13   : > { %959 = vmatpush3.bf16.msra.mxu0 %v1011_v4  ;;  %999 = vmatpush3.bf16.msra.mxu1 %v1011_v4  ;;  %v1023_v11 = vld [vmem:[%s1087_s27 + $0x58] sm:$0xff]   ;;  %v1024_v13 = vld [vmem:[%s1087_s27 + $0x60] sm:$0xff]   ;;  %v1025_v15 = vld [vmem:[%s1087_s27 + $0x68] sm:$0xff]  }
  0x14   : > { %v1018_v16 = vld [vmem:[%s1087_s27 + $0x30] sm:$0xff]   ;;  %v1019_v18 = vld [vmem:[%s1087_s27 + $0x38] sm:$0xff]  }
  0x15   : > { %v1026_v17 = vld [vmem:[%s1087_s27 + $0x70] sm:$0xff]   ;;  %v1027_v19 = vld [vmem:[%s1087_s27 + $0x78] sm:$0xff]  }
  0x16   : > { %961 = vmatmul.mubr.msk.bf16.vlgmr.msra.gmra.mrb[0].mxu0 %vm363_vm0, %v1013_v5  ;;  %977 = vmatmul.mubr.msk.bf16.vlgmr.msra.gmra.mrb[0].mxu1 %vm363_vm0, %v1021_v8 }
  0x17   : > { %964 = vmatprep.mubr.msk.bf16.mxu0 %vm363_vm0, %v1014_v6  ;;  %980 = vmatprep.mubr.msk.bf16.mxu1 %vm363_vm0, %v1022_v9 }
  0x1e   : > { %965 = vmatmul.mubr.msk.bf16.gmra.mrb[4].mxu0 %vm363_vm0, %v1015_v10  ;;  %981 = vmatmul.mubr.msk.bf16.gmra.mrb[4].mxu1 %vm363_vm0, %v1023_v11 }
  0x1f   : > { %968 = vmatprep.mubr.msk.bf16.mxu0 %vm363_vm0, %v1016_v12  ;;  %984 = vmatprep.mubr.msk.bf16.mxu1 %vm363_vm0, %v1024_v13 }
  0x26   : > { %969 = vmatmul.mubr.msk.bf16.gmra.mrb[8].mxu0 %vm363_vm0, %v1017_v14  ;;  %985 = vmatmul.mubr.msk.bf16.gmra.mrb[8].mxu1 %vm363_vm0, %v1025_v15 }
  0x27   : > { %972 = vmatprep.mubr.msk.bf16.mxu0 %vm363_vm0, %v1018_v16  ;;  %988 = vmatprep.mubr.msk.bf16.mxu1 %vm363_vm0, %v1026_v17 }
  0x2e   : > { %973 = vmatmul.mubr.msk.bf16.gmra.mrb[12].mxu0 %vm363_vm0, %v1019_v18  ;;  %989 = vmatmul.mubr.msk.bf16.gmra.mrb[12].mxu1 %vm363_vm0, %v1027_v19 }
  0xe9   : > { %v962_v20 = vpop.f32.mrb[0].mxu0  ;;  %v1130_v21 = vpop.f32.mrb[0].mxu1 }
  0xea   : > { %576 = vst.msk [vmem:[%s1128_s7 + $0x10] sm:$0xff] %vm573_vm1, %v962_v20  ;;  %v446_v22 = vpop.f32.mrb[1].mxu0  ;;  %592 = vst.msk [vmem:[%s1128_s7 + $0x90] sm:$0xff] %vm573_vm1, %v1130_v21  ;;  %v1137_v23 = vpop.f32.mrb[1].mxu1  ;;  %v679_v29 = vmul.f32 %v962_v20, %v962_v20  ;;  %v609_v34 = vsel %vm573_vm1, %v962_v20, 0.0 }
  0xeb   : > { %574 = vst.msk [vmem:[%s1128_s7] sm:$0xff] %vm573_vm1, %v446_v22  ;;  %v677_v24 = vmul.f32 %v446_v22, %v446_v22  ;;  %v963_v25 = vpop.f32.mrb[2].mxu0  ;;  %590 = vst.msk [vmem:[%s1128_s7 + $0x80] sm:$0xff] %vm573_vm1, %v1137_v23  ;;  %v1144_v26 = vpop.f32.mrb[2].mxu1  ;;  %v606_v30 = vsel %vm573_vm1, %v446_v22, 0.0 }
  0xec   : > { %577 = vst.msk [vmem:[%s1128_s7 + $0x18] sm:$0xff] %vm573_vm1, %v963_v25  ;;  %v449_v27 = vpop.f32.mrb[3].mxu0  ;;  %593 = vst.msk [vmem:[%s1128_s7 + $0x98] sm:$0xff] %vm573_vm1, %v1144_v26  ;;  %v1151_v28 = vpop.f32.mrb[3].mxu1  ;;  %v680_v36 = vmul.f32 %v963_v25, %v963_v25  ;;  %v712_v40 = vsel %vm573_vm1, %v679_v29, 0.0  ;;  %v611_v41 = vsel %vm573_vm1, %v963_v25, 0.0 }
  0xed   : > { %575 = vst.msk [vmem:[%s1128_s7 + $0x8] sm:$0xff] %vm573_vm1, %v449_v27  ;;  %v607_v31 = vsel %vm573_vm1, %v449_v27, 0.0  ;;  %v678_v32 = vmul.f32 %v449_v27, %v449_v27  ;;  %591 = vst.msk [vmem:[%s1128_s7 + $0x88] sm:$0xff] %vm573_vm1, %v1151_v28  ;;  %v709_v35 = vsel %vm573_vm1, %v677_v24, 0.0 }
  0xee   : > { %v608_v33 = vadd.f32 %v607_v31, %v606_v30  ;;  %v714_v48 = vsel %vm573_vm1, %v680_v36, 0.0 }
  0xef   : > { %v710_v37 = vsel %vm573_vm1, %v678_v32, 0.0 }
  0xf0   : > { %v610_v38 = vadd.f32 %v609_v34, %v608_v33  ;;  %v711_v39 = vadd.f32 %v710_v37, %v709_v35 }
  0xf1   : > { %v966_v42 = vpop.f32.mrb[4].mxu0  ;;  %v1165_v43 = vpop.f32.mrb[4].mxu1 }
  0xf2   : > { %v713_v44 = vadd.f32 %v712_v40, %v711_v39  ;;  %580 = vst.msk [vmem:[%s1128_s7 + $0x30] sm:$0xff] %vm573_vm1, %v966_v42  ;;  %v462_v45 = vpop.f32.mrb[5].mxu0  ;;  %v612_v46 = vadd.f32 %v611_v41, %v610_v38  ;;  %596 = vst.msk [vmem:[%s1128_s7 + $0xb0] sm:$0xff] %vm573_vm1, %v1165_v43  ;;  %v1172_v47 = vpop.f32.mrb[5].mxu1  ;;  %v683_v57 = vmul.f32 %v966_v42, %v966_v42  ;;  %v617_v63 = vsel %vm573_vm1, %v966_v42, 0.0 }
  0xf3   : > { %578 = vst.msk [vmem:[%s1128_s7 + $0x20] sm:$0xff] %vm573_vm1, %v462_v45  ;;  %v613_v49 = vsel %vm573_vm1, %v462_v45, 0.0  ;;  %v681_v50 = vmul.f32 %v462_v45, %v462_v45  ;;  %v967_v51 = vpop.f32.mrb[6].mxu0  ;;  %594 = vst.msk [vmem:[%s1128_s7 + $0xa0] sm:$0xff] %vm573_vm1, %v1172_v47  ;;  %v1181_v52 = vpop.f32.mrb[6].mxu1 }
  0xf4   : > { %v614_v53 = vadd.f32 %v613_v49, %v612_v46  ;;  %v715_v54 = vadd.f32 %v714_v48, %v713_v44  ;;  %581 = vst.msk [vmem:[%s1128_s7 + $0x38] sm:$0xff] %vm573_vm1, %v967_v51  ;;  %v465_v55 = vpop.f32.mrb[7].mxu0  ;;  %597 = vst.msk [vmem:[%s1128_s7 + $0xb8] sm:$0xff] %vm573_vm1, %v1181_v52  ;;  %v1188_v56 = vpop.f32.mrb[7].mxu1  ;;  %v684_v0 = vmul.f32 %v967_v51, %v967_v51  ;;  %v720_v4 = vsel %vm573_vm1, %v683_v57, 0.0 }
  0xf5   : > { %v716_v58 = vsel %vm573_vm1, %v681_v50, 0.0  ;;  %579 = vst.msk [vmem:[%s1128_s7 + $0x28] sm:$0xff] %vm573_vm1, %v465_v55  ;;  %v615_v59 = vsel %vm573_vm1, %v465_v55, 0.0  ;;  %v682_v60 = vmul.f32 %v465_v55, %v465_v55  ;;  %595 = vst.msk [vmem:[%s1128_s7 + $0xa8] sm:$0xff] %vm573_vm1, %v1188_v56  ;;  %v619_v5 = vsel %vm573_vm1, %v967_v51, 0.0 }
  0xf6   : > { %v717_v61 = vadd.f32 %v716_v58, %v715_v54  ;;  %v616_v62 = vadd.f32 %v615_v59, %v614_v53  ;;  %v722_v12 = vsel %vm573_vm1, %v684_v0, 0.0 }
  0xf7   : > { %v718_v1 = vsel %vm573_vm1, %v682_v60, 0.0 }
  0xf8   : > { %v618_v2 = vadd.f32 %v617_v63, %v616_v62  ;;  %v719_v3 = vadd.f32 %v718_v1, %v717_v61 }
  0xf9   : > { %v970_v6 = vpop.f32.mrb[8].mxu0  ;;  %v1201_v7 = vpop.f32.mrb[8].mxu1 }
  0xfa   : > { %v721_v8 = vadd.f32 %v720_v4, %v719_v3  ;;  %584 = vst.msk [vmem:[%s1128_s7 + $0x50] sm:$0xff] %vm573_vm1, %v970_v6  ;;  %v478_v9 = vpop.f32.mrb[9].mxu0  ;;  %v620_v10 = vadd.f32 %v619_v5, %v618_v2  ;;  %600 = vst.msk [vmem:[%s1128_s7 + $0xd0] sm:$0xff] %vm573_vm1, %v1201_v7  ;;  %v1208_v11 = vpop.f32.mrb[9].mxu1  ;;  %v687_v22 = vmul.f32 %v970_v6, %v970_v6  ;;  %v625_v31 = vsel %vm573_vm1, %v970_v6, 0.0 }
  0xfb   : > { %582 = vst.msk [vmem:[%s1128_s7 + $0x40] sm:$0xff] %vm573_vm1, %v478_v9  ;;  %v621_v13 = vsel %vm573_vm1, %v478_v9, 0.0  ;;  %v685_v14 = vmul.f32 %v478_v9, %v478_v9  ;;  %v971_v15 = vpop.f32.mrb[10].mxu0  ;;  %598 = vst.msk [vmem:[%s1128_s7 + $0xc0] sm:$0xff] %vm573_vm1, %v1208_v11  ;;  %v1217_v16 = vpop.f32.mrb[10].mxu1  ;;  %v693_v2 = vmul.f32 %v1137_v23, %v1137_v23 }
  0xfc   : > { %v622_v17 = vadd.f32 %v621_v13, %v620_v10  ;;  %v723_v18 = vadd.f32 %v722_v12, %v721_v8  ;;  %585 = vst.msk [vmem:[%s1128_s7 + $0x58] sm:$0xff] %vm573_vm1, %v971_v15  ;;  %v481_v19 = vpop.f32.mrb[11].mxu0  ;;  %601 = vst.msk [vmem:[%s1128_s7 + $0xd8] sm:$0xff] %vm573_vm1, %v1217_v16  ;;  %v1224_v20 = vpop.f32.mrb[11].mxu1  ;;  %v688_v32 = vmul.f32 %v971_v15, %v971_v15  ;;  %v728_v36 = vsel %vm573_vm1, %v687_v22, 0.0 }
  0xfd   : > { %v724_v24 = vsel %vm573_vm1, %v685_v14, 0.0  ;;  %583 = vst.msk [vmem:[%s1128_s7 + $0x48] sm:$0xff] %vm573_vm1, %v481_v19  ;;  %v623_v25 = vsel %vm573_vm1, %v481_v19, 0.0  ;;  %v686_v27 = vmul.f32 %v481_v19, %v481_v19  ;;  %599 = vst.msk [vmem:[%s1128_s7 + $0xc8] sm:$0xff] %vm573_vm1, %v1224_v20  ;;  %v627_v37 = vsel %vm573_vm1, %v971_v15, 0.0 }
  0xfe   : > { %v725_v29 = vadd.f32 %v724_v24, %v723_v18  ;;  %v624_v30 = vadd.f32 %v623_v25, %v622_v17  ;;  %v730_v45 = vsel %vm573_vm1, %v688_v32, 0.0  ;;  %v637_v8 = vsel %vm573_vm1, %v1137_v23, 0.0 }
  0xff   : > { %v726_v33 = vsel %vm573_vm1, %v686_v27, 0.0  ;;  %v740_v14 = vsel %vm573_vm1, %v693_v2, 0.0  ;;  %v694_v15 = vmul.f32 %v1151_v28, %v1151_v28  ;;  %v695_v23 = vmul.f32 %v1130_v21, %v1130_v21 }
 0x100   : > { %v626_v34 = vadd.f32 %v625_v31, %v624_v30  ;;  %v727_v35 = vadd.f32 %v726_v33, %v725_v29  ;;  %v639_v22 = vsel %vm573_vm1, %v1151_v28, 0.0  ;;  %v641_v27 = vsel %vm573_vm1, %v1130_v21, 0.0 }
 0x101   : > { %v974_v38 = vpop.f32.mrb[12].mxu0  ;;  %v1237_v39 = vpop.f32.mrb[12].mxu1  ;;  %v696_v29 = vmul.f32 %v1144_v26, %v1144_v26  ;;  %v742_v30 = vsel %vm573_vm1, %v694_v15, 0.0  ;;  %v697_v31 = vmul.f32 %v1172_v47, %v1172_v47  ;;  %v643_v28 = vsel %vm573_vm1, %v1144_v26, 0.0 }
 0x102   : > { %v729_v40 = vadd.f32 %v728_v36, %v727_v35  ;;  %588 = vst.msk [vmem:[%s1128_s7 + $0x70] sm:$0xff] %vm573_vm1, %v974_v38  ;;  %v494_v41 = vpop.f32.mrb[13].mxu0  ;;  %v628_v42 = vadd.f32 %v627_v37, %v626_v34  ;;  %604 = vst.msk [vmem:[%s1128_s7 + $0xf0] sm:$0xff] %vm573_vm1, %v1237_v39  ;;  %v1244_v44 = vpop.f32.mrb[13].mxu1  ;;  %v691_v57 = vmul.f32 %v974_v38, %v974_v38  ;;  %v633_v63 = vsel %vm573_vm1, %v974_v38, 0.0 }
 0x103   : > { %586 = vst.msk [vmem:[%s1128_s7 + $0x60] sm:$0xff] %vm573_vm1, %v494_v41  ;;  %v629_v46 = vsel %vm573_vm1, %v494_v41, 0.0  ;;  %v689_v48 = vmul.f32 %v494_v41, %v494_v41  ;;  %v975_v49 = vpop.f32.mrb[14].mxu0  ;;  %602 = vst.msk [vmem:[%s1128_s7 + $0xe0] sm:$0xff] %vm573_vm1, %v1244_v44  ;;  %v1253_v50 = vpop.f32.mrb[14].mxu1  ;;  %v744_v34 = vsel %vm573_vm1, %v695_v23, 0.0  ;;  %v703_v2 = vmul.f32 %v1201_v7, %v1201_v7 }
 0x104   : > { %v630_v51 = vadd.f32 %v629_v46, %v628_v42  ;;  %v731_v53 = vadd.f32 %v730_v45, %v729_v40  ;;  %589 = vst.msk [vmem:[%s1128_s7 + $0x78] sm:$0xff] %vm573_vm1, %v975_v49  ;;  %v497_v54 = vpop.f32.mrb[15].mxu0  ;;  %605 = vst.msk [vmem:[%s1128_s7 + $0xf8] sm:$0xff] %vm573_vm1, %v1253_v50  ;;  %v1260_v55 = vpop.f32.mrb[15].mxu1  ;;  %v692_v0 = vmul.f32 %v975_v49, %v975_v49  ;;  %v736_v5 = vsel %vm573_vm1, %v691_v57, 0.0 }
 0x105   : > { %v732_v58 = vsel %vm573_vm1, %v689_v48, 0.0  ;;  %587 = vst.msk [vmem:[%s1128_s7 + $0x68] sm:$0xff] %vm573_vm1, %v497_v54  ;;  %v631_v59 = vsel %vm573_vm1, %v497_v54, 0.0  ;;  %v690_v60 = vmul.f32 %v497_v54, %v497_v54  ;;  %603 = vst.msk [vmem:[%s1128_s7 + $0xe8] sm:$0xff] %vm573_vm1, %v1260_v55  ;;  %v635_v6 = vsel %vm573_vm1, %v975_v49, 0.0 }
 0x106   : > { %v733_v61 = vadd.f32 %v732_v58, %v731_v53  ;;  %v632_v62 = vadd.f32 %v631_v59, %v630_v51  ;;  %v708_v9 = vmul.f32 %v1253_v50, %v1253_v50  ;;  %v738_v13 = vsel %vm573_vm1, %v692_v0, 0.0 }
 0x107   : > { %v734_v1 = vsel %vm573_vm1, %v690_v60, 0.0  ;;  %v645_v35 = vsel %vm573_vm1, %v1172_v47, 0.0  ;;  %v746_v37 = vsel %vm573_vm1, %v696_v29, 0.0  ;;  %v748_v38 = vsel %vm573_vm1, %v697_v31, 0.0 }
 0x108   : > { %v634_v3 = vadd.f32 %v633_v63, %v632_v62  ;;  %v735_v4 = vadd.f32 %v734_v1, %v733_v61  ;;  %v1284_v17 = vsel %vm573_vm1, %v708_v9, 0.0  ;;  %v698_v40 = vmul.f32 %v1188_v56, %v1188_v56 }
 0x109   : > { %v699_v45 = vmul.f32 %v1165_v43, %v1165_v43  ;;  %v647_v26 = vsel %vm573_vm1, %v1188_v56, 0.0  ;;  %v649_v47 = vsel %vm573_vm1, %v1165_v43, 0.0  ;;  %v700_v49 = vmul.f32 %v1181_v52, %v1181_v52 }
 0x10a   : > { %v737_v10 = vadd.f32 %v736_v5, %v735_v4  ;;  %v636_v12 = vadd.f32 %v635_v6, %v634_v3  ;;  %v750_v51 = vsel %vm573_vm1, %v698_v40, 0.0  ;;  %v701_v53 = vmul.f32 %v1208_v11, %v1208_v11 }
 0x10b   : > { %v752_v58 = vsel %vm573_vm1, %v699_v45, 0.0  ;;  %v651_v56 = vsel %vm573_vm1, %v1181_v52, 0.0  ;;  %v653_v59 = vsel %vm573_vm1, %v1208_v11, 0.0  ;;  %v754_v61 = vsel %vm573_vm1, %v700_v49, 0.0 }
 0x10c   : > { %v638_v18 = vadd.f32 %v637_v8, %v636_v12  ;;  %v739_v19 = vadd.f32 %v738_v13, %v737_v10  ;;  %v756_v62 = vsel %vm573_vm1, %v701_v53, 0.0  ;;  %v702_v63 = vmul.f32 %v1224_v20, %v1224_v20 }
 0x10d   : > { %v655_v52 = vsel %vm573_vm1, %v1224_v20, 0.0  ;;  %v657_v11 = vsel %vm573_vm1, %v1201_v7, 0.0  ;;  %v704_v5 = vmul.f32 %v1217_v16, %v1217_v16  ;;  %v705_v8 = vmul.f32 %v1244_v44, %v1244_v44 }
 0x10e   : > { %v741_v24 = vadd.f32 %v740_v14, %v739_v19  ;;  %v640_v25 = vadd.f32 %v639_v22, %v638_v18  ;;  %v758_v6 = vsel %vm573_vm1, %v702_v63, 0.0  ;;  %v760_v12 = vsel %vm573_vm1, %v703_v2, 0.0 }
 0x10f   : > { %v659_v20 = vsel %vm573_vm1, %v1217_v16, 0.0  ;;  %v661_v13 = vsel %vm573_vm1, %v1244_v44, 0.0  ;;  %v762_v15 = vsel %vm573_vm1, %v704_v5, 0.0  ;;  %v764_v18 = vsel %vm573_vm1, %v705_v8, 0.0 }
 0x110   : > { %v642_v32 = vadd.f32 %v641_v27, %v640_v25  ;;  %v743_v33 = vadd.f32 %v742_v30, %v741_v24  ;;  %v706_v19 = vmul.f32 %v1260_v55, %v1260_v55  ;;  %v707_v24 = vmul.f32 %v1237_v39, %v1237_v39 }
 0x111   : > { %v663_v16 = vsel %vm573_vm1, %v1260_v55, 0.0  ;;  %v665_v27 = vsel %vm573_vm1, %v1237_v39, 0.0 }
 0x112   : > { %v745_v36 = vadd.f32 %v744_v34, %v743_v33  ;;  %v644_v21 = vadd.f32 %v643_v28, %v642_v32  ;;  %v766_v29 = vsel %vm573_vm1, %v706_v19, 0.0  ;;  %v768_v32 = vsel %vm573_vm1, %v707_v24, 0.0 }
 0x113   : > { %v667_v33 = vsel %vm573_vm1, %v1253_v50, 0.0 }
 0x114   : > { %v646_v41 = vadd.f32 %v645_v35, %v644_v21  ;;  %v747_v42 = vadd.f32 %v746_v37, %v745_v36 }
 0x116   : > { %v749_v46 = vadd.f32 %v748_v38, %v747_v42  ;;  %v648_v48 = vadd.f32 %v647_v26, %v646_v41 }
 0x118   : > { %v650_v54 = vadd.f32 %v649_v47, %v648_v48  ;;  %v751_v57 = vadd.f32 %v750_v51, %v749_v46 }
 0x11a   : > { %v753_v60 = vadd.f32 %v752_v58, %v751_v57  ;;  %v652_v43 = vadd.f32 %v651_v56, %v650_v54 }
 0x11c   : > { %v654_v0 = vadd.f32 %v653_v59, %v652_v43  ;;  %v755_v1 = vadd.f32 %v754_v61, %v753_v60 }
 0x11e   : > { %v757_v3 = vadd.f32 %v756_v62, %v755_v1  ;;  %v656_v4 = vadd.f32 %v655_v52, %v654_v0 }
 0x120   : > { %v658_v9 = vadd.f32 %v657_v11, %v656_v4  ;;  %v759_v10 = vadd.f32 %v758_v6, %v757_v3 }
 0x122   : > { %v761_v14 = vadd.f32 %v760_v12, %v759_v10  ;;  %v660_v7 = vadd.f32 %v659_v20, %v658_v9 }
 0x124   : > { %v662_v23 = vadd.f32 %v661_v13, %v660_v7  ;;  %v763_v22 = vadd.f32 %v762_v15, %v761_v14 }
 0x126   : > { %v765_v25 = vadd.f32 %v764_v18, %v763_v22  ;;  %v664_v44 = vadd.f32 %v663_v16, %v662_v23 }
 0x128   : > { %v666_v30 = vadd.f32 %v665_v27, %v664_v44  ;;  %v767_v31 = vadd.f32 %v766_v29, %v765_v25 }
 0x12a   : > { %v668_v34 = vadd.f32 %v667_v33, %v666_v30  ;;  %v769_v28 = vadd.f32 %v768_v32, %v767_v31 }
 0x12c   : > { %v669_v35 = vrot.slane %v668_v34, 4  ;;  %v771_v55 = vadd.f32 %v1284_v17, %v769_v28 }
 0x12e   : > { %v670_v36 = vadd.f32 %v669_v35, %v668_v34  ;;  %v772_v21 = vrot.slane %v771_v55, 4 }
 0x130   : > { %v671_v37 = vrot.slane %v670_v36, 2  ;;  %v773_v38 = vadd.f32 %v772_v21, %v771_v55 }
 0x132   : > { %v672_v39 = vadd.f32 %v671_v37, %v670_v36  ;;  %v774_v40 = vrot.slane %v773_v38, 2 }
 0x134   : > { %v673_v41 = vrot.slane %v672_v39, 1  ;;  %v775_v42 = vadd.f32 %v774_v40, %v773_v38 }
 0x136   : > { %v674_v50 = vadd.f32 %v673_v41, %v672_v39  ;;  %v776_v45 = vrot.slane %v775_v42, 1 }
 0x138   : > { %676 = vst.msk [vmem:[%s214_s10] sm:$0x1] %vm675_vm2, %v674_v50  ;;  %v777_v17 = vadd.f32 %v776_v45, %v775_v42 }
 0x13a   : > { %778 = vst.msk [vmem:[%s217_s13] sm:$0x1] %vm675_vm2, %v777_v17 }
 0x13b PF: > { %s15_s15 = sadd.s32 1, %s1034_s15  }
 0x13c   : > { %p12_p5 = scmp.ge.s32.totalorder %s15_s15, 4  }
 0x13e   :  { %14 = sbr.rel (!%p12_p5) target bundleno = 1 (0x1), region = 82 }

// kernel: bottleneck_forward.7
= control target key start
LH: loop header
LB: loop body
LE: loop exit
PB: predicated region body
PF: predicated region fallthrough
CT: control target
= control target key end

     0   :  { %s586_s15 = smov 0   ;;  %s819_s0 = inlined_call_operand.vmem [shape: f32[512,64], index: 0, kind: input, shape index: {}]   ;;  %s820_s1 = inlined_call_operand.vmem [shape: f32[512,64], index: 1, kind: input, shape index: {}]   ;;  %s821_s2 = inlined_call_operand.vmem [shape: f32[1,64], index: 2, kind: input, shape index: {}]   ;;  %s822_s3 = inlined_call_operand.vmem [shape: f32[1,64], index: 3, kind: input, shape index: {}]   ;;  %s823_s4 = inlined_call_operand.vmem [shape: f32[512,64], index: 4, kind: output, shape index: {}]  }
   0x1 LB: > { %s530_s16 = sadd.s32 4294967295, %s559_s15   ;;  %p534_p0 = scmp.ge.s32.totalorder %s559_s15, 1  ;;  %s559_s15 = sphi %s586_s15, %s14_s15  }
   0x2   : > { %p174_p1 = scmp.lt.s32.totalorder %s559_s15, 3 }
   0x4   : > { %p175_p2 = pnand %p534_p0, %p174_p1 }
   0x5   : > { %s535_s17 = sshll.u32 (!%p175_p2), %s530_s16, 5  ;;  %v599_v0 = vld [vmem:[%s821_s2] ss:$0 sm:$0xff] (!%p175_p2)  ;;  %vm429_vm0 = vcmask (!%p175_p2), 523264  }
   0x6   : > { %178 = sbr.rel (%p175_p2) target bundleno = 55 (0x37), region = 36  ;;  %p206_p3 = scmp.lt.s32.totalorder (!%p175_p2), %s535_s17, 63  ;;  %v617_v2 = vld [vmem:[%s822_s3] ss:$0 sm:$0xff] (!%p175_p2) }
   0xd   : > { %s825_s17 = smov (!%p206_p3, %s535_s17), 63 }
   0xe   : > { %s594_s18 = sshll.u32 %s825_s17, 3 }
   0xf   : > { %s605_s23 = scalar_lea.vmem %s819_s0, %s594_s18  ;;  %s611_s26 = scalar_lea.vmem %s820_s1, %s594_s18 }
  0x10   : > { %v223_v1 = vld [vmem:[%s605_s23] sm:$0xff]  ;;  %v224_v3 = vld [vmem:[%s605_s23 + $0x8] sm:$0xff]  ;;  %v225_v7 = vld [vmem:[%s605_s23 + $0x10] sm:$0xff]  ;;  %s647_s5 = scalar_lea.vmem %s823_s4, %s594_s18 }
  0x11   : > { %v262_v4 = vmul.f32 %v599_v0, %v223_v1  ;;  %v333_v5 = vld [vmem:[%s611_s26] sm:$0xff]  ;;  %v263_v6 = vmul.f32 %v599_v0, %v224_v3  ;;  %v334_v8 = vld [vmem:[%s611_s26 + $0x8] sm:$0xff]  ;;  %v264_v9 = vmul.f32 %v599_v0, %v225_v7  ;;  %v226_v10 = vld [vmem:[%s605_s23 + $0x18] sm:$0xff] }
  0x12   : > { %v227_v11 = vld [vmem:[%s605_s23 + $0x20] sm:$0xff]  ;;  %v335_v14 = vld [vmem:[%s611_s26 + $0x10] sm:$0xff]  ;;  %v265_v15 = vmul.f32 %v599_v0, %v226_v10  ;;  %v336_v16 = vld [vmem:[%s611_s26 + $0x18] sm:$0xff] }
  0x13   : > { %v301_v12 = vadd.f32 %v617_v2, %v262_v4  ;;  %v302_v13 = vadd.f32 %v617_v2, %v263_v6  ;;  %v266_v17 = vmul.f32 %v599_v0, %v227_v11  ;;  %v228_v18 = vld [vmem:[%s605_s23 + $0x28] sm:$0xff]  ;;  %v303_v19 = vadd.f32 %v617_v2, %v264_v9  ;;  %v337_v20 = vld [vmem:[%s611_s26 + $0x20] sm:$0xff]  ;;  %v229_v22 = vld [vmem:[%s605_s23 + $0x30] sm:$0xff] }
  0x14   : > { %v267_v21 = vmul.f32 %v599_v0, %v228_v18  ;;  %v230_v23 = vld [vmem:[%s605_s23 + $0x38] sm:$0xff]  ;;  %v304_v26 = vadd.f32 %v617_v2, %v265_v15  ;;  %v338_v28 = vld [vmem:[%s611_s26 + $0x28] sm:$0xff]  ;;  %v268_v31 = vmul.f32 %v599_v0, %v229_v22  ;;  %v231_v33 = vld [vmem:[%s605_s23 + $0x40] sm:$0xff] }
  0x15   : > { %v365_v24 = vadd.f32 %v333_v5, %v301_v12  ;;  %v366_v25 = vadd.f32 %v334_v8, %v302_v13  ;;  %v305_v27 = vadd.f32 %v617_v2, %v266_v17  ;;  %v367_v29 = vadd.f32 %v335_v14, %v303_v19  ;;  %v232_v34 = vld [vmem:[%s605_s23 + $0x48] sm:$0xff]  ;;  %v339_v39 = vld [vmem:[%s611_s26 + $0x30] sm:$0xff]  ;;  %v340_v40 = vld [vmem:[%s611_s26 + $0x38] sm:$0xff] }
  0x16   : > { %v306_v30 = vadd.f32 %v617_v2, %v267_v21  ;;  %v269_v32 = vmul.f32 %v599_v0, %v230_v23  ;;  %v368_v37 = vadd.f32 %v336_v16, %v304_v26  ;;  %v233_v41 = vld [vmem:[%s605_s23 + $0x50] sm:$0xff]  ;;  %v307_v44 = vadd.f32 %v617_v2, %v268_v31  ;;  %v234_v46 = vld [vmem:[%s605_s23 + $0x58] sm:$0xff]  ;;  %v235_v47 = vld [vmem:[%s605_s23 + $0x60] sm:$0xff] }
  0x17   : > { %v397_v35 = vmax.f32 %v365_v24, 0.0  ;;  %v398_v36 = vmax.f32 %v366_v25, 0.0  ;;  %v369_v38 = vadd.f32 %v337_v20, %v305_v27  ;;  %v399_v42 = vmax.f32 %v367_v29, 0.0  ;;  %v236_v52 = vld [vmem:[%s605_s23 + $0x68] sm:$0xff]  ;;  %v341_v56 = vld [vmem:[%s611_s26 + $0x40] sm:$0xff]  ;;  %v343_v61 = vld [vmem:[%s611_s26 + $0x50] sm:$0xff] }
  0x18   : > { %v370_v43 = vadd.f32 %v338_v28, %v306_v30  ;;  %v308_v45 = vadd.f32 %v617_v2, %v269_v32  ;;  %v400_v48 = vmax.f32 %v368_v37, 0.0  ;;  %v270_v50 = vmul.f32 %v599_v0, %v231_v33  ;;  %v342_v57 = vld [vmem:[%s611_s26 + $0x48] sm:$0xff]  ;;  %v237_v1 = vld [vmem:[%s605_s23 + $0x70] sm:$0xff]  ;;  %v238_v3 = vld [vmem:[%s605_s23 + $0x78] sm:$0xff] }
  0x19   : > { %430 = vst.msk [vmem:[%s647_s5] sm:$0xff] %vm429_vm0, %v397_v35  ;;  %431 = vst.msk [vmem:[%s647_s5 + $0x8] sm:$0xff] %vm429_vm0, %v398_v36  ;;  %v401_v49 = vmax.f32 %v369_v38, 0.0  ;;  %v271_v51 = vmul.f32 %v599_v0, %v232_v34  ;;  %v371_v54 = vadd.f32 %v339_v39, %v307_v44  ;;  %v272_v58 = vmul.f32 %v599_v0, %v233_v41  ;;  %v344_v7 = vld [vmem:[%s611_s26 + $0x58] sm:$0xff]  ;;  %v345_v8 = vld [vmem:[%s611_s26 + $0x60] sm:$0xff] }
  0x1a   : > { %432 = vst.msk [vmem:[%s647_s5 + $0x10] sm:$0xff] %vm429_vm0, %v399_v42  ;;  %v402_v53 = vmax.f32 %v370_v43, 0.0  ;;  %v372_v55 = vadd.f32 %v340_v40, %v308_v45  ;;  %433 = vst.msk [vmem:[%s647_s5 + $0x18] sm:$0xff] %vm429_vm0, %v400_v48  ;;  %v309_v59 = vadd.f32 %v617_v2, %v270_v50  ;;  %v273_v62 = vmul.f32 %v599_v0, %v234_v46  ;;  %v346_v14 = vld [vmem:[%s611_s26 + $0x68] sm:$0xff]  ;;  %v239_v19 = vld [vmem:[%s605_s23 + $0x80] sm:$0xff] }
  0x1b   : > { %434 = vst.msk [vmem:[%s647_s5 + $0x20] sm:$0xff] %vm429_vm0, %v401_v49  ;;  %v310_v60 = vadd.f32 %v617_v2, %v271_v51  ;;  %v274_v63 = vmul.f32 %v599_v0, %v235_v47  ;;  %v403_v4 = vmax.f32 %v371_v54, 0.0  ;;  %v311_v6 = vadd.f32 %v617_v2, %v272_v58  ;;  %v240_v20 = vld [vmem:[%s605_s23 + $0x88] sm:$0xff]  ;;  %v347_v25 = vld [vmem:[%s611_s26 + $0x70] sm:$0xff]  ;;  %v348_v26 = vld [vmem:[%s611_s26 + $0x78] sm:$0xff] }
  0x1c   : > { %435 = vst.msk [vmem:[%s647_s5 + $0x28] sm:$0xff] %vm429_vm0, %v402_v53  ;;  %v404_v5 = vmax.f32 %v372_v55, 0.0  ;;  %v275_v9 = vmul.f32 %v599_v0, %v236_v52  ;;  %v373_v10 = vadd.f32 %v341_v56, %v309_v59  ;;  %v312_v12 = vadd.f32 %v617_v2, %v273_v62  ;;  %v241_v27 = vld [vmem:[%s605_s23 + $0x90] sm:$0xff]  ;;  %v242_v32 = vld [vmem:[%s605_s23 + $0x98] sm:$0xff]  ;;  %v243_v33 = vld [vmem:[%s605_s23 + $0xa0] sm:$0xff] }
  0x1d   : > { %v374_v11 = vadd.f32 %v342_v57, %v310_v60  ;;  %v313_v13 = vadd.f32 %v617_v2, %v274_v63  ;;  %436 = vst.msk [vmem:[%s647_s5 + $0x30] sm:$0xff] %vm429_vm0, %v403_v4  ;;  %v375_v15 = vadd.f32 %v343_v61, %v311_v6  ;;  %v276_v17 = vmul.f32 %v599_v0, %v237_v1  ;;  %v244_v38 = vld [vmem:[%s605_s23 + $0xa8] sm:$0xff]  ;;  %v349_v42 = vld [vmem:[%s611_s26 + $0x80] sm:$0xff]  ;;  %v351_v47 = vld [vmem:[%s611_s26 + $0x90] sm:$0xff] }
  0x1e   : > { %437 = vst.msk [vmem:[%s647_s5 + $0x38] sm:$0xff] %vm429_vm0, %v404_v5  ;;  %v314_v16 = vadd.f32 %v617_v2, %v275_v9  ;;  %v277_v18 = vmul.f32 %v599_v0, %v238_v3  ;;  %v405_v21 = vmax.f32 %v373_v10, 0.0  ;;  %v376_v23 = vadd.f32 %v344_v7, %v312_v12  ;;  %v350_v43 = vld [vmem:[%s611_s26 + $0x88] sm:$0xff]  ;;  %v245_v50 = vld [vmem:[%s605_s23 + $0xb0] sm:$0xff]  ;;  %v246_v51 = vld [vmem:[%s605_s23 + $0xb8] sm:$0xff] }
  0x1f   : > { %v406_v22 = vmax.f32 %v374_v11, 0.0  ;;  %v377_v24 = vadd.f32 %v345_v8, %v313_v13  ;;  %v407_v28 = vmax.f32 %v375_v15, 0.0  ;;  %v315_v30 = vadd.f32 %v617_v2, %v276_v17  ;;  %v352_v55 = vld [vmem:[%s611_s26 + $0x98] sm:$0xff]  ;;  %v353_v56 = vld [vmem:[%s611_s26 + $0xa0] sm:$0xff]  ;;  %v354_v62 = vld [vmem:[%s611_s26 + $0xa8] sm:$0xff] }
  0x20   : > { %v378_v29 = vadd.f32 %v346_v14, %v314_v16  ;;  %v316_v31 = vadd.f32 %v617_v2, %v277_v18  ;;  %438 = vst.msk [vmem:[%s647_s5 + $0x40] sm:$0xff] %vm429_vm0, %v405_v21  ;;  %v408_v34 = vmax.f32 %v376_v23, 0.0  ;;  %v278_v36 = vmul.f32 %v599_v0, %v239_v19  ;;  %v247_v5 = vld [vmem:[%s605_s23 + $0xc0] sm:$0xff]  ;;  %v248_v6 = vld [vmem:[%s605_s23 + $0xc8] sm:$0xff]  ;;  %v355_v11 = vld [vmem:[%s611_s26 + $0xb0] sm:$0xff] }
  0x21   : > { %439 = vst.msk [vmem:[%s647_s5 + $0x48] sm:$0xff] %vm429_vm0, %v406_v22  ;;  %v409_v35 = vmax.f32 %v377_v24, 0.0  ;;  %v279_v37 = vmul.f32 %v599_v0, %v240_v20  ;;  %440 = vst.msk [vmem:[%s647_s5 + $0x50] sm:$0xff] %vm429_vm0, %v407_v28  ;;  %v379_v40 = vadd.f32 %v347_v25, %v315_v30  ;;  %v280_v44 = vmul.f32 %v599_v0, %v241_v27  ;;  %v356_v12 = vld [vmem:[%s611_s26 + $0xb8] sm:$0xff]  ;;  %v249_v13 = vld [vmem:[%s605_s23 + $0xd0] sm:$0xff] }
  0x22   : > { %v410_v39 = vmax.f32 %v378_v29, 0.0  ;;  %v380_v41 = vadd.f32 %v348_v26, %v316_v31  ;;  %441 = vst.msk [vmem:[%s647_s5 + $0x58] sm:$0xff] %vm429_vm0, %v408_v34  ;;  %v317_v45 = vadd.f32 %v617_v2, %v278_v36  ;;  %v281_v48 = vmul.f32 %v599_v0, %v242_v32  ;;  %v250_v18 = vld [vmem:[%s605_s23 + $0xd8] sm:$0xff]  ;;  %v251_v19 = vld [vmem:[%s605_s23 + $0xe0] sm:$0xff]  ;;  %v252_v24 = vld [vmem:[%s605_s23 + $0xe8] sm:$0xff] }
  0x23   : > { %442 = vst.msk [vmem:[%s647_s5 + $0x60] sm:$0xff] %vm429_vm0, %v409_v35  ;;  %v318_v46 = vadd.f32 %v617_v2, %v279_v37  ;;  %v282_v49 = vmul.f32 %v599_v0, %v243_v33  ;;  %v411_v52 = vmax.f32 %v379_v40, 0.0  ;;  %v319_v54 = vadd.f32 %v617_v2, %v280_v44  ;;  %v357_v28 = vld [vmem:[%s611_s26 + $0xc0] sm:$0xff]  ;;  %v358_v29 = vld [vmem:[%s611_s26 + $0xc8] sm:$0xff]  ;;  %v359_v33 = vld [vmem:[%s611_s26 + $0xd0] sm:$0xff] }
  0x24   : > { %443 = vst.msk [vmem:[%s647_s5 + $0x68] sm:$0xff] %vm429_vm0, %v410_v39  ;;  %v412_v53 = vmax.f32 %v380_v41, 0.0  ;;  %v283_v57 = vmul.f32 %v599_v0, %v244_v38  ;;  %v381_v58 = vadd.f32 %v349_v42, %v317_v45  ;;  %v320_v60 = vadd.f32 %v617_v2, %v281_v48  ;;  %v253_v36 = vld [vmem:[%s605_s23 + $0xf0] sm:$0xff]  ;;  %v254_v37 = vld [vmem:[%s605_s23 + $0xf8] sm:$0xff]  ;;  %v361_v42 = vld [vmem:[%s611_s26 + $0xe0] sm:$0xff] }
  0x25   : > { %v382_v59 = vadd.f32 %v350_v43, %v318_v46  ;;  %v321_v61 = vadd.f32 %v617_v2, %v282_v49  ;;  %444 = vst.msk [vmem:[%s647_s5 + $0x70] sm:$0xff] %vm429_vm0, %v411_v52  ;;  %v383_v63 = vadd.f32 %v351_v47, %v319_v54  ;;  %v284_v3 = vmul.f32 %v599_v0, %v245_v50  ;;  %v360_v41 = vld [vmem:[%s611_s26 + $0xd8] sm:$0xff]  ;;  %v362_v48 = vld [vmem:[%s611_s26 + $0xe8] sm:$0xff] }
  0x26   : > { %445 = vst.msk [vmem:[%s647_s5 + $0x78] sm:$0xff] %vm429_vm0, %v412_v53  ;;  %v322_v1 = vadd.f32 %v617_v2, %v283_v57  ;;  %v285_v4 = vmul.f32 %v599_v0, %v246_v51  ;;  %v413_v7 = vmax.f32 %v381_v58, 0.0  ;;  %v384_v9 = vadd.f32 %v352_v55, %v320_v60  ;;  %v363_v57 = vld [vmem:[%s611_s26 + $0xf0] sm:$0xff]  ;;  %v364_v58 = vld [vmem:[%s611_s26 + $0xf8] sm:$0xff] }
  0x27   : > { %v414_v8 = vmax.f32 %v382_v59, 0.0  ;;  %v385_v10 = vadd.f32 %v353_v56, %v321_v61  ;;  %v415_v14 = vmax.f32 %v383_v63, 0.0  ;;  %v323_v16 = vadd.f32 %v617_v2, %v284_v3 }
  0x28   : > { %v386_v15 = vadd.f32 %v354_v62, %v322_v1  ;;  %v324_v17 = vadd.f32 %v617_v2, %v285_v4  ;;  %446 = vst.msk [vmem:[%s647_s5 + $0x80] sm:$0xff] %vm429_vm0, %v413_v7  ;;  %v416_v20 = vmax.f32 %v384_v9, 0.0  ;;  %v286_v22 = vmul.f32 %v599_v0, %v247_v5 }
  0x29   : > { %447 = vst.msk [vmem:[%s647_s5 + $0x88] sm:$0xff] %vm429_vm0, %v414_v8  ;;  %v417_v21 = vmax.f32 %v385_v10, 0.0  ;;  %v287_v23 = vmul.f32 %v599_v0, %v248_v6  ;;  %448 = vst.msk [vmem:[%s647_s5 + $0x90] sm:$0xff] %vm429_vm0, %v415_v14  ;;  %v387_v26 = vadd.f32 %v355_v11, %v323_v16  ;;  %v288_v30 = vmul.f32 %v599_v0, %v249_v13 }
  0x2a   : > { %v418_v25 = vmax.f32 %v386_v15, 0.0  ;;  %v388_v27 = vadd.f32 %v356_v12, %v324_v17  ;;  %449 = vst.msk [vmem:[%s647_s5 + $0x98] sm:$0xff] %vm429_vm0, %v416_v20  ;;  %v325_v31 = vadd.f32 %v617_v2, %v286_v22  ;;  %v289_v34 = vmul.f32 %v599_v0, %v250_v18 }
  0x2b   : > { %450 = vst.msk [vmem:[%s647_s5 + $0xa0] sm:$0xff] %vm429_vm0, %v417_v21  ;;  %v326_v32 = vadd.f32 %v617_v2, %v287_v23  ;;  %v290_v35 = vmul.f32 %v599_v0, %v251_v19  ;;  %v419_v38 = vmax.f32 %v387_v26, 0.0  ;;  %v327_v40 = vadd.f32 %v617_v2, %v288_v30 }
  0x2c   : > { %451 = vst.msk [vmem:[%s647_s5 + $0xa8] sm:$0xff] %vm429_vm0, %v418_v25  ;;  %v420_v39 = vmax.f32 %v388_v27, 0.0  ;;  %v291_v43 = vmul.f32 %v599_v0, %v252_v24  ;;  %v389_v44 = vadd.f32 %v357_v28, %v325_v31  ;;  %v328_v46 = vadd.f32 %v617_v2, %v289_v34 }
  0x2d   : > { %v390_v45 = vadd.f32 %v358_v29, %v326_v32  ;;  %v329_v47 = vadd.f32 %v617_v2, %v290_v35  ;;  %452 = vst.msk [vmem:[%s647_s5 + $0xb0] sm:$0xff] %vm429_vm0, %v419_v38  ;;  %v391_v49 = vadd.f32 %v359_v33, %v327_v40  ;;  %v292_v51 = vmul.f32 %v599_v0, %v253_v36 }
  0x2e   : > { %453 = vst.msk [vmem:[%s647_s5 + $0xb8] sm:$0xff] %vm429_vm0, %v420_v39  ;;  %v330_v50 = vadd.f32 %v617_v2, %v291_v43  ;;  %v293_v52 = vmul.f32 %v599_v0, %v254_v37  ;;  %v421_v53 = vmax.f32 %v389_v44, 0.0  ;;  %v392_v55 = vadd.f32 %v360_v41, %v328_v46 }
  0x2f   : > { %v422_v54 = vmax.f32 %v390_v45, 0.0  ;;  %v393_v56 = vadd.f32 %v361_v42, %v329_v47  ;;  %v423_v59 = vmax.f32 %v391_v49, 0.0  ;;  %v331_v61 = vadd.f32 %v617_v2, %v292_v51 }
  0x30   : > { %v394_v60 = vadd.f32 %v362_v48, %v330_v50  ;;  %v332_v62 = vadd.f32 %v617_v2, %v293_v52  ;;  %454 = vst.msk [vmem:[%s647_s5 + $0xc0] sm:$0xff] %vm429_vm0, %v421_v53  ;;  %v424_v0 = vmax.f32 %v392_v55, 0.0 }
  0x31   : > { %455 = vst.msk [vmem:[%s647_s5 + $0xc8] sm:$0xff] %vm429_vm0, %v422_v54  ;;  %v425_v63 = vmax.f32 %v393_v56, 0.0  ;;  %456 = vst.msk [vmem:[%s647_s5 + $0xd0] sm:$0xff] %vm429_vm0, %v423_v59  ;;  %v395_v3 = vadd.f32 %v363_v57, %v331_v61 }
  0x32   : > { %v426_v1 = vmax.f32 %v394_v60, 0.0  ;;  %v396_v4 = vadd.f32 %v364_v58, %v332_v62  ;;  %457 = vst.msk [vmem:[%s647_s5 + $0xd8] sm:$0xff] %vm429_vm0, %v424_v0 }
  0x33   : > { %458 = vst.msk [vmem:[%s647_s5 + $0xe0] sm:$0xff] %vm429_vm0, %v425_v63  ;;  %v427_v5 = vmax.f32 %v395_v3, 0.0 }
  0x34   : > { %459 = vst.msk [vmem:[%s647_s5 + $0xe8] sm:$0xff] %vm429_vm0, %v426_v1  ;;  %v428_v6 = vmax.f32 %v396_v4, 0.0 }
  0x35   : > { %460 = vst.msk [vmem:[%s647_s5 + $0xf0] sm:$0xff] %vm429_vm0, %v427_v5 }
  0x36   : > { %461 = vst.msk [vmem:[%s647_s5 + $0xf8] sm:$0xff] %vm429_vm0, %v428_v6 }
  0x37 PF: > { %s14_s15 = sadd.s32 1, %s559_s15  }
  0x38   : > { %p11_p4 = scmp.ge.s32.totalorder %s14_s15, 4  }
  0x3a   :  { %13 = sbr.rel (!%p11_p4) target bundleno = 1 (0x1), region = 69 }

// kernel: bottleneck_forward.6
= control target key start
LH: loop header
LB: loop body
LE: loop exit
PB: predicated region body
PF: predicated region fallthrough
CT: control target
= control target key end

     0   :  { %s1228_s21 = smov 0   ;;  %s1595_s0 = inlined_call_operand.vmem [shape: f32[512,16], index: 0, kind: input, shape index: {}]   ;;  %s1596_s1 = inlined_call_operand.vmem [shape: f32[1,16], index: 1, kind: input, shape index: {}]   ;;  %s1597_s2 = inlined_call_operand.vmem [shape: f32[1,16], index: 2, kind: input, shape index: {}]   ;;  %s1598_s3 = inlined_call_operand.vmem [shape: bf16[16,64], index: 3, kind: input, shape index: {}]   ;;  %s1599_s4 = inlined_call_operand.vmem [shape: f32[512,64], index: 4, kind: output, shape index: {0}]   ;;  %s1600_s5 = inlined_call_operand.vmem [shape: f32[2,1,64], index: 5, kind: output, shape index: {1}]   ;;  %s1601_s6 = inlined_call_operand.vmem [shape: f32[2,1,64], index: 6, kind: output, shape index: {2}]  }
   0x1 LB: > { %s1234_s22 = sadd.s32 4294967295, %s1191_s21   ;;  %p1096_p0 = scmp.ge.s32.totalorder %s1191_s21, 1  ;;  %s1191_s21 = sphi %s1228_s21, %s17_s21  }
   0x2   : > { %p218_p1 = scmp.lt.s32.totalorder %s1191_s21, 3 }
   0x4   : > { %p219_p2 = pnand %p1096_p0, %p218_p1 }
   0x5   : > { %v1184_v0 = vld [vmem:[%s1598_s3] sm:$0xff] (!%p219_p2)   ;;  %s1097_s25 = sshll.u32 (!%p219_p2), %s1234_s22, 5  ;;  %v416_v1 = vlaneseq (!%p219_p2)  ;;  %s1103_s26 = sshll.u32 (!%p219_p2), %s1234_s22, 8  ;;  %vm570_vm1 = vcmask (!%p219_p2), 130048  }
   0x6   : > { %222 = sbr.rel (%p219_p2) target bundleno = 320 (0x140), region = 36  ;;  %p255_p3 = scmp.lt.s32.totalorder (!%p219_p2), %s1097_s25, 63  ;;  %1140 = vmatprep.subr.bf16.mxu0 (!%p219_p2), %v1184_v0  ;;  %v1245_v3 = vstv (!%p219_p2), %s1103_s26  ;;  %1174 = vmatprep.subr.bf16.mxu1 (!%p219_p2), %v1184_v0  ;;  %v1252_v4 = vld [vmem:[%s1596_s1] ss:$0 sm:$0xff] (!%p219_p2) }
   0x7   : > { %v1243_v2 = vshrl.u32 (!%p219_p2), %v416_v1, 7  ;;  %1141 = vmatpush3.bf16.msra.mxu0 (!%p219_p2), %v1184_v0  ;;  %1175 = vmatpush3.bf16.msra.mxu1 (!%p219_p2), %v1184_v0  ;;  %v1274_v13 = vld [vmem:[%s1597_s2] ss:$0 sm:$0xff] (!%p219_p2)  ;;  %p266_p4 = scmp.lt.s32.totalorder (!%p219_p2), %s1234_s22, 1 }
   0x9   : > { %v418_v5 = vadd.s32 (!%p219_p2), 8, %v1243_v2  ;;  %v450_v6 = vadd.s32 (!%p219_p2), %v1245_v3, %v1243_v2  ;;  %v419_v7 = vadd.s32 (!%p219_p2), 16, %v1243_v2  ;;  %v420_v8 = vadd.s32 (!%p219_p2), 24, %v1243_v2 }
   0xa   : > { %v421_v9 = vadd.s32 (!%p219_p2), 32, %v1243_v2  ;;  %v422_v10 = vadd.s32 (!%p219_p2), 40, %v1243_v2  ;;  %v423_v11 = vadd.s32 (!%p219_p2), 48, %v1243_v2  ;;  %v424_v12 = vadd.s32 (!%p219_p2), 56, %v1243_v2 }
   0xb   : > { %v451_v14 = vadd.s32 (!%p219_p2), %v1245_v3, %v418_v5  ;;  %vm482_vm0 = vcmp.lt.s32.totalorder (!%p219_p2), %v450_v6, 392  ;;  %v452_v15 = vadd.s32 (!%p219_p2), %v1245_v3, %v419_v7  ;;  %v453_v16 = vadd.s32 (!%p219_p2), %v1245_v3, %v420_v8 }
   0xc   : > { %v454_v20 = vadd.s32 (!%p219_p2), %v1245_v3, %v421_v9  ;;  %v455_v21 = vadd.s32 (!%p219_p2), %v1245_v3, %v422_v10  ;;  %v456_v22 = vadd.s32 (!%p219_p2), %v1245_v3, %v423_v11  ;;  %v457_v23 = vadd.s32 (!%p219_p2), %v1245_v3, %v424_v12 }
   0xd   : > { %s1603_s25 = smov (!%p255_p3, %s1097_s25), 63  ;;  %vm483_vm2 = vcmp.lt.s32.totalorder %v451_v14, 392  ;;  %vm484_vm3 = vcmp.lt.s32.totalorder %v452_v15, 392  ;;  %vm485_vm4 = vcmp.lt.s32.totalorder %v453_v16, 392  ;;  %v425_v7 = vadd.s32 64, %v1243_v2  ;;  %s1605_s22 = smov (!%p266_p4, %s1234_s22), 1 }
   0xe   : > { %s1098_s29 = sshll.u32 %s1603_s25, 3  ;;  %vm486_vm5 = vcmp.lt.s32.totalorder %v454_v20, 392  ;;  %vm487_vm6 = vcmp.lt.s32.totalorder %v455_v21, 392  ;;  %vm488_vm7 = vcmp.lt.s32.totalorder %v456_v22, 392  ;;  %vm489_vm8 = vcmp.lt.s32.totalorder %v457_v23, 392  ;;  %s268_s16 = scalar_lea.vmem %s1600_s5, %s1605_s22 }
   0xf   : > { %s1269_s8 = scalar_lea.vmem %s1595_s0, %s1098_s29  ;;  %v426_v8 = vadd.s32 72, %v1243_v2  ;;  %v458_v16 = vadd.s32 %v1245_v3, %v425_v7  ;;  %s1454_s13 = scalar_lea.vmem %s1599_s4, %s1098_s29 }
  0x10   : > { %v273_v17 = vld [vmem:[%s1269_s8] sm:$0xff]  ;;  %v274_v18 = vld [vmem:[%s1269_s8 + $0x8] sm:$0xff]  ;;  %v275_v19 = vld [vmem:[%s1269_s8 + $0x10] sm:$0xff]  ;;  %s271_s19 = scalar_lea.vmem %s1601_s6, %s1605_s22 }
  0x11   : > { %v312_v24 = vmul.f32 %v1252_v4, %v273_v17  ;;  %v313_v25 = vmul.f32 %v1252_v4, %v274_v18  ;;  %v276_v26 = vld [vmem:[%s1269_s8 + $0x18] sm:$0xff]  ;;  %v314_v27 = vmul.f32 %v1252_v4, %v275_v19  ;;  %v277_v28 = vld [vmem:[%s1269_s8 + $0x20] sm:$0xff]  ;;  %v278_v29 = vld [vmem:[%s1269_s8 + $0x28] sm:$0xff]  ;;  %v459_v17 = vadd.s32 %v1245_v3, %v426_v8 }
  0x12   : > { %v315_v30 = vmul.f32 %v1252_v4, %v276_v26  ;;  %v316_v31 = vmul.f32 %v1252_v4, %v277_v28  ;;  %v317_v35 = vmul.f32 %v1252_v4, %v278_v29  ;;  %v279_v36 = vld [vmem:[%s1269_s8 + $0x30] sm:$0xff]  ;;  %v280_v37 = vld [vmem:[%s1269_s8 + $0x38] sm:$0xff]  ;;  %v281_v52 = vld [vmem:[%s1269_s8 + $0x40] sm:$0xff]  ;;  %vm490_vm9 = vcmp.lt.s32.totalorder %v458_v16, 392 }
  0x13   : > { %v351_v32 = vadd.f32 %v1274_v13, %v312_v24  ;;  %v352_v33 = vadd.f32 %v1274_v13, %v313_v25  ;;  %v353_v34 = vadd.f32 %v1274_v13, %v314_v27  ;;  %v318_v46 = vmul.f32 %v1252_v4, %v279_v36  ;;  %v282_v57 = vld [vmem:[%s1269_s8 + $0x48] sm:$0xff]  ;;  %v283_v61 = vld [vmem:[%s1269_s8 + $0x50] sm:$0xff]  ;;  %v284_v62 = vld [vmem:[%s1269_s8 + $0x58] sm:$0xff] }
  0x14   : > { %v354_v38 = vadd.f32 %v1274_v13, %v315_v30  ;;  %v355_v39 = vadd.f32 %v1274_v13, %v316_v31  ;;  %v356_v43 = vadd.f32 %v1274_v13, %v317_v35  ;;  %v319_v47 = vmul.f32 %v1252_v4, %v280_v37  ;;  %v285_v22 = vld [vmem:[%s1269_s8 + $0x60] sm:$0xff]  ;;  %v286_v23 = vld [vmem:[%s1269_s8 + $0x68] sm:$0xff]  ;;  %v287_v30 = vld [vmem:[%s1269_s8 + $0x70] sm:$0xff] }
  0x15   : > { %v383_v40 = vmax.f32 %v351_v32, 0.0  ;;  %v384_v41 = vmax.f32 %v352_v33, 0.0  ;;  %v385_v42 = vmax.f32 %v353_v34, 0.0  ;;  %v357_v56 = vadd.f32 %v1274_v13, %v318_v46 }
  0x16   : > { %v386_v44 = vmax.f32 %v354_v38, 0.0  ;;  %v387_v45 = vmax.f32 %v355_v39, 0.0  ;;  %v388_v51 = vmax.f32 %v356_v43, 0.0  ;;  %v358_v60 = vadd.f32 %v1274_v13, %v319_v47  ;;  %v288_v39 = vld [vmem:[%s1269_s8 + $0x78] sm:$0xff] }
  0x17   : > { %v514_v48 = vsel %vm482_vm0, %v383_v40, 0.0  ;;  %v515_v49 = vsel %vm483_vm2, %v384_v41, 0.0  ;;  %v516_v50 = vsel %vm484_vm3, %v385_v42, 0.0  ;;  %v389_v0 = vmax.f32 %v357_v56, 0.0 }
  0x18   : > { %v546_v53 = vpack.c.bf16 %v515_v49, %v514_v48  ;;  %v517_v54 = vsel %vm485_vm4, %v386_v44, 0.0  ;;  %v518_v55 = vsel %vm486_vm5, %v387_v45, 0.0  ;;  %v519_v59 = vsel %vm487_vm6, %v388_v51, 0.0 }
  0x19   : > { %v547_v58 = vpack.c.bf16 %v517_v54, %v516_v50  ;;  %v548_v63 = vpack.c.bf16 %v519_v59, %v518_v55  ;;  %v320_v1 = vmul.f32 %v1252_v4, %v281_v52  ;;  %v390_v5 = vmax.f32 %v358_v60, 0.0  ;;  %v289_v50 = vld [vmem:[%s1269_s8 + $0x80] sm:$0xff] }
  0x1a   : > { %1142 = vmatprep.mubr.msk.bf16.mxu0 %vm570_vm1, %v546_v53  ;;  %v321_v6 = vmul.f32 %v1252_v4, %v282_v57  ;;  %v520_v9 = vsel %vm488_vm7, %v389_v0, 0.0  ;;  %v322_v11 = vmul.f32 %v1252_v4, %v283_v61  ;;  %v323_v12 = vmul.f32 %v1252_v4, %v284_v62  ;;  %v290_v53 = vld [vmem:[%s1269_s8 + $0x88] sm:$0xff] }
  0x1b   : > { %1143 = vmatmul.mubr.msk.bf16.vlgmr.msra.gmra.mrb[0].mxu0 %vm570_vm1, %v547_v58  ;;  %v359_v10 = vadd.f32 %v1274_v13, %v320_v1  ;;  %v521_v14 = vsel %vm489_vm8, %v390_v5, 0.0  ;;  %vm491_vm10 = vcmp.lt.s32.totalorder %v459_v17, 392  ;;  %v427_v25 = vadd.s32 80, %v1243_v2  ;;  %v291_v58 = vld [vmem:[%s1269_s8 + $0x90] sm:$0xff] }
  0x1c   : > { %1146 = vmatprep.mubr.msk.bf16.mxu0 %vm570_vm1, %v548_v63  ;;  %v360_v15 = vadd.f32 %v1274_v13, %v321_v6  ;;  %v549_v18 = vpack.c.bf16 %v521_v14, %v520_v9  ;;  %v361_v20 = vadd.f32 %v1274_v13, %v322_v11  ;;  %v362_v21 = vadd.f32 %v1274_v13, %v323_v12  ;;  %v292_v63 = vld [vmem:[%s1269_s8 + $0x98] sm:$0xff] }
  0x1d   : > { %v391_v19 = vmax.f32 %v359_v10, 0.0  ;;  %v428_v29 = vadd.s32 88, %v1243_v2  ;;  %v460_v32 = vadd.s32 %v1245_v3, %v427_v25  ;;  %v324_v33 = vmul.f32 %v1252_v4, %v285_v22  ;;  %v294_v22 = vld [vmem:[%s1269_s8 + $0xa8] sm:$0xff] }
  0x1e   : > { %v392_v24 = vmax.f32 %v360_v15, 0.0  ;;  %v393_v27 = vmax.f32 %v361_v20, 0.0  ;;  %v394_v28 = vmax.f32 %v362_v21, 0.0  ;;  %v325_v34 = vmul.f32 %v1252_v4, %v286_v23  ;;  %v293_v21 = vld [vmem:[%s1269_s8 + $0xa0] sm:$0xff] }
  0x1f   : > { %v522_v26 = vsel %vm490_vm9, %v391_v19, 0.0  ;;  %v461_v36 = vadd.s32 %v1245_v3, %v428_v29  ;;  %v429_v37 = vadd.s32 96, %v1243_v2  ;;  %v430_v38 = vadd.s32 104, %v1243_v2 }
  0x20   : > { %v523_v31 = vsel %vm491_vm10, %v392_v24, 0.0  ;;  %vm492_vm11 = vcmp.lt.s32.totalorder %v460_v32, 392  ;;  %v363_v40 = vadd.f32 %v1274_v13, %v324_v33  ;;  %v364_v41 = vadd.f32 %v1274_v13, %v325_v34 }
  0x21   : > { %v550_v35 = vpack.c.bf16 %v523_v31, %v522_v26  ;;  %v326_v42 = vmul.f32 %v1252_v4, %v287_v30  ;;  %vm493_vm12 = vcmp.lt.s32.totalorder %v461_v36, 392  ;;  %v524_v43 = vsel %vm492_vm11, %v393_v27, 0.0  ;;  %v295_v30 = vld [vmem:[%s1269_s8 + $0xb0] sm:$0xff]  ;;  %v296_v31 = vld [vmem:[%s1269_s8 + $0xb8] sm:$0xff] }
  0x22   : > { %v462_v44 = vadd.s32 %v1245_v3, %v429_v37  ;;  %v463_v45 = vadd.s32 %v1245_v3, %v430_v38  ;;  %v525_v46 = vsel %vm493_vm12, %v394_v28, 0.0  ;;  %v395_v47 = vmax.f32 %v363_v40, 0.0 }
  0x23   : > { %1147 = vmatmul.mubr.msk.bf16.gmra.mrb[4].mxu0 %vm570_vm1, %v549_v18  ;;  %v396_v48 = vmax.f32 %v364_v41, 0.0  ;;  %v327_v49 = vmul.f32 %v1252_v4, %v288_v39  ;;  %v551_v51 = vpack.c.bf16 %v525_v46, %v524_v43  ;;  %v365_v52 = vadd.f32 %v1274_v13, %v326_v42 }
  0x24   : > { %1150 = vmatprep.mubr.msk.bf16.mxu0 %vm570_vm1, %v550_v35  ;;  %vm494_vm13 = vcmp.lt.s32.totalorder %v462_v44, 392  ;;  %vm495_vm14 = vcmp.lt.s32.totalorder %v463_v45, 392  ;;  %v431_v57 = vadd.s32 112, %v1243_v2  ;;  %v432_v61 = vadd.s32 120, %v1243_v2 }
  0x25   : > { %v526_v54 = vsel %vm494_vm13, %v395_v47, 0.0  ;;  %v527_v55 = vsel %vm495_vm14, %v396_v48, 0.0  ;;  %v366_v56 = vadd.f32 %v1274_v13, %v327_v49  ;;  %v397_v60 = vmax.f32 %v365_v52, 0.0 }
  0x26   : > { %v552_v59 = vpack.c.bf16 %v527_v55, %v526_v54  ;;  %v328_v62 = vmul.f32 %v1252_v4, %v289_v50  ;;  %v464_v1 = vadd.s32 %v1245_v3, %v431_v57  ;;  %v329_v5 = vmul.f32 %v1252_v4, %v290_v53  ;;  %v297_v50 = vld [vmem:[%s1269_s8 + $0xc0] sm:$0xff]  ;;  %v298_v53 = vld [vmem:[%s1269_s8 + $0xc8] sm:$0xff] }
  0x27   : > { %v398_v0 = vmax.f32 %v366_v56, 0.0  ;;  %v433_v6 = vadd.s32 128, %v1243_v2  ;;  %v465_v7 = vadd.s32 %v1245_v3, %v432_v61  ;;  %v434_v9 = vadd.s32 136, %v1243_v2 }
  0x28   : > { %v367_v8 = vadd.f32 %v1274_v13, %v328_v62  ;;  %v330_v10 = vmul.f32 %v1252_v4, %v291_v58  ;;  %vm496_vm15 = vcmp.lt.s32.totalorder %v464_v1, 392  ;;  %v368_v11 = vadd.f32 %v1274_v13, %v329_v5  ;;  %v299_v58 = vld [vmem:[%s1269_s8 + $0xd0] sm:$0xff] }
  0x29   : > { %v466_v12 = vadd.s32 %v1245_v3, %v433_v6  ;;  %v331_v14 = vmul.f32 %v1252_v4, %v292_v63  ;;  %vm497_vm0 = vcmp.lt.s32.totalorder %v465_v7, 392  ;;  %v528_v15 = vsel %vm496_vm15, %v397_v60, 0.0  ;;  %v300_v63 = vld [vmem:[%s1269_s8 + $0xd8] sm:$0xff] }
  0x2a   : > { %v399_v16 = vmax.f32 %v367_v8, 0.0  ;;  %v467_v17 = vadd.s32 %v1245_v3, %v434_v9  ;;  %v529_v18 = vsel %vm497_vm0, %v398_v0, 0.0  ;;  %v400_v19 = vmax.f32 %v368_v11, 0.0 }
  0x2b   : > { %1151 = vmatmul.mubr.msk.bf16.gmra.mrb[8].mxu0 %vm570_vm1, %v551_v51  ;;  %vm498_vm2 = vcmp.lt.s32.totalorder %v466_v12, 392  ;;  %v369_v20 = vadd.f32 %v1274_v13, %v330_v10  ;;  %v553_v23 = vpack.c.bf16 %v529_v18, %v528_v15  ;;  %v370_v25 = vadd.f32 %v1274_v13, %v331_v14 }
  0x2c   : > { %1154 = vmatprep.mubr.msk.bf16.mxu0 %vm570_vm1, %v552_v59  ;;  %vm499_vm3 = vcmp.lt.s32.totalorder %v467_v17, 392  ;;  %v530_v24 = vsel %vm498_vm2, %v399_v16, 0.0  ;;  %v435_v28 = vadd.s32 144, %v1243_v2  ;;  %v436_v29 = vadd.s32 152, %v1243_v2 }
  0x2d   : > { %v531_v26 = vsel %vm499_vm3, %v400_v19, 0.0  ;;  %v401_v27 = vmax.f32 %v369_v20, 0.0  ;;  %v402_v33 = vmax.f32 %v370_v25, 0.0  ;;  %v332_v34 = vmul.f32 %v1252_v4, %v293_v21  ;;  %v301_v21 = vld [vmem:[%s1269_s8 + $0xe0] sm:$0xff] }
  0x2e   : > { %v554_v32 = vpack.c.bf16 %v531_v26, %v530_v24  ;;  %v333_v35 = vmul.f32 %v1252_v4, %v294_v22  ;;  %v468_v36 = vadd.s32 %v1245_v3, %v435_v28  ;;  %v469_v37 = vadd.s32 %v1245_v3, %v436_v29  ;;  %v302_v22 = vld [vmem:[%s1269_s8 + $0xe8] sm:$0xff] }
  0x2f   : > { %v437_v38 = vadd.s32 160, %v1243_v2  ;;  %v438_v39 = vadd.s32 168, %v1243_v2  ;;  %v371_v40 = vadd.f32 %v1274_v13, %v332_v34  ;;  %v334_v42 = vmul.f32 %v1252_v4, %v295_v30  ;;  %v303_v30 = vld [vmem:[%s1269_s8 + $0xf0] sm:$0xff] }
  0x30   : > { %1158 = vmatprep.mubr.msk.bf16.mxu1 %vm570_vm1, %v554_v32  ;;  %v372_v41 = vadd.f32 %v1274_v13, %v333_v35  ;;  %v335_v43 = vmul.f32 %v1252_v4, %v296_v31  ;;  %vm500_vm4 = vcmp.lt.s32.totalorder %v468_v36, 392  ;;  %vm501_vm5 = vcmp.lt.s32.totalorder %v469_v37, 392  ;;  %v304_v31 = vld [vmem:[%s1269_s8 + $0xf8] sm:$0xff] }
  0x31   : > { %v470_v44 = vadd.s32 %v1245_v3, %v437_v38  ;;  %v471_v45 = vadd.s32 %v1245_v3, %v438_v39  ;;  %v532_v46 = vsel %vm500_vm4, %v401_v27, 0.0  ;;  %v533_v47 = vsel %vm501_vm5, %v402_v33, 0.0 }
  0x32   : > { %v403_v48 = vmax.f32 %v371_v40, 0.0  ;;  %v404_v49 = vmax.f32 %v372_v41, 0.0  ;;  %v555_v51 = vpack.c.bf16 %v533_v47, %v532_v46  ;;  %v373_v52 = vadd.f32 %v1274_v13, %v334_v42 }
  0x33   : > { %1155 = vmatmul.mubr.msk.bf16.gmra.mrb[12].mxu0 %vm570_vm1, %v553_v23  ;;  %vm502_vm6 = vcmp.lt.s32.totalorder %v470_v44, 392  ;;  %vm503_vm7 = vcmp.lt.s32.totalorder %v471_v45, 392  ;;  %v374_v56 = vadd.f32 %v1274_v13, %v335_v43  ;;  %v439_v57 = vadd.s32 176, %v1243_v2 }
  0x34   : > { %v534_v54 = vsel %vm502_vm6, %v403_v48, 0.0  ;;  %v535_v55 = vsel %vm503_vm7, %v404_v49, 0.0  ;;  %1159 = vmatmul.mubr.msk.bf16.vlgmr.msra.gmra.mrb[0].mxu1 %vm570_vm1, %v555_v51  ;;  %v405_v60 = vmax.f32 %v373_v52, 0.0  ;;  %v440_v61 = vadd.s32 184, %v1243_v2 }
  0x35   : > { %v556_v59 = vpack.c.bf16 %v535_v55, %v534_v54  ;;  %v336_v62 = vmul.f32 %v1252_v4, %v297_v50  ;;  %v406_v0 = vmax.f32 %v374_v56, 0.0  ;;  %v472_v1 = vadd.s32 %v1245_v3, %v439_v57 }
  0x36   : > { %v337_v5 = vmul.f32 %v1252_v4, %v298_v53  ;;  %v441_v6 = vadd.s32 192, %v1243_v2  ;;  %v473_v7 = vadd.s32 %v1245_v3, %v440_v61  ;;  %v442_v9 = vadd.s32 200, %v1243_v2 }
  0x37   : > { %1162 = vmatprep.mubr.msk.bf16.mxu1 %vm570_vm1, %v556_v59  ;;  %v375_v8 = vadd.f32 %v1274_v13, %v336_v62  ;;  %v338_v10 = vmul.f32 %v1252_v4, %v299_v58  ;;  %vm504_vm8 = vcmp.lt.s32.totalorder %v472_v1, 392  ;;  %v339_v14 = vmul.f32 %v1252_v4, %v300_v63 }
  0x38   : > { %v376_v11 = vadd.f32 %v1274_v13, %v337_v5  ;;  %v474_v12 = vadd.s32 %v1245_v3, %v441_v6  ;;  %vm505_vm9 = vcmp.lt.s32.totalorder %v473_v7, 392  ;;  %v536_v15 = vsel %vm504_vm8, %v405_v60, 0.0 }
  0x39   : > { %v407_v16 = vmax.f32 %v375_v8, 0.0  ;;  %v475_v17 = vadd.s32 %v1245_v3, %v442_v9  ;;  %v537_v18 = vsel %vm505_vm9, %v406_v0, 0.0  ;;  %v377_v20 = vadd.f32 %v1274_v13, %v338_v10 }
  0x3a   : > { %v408_v19 = vmax.f32 %v376_v11, 0.0  ;;  %vm506_vm10 = vcmp.lt.s32.totalorder %v474_v12, 392  ;;  %v557_v23 = vpack.c.bf16 %v537_v18, %v536_v15  ;;  %v378_v25 = vadd.f32 %v1274_v13, %v339_v14 }
  0x3b   : > { %vm507_vm11 = vcmp.lt.s32.totalorder %v475_v17, 392  ;;  %v538_v24 = vsel %vm506_vm10, %v407_v16, 0.0  ;;  %v409_v27 = vmax.f32 %v377_v20, 0.0  ;;  %v443_v28 = vadd.s32 208, %v1243_v2 }
  0x3c   : > { %v539_v26 = vsel %vm507_vm11, %v408_v19, 0.0  ;;  %v444_v29 = vadd.s32 216, %v1243_v2  ;;  %1163 = vmatmul.mubr.msk.bf16.gmra.mrb[4].mxu1 %vm570_vm1, %v557_v23  ;;  %v410_v33 = vmax.f32 %v378_v25, 0.0  ;;  %v340_v34 = vmul.f32 %v1252_v4, %v301_v21 }
  0x3d   : > { %v558_v32 = vpack.c.bf16 %v539_v26, %v538_v24  ;;  %v341_v35 = vmul.f32 %v1252_v4, %v302_v22  ;;  %v476_v36 = vadd.s32 %v1245_v3, %v443_v28  ;;  %v445_v38 = vadd.s32 224, %v1243_v2 }
  0x3e   : > { %v477_v37 = vadd.s32 %v1245_v3, %v444_v29  ;;  %v446_v39 = vadd.s32 232, %v1243_v2  ;;  %v379_v40 = vadd.f32 %v1274_v13, %v340_v34  ;;  %v342_v42 = vmul.f32 %v1252_v4, %v303_v30 }
  0x3f   : > { %1166 = vmatprep.mubr.msk.bf16.mxu1 %vm570_vm1, %v558_v32  ;;  %v380_v41 = vadd.f32 %v1274_v13, %v341_v35  ;;  %v343_v43 = vmul.f32 %v1252_v4, %v304_v31  ;;  %vm508_vm12 = vcmp.lt.s32.totalorder %v476_v36, 392  ;;  %v478_v44 = vadd.s32 %v1245_v3, %v445_v38 }
  0x40   : > { %vm509_vm13 = vcmp.lt.s32.totalorder %v477_v37, 392  ;;  %v479_v45 = vadd.s32 %v1245_v3, %v446_v39  ;;  %v540_v46 = vsel %vm508_vm12, %v409_v27, 0.0  ;;  %v411_v48 = vmax.f32 %v379_v40, 0.0 }
  0x41   : > { %v541_v47 = vsel %vm509_vm13, %v410_v33, 0.0  ;;  %v412_v49 = vmax.f32 %v380_v41, 0.0  ;;  %vm510_vm14 = vcmp.lt.s32.totalorder %v478_v44, 392  ;;  %v381_v51 = vadd.f32 %v1274_v13, %v342_v42 }
  0x42   : > { %v559_v50 = vpack.c.bf16 %v541_v47, %v540_v46  ;;  %vm511_vm15 = vcmp.lt.s32.totalorder %v479_v45, 392  ;;  %v542_v52 = vsel %vm510_vm14, %v411_v48, 0.0  ;;  %v382_v54 = vadd.f32 %v1274_v13, %v343_v43 }
  0x43   : > { %v543_v53 = vsel %vm511_vm15, %v412_v49, 0.0  ;;  %v447_v4 = vadd.s32 240, %v1243_v2  ;;  %v413_v56 = vmax.f32 %v381_v51, 0.0  ;;  %v448_v57 = vadd.s32 248, %v1243_v2 }
  0x44   : > { %v560_v55 = vpack.c.bf16 %v543_v53, %v542_v52  ;;  %1167 = vmatmul.mubr.msk.bf16.gmra.mrb[8].mxu1 %vm570_vm1, %v559_v50  ;;  %v414_v58 = vmax.f32 %v382_v54, 0.0  ;;  %vm780_vm3 = vcmask 523264  }
  0x45   : > { %v480_v59 = vadd.s32 %v1245_v3, %v447_v4  ;;  %v481_v60 = vadd.s32 %v1245_v3, %v448_v57 }
  0x46   : > { %1170 = vmatprep.mubr.msk.bf16.mxu1 %vm570_vm1, %v560_v55 }
  0x47   : > { %vm512_vm0 = vcmp.lt.s32.totalorder %v480_v59, 392  ;;  %vm513_vm2 = vcmp.lt.s32.totalorder %v481_v60, 392 }
  0x48   : > { %v544_v61 = vsel %vm512_vm0, %v413_v56, 0.0  ;;  %v545_v13 = vsel %vm513_vm2, %v414_v58, 0.0 }
  0x49   : > { %v561_v62 = vpack.c.bf16 %v545_v13, %v544_v61 }
  0x4c   : > { %1171 = vmatmul.mubr.msk.bf16.gmra.mrb[12].mxu1 %vm570_vm1, %v561_v62  ;;  %vm882_vm1 = vcmask 516096  }
  0xee   : > { %v1144_v2 = vpop.f32.mrb[0].mxu0 }
  0xef   : > { %783 = vst.msk [vmem:[%s1454_s13 + $0x10] sm:$0xff] %vm780_vm3, %v1144_v2  ;;  %v653_v3 = vpop.f32.mrb[1].mxu0  ;;  %v886_v5 = vmul.f32 %v1144_v2, %v1144_v2  ;;  %v816_v10 = vsel %vm780_vm3, %v1144_v2, 0.0 }
  0xf0   : > { %781 = vst.msk [vmem:[%s1454_s13] sm:$0xff] %vm780_vm3, %v653_v3  ;;  %v884_v63 = vmul.f32 %v653_v3, %v653_v3  ;;  %v1145_v0 = vpop.f32.mrb[2].mxu0  ;;  %v813_v6 = vsel %vm780_vm3, %v653_v3, 0.0 }
  0xf1   : > { %784 = vst.msk [vmem:[%s1454_s13 + $0x18] sm:$0xff] %vm780_vm3, %v1145_v0  ;;  %v656_v1 = vpop.f32.mrb[3].mxu0  ;;  %v887_v12 = vmul.f32 %v1145_v0, %v1145_v0  ;;  %v919_v17 = vsel %vm780_vm3, %v886_v5, 0.0  ;;  %v818_v18 = vsel %vm780_vm3, %v1145_v0, 0.0 }
  0xf2   : > { %782 = vst.msk [vmem:[%s1454_s13 + $0x8] sm:$0xff] %vm780_vm3, %v656_v1  ;;  %v814_v7 = vsel %vm780_vm3, %v656_v1, 0.0  ;;  %v885_v8 = vmul.f32 %v656_v1, %v656_v1  ;;  %v916_v11 = vsel %vm780_vm3, %v884_v63, 0.0 }
  0xf3   : > { %v815_v9 = vadd.f32 %v814_v7, %v813_v6  ;;  %v921_v23 = vsel %vm780_vm3, %v887_v12, 0.0 }
  0xf4   : > { %v917_v14 = vsel %vm780_vm3, %v885_v8, 0.0 }
  0xf5   : > { %v817_v15 = vadd.f32 %v816_v10, %v815_v9  ;;  %v918_v16 = vadd.f32 %v917_v14, %v916_v11 }
  0xf6   : > { %v1148_v19 = vpop.f32.mrb[4].mxu0 }
  0xf7   : > { %v920_v20 = vadd.f32 %v919_v17, %v918_v16  ;;  %787 = vst.msk [vmem:[%s1454_s13 + $0x30] sm:$0xff] %vm780_vm3, %v1148_v19  ;;  %v669_v21 = vpop.f32.mrb[5].mxu0  ;;  %v819_v22 = vadd.f32 %v818_v18, %v817_v15  ;;  %v890_v30 = vmul.f32 %v1148_v19, %v1148_v19  ;;  %v824_v36 = vsel %vm780_vm3, %v1148_v19, 0.0 }
  0xf8   : > { %785 = vst.msk [vmem:[%s1454_s13 + $0x20] sm:$0xff] %vm780_vm3, %v669_v21  ;;  %v820_v24 = vsel %vm780_vm3, %v669_v21, 0.0  ;;  %v888_v25 = vmul.f32 %v669_v21, %v669_v21  ;;  %v1149_v26 = vpop.f32.mrb[6].mxu0 }
  0xf9   : > { %v821_v27 = vadd.f32 %v820_v24, %v819_v22  ;;  %v922_v28 = vadd.f32 %v921_v23, %v920_v20  ;;  %788 = vst.msk [vmem:[%s1454_s13 + $0x38] sm:$0xff] %vm780_vm3, %v1149_v26  ;;  %v672_v29 = vpop.f32.mrb[7].mxu0  ;;  %v891_v37 = vmul.f32 %v1149_v26, %v1149_v26  ;;  %v927_v41 = vsel %vm780_vm3, %v890_v30, 0.0 }
  0xfa   : > { %v923_v31 = vsel %vm780_vm3, %v888_v25, 0.0  ;;  %786 = vst.msk [vmem:[%s1454_s13 + $0x28] sm:$0xff] %vm780_vm3, %v672_v29  ;;  %v822_v32 = vsel %vm780_vm3, %v672_v29, 0.0  ;;  %v889_v33 = vmul.f32 %v672_v29, %v672_v29  ;;  %v826_v42 = vsel %vm780_vm3, %v1149_v26, 0.0 }
  0xfb   : > { %v924_v34 = vadd.f32 %v923_v31, %v922_v28  ;;  %v823_v35 = vadd.f32 %v822_v32, %v821_v27  ;;  %v929_v47 = vsel %vm780_vm3, %v891_v37, 0.0 }
  0xfc   : > { %v925_v38 = vsel %vm780_vm3, %v889_v33, 0.0 }
  0xfd   : > { %v825_v39 = vadd.f32 %v824_v36, %v823_v35  ;;  %v926_v40 = vadd.f32 %v925_v38, %v924_v34 }
  0xfe   : > { %v1152_v43 = vpop.f32.mrb[8].mxu0 }
  0xff   : > { %v928_v44 = vadd.f32 %v927_v41, %v926_v40  ;;  %791 = vst.msk [vmem:[%s1454_s13 + $0x50] sm:$0xff] %vm780_vm3, %v1152_v43  ;;  %v685_v45 = vpop.f32.mrb[9].mxu0  ;;  %v827_v46 = vadd.f32 %v826_v42, %v825_v39  ;;  %v894_v54 = vmul.f32 %v1152_v43, %v1152_v43  ;;  %v832_v59 = vsel %vm780_vm3, %v1152_v43, 0.0 }
 0x100   : > { %789 = vst.msk [vmem:[%s1454_s13 + $0x40] sm:$0xff] %vm780_vm3, %v685_v45  ;;  %v828_v48 = vsel %vm780_vm3, %v685_v45, 0.0  ;;  %v892_v49 = vmul.f32 %v685_v45, %v685_v45  ;;  %v1153_v50 = vpop.f32.mrb[10].mxu0 }
 0x101   : > { %v829_v51 = vadd.f32 %v828_v48, %v827_v46  ;;  %v930_v52 = vadd.f32 %v929_v47, %v928_v44  ;;  %792 = vst.msk [vmem:[%s1454_s13 + $0x58] sm:$0xff] %vm780_vm3, %v1153_v50  ;;  %v688_v53 = vpop.f32.mrb[11].mxu0  ;;  %v895_v60 = vmul.f32 %v1153_v50, %v1153_v50  ;;  %v935_v2 = vsel %vm780_vm3, %v894_v54, 0.0 }
 0x102   : > { %v931_v4 = vsel %vm780_vm3, %v892_v49, 0.0  ;;  %790 = vst.msk [vmem:[%s1454_s13 + $0x48] sm:$0xff] %vm780_vm3, %v688_v53  ;;  %v830_v55 = vsel %vm780_vm3, %v688_v53, 0.0  ;;  %v893_v56 = vmul.f32 %v688_v53, %v688_v53  ;;  %v834_v3 = vsel %vm780_vm3, %v1153_v50, 0.0 }
 0x103   : > { %v932_v57 = vadd.f32 %v931_v4, %v930_v52  ;;  %v831_v58 = vadd.f32 %v830_v55, %v829_v51  ;;  %v937_v6 = vsel %vm780_vm3, %v895_v60, 0.0 }
 0x104   : > { %v933_v61 = vsel %vm780_vm3, %v893_v56, 0.0 }
 0x105   : > { %v833_v13 = vadd.f32 %v832_v59, %v831_v58  ;;  %v934_v62 = vadd.f32 %v933_v61, %v932_v57 }
 0x106   : > { %v1156_v63 = vpop.f32.mrb[12].mxu0 }
 0x107   : > { %v936_v0 = vadd.f32 %v935_v2, %v934_v62  ;;  %795 = vst.msk [vmem:[%s1454_s13 + $0x70] sm:$0xff] %vm780_vm3, %v1156_v63  ;;  %v701_v1 = vpop.f32.mrb[13].mxu0  ;;  %v835_v5 = vadd.f32 %v834_v3, %v833_v13  ;;  %v898_v14 = vmul.f32 %v1156_v63, %v1156_v63  ;;  %v1160_v18 = vpop.f32.mrb[0].mxu1  ;;  %v840_v22 = vsel %vm780_vm3, %v1156_v63, 0.0 }
 0x108   : > { %793 = vst.msk [vmem:[%s1454_s13 + $0x60] sm:$0xff] %vm780_vm3, %v701_v1  ;;  %v836_v7 = vsel %vm780_vm3, %v701_v1, 0.0  ;;  %v896_v8 = vmul.f32 %v701_v1, %v701_v1  ;;  %v1157_v9 = vpop.f32.mrb[14].mxu0  ;;  %799 = vst.msk [vmem:[%s1454_s13 + $0x90] sm:$0xff] %vm780_vm3, %v1160_v18  ;;  %v717_v21 = vpop.f32.mrb[1].mxu1  ;;  %v902_v40 = vmul.f32 %v1160_v18, %v1160_v18  ;;  %v848_v46 = vsel %vm780_vm3, %v1160_v18, 0.0 }
 0x109   : > { %v837_v10 = vadd.f32 %v836_v7, %v835_v5  ;;  %v938_v11 = vadd.f32 %v937_v6, %v936_v0  ;;  %796 = vst.msk [vmem:[%s1454_s13 + $0x78] sm:$0xff] %vm780_vm3, %v1157_v9  ;;  %v704_v12 = vpop.f32.mrb[15].mxu0  ;;  %v899_v23 = vmul.f32 %v1157_v9, %v1157_v9  ;;  %797 = vst.msk [vmem:[%s1454_s13 + $0x80] sm:$0xff] %vm780_vm3, %v717_v21  ;;  %v1161_v26 = vpop.f32.mrb[2].mxu1  ;;  %v943_v30 = vsel %vm780_vm3, %v898_v14, 0.0 }
 0x10a   : > { %v939_v15 = vsel %vm780_vm3, %v896_v8, 0.0  ;;  %794 = vst.msk [vmem:[%s1454_s13 + $0x68] sm:$0xff] %vm780_vm3, %v704_v12  ;;  %v838_v16 = vsel %vm780_vm3, %v704_v12, 0.0  ;;  %v897_v17 = vmul.f32 %v704_v12, %v704_v12  ;;  %v900_v25 = vmul.f32 %v717_v21, %v717_v21  ;;  %800 = vst.msk [vmem:[%s1454_s13 + $0x98] sm:$0xff] %vm780_vm3, %v1161_v26  ;;  %v720_v29 = vpop.f32.mrb[3].mxu1 }
 0x10b   : > { %v940_v19 = vadd.f32 %v939_v15, %v938_v11  ;;  %v839_v20 = vadd.f32 %v838_v16, %v837_v10  ;;  %v842_v31 = vsel %vm780_vm3, %v1157_v9, 0.0  ;;  %v844_v32 = vsel %vm780_vm3, %v717_v21, 0.0  ;;  %798 = vst.msk [vmem:[%s1454_s13 + $0x88] sm:$0xff] %vm780_vm3, %v720_v29 }
 0x10c   : > { %v941_v24 = vsel %vm780_vm3, %v897_v17, 0.0  ;;  %v945_v35 = vsel %vm780_vm3, %v899_v23, 0.0  ;;  %v947_v36 = vsel %vm780_vm3, %v900_v25, 0.0  ;;  %v901_v37 = vmul.f32 %v720_v29, %v720_v29 }
 0x10d   : > { %v841_v27 = vadd.f32 %v840_v22, %v839_v20  ;;  %v942_v28 = vadd.f32 %v941_v24, %v940_v19  ;;  %v846_v41 = vsel %vm780_vm3, %v720_v29, 0.0  ;;  %v903_v47 = vmul.f32 %v1161_v26, %v1161_v26 }
 0x10e   : > { %v949_v48 = vsel %vm780_vm3, %v901_v37, 0.0  ;;  %v951_v54 = vsel %vm780_vm3, %v902_v40, 0.0  ;;  %v850_v4 = vsel %vm780_vm3, %v1161_v26, 0.0 }
 0x10f   : > { %v944_v33 = vadd.f32 %v943_v30, %v942_v28  ;;  %v843_v34 = vadd.f32 %v842_v31, %v841_v27  ;;  %v1164_v42 = vpop.f32.mrb[4].mxu1  ;;  %v953_v58 = vsel %vm780_vm3, %v903_v47, 0.0 }
 0x110   : > { %803 = vst.msk [vmem:[%s1454_s13 + $0xb0] sm:$0xff] %vm780_vm3, %v1164_v42  ;;  %v733_v45 = vpop.f32.mrb[5].mxu1  ;;  %v906_v62 = vmul.f32 %v1164_v42, %v1164_v42  ;;  %v856_v5 = vsel %vm780_vm3, %v1164_v42, 0.0 }
 0x111   : > { %v845_v38 = vadd.f32 %v844_v32, %v843_v34  ;;  %v946_v39 = vadd.f32 %v945_v35, %v944_v33  ;;  %801 = vst.msk [vmem:[%s1454_s13 + $0xa0] sm:$0xff] %vm780_vm3, %v733_v45  ;;  %v904_v49 = vmul.f32 %v733_v45, %v733_v45  ;;  %v1165_v50 = vpop.f32.mrb[6].mxu1  ;;  %v852_v55 = vsel %vm780_vm3, %v733_v45, 0.0 }
 0x112   : > { %804 = vst.msk [vmem:[%s1454_s13 + $0xb8] sm:$0xff] %vm780_vm3, %v1165_v50  ;;  %v736_v53 = vpop.f32.mrb[7].mxu1  ;;  %v907_v6 = vmul.f32 %v1165_v50, %v1165_v50  ;;  %v959_v14 = vsel %vm780_vm3, %v906_v62, 0.0  ;;  %v858_v15 = vsel %vm780_vm3, %v1165_v50, 0.0 }
 0x113   : > { %v948_v43 = vadd.f32 %v947_v36, %v946_v39  ;;  %v847_v44 = vadd.f32 %v846_v41, %v845_v38  ;;  %802 = vst.msk [vmem:[%s1454_s13 + $0xa8] sm:$0xff] %vm780_vm3, %v736_v53  ;;  %v955_v59 = vsel %vm780_vm3, %v904_v49, 0.0  ;;  %v905_v60 = vmul.f32 %v736_v53, %v736_v53 }
 0x114   : > { %v854_v2 = vsel %vm780_vm3, %v736_v53, 0.0  ;;  %v961_v19 = vsel %vm780_vm3, %v907_v6, 0.0 }
 0x115   : > { %v849_v51 = vadd.f32 %v848_v46, %v847_v44  ;;  %v950_v52 = vadd.f32 %v949_v48, %v948_v43  ;;  %v957_v7 = vsel %vm780_vm3, %v905_v60, 0.0 }
 0x117   : > { %v952_v56 = vadd.f32 %v951_v54, %v950_v52  ;;  %v851_v57 = vadd.f32 %v850_v4, %v849_v51  ;;  %v1168_v3 = vpop.f32.mrb[8].mxu1 }
 0x118   : > { %807 = vst.msk [vmem:[%s1454_s13 + $0xd0] sm:$0xff] %vm780_vm3, %v1168_v3  ;;  %v749_v1 = vpop.f32.mrb[9].mxu1  ;;  %v910_v24 = vmul.f32 %v1168_v3, %v1168_v3  ;;  %v864_v30 = vsel %vm780_vm3, %v1168_v3, 0.0 }
 0x119   : > { %v853_v61 = vadd.f32 %v852_v55, %v851_v57  ;;  %v954_v13 = vadd.f32 %v953_v58, %v952_v56  ;;  %805 = vst.msk [vmem:[%s1454_s13 + $0xc0] sm:$0xff] %vm780_vm3, %v749_v1  ;;  %v908_v8 = vmul.f32 %v749_v1, %v749_v1  ;;  %v1169_v9 = vpop.f32.mrb[10].mxu1  ;;  %v860_v16 = vsel %vm780_vm3, %v749_v1, 0.0 }
 0x11a   : > { %808 = vst.msk [vmem:[%s1454_s13 + $0xd8] sm:$0xff] %vm780_vm3, %v1169_v9  ;;  %v752_v12 = vpop.f32.mrb[11].mxu1  ;;  %v911_v31 = vmul.f32 %v1169_v9, %v1169_v9  ;;  %v967_v38 = vsel %vm780_vm3, %v910_v24, 0.0  ;;  %v866_v39 = vsel %vm780_vm3, %v1169_v9, 0.0 }
 0x11b   : > { %v956_v63 = vadd.f32 %v955_v59, %v954_v13  ;;  %v855_v0 = vadd.f32 %v854_v2, %v853_v61  ;;  %806 = vst.msk [vmem:[%s1454_s13 + $0xc8] sm:$0xff] %vm780_vm3, %v752_v12  ;;  %v963_v20 = vsel %vm780_vm3, %v908_v8, 0.0  ;;  %v909_v21 = vmul.f32 %v752_v12, %v752_v12 }
 0x11c   : > { %v862_v25 = vsel %vm780_vm3, %v752_v12, 0.0  ;;  %v969_v44 = vsel %vm780_vm3, %v911_v31, 0.0 }
 0x11d   : > { %v857_v10 = vadd.f32 %v856_v5, %v855_v0  ;;  %v958_v11 = vadd.f32 %v957_v7, %v956_v63  ;;  %v965_v32 = vsel %vm780_vm3, %v909_v21, 0.0 }
 0x11f   : > { %v960_v17 = vadd.f32 %v959_v14, %v958_v11  ;;  %v859_v18 = vadd.f32 %v858_v15, %v857_v10  ;;  %v1172_v26 = vpop.f32.mrb[12].mxu1 }
 0x120   : > { %811 = vst.msk [vmem:[%s1454_s13 + $0xf0] sm:$0xff] %vm780_vm3, %v1172_v26  ;;  %v765_v29 = vpop.f32.mrb[13].mxu1  ;;  %v914_v50 = vmul.f32 %v1172_v26, %v1172_v26  ;;  %v872_v54 = vsel %vm780_vm3, %v1172_v26, 0.0 }
 0x121   : > { %v861_v22 = vadd.f32 %v860_v16, %v859_v18  ;;  %v962_v23 = vadd.f32 %v961_v19, %v960_v17  ;;  %809 = vst.msk [vmem:[%s1454_s13 + $0xe0] sm:$0xff] %vm780_vm3, %v765_v29  ;;  %v912_v33 = vmul.f32 %v765_v29, %v765_v29  ;;  %v1173_v34 = vpop.f32.mrb[14].mxu1  ;;  %v868_v40 = vsel %vm780_vm3, %v765_v29, 0.0 }
 0x122   : > { %812 = vst.msk [vmem:[%s1454_s13 + $0xf8] sm:$0xff] %vm780_vm3, %v1173_v34  ;;  %v768_v37 = vpop.f32.mrb[15].mxu1  ;;  %v915_v41 = vmul.f32 %v1173_v34, %v1173_v34  ;;  %v975_v57 = vsel %vm780_vm3, %v914_v50, 0.0  ;;  %v874_v58 = vsel %vm780_vm3, %v1173_v34, 0.0 }
 0x123   : > { %v964_v27 = vadd.f32 %v963_v20, %v962_v23  ;;  %v863_v28 = vadd.f32 %v862_v25, %v861_v22  ;;  %810 = vst.msk [vmem:[%s1454_s13 + $0xe8] sm:$0xff] %vm780_vm3, %v768_v37  ;;  %v971_v45 = vsel %vm780_vm3, %v912_v33, 0.0  ;;  %v913_v47 = vmul.f32 %v768_v37, %v768_v37 }
 0x124   : > { %v977_v46 = vsel %vm780_vm3, %v915_v41, 0.0  ;;  %v870_v51 = vsel %vm780_vm3, %v768_v37, 0.0 }
 0x125   : > { %v865_v35 = vadd.f32 %v864_v30, %v863_v28  ;;  %v966_v36 = vadd.f32 %v965_v32, %v964_v27  ;;  %v973_v4 = vsel %vm780_vm3, %v913_v47, 0.0 }
 0x127   : > { %v968_v42 = vadd.f32 %v967_v38, %v966_v36  ;;  %v867_v43 = vadd.f32 %v866_v39, %v865_v35 }
 0x129   : > { %v869_v48 = vadd.f32 %v868_v40, %v867_v43  ;;  %v970_v49 = vadd.f32 %v969_v44, %v968_v42 }
 0x12b   : > { %v972_v52 = vadd.f32 %v971_v45, %v970_v49  ;;  %v871_v53 = vadd.f32 %v870_v51, %v869_v48 }
 0x12d   : > { %v873_v55 = vadd.f32 %v872_v54, %v871_v53  ;;  %v974_v56 = vadd.f32 %v973_v4, %v972_v52 }
 0x12f   : > { %v875_v59 = vadd.f32 %v874_v58, %v873_v55  ;;  %v976_v60 = vadd.f32 %v975_v57, %v974_v56 }
 0x131   : > { %v876_v61 = vrot.slane %v875_v59, 4  ;;  %v978_v13 = vadd.f32 %v977_v46, %v976_v60 }
 0x133   : > { %v877_v62 = vadd.f32 %v876_v61, %v875_v59  ;;  %v979_v2 = vrot.slane %v978_v13, 4 }
 0x135   : > { %v878_v3 = vrot.slane %v877_v62, 2  ;;  %v980_v63 = vadd.f32 %v979_v2, %v978_v13 }
 0x137   : > { %v879_v0 = vadd.f32 %v878_v3, %v877_v62  ;;  %v981_v1 = vrot.slane %v980_v63, 2 }
 0x139   : > { %v880_v5 = vrot.slane %v879_v0, 1  ;;  %v982_v6 = vadd.f32 %v981_v1, %v980_v63 }
 0x13b   : > { %v881_v7 = vadd.f32 %v880_v5, %v879_v0  ;;  %v983_v8 = vrot.slane %v982_v6, 1 }
 0x13d   : > { %883 = vst.msk [vmem:[%s268_s16] sm:$0x1] %vm882_vm1, %v881_v7  ;;  %v984_v9 = vadd.f32 %v983_v8, %v982_v6 }
 0x13f   : > { %985 = vst.msk [vmem:[%s271_s19] sm:$0x1] %vm882_vm1, %v984_v9 }
 0x140 PF: > { %s17_s21 = sadd.s32 1, %s1191_s21  }
 0x141   : > { %p14_p5 = scmp.ge.s32.totalorder %s17_s21, 4  }
 0x143   :  { %16 = sbr.rel (!%p14_p5) target bundleno = 1 (0x1), region = 90 }

// kernel: bottleneck_forward.5
= control target key start
LH: loop header
LB: loop body
LE: loop exit
PB: predicated region body
PF: predicated region fallthrough
CT: control target
= control target key end

     0   :  { %s13689_s21 = smov 0   ;;  %s15763_s0 = inlined_call_operand.vmem [shape: f32[2,14,14,16], index: 0, kind: input, shape index: {}]   ;;  %s15764_s1 = inlined_call_operand.vmem [shape: f32[1,16], index: 1, kind: input, shape index: {}]   ;;  %s15765_s2 = inlined_call_operand.vmem [shape: f32[1,16], index: 2, kind: input, shape index: {}]   ;;  %s15766_s3 = inlined_call_operand.vmem [shape: bf16[9,16,16], index: 3, kind: input, shape index: {}]   ;;  %s15767_s4 = inlined_call_operand.vmem [shape: f32[2,14,14,16], index: 4, kind: output, shape index: {0}]   ;;  %s15768_s5 = inlined_call_operand.vmem [shape: f32[2,1,16], index: 5, kind: output, shape index: {1}]   ;;  %s15769_s6 = inlined_call_operand.vmem [shape: f32[2,1,16], index: 6, kind: output, shape index: {2}]  }
   0x1 LB: > { %s12241_s22 = sadd.s32 4294967295, %s13649_s21   ;;  %p12245_p0 = scmp.ge.s32.totalorder %s13649_s21, 1  ;;  %s13649_s21 = sphi %s13689_s21, %s17_s21  }
   0x2   : > { %p217_p1 = scmp.lt.s32.totalorder %s13649_s21, 3 }
   0x4   : > { %p218_p2 = pnand %p12245_p0, %p217_p1 }
   0x5   : > { %v13409_v0 = vld [vmem:[%s15766_s3 + $0x8] sm:$0xff] (!%p218_p2)   ;;  %v519_v1 = vlaneseq (!%p218_p2)  ;;  %v13651_v2 = vmov (!%p218_p2), 0.0   ;;  %p253_p3 = scmp.lt.s32.totalorder (!%p218_p2), %s12241_s22, 1  ;;  %vm13652_vm0 = vmmov (!%p218_p2), 0   ;;  %vm396_vm1 = vcmask (!%p218_p2), 130048   ;;  %v13412_v6 = vld [vmem:[%s15766_s3 + $0x20] sm:$0xff] (!%p218_p2)  }
   0x6   : > { %221 = sbr.rel (%p218_p2) target bundleno = 845 (0x34d), region = 36  ;;  %12520 = vmatprep.subr.bf16.mxu1 (!%p218_p2), %v13651_v2  ;;  %12736 = vmatprep.subr.bf16.mxu0 (!%p218_p2), %v13651_v2  ;;  %397 = vst.msk [vmem:[#allocation2] sm:$0xff] (!%p218_p2), %vm396_vm1, %v13651_v2  ;;  %398 = vst.msk [vmem:[#allocation2 + $0x8] sm:$0xff] (!%p218_p2), %vm396_vm1, %v13651_v2  ;;  %v13653_v3 = vmov (!%p218_p2), 1983009808   ;;  %vm431_vm2 = vcmask (!%p218_p2), 128000  }
   0x7   : > { %12521 = vmatpush3.bf16.msra.mxu1 (!%p218_p2), %v13409_v0  ;;  %12522 = vmatprep.mubr.msk.bf16.mxu1 (!%p218_p2), %vm13652_vm0, %v13651_v2  ;;  %399 = vst.msk [vmem:[#allocation2 + $0x10] sm:$0xff] (!%p218_p2), %vm396_vm1, %v13651_v2  ;;  %400 = vst.msk [vmem:[#allocation2 + $0x18] sm:$0xff] (!%p218_p2), %vm396_vm1, %v13651_v2  ;;  %v517_v4 = vunpack.c.l.s4 (!%p218_p2), %v13653_v3  ;;  %v520_v5 = vshrl.u32 (!%p218_p2), %v519_v1, 7  ;;  %v13779_v7 = vld [vmem:[%s15764_s1] ss:$0 sm:$0xff] (!%p218_p2)  ;;  %vm12044_vm3 = vcmask (!%p218_p2), 125952  }
   0x8   : > { %401 = vst.msk [vmem:[#allocation2 + $0x20] sm:$0xff] (!%p218_p2), %vm396_vm1, %v13651_v2  ;;  %402 = vst.msk [vmem:[#allocation2 + $0x28] sm:$0xff] (!%p218_p2), %vm396_vm1, %v13651_v2  ;;  %12738 = vmatprep.mubr.msk.bf16.mxu0 (!%p218_p2), %vm13652_vm0, %v13651_v2  ;;  %12574 = vmatprep.subr.bf16.mxu1 (!%p218_p2), %v13651_v2  ;;  %v13785_v9 = vld [vmem:[%s15765_s2] ss:$0 sm:$0xff] (!%p218_p2)  ;;  %vm12053_vm4 = vcmask (!%p218_p2), 122880  }
   0x9   : > { %403 = vst.msk [vmem:[#allocation2 + $0x30] sm:$0xff] (!%p218_p2), %vm396_vm1, %v13651_v2  ;;  %404 = vst.msk [vmem:[#allocation2 + $0x38] sm:$0xff] (!%p218_p2), %vm396_vm1, %v13651_v2  ;;  %v518_v8 = vunpack.c.0.s8 (!%p218_p2), %v517_v4  ;;  %12737 = vmatpush3.bf16.msra.mxu0 (!%p218_p2), %v13412_v6 }
   0xa   : > { %405 = vst.msk [vmem:[#allocation2 + $0x40] sm:$0xff] (!%p218_p2), %vm396_vm1, %v13651_v2  ;;  %406 = vst.msk [vmem:[#allocation2 + $0x48] sm:$0xff] (!%p218_p2), %vm396_vm1, %v13651_v2  ;;  %12790 = vmatprep.subr.bf16.mxu0 (!%p218_p2), %v13651_v2 }
   0xb   : > { %407 = vst.msk [vmem:[#allocation2 + $0x50] sm:$0xff] (!%p218_p2), %vm396_vm1, %v13651_v2  ;;  %408 = vst.msk [vmem:[#allocation2 + $0x58] sm:$0xff] (!%p218_p2), %vm396_vm1, %v13651_v2  ;;  %v13795_v10 = vsub.s32 (!%p218_p2), %v518_v8, %v520_v5 }
   0xc   : > { %409 = vst.msk [vmem:[#allocation2 + $0x60] sm:$0xff] (!%p218_p2), %vm396_vm1, %v13651_v2  ;;  %410 = vst.msk [vmem:[#allocation2 + $0x68] sm:$0xff] (!%p218_p2), %vm396_vm1, %v13651_v2 }
   0xd   : > { %s15771_s22 = smov (!%p253_p3, %s12241_s22), 1  ;;  %411 = vst.msk [vmem:[#allocation2 + $0x70] sm:$0xff] %vm396_vm1, %v13651_v2  ;;  %412 = vst.msk [vmem:[#allocation2 + $0x78] sm:$0xff] %vm396_vm1, %v13651_v2  ;;  %v1433_v20 = vld [vmem:[#allocation2 + $0x1] sm:$0xff]  ;;  %v1434_v21 = vld [vmem:[#allocation2 + $0x9] sm:$0x3f] }
   0xe   : > { %413 = vst.msk [vmem:[#allocation2 + $0x80] sm:$0xff] %vm396_vm1, %v13651_v2  ;;  %414 = vst.msk [vmem:[#allocation2 + $0x88] sm:$0xff] %vm396_vm1, %v13651_v2  ;;  %s13397_s29 = smul.u32 224, %s15771_s22  ;;  %v1489_v26 = vcombine.high %v1433_v20, %v1433_v20  ;;  %v1496_v27 = vrot.slane %v1433_v20, %v13795_v10  ;;  %v1506_v28 = vcombine.high %v1434_v21, %v1434_v21  ;;  %s265_s16 = scalar_lea.vmem %s15768_s5, %s15771_s22 }
   0xf   : > { %415 = vst.msk [vmem:[#allocation2 + $0x90] sm:$0xff] %vm396_vm1, %v13651_v2  ;;  %416 = vst.msk [vmem:[#allocation2 + $0x98] sm:$0xff] %vm396_vm1, %v13651_v2  ;;  %v1513_v29 = vrot.slane %v1434_v21, %v13795_v10  ;;  %s268_s19 = scalar_lea.vmem %s15769_s6, %s15771_s22 }
  0x10   : > { %417 = vst.msk [vmem:[#allocation2 + $0xa0] sm:$0xff] %vm396_vm1, %v13651_v2  ;;  %418 = vst.msk [vmem:[#allocation2 + $0xa8] sm:$0xff] %vm396_vm1, %v13651_v2  ;;  %s13793_s10 = scalar_lea.vmem %s15763_s0, %s13397_s29  ;;  %v1503_v35 = vrot.slane %v1489_v26, %v13795_v10  ;;  %v1504_v36 = vcombine.high %v1496_v27, %v1496_v27  ;;  %v13818_v37 = vrot.slane %v1506_v28, %v13795_v10  ;;  %s15508_s14 = scalar_lea.vmem %s15767_s4, %s13397_s29 }
  0x11   : > { %419 = vst.msk [vmem:[#allocation2 + $0xb0] sm:$0xff] %vm396_vm1, %v13651_v2  ;;  %420 = vst.msk [vmem:[#allocation2 + $0xb8] sm:$0xff] %vm396_vm1, %v13651_v2  ;;  %v270_v11 = vld [vmem:[%s13793_s10] sm:$0xff]  ;;  %v271_v12 = vld [vmem:[%s13793_s10 + $0x8] sm:$0x3f]  ;;  %v1521_v39 = vcombine.high %v1513_v29, %v1513_v29 }
  0x12   : > { %421 = vst.msk [vmem:[#allocation2 + $0xc0] sm:$0xff] %vm396_vm1, %v13651_v2  ;;  %422 = vst.msk [vmem:[#allocation2 + $0xc8] sm:$0xff] %vm396_vm1, %v13651_v2  ;;  %v272_v13 = vld [vmem:[%s13793_s10 + $0x10] sm:$0xff]  ;;  %v305_v14 = vmul.f32 %v13779_v7, %v270_v11  ;;  %v306_v15 = vmul.f32 %v13779_v7, %v271_v12  ;;  %v273_v17 = vld [vmem:[%s13793_s10 + $0x18] sm:$0x3f]  ;;  %v1505_v44 = vcombine.high %v1503_v35, %v1503_v35 }
  0x13   : > { %423 = vst.msk [vmem:[#allocation2 + $0xd0] sm:$0xff] %vm396_vm1, %v13651_v2  ;;  %424 = vst.msk [vmem:[#allocation2 + $0xd8] sm:$0xff] %vm396_vm1, %v13651_v2  ;;  %v307_v16 = vmul.f32 %v13779_v7, %v272_v13  ;;  %v274_v18 = vld [vmem:[%s13793_s10 + $0x20] sm:$0xff]  ;;  %v275_v19 = vld [vmem:[%s13793_s10 + $0x28] sm:$0x3f]  ;;  %v308_v22 = vmul.f32 %v13779_v7, %v273_v17  ;;  %v1951_v45 = vcombine.low %v1496_v27, %v1504_v36 }
  0x14   : > { %425 = vst.msk [vmem:[#allocation2 + $0xe0] sm:$0xff] %vm396_vm1, %v13651_v2  ;;  %426 = vst.msk [vmem:[#allocation2 + $0xe8] sm:$0xff] %vm396_vm1, %v13651_v2  ;;  %v309_v23 = vmul.f32 %v13779_v7, %v274_v18  ;;  %v310_v24 = vmul.f32 %v13779_v7, %v275_v19  ;;  %v340_v25 = vadd.f32 %v13785_v9, %v305_v14  ;;  %v276_v33 = vld [vmem:[%s13793_s10 + $0x30] sm:$0xff]  ;;  %v277_v38 = vld [vmem:[%s13793_s10 + $0x38] sm:$0x3f] }
  0x15   : > { %427 = vst.msk [vmem:[#allocation2 + $0xf0] sm:$0xff] %vm396_vm1, %v13651_v2  ;;  %428 = vst.msk [vmem:[#allocation2 + $0xf8] sm:$0xff] %vm396_vm1, %v13651_v2  ;;  %v341_v30 = vadd.f32 %v13785_v9, %v306_v15  ;;  %v342_v31 = vadd.f32 %v13785_v9, %v307_v16  ;;  %v343_v32 = vadd.f32 %v13785_v9, %v308_v22  ;;  %v278_v43 = vld [vmem:[%s13793_s10 + $0x40] sm:$0xff]  ;;  %v279_v48 = vld [vmem:[%s13793_s10 + $0x48] sm:$0x3f] }
  0x16   : > { %v368_v34 = vmax.f32 %v340_v25, 0.0  ;;  %v344_v42 = vadd.f32 %v13785_v9, %v309_v23  ;;  %v311_v47 = vmul.f32 %v13779_v7, %v276_v33  ;;  %v13826_v49 = vcombine.low %v1513_v29, %v1521_v39  ;;  %v280_v53 = vld [vmem:[%s13793_s10 + $0x50] sm:$0xff]  ;;  %v281_v54 = vld [vmem:[%s13793_s10 + $0x58] sm:$0x3f]  ;;  %v282_v55 = vld [vmem:[%s13793_s10 + $0x60] sm:$0xff] }
  0x17   : > { %v369_v40 = vmax.f32 %v341_v30, 0.0  ;;  %v370_v41 = vmax.f32 %v342_v31, 0.0  ;;  %v371_v46 = vmax.f32 %v343_v32, 0.0  ;;  %v345_v51 = vadd.f32 %v13785_v9, %v310_v24  ;;  %v283_v60 = vld [vmem:[%s13793_s10 + $0x68] sm:$0x3f]  ;;  %v284_v6 = vld [vmem:[%s13793_s10 + $0x70] sm:$0xff] }
  0x18   : > { %430 = vst.msk [vmem:[#allocation2 + $0x11] sm:$0xff] %vm396_vm1, %v368_v34  ;;  %v372_v50 = vmax.f32 %v344_v42, 0.0  ;;  %v312_v52 = vmul.f32 %v13779_v7, %v277_v38  ;;  %v1952_v56 = vcombine.low %v1503_v35, %v1505_v44  ;;  %v1959_v57 = vrot.slane %v1951_v45, %v13795_v10 }
  0x19   : > { %432 = vst.msk [vmem:[#allocation2 + $0x19] sm:$0x3f] %vm431_vm2, %v369_v40  ;;  %434 = vst.msk [vmem:[#allocation2 + $0x29] sm:$0x3f] %vm431_vm2, %v371_v46  ;;  %v346_v58 = vadd.f32 %v13785_v9, %v311_v47  ;;  %v313_v59 = vmul.f32 %v13779_v7, %v278_v43  ;;  %v1976_v61 = vrot.slane %v13826_v49, %v13795_v10  ;;  %v373_v62 = vmax.f32 %v345_v51, 0.0 }
  0x1a   : > { %433 = vst.msk [vmem:[#allocation2 + $0x21] sm:$0xff] %vm396_vm1, %v370_v41  ;;  %435 = vst.msk [vmem:[#allocation2 + $0x31] sm:$0xff] %vm396_vm1, %v372_v50  ;;  %v347_v63 = vadd.f32 %v13785_v9, %v312_v52  ;;  %v314_v0 = vmul.f32 %v13779_v7, %v279_v48  ;;  %v1966_v1 = vrot.slane %v1952_v56, %v13795_v10 }
  0x1b   : > { %v374_v3 = vmax.f32 %v346_v58, 0.0  ;;  %v348_v4 = vadd.f32 %v13785_v9, %v313_v59  ;;  %v315_v5 = vmul.f32 %v13779_v7, %v280_v53  ;;  %436 = vst.msk [vmem:[#allocation2 + $0x39] sm:$0x3f] %vm431_vm2, %v373_v62  ;;  %v316_v12 = vmul.f32 %v13779_v7, %v281_v54 }
  0x1c   : > { %v375_v8 = vmax.f32 %v347_v63, 0.0  ;;  %v349_v11 = vadd.f32 %v13785_v9, %v314_v0  ;;  %v317_v13 = vmul.f32 %v13779_v7, %v282_v55  ;;  %v1967_v14 = vcombine.low %v1959_v57, %v1966_v1  ;;  %v13416_v57 = vld [vmem:[%s15766_s3] sm:$0xff]  }
  0x1d   : > { %437 = vst.msk [vmem:[#allocation2 + $0x41] sm:$0xff] %vm396_vm1, %v374_v3  ;;  %v376_v15 = vmax.f32 %v348_v4, 0.0  ;;  %v350_v16 = vadd.f32 %v13785_v9, %v315_v5  ;;  %v318_v17 = vmul.f32 %v13779_v7, %v283_v60  ;;  %v13858_v20 = vadd.f32 %v13785_v9, %v316_v12  ;;  %v13414_v12 = vld [vmem:[%s15766_s3 + $0x28] sm:$0xff]  }
  0x1e   : > { %438 = vst.msk [vmem:[#allocation2 + $0x49] sm:$0x3f] %vm431_vm2, %v375_v8  ;;  %v377_v19 = vmax.f32 %v349_v11, 0.0  ;;  %v13861_v21 = vadd.f32 %v13785_v9, %v317_v13  ;;  %v13864_v22 = vmul.f32 %v13779_v7, %v284_v6 }
  0x1f   : > { %v1435_v18 = vld [vmem:[#allocation2 + $0x11] sm:$0xff]  ;;  %439 = vst.msk [vmem:[#allocation2 + $0x51] sm:$0xff] %vm396_vm1, %v376_v15  ;;  %v378_v28 = vmax.f32 %v350_v16, 0.0  ;;  %v13869_v29 = vadd.f32 %v13785_v9, %v318_v17  ;;  %v379_v16 = vmax.f32 %v13858_v20, 0.0 }
  0x20   : > { %v1529_v23 = vrot.slane %v1435_v18, %v13795_v10  ;;  %v5133_v24 = vld [vmem:[#allocation2 + $0x19] sm:$0x3f]  ;;  %v5188_v26 = vcombine.high %v1435_v18, %v1435_v18  ;;  %440 = vst.msk [vmem:[#allocation2 + $0x59] sm:$0x3f] %vm431_vm2, %v377_v19  ;;  %v5135_v58 = vld [vmem:[#allocation2 + $0x29] sm:$0x3f] }
  0x21   : > { %v5134_v25 = vld [vmem:[#allocation2 + $0x21] sm:$0xff]  ;;  %v1436_v27 = vld [vmem:[#allocation2 + $0x19] sm:$0x3f]  ;;  %v5205_v30 = vcombine.high %v5133_v24, %v5133_v24  ;;  %v5212_v31 = vrot.slane %v5133_v24, %v13795_v10  ;;  %441 = vst.msk [vmem:[#allocation2 + $0x61] sm:$0xff] %vm396_vm1, %v378_v28  ;;  %v5136_v63 = vld [vmem:[#allocation2 + $0x31] sm:$0xff]  ;;  %v5238_v11 = vcombine.high %v5135_v58, %v5135_v58 }
  0x22   : > { %v5228_v32 = vrot.slane %v5134_v25, %v13795_v10  ;;  %v1539_v33 = vcombine.high %v1436_v27, %v1436_v27  ;;  %v1969_v34 = vcombine.low %v13818_v37, %v1529_v23  ;;  %v5202_v35 = vrot.slane %v5188_v26, %v13795_v10  ;;  %v1438_v4 = vld [vmem:[#allocation2 + $0x29] sm:$0x3f]  ;;  %442 = vst.msk [vmem:[#allocation2 + $0x69] sm:$0x3f] %vm431_vm2, %v379_v16 }
  0x23   : > { %v5203_v36 = vcombine.high %v1529_v23, %v1529_v23  ;;  %v5219_v38 = vrot.slane %v5205_v30, %v13795_v10  ;;  %v5220_v39 = vcombine.high %v5212_v31, %v5212_v31  ;;  %v1546_v40 = vrot.slane %v1436_v27, %v13795_v10 }
  0x24   : > { %v1553_v41 = vrot.slane %v1539_v33, %v13795_v10  ;;  %v1983_v42 = vrot.slane %v1969_v34, %v13795_v10  ;;  %v5204_v43 = vcombine.high %v5202_v35, %v5202_v35  ;;  %v1570_v45 = vcombine.high %v5228_v32, %v5228_v32 }
  0x25   : > { %v5650_v44 = vcombine.low %v1529_v23, %v5203_v36  ;;  %v5667_v46 = vcombine.low %v5212_v31, %v5220_v39  ;;  %v5668_v47 = vcombine.low %v5219_v38, %v5228_v32  ;;  %v1554_v37 = vcombine.high %v1546_v40, %v1546_v40 }
  0x26   : > { %v1985_v48 = vcombine.low %v5203_v36, %v5202_v35  ;;  %v1984_v49 = vcombine.low %v1976_v61, %v1983_v42  ;;  %v5651_v50 = vcombine.low %v5202_v35, %v5204_v43  ;;  %v1986_v52 = vcombine.low %v5204_v43, %v1546_v40 }
  0x27   : > { %v5658_v51 = vrot.slane %v5650_v44, %v13795_v10  ;;  %v5675_v53 = vrot.slane %v5667_v46, %v13795_v10  ;;  %v5682_v54 = vrot.slane %v5668_v47, %v13795_v10  ;;  %v2002_v56 = vcombine.low %v1554_v37, %v1553_v41 }
  0x28   : > { %v1993_v55 = vrot.slane %v1985_v48, %v13795_v10  ;;  %v2392_v59 = vpack.c.bf16 %v1984_v49, %v1967_v14  ;;  %v5665_v60 = vrot.slane %v5651_v50, %v13795_v10  ;;  %v2000_v61 = vrot.slane %v1986_v52, %v13795_v10  ;;  %v5138_v48 = vld [vmem:[#allocation2 + $0x41] sm:$0xff] }
  0x29   : > { %v2003_v62 = vcombine.low %v5228_v32, %v1570_v45  ;;  %v5683_v0 = vcombine.low %v5675_v53, %v5682_v54  ;;  %v2010_v1 = vrot.slane %v2002_v56, %v13795_v10  ;;  %v5221_v3 = vcombine.high %v5134_v25, %v5134_v25  ;;  %v5137_v32 = vld [vmem:[#allocation2 + $0x39] sm:$0x3f] }
  0x2a   : > { %12523 = vmatmul.mubr.msk.bf16.vlgmr.msra.gmra.mrb[0].mxu1 %vm396_vm1, %v2392_v59  ;;  %v5666_v5 = vcombine.low %v5658_v51, %v5665_v60  ;;  %v2001_v6 = vcombine.low %v1993_v55, %v2000_v61  ;;  %v5245_v14 = vrot.slane %v5135_v58, %v13795_v10  ;;  %v5261_v15 = vrot.slane %v5136_v63, %v13795_v10  ;;  %v1440_v61 = vld [vmem:[#allocation2 + $0x39] sm:$0x3f] }
  0x2b   : > { %v2017_v8 = vrot.slane %v2003_v62, %v13795_v10  ;;  %12526 = vmatprep.mubr.msk.bf16.mxu1 %vm13652_vm0, %v13651_v2  ;;  %12575 = vmatpush3.bf16.msra.mxu1 %v13416_v57  ;;  %v5235_v13 = vrot.slane %v5221_v3, %v13795_v10  ;;  %v5252_v19 = vrot.slane %v5238_v11, %v13795_v10  ;;  %v380_v36 = vmax.f32 %v13861_v21, 0.0 }
  0x2c   : > { %v6091_v17 = vpack.c.bf16 %v5683_v0, %v5666_v5  ;;  %v1572_v23 = vcombine.high %v1438_v4, %v1438_v4  ;;  %12628 = vmatprep.subr.bf16.mxu1 %v13651_v2  ;;  %v5253_v25 = vcombine.high %v5245_v14, %v5245_v14  ;;  %v5269_v26 = vcombine.high %v5261_v15, %v5261_v15 }
  0x2d   : > { %v2018_v18 = vcombine.low %v2010_v1, %v2017_v8  ;;  %v5237_v24 = vcombine.high %v5235_v13, %v5235_v13  ;;  %v5684_v27 = vcombine.low %v1570_v45, %v5235_v13  ;;  %v1579_v30 = vrot.slane %v1438_v4, %v13795_v10  ;;  %443 = vst.msk [vmem:[#allocation2 + $0x71] sm:$0xff] %vm396_vm1, %v380_v36 }
  0x2e   : > { %12739 = vmatmul.mubr.msk.bf16.vlgmr.msra.gmra.mrb[0].mxu0 %vm396_vm1, %v6091_v17  ;;  %v1586_v20 = vrot.slane %v1572_v23, %v13795_v10  ;;  %v1588_v31 = vcombine.high %v5136_v63, %v5136_v63  ;;  %v5701_v35 = vcombine.low %v5253_v25, %v5252_v19  ;;  %v5702_v38 = vcombine.low %v5261_v15, %v5269_v26  ;;  %v5139_v17 = vld [vmem:[#allocation2 + $0x49] sm:$0x3f]  ;;  %v5140_v25 = vld [vmem:[#allocation2 + $0x51] sm:$0xff] }
  0x2f   : > { %v2393_v28 = vpack.c.bf16 %v2018_v18, %v2001_v6  ;;  %12791 = vmatpush3.bf16.msra.mxu0 %v13414_v12  ;;  %12742 = vmatprep.mubr.msk.bf16.mxu0 %vm13652_vm0, %v13651_v2  ;;  %v5685_v33 = vcombine.low %v5237_v24, %v5245_v14  ;;  %v5692_v34 = vrot.slane %v5684_v27, %v13795_v10 }
  0x30   : > { %v1587_v39 = vcombine.high %v1579_v30, %v1579_v30  ;;  %v1602_v40 = vrot.slane %v1588_v31, %v13795_v10  ;;  %v2019_v41 = vcombine.low %v5235_v13, %v5237_v24  ;;  %12844 = vmatprep.subr.bf16.mxu0 %v13651_v2  ;;  %v5709_v43 = vrot.slane %v5701_v35, %v13795_v10 }
  0x31   : > { %v5699_v42 = vrot.slane %v5685_v33, %v13795_v10  ;;  %v2036_v44 = vcombine.low %v1586_v20, %v5261_v15  ;;  %v5271_v45 = vcombine.high %v5137_v32, %v5137_v32  ;;  %v5716_v46 = vrot.slane %v5702_v38, %v13795_v10  ;;  %v1442_v20 = vld [vmem:[#allocation2 + $0x49] sm:$0x3f] }
  0x32   : > { %12527 = vmatmul.mubr.msk.bf16.gmra.mrb[4].mxu1 %vm396_vm1, %v2393_v28  ;;  %v2020_v21 = vcombine.low %v1579_v30, %v1587_v39  ;;  %v2027_v47 = vrot.slane %v2019_v41, %v13795_v10  ;;  %v2037_v37 = vcombine.low %v5269_v26, %v1602_v40  ;;  %v5270_v51 = vcombine.high %v1602_v40, %v1602_v40 }
  0x33   : > { %v5700_v49 = vcombine.low %v5692_v34, %v5699_v42  ;;  %12530 = vmatprep.mubr.msk.bf16.mxu1 %vm13652_vm0, %v13651_v2  ;;  %v2044_v50 = vrot.slane %v2036_v44, %v13795_v10  ;;  %v5278_v52 = vrot.slane %v5137_v32, %v13795_v10  ;;  %v5717_v53 = vcombine.low %v5709_v43, %v5716_v46  ;;  %v1444_v42 = vld [vmem:[#allocation2 + $0x59] sm:$0x3f] }
  0x34   : > { %v2034_v54 = vrot.slane %v2020_v21, %v13795_v10  ;;  %v2051_v55 = vrot.slane %v2037_v37, %v13795_v10  ;;  %v5285_v56 = vrot.slane %v5271_v45, %v13795_v10  ;;  %v5287_v58 = vcombine.high %v5138_v48, %v5138_v48 }
  0x35   : > { %v5286_v57 = vcombine.high %v5278_v52, %v5278_v52  ;;  %v5294_v59 = vrot.slane %v5138_v48, %v13795_v10  ;;  %v5718_v60 = vcombine.low %v1602_v40, %v5270_v51  ;;  %v6092_v62 = vpack.c.bf16 %v5717_v53, %v5700_v49 }
  0x36   : > { %v2035_v63 = vcombine.low %v2027_v47, %v2034_v54  ;;  %v2052_v0 = vcombine.low %v2044_v50, %v2051_v55  ;;  %v5301_v1 = vrot.slane %v5287_v58, %v13795_v10  ;;  %v1605_v11 = vcombine.high %v1440_v61, %v1440_v61  ;;  %v5141_v54 = vld [vmem:[#allocation2 + $0x59] sm:$0x3f] }
  0x37   : > { %v5302_v3 = vcombine.high %v5294_v59, %v5294_v59  ;;  %v5719_v4 = vcombine.low %v5278_v52, %v5286_v57  ;;  %v5726_v5 = vrot.slane %v5718_v60, %v13795_v10  ;;  %12743 = vmatmul.mubr.msk.bf16.gmra.mrb[4].mxu0 %vm396_vm1, %v6092_v62  ;;  %v5735_v8 = vcombine.low %v5285_v56, %v5294_v59 }
  0x38   : > { %v2394_v6 = vpack.c.bf16 %v2052_v0, %v2035_v63  ;;  %v1612_v12 = vrot.slane %v1440_v61, %v13795_v10  ;;  %12746 = vmatprep.mubr.msk.bf16.mxu0 %vm13652_vm0, %v13651_v2  ;;  %v1637_v15 = vcombine.high %v5301_v1, %v5301_v1  ;;  %v1619_v19 = vrot.slane %v1605_v11, %v13795_v10 }
  0x39   : > { %v5733_v13 = vrot.slane %v5719_v4, %v13795_v10  ;;  %v5736_v14 = vcombine.low %v5302_v3, %v5301_v1  ;;  %v2070_v16 = vcombine.low %v5294_v59, %v5302_v3  ;;  %v5743_v18 = vrot.slane %v5735_v8, %v13795_v10  ;;  %v5142_v3 = vld [vmem:[#allocation2 + $0x61] sm:$0xff]  ;;  %v5143_v4 = vld [vmem:[#allocation2 + $0x69] sm:$0x3f] }
  0x3a   : > { %12531 = vmatmul.mubr.msk.bf16.gmra.mrb[8].mxu1 %vm396_vm1, %v2394_v6  ;;  %v1620_v23 = vcombine.high %v1612_v12, %v1612_v12  ;;  %v2053_v24 = vcombine.low %v5270_v51, %v1612_v12  ;;  %v2071_v28 = vcombine.low %v5301_v1, %v1637_v15  ;;  %v5304_v33 = vcombine.high %v5139_v17, %v5139_v17 }
  0x3b   : > { %v5734_v26 = vcombine.low %v5726_v5, %v5733_v13  ;;  %v5750_v27 = vrot.slane %v5736_v14, %v13795_v10  ;;  %12534 = vmatprep.mubr.msk.bf16.mxu1 %vm13652_vm0, %v13651_v2  ;;  %v2078_v30 = vrot.slane %v2070_v16, %v13795_v10  ;;  %v5311_v36 = vrot.slane %v5139_v17, %v13795_v10 }
  0x3c   : > { %v2054_v31 = vcombine.low %v1620_v23, %v1619_v19  ;;  %v2061_v32 = vrot.slane %v2053_v24, %v13795_v10  ;;  %v2085_v35 = vrot.slane %v2071_v28, %v13795_v10  ;;  %v5320_v38 = vcombine.high %v5140_v25, %v5140_v25 }
  0x3d   : > { %v5751_v34 = vcombine.low %v5743_v18, %v5750_v27  ;;  %v5318_v40 = vrot.slane %v5304_v33, %v13795_v10  ;;  %v5327_v41 = vrot.slane %v5140_v25, %v13795_v10  ;;  %v1638_v43 = vcombine.high %v1442_v20, %v1442_v20  ;;  %v1446_v27 = vld [vmem:[#allocation2 + $0x69] sm:$0x3f] }
  0x3e   : > { %v2068_v39 = vrot.slane %v2054_v31, %v13795_v10  ;;  %v2086_v45 = vcombine.low %v2078_v30, %v2085_v35  ;;  %v5319_v46 = vcombine.high %v5311_v36, %v5311_v36  ;;  %v5334_v21 = vrot.slane %v5320_v38, %v13795_v10 }
  0x3f   : > { %v6093_v44 = vpack.c.bf16 %v5751_v34, %v5734_v26  ;;  %v5335_v37 = vcombine.high %v5327_v41, %v5327_v41  ;;  %v5752_v48 = vcombine.low %v1637_v15, %v5311_v36  ;;  %v1645_v49 = vrot.slane %v1442_v20, %v13795_v10 }
  0x40   : > { %v2069_v47 = vcombine.low %v2061_v32, %v2068_v39  ;;  %v5336_v50 = vcombine.high %v5334_v21, %v5334_v21  ;;  %v5753_v51 = vcombine.low %v5319_v46, %v5318_v40  ;;  %v1652_v52 = vrot.slane %v1638_v43, %v13795_v10 }
  0x41   : > { %12747 = vmatmul.mubr.msk.bf16.gmra.mrb[8].mxu0 %vm396_vm1, %v6093_v44  ;;  %v1678_v53 = vrot.slane %v1444_v42, %v13795_v10  ;;  %v5760_v56 = vrot.slane %v5752_v48, %v13795_v10  ;;  %v5769_v57 = vcombine.low %v5327_v41, %v5335_v37  ;;  %v1653_v58 = vcombine.high %v1645_v49, %v1645_v49  ;;  %v5144_v48 = vld [vmem:[#allocation2 + $0x71] sm:$0xff] }
  0x42   : > { %v2395_v55 = vpack.c.bf16 %v2086_v45, %v2069_v47  ;;  %12750 = vmatprep.mubr.msk.bf16.mxu0 %vm13652_vm0, %v13651_v2  ;;  %v5767_v59 = vrot.slane %v5753_v51, %v13795_v10  ;;  %v5770_v60 = vcombine.low %v5334_v21, %v5336_v50  ;;  %v2088_v61 = vcombine.low %v1652_v52, %v5327_v41 }
  0x43   : > { %v2104_v62 = vcombine.low %v5335_v37, %v5334_v21  ;;  %v5777_v63 = vrot.slane %v5769_v57, %v13795_v10  ;;  %v2087_v0 = vcombine.low %v1645_v49, %v1653_v58  ;;  %v2105_v1 = vcombine.low %v5336_v50, %v1678_v53 }
  0x44   : > { %12535 = vmatmul.mubr.msk.bf16.gmra.mrb[12].mxu1 %vm396_vm1, %v2395_v55  ;;  %v5337_v5 = vcombine.high %v5141_v54, %v5141_v54  ;;  %v5768_v6 = vcombine.low %v5760_v56, %v5767_v59  ;;  %v5784_v8 = vrot.slane %v5770_v60, %v13795_v10  ;;  %v2102_v11 = vrot.slane %v2088_v61, %v13795_v10 }
  0x45   : > { %12538 = vmatprep.mubr.msk.bf16.mxu1 %vm13652_vm0, %v13651_v2  ;;  %v2112_v12 = vrot.slane %v2104_v62, %v13795_v10  ;;  %v2095_v13 = vrot.slane %v2087_v0, %v13795_v10  ;;  %v2119_v14 = vrot.slane %v2105_v1, %v13795_v10  ;;  %v5344_v15 = vrot.slane %v5141_v54, %v13795_v10 }
  0x46   : > { %v5351_v16 = vrot.slane %v5337_v5, %v13795_v10  ;;  %v5785_v17 = vcombine.low %v5777_v63, %v5784_v8  ;;  %v5353_v18 = vcombine.high %v5142_v3, %v5142_v3  ;;  %v5360_v19 = vrot.slane %v5142_v3, %v13795_v10 }
  0x47   : > { %v5377_v23 = vrot.slane %v5143_v4, %v13795_v10  ;;  %v2103_v24 = vcombine.low %v2095_v13, %v2102_v11  ;;  %v2120_v25 = vcombine.low %v2112_v12, %v2119_v14  ;;  %v5352_v26 = vcombine.high %v5344_v15, %v5344_v15 }
  0x48   : > { %v1671_v28 = vcombine.high %v1444_v42, %v1444_v42  ;;  %v6094_v30 = vpack.c.bf16 %v5785_v17, %v5768_v6  ;;  %v5367_v20 = vrot.slane %v5353_v18, %v13795_v10  ;;  %v5368_v31 = vcombine.high %v5360_v19, %v5360_v19 }
  0x49   : > { %v5787_v32 = vcombine.low %v5351_v16, %v5360_v19  ;;  %v2396_v33 = vpack.c.bf16 %v2120_v25, %v2103_v24  ;;  %v5786_v34 = vcombine.low %v5344_v15, %v5352_v26  ;;  %v1686_v36 = vcombine.high %v1678_v53, %v1678_v53  ;;  %v285_v53 = vld [vmem:[%s13793_s10 + $0x78] sm:$0x3f] }
  0x4a   : > { %v1685_v35 = vrot.slane %v1671_v28, %v13795_v10  ;;  %12751 = vmatmul.mubr.msk.bf16.gmra.mrb[12].mxu0 %vm396_vm1, %v6094_v30  ;;  %v5369_v38 = vcombine.high %v5367_v20, %v5367_v20  ;;  %v5803_v40 = vcombine.low %v5368_v31, %v5367_v20  ;;  %v1711_v41 = vrot.slane %v1446_v27, %v13795_v10 }
  0x4b   : > { %v5801_v39 = vrot.slane %v5787_v32, %v13795_v10  ;;  %12754 = vmatprep.mubr.msk.bf16.mxu0 %vm13652_vm0, %v13651_v2  ;;  %v5794_v42 = vrot.slane %v5786_v34, %v13795_v10  ;;  %v2122_v44 = vcombine.low %v5360_v19, %v5368_v31  ;;  %v381_v45 = vmax.f32 %v13869_v29, 0.0  ;;  %v6313_v34 = vld [vmem:[#allocation2 + $0x12] sm:$0xff] }
  0x4c   : > { %12539 = vmatmul.mubr.msk.bf16.gmra.mrb[16].mxu1 %vm396_vm1, %v2396_v33  ;;  %v2121_v43 = vcombine.low %v1686_v36, %v1685_v35  ;;  %v5804_v46 = vcombine.low %v5369_v38, %v5377_v23  ;;  %v5811_v21 = vrot.slane %v5803_v40, %v13795_v10  ;;  %v1719_v47 = vcombine.high %v1711_v41, %v1711_v41  ;;  %v286_v33 = vld [vmem:[%s13793_s10 + $0x80] sm:$0xff]  ;;  %v6314_v40 = vld [vmem:[#allocation2 + $0x1a] sm:$0x3f] }
  0x4d   : > { %12542 = vmatprep.mubr.msk.bf16.mxu1 %vm13652_vm0, %v13651_v2  ;;  %v2138_v37 = vcombine.low %v5367_v20, %v5369_v38  ;;  %v5802_v49 = vcombine.low %v5794_v42, %v5801_v39  ;;  %v2136_v51 = vrot.slane %v2122_v44, %v13795_v10  ;;  %444 = vst.msk [vmem:[#allocation2 + $0x79] sm:$0x3f] %vm431_vm2, %v381_v45 }
  0x4e   : > { %v2129_v50 = vrot.slane %v2121_v43, %v13795_v10  ;;  %v5370_v52 = vcombine.high %v5143_v4, %v5143_v4  ;;  %v5818_v29 = vrot.slane %v5804_v46, %v13795_v10  ;;  %v2139_v54 = vcombine.low %v1711_v41, %v1719_v47 }
  0x4f   : > { %v2146_v55 = vrot.slane %v2138_v37, %v13795_v10  ;;  %v5385_v56 = vcombine.high %v5377_v23, %v5377_v23  ;;  %v5386_v59 = vcombine.high %v5144_v48, %v5144_v48  ;;  %v5393_v60 = vrot.slane %v5144_v48, %v13795_v10 }
  0x50   : > { %v2137_v57 = vcombine.low %v2129_v50, %v2136_v51  ;;  %v5384_v58 = vrot.slane %v5370_v52, %v13795_v10  ;;  %v5819_v61 = vcombine.low %v5811_v21, %v5818_v29  ;;  %v2153_v62 = vrot.slane %v2139_v54, %v13795_v10  ;;  %v14017_v21 = vld [vmem:[#allocation2 + $0x22] sm:$0xff] }
  0x51   : > { %v1704_v63 = vcombine.high %v1446_v27, %v1446_v27  ;;  %v320_v0 = vmul.f32 %v13779_v7, %v285_v53  ;;  %v5400_v1 = vrot.slane %v5386_v59, %v13795_v10  ;;  %v5401_v3 = vcombine.high %v5393_v60, %v5393_v60 }
  0x52   : > { %v5820_v4 = vcombine.low %v5385_v56, %v5384_v58  ;;  %v354_v5 = vadd.f32 %v13785_v9, %v13864_v22  ;;  %v6095_v6 = vpack.c.bf16 %v5819_v61, %v5802_v49  ;;  %v2154_v8 = vcombine.low %v2146_v55, %v2153_v62 }
  0x53   : > { %v1718_v11 = vrot.slane %v1704_v63, %v13795_v10  ;;  %v355_v12 = vadd.f32 %v13785_v9, %v320_v0  ;;  %v5402_v13 = vcombine.high %v5400_v1, %v5400_v1  ;;  %v5821_v14 = vcombine.low %v5393_v60, %v5401_v3 }
  0x54   : > { %v5828_v15 = vrot.slane %v5820_v4, %v13795_v10  ;;  %v2156_v16 = vcombine.low %v5401_v3, %v5400_v1  ;;  %12755 = vmatmul.mubr.msk.bf16.gmra.mrb[16].mxu0 %vm396_vm1, %v6095_v6  ;;  %v2397_v17 = vpack.c.bf16 %v2154_v8, %v2137_v57  ;;  %v5145_v18 = vld [vmem:[#allocation2 + $0x79] sm:$0x3f]  ;;  %v382_v24 = vmax.f32 %v354_v5, 0.0 }
  0x55   : > { %v1448_v19 = vld [vmem:[#allocation2 + $0x79] sm:$0x3f]  ;;  %v2155_v23 = vcombine.low %v1718_v11, %v5393_v60  ;;  %v383_v22 = vmax.f32 %v355_v12, 0.0  ;;  %12758 = vmatprep.mubr.msk.bf16.mxu0 %vm13652_vm0, %v13651_v2  ;;  %v5410_v25 = vrot.slane %v5145_v18, %v13795_v10  ;;  %v5835_v26 = vrot.slane %v5821_v14, %v13795_v10 }
  0x56   : > { %v5837_v27 = vcombine.low %v5400_v1, %v5402_v13  ;;  %v1737_v28 = vcombine.high %v1448_v19, %v1448_v19  ;;  %12543 = vmatmul.mubr.msk.bf16.gmra.mrb[20].mxu1 %vm396_vm1, %v2397_v17  ;;  %v1744_v30 = vrot.slane %v1448_v19, %v13795_v10  ;;  %v2170_v31 = vrot.slane %v2156_v16, %v13795_v10 }
  0x57   : > { %v2163_v20 = vrot.slane %v2155_v23, %v13795_v10  ;;  %445 = vst.msk [vmem:[#allocation2 + $0x81] sm:$0xff] %vm396_vm1, %v382_v24  ;;  %v5403_v32 = vcombine.high %v5145_v18, %v5145_v18  ;;  %v5418_v35 = vcombine.high %v5410_v25, %v5410_v25  ;;  %v5836_v36 = vcombine.low %v5828_v15, %v5835_v26 }
  0x58   : > { %446 = vst.msk [vmem:[#allocation2 + $0x89] sm:$0x3f] %vm431_vm2, %v383_v22  ;;  %v5845_v38 = vrot.slane %v5837_v27, %v13795_v10  ;;  %12546 = vmatprep.mubr.msk.bf16.mxu1 %vm13652_vm0, %v13651_v2  ;;  %v1751_v39 = vrot.slane %v1737_v28, %v13795_v10  ;;  %v1752_v41 = vcombine.high %v1744_v30, %v1744_v30 }
  0x59   : > { %v2171_v42 = vcombine.low %v2163_v20, %v2170_v31  ;;  %v2172_v43 = vcombine.low %v5402_v13, %v1744_v30  ;;  %v5417_v44 = vrot.slane %v5403_v32, %v13795_v10  ;;  %v5838_v45 = vcombine.low %v5410_v25, %v5418_v35  ;;  %v287_v35 = vld [vmem:[%s13793_s10 + $0x88] sm:$0x3f] }
  0x5a   : > { %v321_v46 = vmul.f32 %v13779_v7, %v286_v33  ;;  %v6369_v47 = vcombine.high %v6313_v34, %v6313_v34  ;;  %v6376_v37 = vrot.slane %v6313_v34, %v13795_v10  ;;  %v2173_v48 = vcombine.low %v1752_v41, %v1751_v39  ;;  %v288_v41 = vld [vmem:[%s13793_s10 + $0x90] sm:$0xff] }
  0x5b   : > { %v2180_v49 = vrot.slane %v2172_v43, %v13795_v10  ;;  %v6386_v50 = vcombine.high %v6314_v40, %v6314_v40  ;;  %v6393_v51 = vrot.slane %v6314_v40, %v13795_v10  ;;  %v5852_v52 = vrot.slane %v5838_v45, %v13795_v10 }
  0x5c   : > { %v356_v53 = vadd.f32 %v13785_v9, %v321_v46  ;;  %v6383_v29 = vrot.slane %v6369_v47, %v13795_v10  ;;  %v6384_v54 = vcombine.high %v6376_v37, %v6376_v37  ;;  %v2187_v55 = vrot.slane %v2173_v48, %v13795_v10 }
  0x5d   : > { %v14027_v56 = vrot.slane %v6386_v50, %v13795_v10  ;;  %v6401_v57 = vcombine.high %v6393_v51, %v6393_v51  ;;  %v14031_v58 = vrot.slane %v14017_v21, %v13795_v10  ;;  %v5853_v59 = vcombine.low %v5845_v38, %v5852_v52 }
  0x5e   : > { %v5146_v60 = vld [vmem:[#allocation2 + $0x81] sm:$0xff]  ;;  %v384_v62 = vmax.f32 %v356_v53, 0.0  ;;  %v6385_v0 = vcombine.high %v6383_v29, %v6383_v29  ;;  %v6831_v1 = vcombine.low %v6376_v37, %v6384_v54  ;;  %v2188_v3 = vcombine.low %v2180_v49, %v2187_v55 }
  0x5f   : > { %v5147_v61 = vld [vmem:[#allocation2 + $0x89] sm:$0x3f]  ;;  %v5419_v4 = vcombine.high %v5146_v60, %v5146_v60  ;;  %v5426_v5 = vrot.slane %v5146_v60, %v13795_v10  ;;  %v6096_v8 = vpack.c.bf16 %v5853_v59, %v5836_v36  ;;  %v6848_v46 = vcombine.low %v6393_v51, %v6401_v57 }
  0x60   : > { %v1450_v63 = vld [vmem:[#allocation2 + $0x89] sm:$0x3f]  ;;  %v5436_v6 = vcombine.high %v5147_v61, %v5147_v61  ;;  %v5443_v11 = vrot.slane %v5147_v61, %v13795_v10  ;;  %447 = vst.msk [vmem:[#allocation2 + $0x91] sm:$0xff] %vm396_vm1, %v384_v62  ;;  %v2398_v14 = vpack.c.bf16 %v2188_v3, %v2171_v42  ;;  %v6832_v20 = vcombine.low %v6383_v29, %v6385_v0 }
  0x61   : > { %v1770_v12 = vcombine.high %v1450_v63, %v1450_v63  ;;  %v1777_v13 = vrot.slane %v1450_v63, %v13795_v10  ;;  %v5433_v15 = vrot.slane %v5419_v4, %v13795_v10  ;;  %v5434_v16 = vcombine.high %v5426_v5, %v5426_v5  ;;  %12759 = vmatmul.mubr.msk.bf16.gmra.mrb[20].mxu0 %vm396_vm1, %v6096_v8  ;;  %v6316_v59 = vld [vmem:[#allocation2 + $0x2a] sm:$0x3f]  ;;  %v6317_v4 = vld [vmem:[#allocation2 + $0x32] sm:$0xff] }
  0x62   : > { %v5450_v17 = vrot.slane %v5436_v6, %v13795_v10  ;;  %v5451_v18 = vcombine.high %v5443_v11, %v5443_v11  ;;  %v5854_v19 = vcombine.low %v5417_v44, %v5426_v5  ;;  %12547 = vmatmul.mubr.msk.bf16.gmra.mrb[24].mxu1 %vm396_vm1, %v2398_v14  ;;  %12762 = vmatprep.mubr.msk.bf16.mxu0 %vm13652_vm0, %v13651_v2 }
  0x63   : > { %v1784_v23 = vrot.slane %v1770_v12, %v13795_v10  ;;  %v1785_v24 = vcombine.high %v1777_v13, %v1777_v13  ;;  %v5435_v22 = vcombine.high %v5433_v15, %v5433_v15  ;;  %v5855_v25 = vcombine.low %v5434_v16, %v5433_v15  ;;  %12550 = vmatprep.mubr.msk.bf16.mxu1 %vm13652_vm0, %v13651_v2  ;;  %v289_v12 = vld [vmem:[%s13793_s10 + $0x98] sm:$0x3f] }
  0x64   : > { %v2189_v26 = vcombine.low %v5426_v5, %v5434_v16  ;;  %v5862_v27 = vrot.slane %v5854_v19, %v13795_v10  ;;  %v5872_v28 = vcombine.low %v5451_v18, %v5450_v17  ;;  %v6839_v39 = vrot.slane %v6831_v1, %v13795_v10  ;;  %v290_v16 = vld [vmem:[%s13793_s10 + $0xa0] sm:$0xff] }
  0x65   : > { %v2206_v30 = vcombine.low %v1777_v13, %v1785_v24  ;;  %v5869_v31 = vrot.slane %v5855_v25, %v13795_v10  ;;  %v5871_v32 = vcombine.low %v5435_v22, %v5443_v11  ;;  %v2190_v33 = vcombine.low %v5433_v15, %v5435_v22 }
  0x66   : > { %v2197_v34 = vrot.slane %v2189_v26, %v13795_v10  ;;  %v5886_v36 = vrot.slane %v5872_v28, %v13795_v10  ;;  %v6846_v40 = vrot.slane %v6832_v20, %v13795_v10  ;;  %v6849_v48 = vcombine.low %v14027_v56, %v14031_v58 }
  0x67   : > { %v2214_v38 = vrot.slane %v2206_v30, %v13795_v10  ;;  %v5870_v42 = vcombine.low %v5862_v27, %v5869_v31  ;;  %v5879_v43 = vrot.slane %v5871_v32, %v13795_v10  ;;  %v1451_v44 = vld [vmem:[#allocation2 + $0x91] sm:$0xff]  ;;  %v2204_v45 = vrot.slane %v2190_v33, %v13795_v10 }
  0x68   : > { %v1793_v47 = vrot.slane %v1451_v44, %v13795_v10  ;;  %v14058_v37 = vcombine.low %v6839_v39, %v6846_v40  ;;  %v322_v49 = vmul.f32 %v13779_v7, %v287_v35  ;;  %v6856_v53 = vrot.slane %v6848_v46, %v13795_v10  ;;  %v13435_v31 = vld [vmem:[%s15766_s3 + $0x30] sm:$0xff]  }
  0x69   : > { %v5887_v50 = vcombine.low %v5879_v43, %v5886_v36  ;;  %v2205_v52 = vcombine.low %v2197_v34, %v2204_v45  ;;  %v323_v29 = vmul.f32 %v13779_v7, %v288_v41  ;;  %v6863_v55 = vrot.slane %v6849_v48, %v13795_v10  ;;  %v6319_v48 = vld [vmem:[#allocation2 + $0x42] sm:$0xff] }
  0x6a   : > { %v2207_v54 = vcombine.low %v1784_v23, %v1793_v47  ;;  %v357_v51 = vadd.f32 %v13785_v9, %v322_v49  ;;  %v1786_v57 = vcombine.high %v1451_v44, %v1451_v44  ;;  %v1801_v56 = vcombine.high %v1793_v47, %v1793_v47  ;;  %v6318_v23 = vld [vmem:[#allocation2 + $0x3a] sm:$0x3f] }
  0x6b   : > { %v6097_v60 = vpack.c.bf16 %v5887_v50, %v5870_v42  ;;  %v358_v61 = vadd.f32 %v13785_v9, %v323_v29  ;;  %v6402_v62 = vcombine.high %v14017_v21, %v14017_v21  ;;  %v6864_v0 = vcombine.low %v6856_v53, %v6863_v55 }
  0x6c   : > { %v2221_v63 = vrot.slane %v2207_v54, %v13795_v10  ;;  %v385_v1 = vmax.f32 %v357_v51, 0.0  ;;  %v14072_v3 = vrot.slane %v1786_v57, %v13795_v10  ;;  %v6417_v8 = vcombine.high %v14031_v58, %v14031_v58 }
  0x6d   : > { %12763 = vmatmul.mubr.msk.bf16.gmra.mrb[24].mxu0 %vm396_vm1, %v6097_v60  ;;  %v386_v5 = vmax.f32 %v358_v61, 0.0  ;;  %v6416_v6 = vrot.slane %v6402_v62, %v13795_v10  ;;  %v6419_v11 = vcombine.high %v6316_v59, %v6316_v59  ;;  %v7272_v13 = vpack.c.bf16 %v6864_v0, %v14058_v37 }
  0x6e   : > { %v2222_v21 = vcombine.low %v2214_v38, %v2221_v63  ;;  %12792 = vmatprep.mubr.msk.bf16.mxu0 %vm13652_vm0, %v13651_v2  ;;  %448 = vst.msk [vmem:[#allocation2 + $0x99] sm:$0x3f] %vm431_vm2, %v385_v1  ;;  %v1802_v14 = vcombine.high %v14072_v3, %v14072_v3  ;;  %v14086_v15 = vcombine.low %v1801_v56, %v14072_v3 }
  0x6f   : > { %449 = vst.msk [vmem:[#allocation2 + $0xa1] sm:$0xff] %vm396_vm1, %v386_v5  ;;  %v6418_v58 = vcombine.high %v6416_v6, %v6416_v6  ;;  %v6426_v17 = vrot.slane %v6316_v59, %v13795_v10  ;;  %v6433_v18 = vrot.slane %v6419_v11, %v13795_v10  ;;  %v6442_v19 = vrot.slane %v6317_v4, %v13795_v10 }
  0x70   : > { %v2399_v24 = vpack.c.bf16 %v2222_v21, %v2205_v52  ;;  %v2231_v22 = vrot.slane %v14086_v15, %v13795_v10  ;;  %v6865_v25 = vcombine.low %v6417_v8, %v6416_v6  ;;  %v324_v26 = vmul.f32 %v13779_v7, %v289_v12  ;;  %v291_v21 = vld [vmem:[%s13793_s10 + $0xa8] sm:$0x3f] }
  0x71   : > { %v6434_v27 = vcombine.high %v6426_v17, %v6426_v17  ;;  %v6450_v28 = vcombine.high %v6442_v19, %v6442_v19  ;;  %v6866_v30 = vcombine.low %v6418_v58, %v6426_v17  ;;  %v325_v20 = vmul.f32 %v13779_v7, %v290_v16  ;;  %v14109_v7 = vld [vmem:[%s15765_s2] ss:$0 sm:$0xff] }
  0x72   : > { %12551 = vmatmul.mubr.msk.bf16.gmra.mrb[28].mxu1 %vm396_vm1, %v2399_v24  ;;  %v6873_v32 = vrot.slane %v6865_v25, %v13795_v10  ;;  %v359_v33 = vadd.f32 %v13785_v9, %v324_v26  ;;  %v6435_v34 = vcombine.high %v6317_v4, %v6317_v4  ;;  %v6452_v35 = vcombine.high %v6318_v23, %v6318_v23 }
  0x73   : > { %12554 = vmatprep.mubr.msk.bf16.mxu1 %vm13652_vm0, %v13651_v2  ;;  %v6880_v36 = vrot.slane %v6866_v30, %v13795_v10  ;;  %v6882_v38 = vcombine.low %v6434_v27, %v6433_v18  ;;  %v6883_v39 = vcombine.low %v6442_v19, %v6450_v28  ;;  %v360_v40 = vadd.f32 %v14109_v7, %v325_v20  ;;  %v292_v27 = vld [vmem:[%s13793_s10 + $0xb0] sm:$0xff]  ;;  %v14147_v28 = vld [vmem:[%s15764_s1] ss:$0 sm:$0xff] }
  0x74   : > { %v387_v41 = vmax.f32 %v359_v33, 0.0  ;;  %v6449_v42 = vrot.slane %v6435_v34, %v13795_v10  ;;  %v6459_v9 = vrot.slane %v6318_v23, %v13795_v10  ;;  %v6466_v43 = vrot.slane %v6452_v35, %v13795_v10 }
  0x75   : > { %12793 = vmatmul.mubr.msk.bf16.vlgmr.msra.gmra.mrb[0].mxu0 %vm396_vm1, %v7272_v13  ;;  %v1452_v44 = vld [vmem:[#allocation2 + $0x99] sm:$0x3f]  ;;  %v6881_v45 = vcombine.low %v6873_v32, %v6880_v36  ;;  %v6890_v46 = vrot.slane %v6882_v38, %v13795_v10  ;;  %v6897_v47 = vrot.slane %v6883_v39, %v13795_v10  ;;  %v388_v37 = vmax.f32 %v360_v40, 0.0 }
  0x76   : > { %12845 = vmatpush3.bf16.msra.mxu0 %v13435_v31  ;;  %v1453_v49 = vld [vmem:[#allocation2 + $0xa1] sm:$0xff]  ;;  %v1803_v50 = vcombine.high %v1452_v44, %v1452_v44  ;;  %v1810_v52 = vrot.slane %v1452_v44, %v13795_v10  ;;  %12796 = vmatprep.mubr.msk.bf16.mxu0 %vm13652_vm0, %v13651_v2  ;;  %450 = vst.msk [vmem:[#allocation2 + $0xa9] sm:$0x3f] %vm431_vm2, %v387_v41 }
  0x77   : > { %v6451_v53 = vcombine.high %v6449_v42, %v6449_v42  ;;  %v1826_v29 = vrot.slane %v1453_v49, %v13795_v10  ;;  %v6898_v54 = vcombine.low %v6890_v46, %v6897_v47  ;;  %451 = vst.msk [vmem:[#allocation2 + $0xb1] sm:$0xff] %vm396_vm1, %v388_v37  ;;  %v1819_v55 = vcombine.high %v1453_v49, %v1453_v49  ;;  %v6320_v46 = vld [vmem:[#allocation2 + $0x4a] sm:$0x3f]  ;;  %v6321_v49 = vld [vmem:[#allocation2 + $0x52] sm:$0xff] }
  0x78   : > { %v6467_v51 = vcombine.high %v6459_v9, %v6459_v9  ;;  %12898 = vmatprep.subr.bf16.mxu0 %v13651_v2  ;;  %v1817_v57 = vrot.slane %v1803_v50, %v13795_v10  ;;  %v1818_v59 = vcombine.high %v1810_v52, %v1810_v52  ;;  %v2224_v60 = vcombine.low %v1802_v14, %v1810_v52  ;;  %v293_v52 = vld [vmem:[%s13793_s10 + $0xb8] sm:$0x3f] }
  0x79   : > { %v6468_v61 = vcombine.high %v6319_v48, %v6319_v48  ;;  %v1834_v56 = vcombine.high %v1826_v29, %v1826_v29  ;;  %v7273_v62 = vpack.c.bf16 %v6898_v54, %v6881_v45  ;;  %v1833_v63 = vrot.slane %v1819_v55, %v13795_v10 }
  0x7a   : > { %v6475_v0 = vrot.slane %v6319_v48, %v13795_v10  ;;  %v2238_v1 = vrot.slane %v2224_v60, %v13795_v10  ;;  %v2240_v3 = vcombine.low %v1818_v59, %v1817_v57  ;;  %v6899_v5 = vcombine.low %v6449_v42, %v6451_v53 }
  0x7b   : > { %v14130_v4 = vrot.slane %v6468_v61, %v13795_v10  ;;  %v2241_v6 = vcombine.low %v1826_v29, %v1834_v56  ;;  %v1835_v8 = vcombine.high %v1833_v63, %v1833_v63  ;;  %v6900_v12 = vcombine.low %v6459_v9, %v6467_v51  ;;  %v294_v61 = vld [vmem:[%s13793_s10 + $0xc0] sm:$0xff]  ;;  %v295_v56 = vld [vmem:[%s13793_s10 + $0xc8] sm:$0x3f] }
  0x7c   : > { %v6483_v11 = vcombine.high %v6475_v0, %v6475_v0  ;;  %v2239_v13 = vcombine.low %v2231_v22, %v2238_v1  ;;  %v2248_v14 = vrot.slane %v2240_v3, %v13795_v10  ;;  %v6907_v15 = vrot.slane %v6899_v5, %v13795_v10 }
  0x7d   : > { %v6916_v16 = vcombine.low %v6466_v43, %v6475_v0  ;;  %v2255_v58 = vrot.slane %v2241_v6, %v13795_v10  ;;  %12797 = vmatmul.mubr.msk.bf16.gmra.mrb[4].mxu0 %vm396_vm1, %v7273_v62  ;;  %v1454_v17 = vld [vmem:[#allocation2 + $0xa9] sm:$0x3f]  ;;  %v2257_v18 = vcombine.low %v1833_v63, %v1835_v8  ;;  %v6914_v19 = vrot.slane %v6900_v12, %v13795_v10 }
  0x7e   : > { %v6917_v23 = vcombine.low %v6483_v11, %v14130_v4  ;;  %v1455_v24 = vld [vmem:[#allocation2 + $0xb1] sm:$0xff]  ;;  %v1836_v25 = vcombine.high %v1454_v17, %v1454_v17  ;;  %v1843_v26 = vrot.slane %v1454_v17, %v13795_v10  ;;  %12800 = vmatprep.mubr.msk.bf16.mxu0 %vm13652_vm0, %v13651_v2  ;;  %v326_v30 = vmul.f32 %v14147_v28, %v291_v21 }
  0x7f   : > { %v6924_v22 = vrot.slane %v6916_v16, %v13795_v10  ;;  %v2256_v20 = vcombine.low %v2248_v14, %v2255_v58  ;;  %v1852_v31 = vcombine.high %v1455_v24, %v1455_v24  ;;  %v1859_v32 = vrot.slane %v1455_v24, %v13795_v10  ;;  %v6323_v24 = vld [vmem:[#allocation2 + $0x62] sm:$0xff] }
  0x80   : > { %v2265_v33 = vrot.slane %v2257_v18, %v13795_v10  ;;  %v1850_v34 = vrot.slane %v1836_v25, %v13795_v10  ;;  %v1851_v35 = vcombine.high %v1843_v26, %v1843_v26  ;;  %v6915_v36 = vcombine.low %v6907_v15, %v6914_v19 }
  0x81   : > { %v6931_v38 = vrot.slane %v6917_v23, %v13795_v10  ;;  %v2400_v39 = vpack.c.bf16 %v2256_v20, %v2239_v13  ;;  %v14155_v40 = vrot.slane %v1852_v31, %v13795_v10  ;;  %v1867_v41 = vcombine.high %v1859_v32, %v1859_v32  ;;  %v6322_v13 = vld [vmem:[#allocation2 + $0x5a] sm:$0x3f] }
  0x82   : > { %v327_v42 = vmul.f32 %v14147_v28, %v292_v27  ;;  %v2258_v9 = vcombine.low %v1843_v26, %v1851_v35  ;;  %v2274_v43 = vcombine.low %v1850_v34, %v1859_v32  ;;  %v361_v45 = vadd.f32 %v14109_v7, %v326_v30 }
  0x83   : > { %v6932_v44 = vcombine.low %v6924_v22, %v6931_v38  ;;  %12555 = vmatmul.mubr.msk.bf16.gmra.mrb[32].mxu1 %vm396_vm1, %v2400_v39  ;;  %v2275_v47 = vcombine.low %v1867_v41, %v14155_v40  ;;  %v1868_v48 = vcombine.high %v14155_v40, %v14155_v40  ;;  %v6484_v50 = vcombine.high %v14130_v4, %v14130_v4 }
  0x84   : > { %v362_v37 = vadd.f32 %v14109_v7, %v327_v42  ;;  %12558 = vmatprep.mubr.msk.bf16.mxu1 %vm13652_vm0, %v13651_v2  ;;  %v2272_v53 = vrot.slane %v2258_v9, %v13795_v10  ;;  %v2282_v29 = vrot.slane %v2274_v43, %v13795_v10  ;;  %v389_v55 = vmax.f32 %v361_v45, 0.0 }
  0x85   : > { %v7274_v54 = vpack.c.bf16 %v6932_v44, %v6915_v36  ;;  %v2289_v51 = vrot.slane %v2275_v47, %v13795_v10  ;;  %v6485_v59 = vcombine.high %v6320_v46, %v6320_v46  ;;  %v6492_v60 = vrot.slane %v6320_v46, %v13795_v10 }
  0x86   : > { %v390_v57 = vmax.f32 %v362_v37, 0.0  ;;  %v2273_v62 = vcombine.low %v2265_v33, %v2272_v53  ;;  %452 = vst.msk [vmem:[#allocation2 + $0xb9] sm:$0x3f] %vm431_vm2, %v389_v55  ;;  %v6501_v63 = vcombine.high %v6321_v49, %v6321_v49  ;;  %v6508_v0 = vrot.slane %v6321_v49, %v13795_v10  ;;  %v14196_v33 = vld [vmem:[#allocation2 + $0x6a] sm:$0x3f] }
  0x87   : > { %12801 = vmatmul.mubr.msk.bf16.gmra.mrb[8].mxu0 %vm396_vm1, %v7274_v54  ;;  %v328_v1 = vmul.f32 %v14147_v28, %v293_v52  ;;  %v2290_v3 = vcombine.low %v2282_v29, %v2289_v51  ;;  %v6499_v4 = vrot.slane %v6485_v59, %v13795_v10  ;;  %v6500_v5 = vcombine.high %v6492_v60, %v6492_v60 }
  0x88   : > { %453 = vst.msk [vmem:[#allocation2 + $0xc1] sm:$0xff] %vm396_vm1, %v390_v57  ;;  %12804 = vmatprep.mubr.msk.bf16.mxu0 %vm13652_vm0, %v13651_v2  ;;  %v6933_v6 = vcombine.low %v6484_v50, %v6492_v60  ;;  %v6515_v8 = vrot.slane %v6501_v63, %v13795_v10  ;;  %v6516_v11 = vcombine.high %v6508_v0, %v6508_v0 }
  0x89   : > { %v329_v12 = vmul.f32 %v14147_v28, %v294_v61  ;;  %v330_v21 = vmul.f32 %v14147_v28, %v295_v56  ;;  %v2401_v14 = vpack.c.bf16 %v2290_v3, %v2273_v62  ;;  %v6934_v15 = vcombine.low %v6500_v5, %v6499_v4 }
  0x8a   : > { %v6941_v16 = vrot.slane %v6933_v6, %v13795_v10  ;;  %v363_v58 = vadd.f32 %v14109_v7, %v328_v1  ;;  %v6517_v17 = vcombine.high %v6515_v8, %v6515_v8  ;;  %v6950_v18 = vcombine.low %v6508_v0, %v6516_v11 }
  0x8b   : > { %v364_v19 = vadd.f32 %v14109_v7, %v329_v12  ;;  %v365_v23 = vadd.f32 %v14109_v7, %v330_v21  ;;  %12559 = vmatmul.mubr.msk.bf16.gmra.mrb[36].mxu1 %vm396_vm1, %v2401_v14  ;;  %v6948_v25 = vrot.slane %v6934_v15, %v13795_v10  ;;  %v6518_v22 = vcombine.high %v6322_v13, %v6322_v13 }
  0x8c   : > { %v391_v26 = vmax.f32 %v363_v58, 0.0  ;;  %v6525_v27 = vrot.slane %v6322_v13, %v13795_v10  ;;  %12562 = vmatprep.mubr.msk.bf16.mxu1 %vm13652_vm0, %v13651_v2  ;;  %v6951_v30 = vcombine.low %v6515_v8, %v6517_v17  ;;  %v6958_v20 = vrot.slane %v6950_v18, %v13795_v10 }
  0x8d   : > { %v392_v31 = vmax.f32 %v364_v19, 0.0  ;;  %v393_v32 = vmax.f32 %v365_v23, 0.0  ;;  %v1456_v7 = vld [vmem:[#allocation2 + $0xb9] sm:$0x3f]  ;;  %v6949_v34 = vcombine.low %v6941_v16, %v6948_v25  ;;  %v6532_v35 = vrot.slane %v6518_v22, %v13795_v10 }
  0x8e   : > { %454 = vst.msk [vmem:[#allocation2 + $0xc9] sm:$0x3f] %vm431_vm2, %v391_v26  ;;  %v6533_v36 = vcombine.high %v6525_v27, %v6525_v27  ;;  %v6534_v38 = vcombine.high %v6323_v24, %v6323_v24  ;;  %v1869_v41 = vcombine.high %v1456_v7, %v1456_v7  ;;  %v1876_v42 = vrot.slane %v1456_v7, %v13795_v10  ;;  %v6325_v7 = vld [vmem:[#allocation2 + $0x72] sm:$0xff] }
  0x8f   : > { %v1457_v39 = vld [vmem:[#allocation2 + $0xc1] sm:$0xff]  ;;  %v6965_v9 = vrot.slane %v6951_v30, %v13795_v10  ;;  %455 = vst.msk [vmem:[#allocation2 + $0xd1] sm:$0xff] %vm396_vm1, %v392_v31  ;;  %v6541_v43 = vrot.slane %v6323_v24, %v13795_v10  ;;  %v14209_v47 = vrot.slane %v14196_v33, %v13795_v10  ;;  %v6551_v3 = vcombine.high %v14196_v33, %v14196_v33 }
  0x90   : > { %456 = vst.msk [vmem:[#allocation2 + $0xd9] sm:$0x3f] %vm431_vm2, %v393_v32  ;;  %v1885_v44 = vcombine.high %v1457_v39, %v1457_v39  ;;  %v1892_v45 = vrot.slane %v1457_v39, %v13795_v10  ;;  %v6548_v46 = vrot.slane %v6534_v38, %v13795_v10  ;;  %v1883_v37 = vrot.slane %v1869_v41, %v13795_v10 }
  0x91   : > { %v1884_v49 = vcombine.high %v1876_v42, %v1876_v42  ;;  %v2291_v50 = vcombine.low %v1868_v48, %v1876_v42  ;;  %v6966_v52 = vcombine.low %v6958_v20, %v6965_v9  ;;  %v6549_v54 = vcombine.high %v6541_v43, %v6541_v43 }
  0x92   : > { %v1899_v53 = vrot.slane %v1885_v44, %v13795_v10  ;;  %v1900_v29 = vcombine.high %v1892_v45, %v1892_v45  ;;  %v6550_v55 = vcombine.high %v6548_v46, %v6548_v46  ;;  %v6967_v60 = vcombine.low %v6525_v27, %v6533_v36  ;;  %v459_v44 = vld [vmem:[#allocation2] sm:$0xff] }
  0x93   : > { %v2292_v51 = vcombine.low %v1884_v49, %v1883_v37  ;;  %v2299_v57 = vrot.slane %v2291_v50, %v13795_v10  ;;  %v7275_v59 = vpack.c.bf16 %v6966_v52, %v6949_v34  ;;  %v6968_v62 = vcombine.low %v6532_v35, %v6541_v43  ;;  %v6326_v43 = vld [vmem:[#allocation2 + $0x7a] sm:$0x3f] }
  0x94   : > { %v1901_v61 = vcombine.high %v1899_v53, %v1899_v53  ;;  %v2308_v56 = vcombine.low %v1892_v45, %v1900_v29  ;;  %v6984_v63 = vcombine.low %v6549_v54, %v6548_v46  ;;  %v6975_v48 = vrot.slane %v6967_v60, %v13795_v10  ;;  %v460_v60 = vld [vmem:[#allocation2 + $0x8] sm:$0x3f] }
  0x95   : > { %v2306_v0 = vrot.slane %v2292_v51, %v13795_v10  ;;  %12805 = vmatmul.mubr.msk.bf16.gmra.mrb[12].mxu0 %vm396_vm1, %v7275_v59  ;;  %v1458_v40 = vld [vmem:[#allocation2 + $0xc9] sm:$0x3f]  ;;  %v6985_v1 = vcombine.low %v6550_v55, %v14209_v47  ;;  %v6982_v18 = vrot.slane %v6968_v62, %v13795_v10  ;;  %v6565_v46 = vrot.slane %v6551_v3, %v13795_v10 }
  0x96   : > { %v2309_v4 = vcombine.low %v1899_v53, %v1901_v61  ;;  %v2316_v5 = vrot.slane %v2308_v56, %v13795_v10  ;;  %v1459_v6 = vld [vmem:[#allocation2 + $0xd1] sm:$0xff]  ;;  %v1902_v11 = vcombine.high %v1458_v40, %v1458_v40  ;;  %v1909_v12 = vrot.slane %v1458_v40, %v13795_v10  ;;  %12808 = vmatprep.mubr.msk.bf16.mxu0 %vm13652_vm0, %v13651_v2 }
  0x97   : > { %v1460_v8 = vld [vmem:[#allocation2 + $0xd9] sm:$0x3f]  ;;  %v2307_v21 = vcombine.low %v2299_v57, %v2306_v0  ;;  %v1918_v13 = vcombine.high %v1459_v6, %v1459_v6  ;;  %v1925_v14 = vrot.slane %v1459_v6, %v13795_v10  ;;  %v6992_v24 = vrot.slane %v6984_v63, %v13795_v10  ;;  %v461_v0 = vld [vmem:[#allocation2 + $0x10] sm:$0xff] }
  0x98   : > { %v1942_v15 = vrot.slane %v1460_v8, %v13795_v10  ;;  %v2323_v16 = vrot.slane %v2309_v4, %v13795_v10  ;;  %v1916_v58 = vrot.slane %v1902_v11, %v13795_v10  ;;  %v1917_v17 = vcombine.high %v1909_v12, %v1909_v12 }
  0x99   : > { %v1932_v19 = vrot.slane %v1918_v13, %v13795_v10  ;;  %v1933_v23 = vcombine.high %v1925_v14, %v1925_v14  ;;  %v6999_v25 = vrot.slane %v6985_v1, %v13795_v10  ;;  %v6983_v30 = vcombine.low %v6975_v48, %v6982_v18 }
  0x9a   : > { %v2324_v26 = vcombine.low %v2316_v5, %v2323_v16  ;;  %v2325_v22 = vcombine.low %v1909_v12, %v1917_v17  ;;  %v2326_v27 = vcombine.low %v1916_v58, %v1925_v14  ;;  %v1935_v33 = vcombine.high %v1460_v8, %v1460_v8 }
  0x9b   : > { %v1934_v20 = vcombine.high %v1932_v19, %v1932_v19  ;;  %v2342_v31 = vcombine.low %v1933_v23, %v1932_v19  ;;  %v7000_v32 = vcombine.low %v6992_v24, %v6999_v25  ;;  %v1950_v38 = vcombine.high %v1942_v15, %v1942_v15  ;;  %v6328_v19 = vld [vmem:[#allocation2 + $0x8a] sm:$0x3f] }
  0x9c   : > { %v2402_v34 = vpack.c.bf16 %v2324_v26, %v2307_v21  ;;  %v2333_v35 = vrot.slane %v2325_v22, %v13795_v10  ;;  %v2340_v36 = vrot.slane %v2326_v27, %v13795_v10  ;;  %v1949_v9 = vrot.slane %v1935_v33, %v13795_v10 }
  0x9d   : > { %v2343_v39 = vcombine.low %v1934_v20, %v1942_v15  ;;  %v2350_v41 = vrot.slane %v2342_v31, %v13795_v10  ;;  %v7276_v42 = vpack.c.bf16 %v7000_v32, %v6983_v30  ;;  %v6566_v37 = vcombine.high %v14209_v47, %v14209_v47  ;;  %v6327_v15 = vld [vmem:[#allocation2 + $0x82] sm:$0xff] }
  0x9e   : > { %12563 = vmatmul.mubr.msk.bf16.gmra.mrb[40].mxu1 %vm396_vm1, %v2402_v34  ;;  %v2341_v45 = vcombine.low %v2333_v35, %v2340_v36  ;;  %v6567_v49 = vcombine.high %v6325_v7, %v6325_v7  ;;  %v2359_v52 = vcombine.low %v1950_v38, %v1949_v9  ;;  %v6574_v53 = vrot.slane %v6325_v7, %v13795_v10 }
  0x9f   : > { %12566 = vmatprep.mubr.msk.bf16.mxu1 %vm13652_vm0, %v13651_v2  ;;  %v2357_v50 = vrot.slane %v2343_v39, %v13795_v10  ;;  %12809 = vmatmul.mubr.msk.bf16.gmra.mrb[16].mxu0 %vm396_vm1, %v7276_v42  ;;  %v6591_v54 = vrot.slane %v6326_v43, %v13795_v10  ;;  %v7001_v55 = vcombine.low %v6566_v37, %v6565_v46  ;;  %v462_v39 = vld [vmem:[#allocation2 + $0x18] sm:$0x3f] }
  0xa0   : > { %12812 = vmatprep.mubr.msk.bf16.mxu0 %vm13652_vm0, %v13651_v2  ;;  %v6581_v29 = vrot.slane %v6567_v49, %v13795_v10  ;;  %v515_v47 = vcombine.high %v459_v44, %v459_v44  ;;  %v2366_v57 = vrot.slane %v2359_v52, %v13795_v10  ;;  %v6582_v59 = vcombine.high %v6574_v53, %v6574_v53 }
  0xa1   : > { %v2358_v51 = vcombine.low %v2350_v41, %v2357_v50  ;;  %v522_v61 = vrot.slane %v459_v44, %v13795_v10  ;;  %v6599_v62 = vcombine.high %v6591_v54, %v6591_v54  ;;  %v7009_v63 = vrot.slane %v7001_v55, %v13795_v10 }
  0xa2   : > { %v6583_v56 = vcombine.high %v6581_v29, %v6581_v29  ;;  %v529_v40 = vrot.slane %v515_v47, %v13795_v10  ;;  %v2404_v1 = vpack.c.bf16 %v2366_v57, %v2366_v57  ;;  %v7002_v3 = vcombine.low %v6574_v53, %v6582_v59  ;;  %v463_v53 = vld [vmem:[#allocation2 + $0x20] sm:$0xff]  ;;  %v6329_v57 = vld [vmem:[#allocation2 + $0x92] sm:$0xff] }
  0xa3   : > { %v2403_v48 = vpack.c.bf16 %v2358_v51, %v2341_v45  ;;  %v530_v4 = vcombine.high %v522_v61, %v522_v61  ;;  %v7019_v6 = vcombine.low %v6591_v54, %v6599_v62  ;;  %v532_v11 = vcombine.high %v460_v60, %v460_v60 }
  0xa4   : > { %v7018_v5 = vcombine.low %v6581_v29, %v6583_v56  ;;  %v531_v8 = vcombine.high %v529_v40, %v529_v40  ;;  %v7016_v12 = vrot.slane %v7002_v3, %v13795_v10  ;;  %v539_v21 = vrot.slane %v460_v60, %v13795_v10 }
  0xa5   : > { %v555_v13 = vrot.slane %v461_v0, %v13795_v10  ;;  %v977_v14 = vcombine.low %v522_v61, %v530_v4  ;;  %v7033_v58 = vrot.slane %v7019_v6, %v13795_v10  ;;  %v546_v17 = vrot.slane %v532_v11, %v13795_v10 }
  0xa6   : > { %12567 = vmatmul.mubr.msk.bf16.gmra.mrb[44].mxu1 %vm396_vm1, %v2403_v48  ;;  %v7026_v16 = vrot.slane %v7018_v5, %v13795_v10  ;;  %v978_v18 = vcombine.low %v529_v40, %v531_v8  ;;  %v7017_v23 = vcombine.low %v7009_v63, %v7016_v12  ;;  %v547_v24 = vcombine.high %v539_v21, %v539_v21  ;;  %v6330_v48 = vld [vmem:[#allocation2 + $0x9a] sm:$0x3f] }
  0xa7   : > { %12570 = vmatprep.mubr.msk.bf16.mxu1 %vm13652_vm0, %v13651_v2  ;;  %v985_v25 = vrot.slane %v977_v14, %v13795_v10  ;;  %v6584_v26 = vcombine.high %v6326_v43, %v6326_v43  ;;  %v995_v30 = vcombine.low %v546_v17, %v555_v13  ;;  %v6600_v20 = vcombine.high %v6327_v15, %v6327_v15  ;;  %v6331_v14 = vld [vmem:[#allocation2 + $0xa2] sm:$0xff] }
  0xa8   : > { %v7034_v22 = vcombine.low %v7026_v16, %v7033_v58  ;;  %v992_v27 = vrot.slane %v978_v18, %v13795_v10  ;;  %v994_v31 = vcombine.low %v539_v21, %v547_v24  ;;  %v6607_v33 = vrot.slane %v6327_v15, %v13795_v10 }
  0xa9   : > { %v6598_v32 = vrot.slane %v6584_v26, %v13795_v10  ;;  %v6617_v7 = vcombine.high %v6328_v19, %v6328_v19  ;;  %v1009_v36 = vrot.slane %v995_v30, %v13795_v10  ;;  %v6614_v38 = vrot.slane %v6600_v20, %v13795_v10 }
  0xaa   : > { %v7277_v34 = vpack.c.bf16 %v7034_v22, %v7017_v23  ;;  %v993_v35 = vcombine.low %v985_v25, %v992_v27  ;;  %v1002_v41 = vrot.slane %v994_v31, %v13795_v10  ;;  %v6615_v42 = vcombine.high %v6607_v33, %v6607_v33 }
  0xab   : > { %v6624_v9 = vrot.slane %v6328_v19, %v13795_v10  ;;  %v6631_v43 = vrot.slane %v6617_v7, %v13795_v10  ;;  %v6616_v44 = vcombine.high %v6614_v38, %v6614_v38  ;;  %v7035_v45 = vcombine.low %v6598_v32, %v6607_v33  ;;  %v13460_v19 = vld [vmem:[%s15766_s3 + $0x10] sm:$0xff]   ;;  %v464_v32 = vld [vmem:[#allocation2 + $0x28] sm:$0x3f] }
  0xac   : > { %12813 = vmatmul.mubr.msk.bf16.gmra.mrb[20].mxu0 %vm396_vm1, %v7277_v34  ;;  %v548_v46 = vcombine.high %v461_v0, %v461_v0  ;;  %v563_v37 = vcombine.high %v555_v13, %v555_v13  ;;  %v1010_v49 = vcombine.low %v1002_v41, %v1009_v36  ;;  %v7036_v52 = vcombine.low %v6615_v42, %v6614_v38  ;;  %v465_v34 = vld [vmem:[#allocation2 + $0x30] sm:$0xff] }
  0xad   : > { %12816 = vmatprep.mubr.msk.bf16.mxu0 %vm13652_vm0, %v13651_v2  ;;  %v6632_v50 = vcombine.high %v6624_v9, %v6624_v9  ;;  %v565_v29 = vcombine.high %v462_v39, %v462_v39  ;;  %v7043_v54 = vrot.slane %v7035_v45, %v13795_v10  ;;  %v7052_v55 = vcombine.low %v6616_v44, %v6624_v9 }
  0xae   : > { %12571 = vmatmul.mubr.msk.bf16.gmra.mrb[48].mxu1 %vm396_vm1, %v2404_v1  ;;  %v562_v47 = vrot.slane %v548_v46, %v13795_v10  ;;  %v572_v51 = vrot.slane %v462_v39, %v13795_v10  ;;  %v1418_v59 = vpack.c.bf16 %v1010_v49, %v993_v35  ;;  %v7050_v60 = vrot.slane %v7036_v52, %v13795_v10  ;;  %v6332_v49 = vld [vmem:[#allocation2 + $0xaa] sm:$0x3f] }
  0xaf   : > { %12576 = vmatprep.mubr.msk.bf16.mxu1 %vm13652_vm0, %v13651_v2  ;;  %v7053_v61 = vcombine.low %v6632_v50, %v6631_v43  ;;  %v579_v56 = vrot.slane %v565_v29, %v13795_v10  ;;  %v7060_v62 = vrot.slane %v7052_v55, %v13795_v10  ;;  %v588_v40 = vrot.slane %v463_v53, %v13795_v10 }
  0xb0   : > { %v564_v63 = vcombine.high %v562_v47, %v562_v47  ;;  %v580_v0 = vcombine.high %v572_v51, %v572_v51  ;;  %v7051_v1 = vcombine.low %v7043_v54, %v7050_v60  ;;  %v1011_v4 = vcombine.low %v563_v37, %v562_v47 }
  0xb1   : > { %v7067_v3 = vrot.slane %v7053_v61, %v13795_v10  ;;  %v6633_v5 = vcombine.high %v6329_v57, %v6329_v57  ;;  %v596_v6 = vcombine.high %v588_v40, %v588_v40  ;;  %v6640_v12 = vrot.slane %v6329_v57, %v13795_v10 }
  0xb2   : > { %v1012_v8 = vcombine.low %v564_v63, %v572_v51  ;;  %v1028_v11 = vcombine.low %v580_v0, %v579_v56  ;;  %v1019_v13 = vrot.slane %v1011_v4, %v13795_v10  ;;  %v6650_v16 = vcombine.high %v6330_v48, %v6330_v48  ;;  %v6333_v0 = vld [vmem:[#allocation2 + $0xb2] sm:$0xff] }
  0xb3   : > { %v7068_v21 = vcombine.low %v7060_v62, %v7067_v3  ;;  %v6647_v15 = vrot.slane %v6633_v5, %v13795_v10  ;;  %v1029_v17 = vcombine.low %v588_v40, %v596_v6  ;;  %v6648_v23 = vcombine.high %v6640_v12, %v6640_v12  ;;  %v466_v5 = vld [vmem:[#allocation2 + $0x38] sm:$0x3f] }
  0xb4   : > { %v1026_v58 = vrot.slane %v1012_v8, %v13795_v10  ;;  %v1036_v18 = vrot.slane %v1028_v11, %v13795_v10  ;;  %v6657_v26 = vrot.slane %v6330_v48, %v13795_v10  ;;  %v6664_v22 = vrot.slane %v6650_v16, %v13795_v10 }
  0xb5   : > { %v7278_v24 = vpack.c.bf16 %v7068_v21, %v7051_v1  ;;  %v6649_v25 = vcombine.high %v6647_v15, %v6647_v15  ;;  %v14300_v30 = vrot.slane %v1029_v17, %v13795_v10  ;;  %v6673_v20 = vrot.slane %v6331_v14, %v13795_v10 }
  0xb6   : > { %12577 = vmatmul.mubr.msk.bf16.vlgmr.msra.gmra.mrb[0].mxu1 %vm396_vm1, %v1418_v59  ;;  %v1027_v27 = vcombine.low %v1019_v13, %v1026_v58  ;;  %v7069_v31 = vcombine.low %v6640_v12, %v6648_v23  ;;  %v6665_v33 = vcombine.high %v6657_v26, %v6657_v26  ;;  %v581_v35 = vcombine.high %v463_v53, %v463_v53 }
  0xb7   : > { %12817 = vmatmul.mubr.msk.bf16.gmra.mrb[24].mxu0 %vm396_vm1, %v7278_v24  ;;  %12580 = vmatprep.mubr.msk.bf16.mxu1 %vm13652_vm0, %v13651_v2  ;;  %v7070_v7 = vcombine.low %v6647_v15, %v6649_v25  ;;  %v1044_v36 = vcombine.low %v1036_v18, %v14300_v30  ;;  %v7087_v39 = vcombine.low %v6664_v22, %v6673_v20  ;;  %v467_v15 = vld [vmem:[#allocation2 + $0x40] sm:$0xff] }
  0xb8   : > { %12820 = vmatprep.mubr.msk.bf16.mxu0 %vm13652_vm0, %v13651_v2  ;;  %12629 = vmatpush3.bf16.msra.mxu1 %v13460_v19  ;;  %v7077_v38 = vrot.slane %v7069_v31, %v13795_v10  ;;  %v7086_v42 = vcombine.low %v6657_v26, %v6665_v33  ;;  %v595_v9 = vrot.slane %v581_v35, %v13795_v10  ;;  %v6334_v35 = vld [vmem:[#allocation2 + $0xba] sm:$0x3f] }
  0xb9   : > { %v7084_v41 = vrot.slane %v7070_v7, %v13795_v10  ;;  %v598_v43 = vcombine.high %v464_v32, %v464_v32  ;;  %12682 = vmatprep.subr.bf16.mxu1 %v13651_v2  ;;  %v1419_v44 = vpack.c.bf16 %v1044_v36, %v1027_v27  ;;  %v7101_v45 = vrot.slane %v7087_v39, %v13795_v10 }
  0xba   : > { %v605_v46 = vrot.slane %v464_v32, %v13795_v10  ;;  %v614_v37 = vcombine.high %v465_v34, %v465_v34  ;;  %v7094_v52 = vrot.slane %v7086_v42, %v13795_v10  ;;  %v597_v53 = vcombine.high %v595_v9, %v595_v9 }
  0xbb   : > { %v7085_v50 = vcombine.low %v7077_v38, %v7084_v41  ;;  %v612_v29 = vrot.slane %v598_v43, %v13795_v10  ;;  %v14318_v55 = vrot.slane %v465_v34, %v13795_v10  ;;  %v6666_v51 = vcombine.high %v6331_v14, %v6331_v14 }
  0xbc   : > { %v613_v54 = vcombine.high %v605_v46, %v605_v46  ;;  %v628_v47 = vrot.slane %v614_v37, %v13795_v10  ;;  %v7102_v57 = vcombine.low %v7094_v52, %v7101_v45  ;;  %v1045_v59 = vcombine.low %v595_v9, %v597_v53 }
  0xbd   : > { %v6681_v60 = vcombine.high %v6673_v20, %v6673_v20  ;;  %v6683_v61 = vcombine.high %v6332_v49, %v6332_v49  ;;  %v629_v56 = vcombine.high %v14318_v55, %v14318_v55  ;;  %v1062_v63 = vcombine.low %v612_v29, %v14318_v55 }
  0xbe   : > { %12581 = vmatmul.mubr.msk.bf16.gmra.mrb[4].mxu1 %vm396_vm1, %v1419_v44  ;;  %v1046_v62 = vcombine.low %v605_v46, %v613_v54  ;;  %v6680_v40 = vrot.slane %v6666_v51, %v13795_v10  ;;  %v7279_v48 = vpack.c.bf16 %v7102_v57, %v7085_v50  ;;  %v14329_v1 = vrot.slane %v1045_v59, %v13795_v10  ;;  %v6335_v44 = vld [vmem:[#allocation2 + $0xc2] sm:$0xff] }
  0xbf   : > { %12584 = vmatprep.mubr.msk.bf16.mxu1 %vm13652_vm0, %v13651_v2  ;;  %v6690_v3 = vrot.slane %v6332_v49, %v13795_v10  ;;  %v6697_v4 = vrot.slane %v6683_v61, %v13795_v10  ;;  %v1063_v8 = vcombine.low %v629_v56, %v628_v47  ;;  %v1070_v11 = vrot.slane %v1062_v63, %v13795_v10  ;;  %v469_v61 = vld [vmem:[#allocation2 + $0x50] sm:$0xff] }
  0xc0   : > { %v1060_v6 = vrot.slane %v1046_v62, %v13795_v10  ;;  %v6682_v12 = vcombine.high %v6680_v40, %v6680_v40  ;;  %12821 = vmatmul.mubr.msk.bf16.gmra.mrb[28].mxu0 %vm396_vm1, %v7279_v48  ;;  %v6706_v13 = vrot.slane %v6333_v0, %v13795_v10  ;;  %v7103_v14 = vcombine.low %v6681_v60, %v6680_v40  ;;  %v468_v60 = vld [vmem:[#allocation2 + $0x48] sm:$0x3f] }
  0xc1   : > { %v6698_v21 = vcombine.high %v6690_v3, %v6690_v3  ;;  %v14337_v16 = vcombine.high %v628_v47, %v628_v47  ;;  %v14341_v17 = vrot.slane %v1063_v8, %v13795_v10  ;;  %12824 = vmatprep.mubr.msk.bf16.mxu0 %vm13652_vm0, %v13651_v2  ;;  %v631_v19 = vcombine.high %v466_v5, %v466_v5 }
  0xc2   : > { %v1061_v58 = vcombine.low %v14329_v1, %v1060_v6  ;;  %v7104_v18 = vcombine.low %v6682_v12, %v6690_v3  ;;  %v6714_v23 = vcombine.high %v6706_v13, %v6706_v13  ;;  %v7111_v24 = vrot.slane %v7103_v14, %v13795_v10 }
  0xc3   : > { %v7120_v25 = vcombine.low %v6698_v21, %v6697_v4  ;;  %v638_v26 = vrot.slane %v466_v5, %v13795_v10  ;;  %v1078_v22 = vcombine.low %v1070_v11, %v14341_v17  ;;  %v645_v20 = vrot.slane %v631_v19, %v13795_v10 }
  0xc4   : > { %v7118_v27 = vrot.slane %v7104_v18, %v13795_v10  ;;  %v647_v31 = vcombine.high %v467_v15, %v467_v15  ;;  %v7121_v32 = vcombine.low %v6706_v13, %v6714_v23  ;;  %v654_v34 = vrot.slane %v467_v15, %v13795_v10  ;;  %v470_v15 = vld [vmem:[#allocation2 + $0x58] sm:$0x3f] }
  0xc5   : > { %v7128_v33 = vrot.slane %v7120_v25, %v13795_v10  ;;  %v646_v7 = vcombine.high %v638_v26, %v638_v26  ;;  %v1420_v36 = vpack.c.bf16 %v1078_v22, %v1061_v58  ;;  %v1079_v41 = vcombine.low %v14337_v16, %v638_v26 }
  0xc6   : > { %v7119_v38 = vcombine.low %v7111_v24, %v7118_v27  ;;  %v661_v39 = vrot.slane %v647_v31, %v13795_v10  ;;  %v7135_v42 = vrot.slane %v7121_v32, %v13795_v10  ;;  %v662_v9 = vcombine.high %v654_v34, %v654_v34  ;;  %v6336_v27 = vld [vmem:[#allocation2 + $0xca] sm:$0x3f] }
  0xc7   : > { %v1080_v43 = vcombine.low %v646_v7, %v645_v20  ;;  %v6699_v45 = vcombine.high %v6333_v0, %v6333_v0  ;;  %12585 = vmatmul.mubr.msk.bf16.gmra.mrb[8].mxu1 %vm396_vm1, %v1420_v36  ;;  %v1087_v37 = vrot.slane %v1079_v41, %v13795_v10  ;;  %v6716_v49 = vcombine.high %v6334_v35, %v6334_v35  ;;  %v6337_v7 = vld [vmem:[#allocation2 + $0xd2] sm:$0xff] }
  0xc8   : > { %v663_v46 = vcombine.high %v661_v39, %v661_v39  ;;  %v6723_v50 = vrot.slane %v6334_v35, %v13795_v10  ;;  %v7136_v52 = vcombine.low %v7128_v33, %v7135_v42  ;;  %12588 = vmatprep.mubr.msk.bf16.mxu1 %vm13652_vm0, %v13651_v2  ;;  %v1096_v29 = vcombine.low %v654_v34, %v662_v9 }
  0xc9   : > { %v1094_v53 = vrot.slane %v1080_v43, %v13795_v10  ;;  %v6713_v54 = vrot.slane %v6699_v45, %v13795_v10  ;;  %v6730_v51 = vrot.slane %v6716_v49, %v13795_v10  ;;  %v6732_v59 = vcombine.high %v6335_v44, %v6335_v44 }
  0xca   : > { %v1097_v47 = vcombine.low %v661_v39, %v663_v46  ;;  %v6731_v57 = vcombine.high %v6723_v50, %v6723_v50  ;;  %v7280_v56 = vpack.c.bf16 %v7136_v52, %v7119_v38  ;;  %v14364_v63 = vrot.slane %v1096_v29, %v13795_v10 }
  0xcb   : > { %v1095_v62 = vcombine.low %v1087_v37, %v1094_v53  ;;  %v6715_v0 = vcombine.high %v6713_v54, %v6713_v54  ;;  %v6739_v48 = vrot.slane %v6335_v44, %v13795_v10  ;;  %v6746_v3 = vrot.slane %v6732_v59, %v13795_v10  ;;  %v471_v53 = vld [vmem:[#allocation2 + $0x60] sm:$0xff] }
  0xcc   : > { %v14367_v40 = vrot.slane %v1097_v47, %v13795_v10  ;;  %v7138_v4 = vcombine.low %v6723_v50, %v6731_v57  ;;  %12825 = vmatmul.mubr.msk.bf16.gmra.mrb[32].mxu0 %vm396_vm1, %v7280_v56  ;;  %v664_v6 = vcombine.high %v468_v60, %v468_v60  ;;  %v671_v8 = vrot.slane %v468_v60, %v13795_v10 }
  0xcd   : > { %v7137_v5 = vcombine.low %v6713_v54, %v6715_v0  ;;  %v680_v11 = vcombine.high %v469_v61, %v469_v61  ;;  %12828 = vmatprep.mubr.msk.bf16.mxu0 %vm13652_vm0, %v13651_v2  ;;  %v6747_v21 = vcombine.high %v6739_v48, %v6739_v48  ;;  %v7154_v14 = vcombine.low %v6730_v51, %v6739_v48  ;;  %v472_v0 = vld [vmem:[#allocation2 + $0x68] sm:$0x3f] }
  0xce   : > { %v1112_v12 = vcombine.low %v14364_v63, %v14367_v40  ;;  %v7152_v13 = vrot.slane %v7138_v4, %v13795_v10  ;;  %v678_v18 = vrot.slane %v664_v6, %v13795_v10  ;;  %v679_v19 = vcombine.high %v671_v8, %v671_v8 }
  0xcf   : > { %v7145_v58 = vrot.slane %v7137_v5, %v13795_v10  ;;  %v14381_v23 = vrot.slane %v469_v61, %v13795_v10  ;;  %v7155_v25 = vcombine.low %v6747_v21, %v6746_v3  ;;  %v7162_v26 = vrot.slane %v7154_v14, %v13795_v10 }
  0xd0   : > { %v1421_v24 = vpack.c.bf16 %v1112_v12, %v1095_v62  ;;  %v694_v22 = vrot.slane %v680_v11, %v13795_v10  ;;  %v704_v32 = vrot.slane %v470_v15, %v13795_v10  ;;  %v1113_v33 = vcombine.low %v671_v8, %v679_v19  ;;  %v296_v11 = vld [vmem:[%s13793_s10 + $0xd0] sm:$0xff] }
  0xd1   : > { %v7153_v20 = vcombine.low %v7145_v58, %v7152_v13  ;;  %v695_v31 = vcombine.high %v14381_v23, %v14381_v23  ;;  %v7169_v34 = vrot.slane %v7155_v25, %v13795_v10  ;;  %v1114_v36 = vcombine.low %v678_v18, %v14381_v23  ;;  %v6338_v58 = vld [vmem:[#allocation2 + $0xda] sm:$0x3f] }
  0xd2   : > { %12589 = vmatmul.mubr.msk.bf16.gmra.mrb[12].mxu1 %vm396_vm1, %v1421_v24  ;;  %v14390_v35 = vcombine.high %v694_v22, %v694_v22  ;;  %v6748_v38 = vcombine.high %v6746_v3, %v6746_v3  ;;  %v1121_v39 = vrot.slane %v1113_v33, %v13795_v10  ;;  %v6749_v42 = vcombine.high %v6336_v27, %v6336_v27 }
  0xd3   : > { %12592 = vmatprep.mubr.msk.bf16.mxu1 %vm13652_vm0, %v13651_v2  ;;  %v1130_v41 = vcombine.low %v695_v31, %v694_v22  ;;  %v6756_v9 = vrot.slane %v6336_v27, %v13795_v10  ;;  %v7170_v43 = vcombine.low %v7162_v26, %v7169_v34  ;;  %v1128_v44 = vrot.slane %v1114_v36, %v13795_v10 }
  0xd4   : > { %v1131_v45 = vcombine.low %v14390_v35, %v704_v32  ;;  %v6765_v46 = vcombine.high %v6337_v7, %v6337_v7  ;;  %v6763_v49 = vrot.slane %v6749_v42, %v13795_v10  ;;  %v6772_v52 = vrot.slane %v6337_v7, %v13795_v10 }
  0xd5   : > { %v14400_v37 = vrot.slane %v1130_v41, %v13795_v10  ;;  %v6764_v50 = vcombine.high %v6756_v9, %v6756_v9  ;;  %v7281_v29 = vpack.c.bf16 %v7170_v43, %v7153_v20  ;;  %v1129_v54 = vcombine.low %v1121_v39, %v1128_v44  ;;  %v13641_v39 = vld [vmem:[%s15765_s2] ss:$0 sm:$0xff] }
  0xd6   : > { %v1145_v47 = vrot.slane %v1131_v45, %v13795_v10  ;;  %v6779_v51 = vrot.slane %v6765_v46, %v13795_v10  ;;  %v6780_v57 = vcombine.high %v6772_v52, %v6772_v52  ;;  %v7171_v59 = vcombine.low %v6748_v38, %v6756_v9  ;;  %v473_v45 = vld [vmem:[#allocation2 + $0x70] sm:$0xff]  ;;  %v474_v46 = vld [vmem:[#allocation2 + $0x78] sm:$0x3f] }
  0xd7   : > { %v7172_v60 = vcombine.low %v6764_v50, %v6763_v49  ;;  %v697_v61 = vcombine.high %v470_v15, %v470_v15  ;;  %12829 = vmatmul.mubr.msk.bf16.gmra.mrb[36].mxu0 %vm396_vm1, %v7281_v29  ;;  %v712_v48 = vcombine.high %v704_v32, %v704_v32  ;;  %v713_v3 = vcombine.high %v471_v53, %v471_v53  ;;  %v297_v15 = vld [vmem:[%s13793_s10 + $0xd8] sm:$0x3f] }
  0xd8   : > { %v1146_v56 = vcombine.low %v14400_v37, %v1145_v47  ;;  %v6781_v62 = vcombine.high %v6779_v51, %v6779_v51  ;;  %12832 = vmatprep.mubr.msk.bf16.mxu0 %vm13652_vm0, %v13651_v2  ;;  %v7179_v4 = vrot.slane %v7171_v59, %v13795_v10  ;;  %v7188_v6 = vcombine.low %v6772_v52, %v6780_v57 }
  0xd9   : > { %v7186_v5 = vrot.slane %v7172_v60, %v13795_v10  ;;  %v711_v8 = vrot.slane %v697_v61, %v13795_v10  ;;  %v720_v13 = vrot.slane %v471_v53, %v13795_v10  ;;  %v727_v14 = vrot.slane %v713_v3, %v13795_v10 }
  0xda   : > { %v1422_v12 = vpack.c.bf16 %v1146_v56, %v1129_v54  ;;  %v7189_v21 = vcombine.low %v6779_v51, %v6781_v62  ;;  %v7196_v19 = vrot.slane %v7188_v6, %v13795_v10  ;;  %v737_v24 = vrot.slane %v472_v0, %v13795_v10  ;;  %v475_v51 = vld [vmem:[#allocation2 + $0x80] sm:$0xff]  ;;  %v476_v6 = vld [vmem:[#allocation2 + $0x88] sm:$0x3f] }
  0xdb   : > { %v7187_v18 = vcombine.low %v7179_v4, %v7186_v5  ;;  %v1147_v25 = vcombine.low %v712_v48, %v711_v8  ;;  %v728_v22 = vcombine.high %v720_v13, %v720_v13  ;;  %v729_v27 = vcombine.high %v727_v14, %v727_v14 }
  0xdc   : > { %12593 = vmatmul.mubr.msk.bf16.gmra.mrb[16].mxu1 %vm396_vm1, %v1422_v12  ;;  %v7203_v26 = vrot.slane %v7189_v21, %v13795_v10  ;;  %v331_v20 = vmul.f32 %v14147_v28, %v296_v11  ;;  %v745_v31 = vcombine.high %v737_v24, %v737_v24  ;;  %v332_v33 = vmul.f32 %v14147_v28, %v297_v15 }
  0xdd   : > { %12596 = vmatprep.mubr.msk.bf16.mxu1 %vm13652_vm0, %v13651_v2  ;;  %v1155_v32 = vrot.slane %v1147_v25, %v13795_v10  ;;  %v6782_v7 = vcombine.high %v6338_v58, %v6338_v58  ;;  %v1148_v36 = vcombine.low %v720_v13, %v728_v22  ;;  %v1164_v38 = vcombine.low %v727_v14, %v729_v27 }
  0xde   : > { %v7204_v34 = vcombine.low %v7196_v19, %v7203_v26  ;;  %v366_v41 = vadd.f32 %v13641_v39, %v331_v20  ;;  %v1165_v42 = vcombine.low %v737_v24, %v745_v31  ;;  %v367_v9 = vadd.f32 %v13641_v39, %v332_v33 }
  0xdf   : > { %v6789_v43 = vrot.slane %v6338_v58, %v13795_v10  ;;  %v14431_v44 = vrot.slane %v6782_v7, %v13795_v10  ;;  %v14434_v28 = vrot.slane %v1148_v36, %v13795_v10  ;;  %v14437_v50 = vrot.slane %v1164_v38, %v13795_v10  ;;  %v14463_v58 = vld [vmem:[#allocation2 + $0x90] sm:$0xff] }
  0xe0   : > { %v7282_v49 = vpack.c.bf16 %v7204_v34, %v7187_v18  ;;  %v394_v52 = vmax.f32 %v366_v41, 0.0  ;;  %v1179_v53 = vrot.slane %v1165_v42, %v13795_v10  ;;  %v395_v29 = vmax.f32 %v367_v9, 0.0 }
  0xe1   : > { %v6797_v54 = vcombine.high %v6789_v43, %v6789_v43  ;;  %v730_v47 = vcombine.high %v472_v0, %v472_v0  ;;  %v1163_v57 = vcombine.low %v1155_v32, %v14434_v28  ;;  %v746_v59 = vcombine.high %v473_v45, %v473_v45 }
  0xe2   : > { %12833 = vmatmul.mubr.msk.bf16.gmra.mrb[40].mxu0 %vm396_vm1, %v7282_v49  ;;  %457 = vst.msk [vmem:[#allocation2 + $0xe1] sm:$0xff] %vm396_vm1, %v394_v52  ;;  %v14444_v60 = vrot.slane %v473_v45, %v13795_v10  ;;  %v763_v61 = vcombine.high %v474_v46, %v474_v46  ;;  %v1180_v56 = vcombine.low %v14437_v50, %v1179_v53 }
  0xe3   : > { %12836 = vmatprep.mubr.msk.bf16.mxu0 %vm13652_vm0, %v13651_v2  ;;  %458 = vst.msk [vmem:[#allocation2 + $0xe9] sm:$0x3f] %vm431_vm2, %v395_v29  ;;  %v14450_v62 = vcombine.low %v6789_v43, %v6797_v54  ;;  %v744_v0 = vrot.slane %v730_v47, %v13795_v10  ;;  %v770_v48 = vrot.slane %v474_v46, %v13795_v10 }
  0xe4   : > { %v760_v3 = vrot.slane %v746_v59, %v13795_v10  ;;  %v761_v4 = vcombine.high %v14444_v60, %v14444_v60  ;;  %v777_v5 = vrot.slane %v763_v61, %v13795_v10  ;;  %v779_v8 = vcombine.high %v475_v51, %v475_v51 }
  0xe5   : > { %v1423_v11 = vpack.c.bf16 %v1180_v56, %v1163_v57  ;;  %v7213_v12 = vrot.slane %v14450_v62, %v13795_v10  ;;  %v778_v21 = vcombine.high %v770_v48, %v770_v48  ;;  %v1181_v13 = vcombine.low %v744_v0, %v14444_v60  ;;  %v7496_v56 = vld [vmem:[#allocation2 + $0x28] sm:$0x3f] }
  0xe6   : > { %v14461_v14 = vcombine.high %v760_v3, %v760_v3  ;;  %v1182_v15 = vcombine.low %v761_v4, %v760_v3  ;;  %v786_v18 = vrot.slane %v475_v51, %v13795_v10  ;;  %v793_v19 = vrot.slane %v779_v8, %v13795_v10 }
  0xe7   : > { %12597 = vmatmul.mubr.msk.bf16.gmra.mrb[20].mxu1 %vm396_vm1, %v1423_v11  ;;  %v1189_v24 = vrot.slane %v1181_v13, %v13795_v10  ;;  %v1199_v25 = vcombine.low %v778_v21, %v777_v5  ;;  %v796_v26 = vcombine.high %v476_v6, %v476_v6  ;;  %v803_v22 = vrot.slane %v476_v6, %v13795_v10 }
  0xe8   : > { %12600 = vmatprep.mubr.msk.bf16.mxu1 %vm13652_vm0, %v13651_v2  ;;  %v14473_v27 = vrot.slane %v1182_v15, %v13795_v10  ;;  %v1198_v20 = vcombine.low %v14461_v14, %v770_v48  ;;  %v794_v31 = vcombine.high %v786_v18, %v786_v18  ;;  %v795_v32 = vcombine.high %v793_v19, %v793_v19  ;;  %v478_v15 = vld [vmem:[#allocation2 + $0x98] sm:$0x3f] }
  0xe9   : > { %v1213_v33 = vrot.slane %v1199_v25, %v13795_v10  ;;  %v810_v7 = vrot.slane %v796_v26, %v13795_v10  ;;  %v811_v34 = vcombine.high %v803_v22, %v803_v22  ;;  %v14480_v36 = vrot.slane %v14463_v58, %v13795_v10 }
  0xea   : > { %v6339_v38 = vld [vmem:[#allocation2 + $0xe2] sm:$0xff]  ;;  %v6340_v39 = vld [vmem:[#allocation2 + $0xea] sm:$0x3f]  ;;  %v1197_v41 = vcombine.low %v1189_v24, %v14473_v27  ;;  %v1206_v42 = vrot.slane %v1198_v20, %v13795_v10  ;;  %v1215_v9 = vcombine.low %v786_v18, %v794_v31  ;;  %v1216_v43 = vcombine.low %v793_v19, %v795_v32 }
  0xeb   : > { %v6798_v45 = vcombine.high %v6339_v38, %v6339_v38  ;;  %v6805_v46 = vrot.slane %v6339_v38, %v13795_v10  ;;  %v6822_v49 = vrot.slane %v6340_v39, %v13795_v10  ;;  %v6815_v52 = vcombine.high %v6340_v39, %v6340_v39  ;;  %v7498_v38 = vld [vmem:[#allocation2 + $0x38] sm:$0x3f] }
  0xec   : > { %v1214_v53 = vcombine.low %v1206_v42, %v1213_v33  ;;  %v14487_v29 = vrot.slane %v1215_v9, %v13795_v10  ;;  %v14490_v54 = vrot.slane %v1216_v43, %v13795_v10  ;;  %v1232_v47 = vcombine.low %v803_v22, %v811_v34  ;;  %v479_v33 = vld [vmem:[#allocation2 + $0xa0] sm:$0xff] }
  0xed   : > { %v6812_v51 = vrot.slane %v6798_v45, %v13795_v10  ;;  %v6813_v57 = vcombine.high %v6805_v46, %v6805_v46  ;;  %v7206_v59 = vcombine.low %v14431_v44, %v6805_v46  ;;  %v6829_v61 = vrot.slane %v6815_v52, %v13795_v10 }
  0xee   : > { %v1424_v62 = vpack.c.bf16 %v1214_v53, %v1197_v41  ;;  %v6830_v0 = vcombine.high %v6822_v49, %v6822_v49  ;;  %v1231_v48 = vcombine.low %v14487_v29, %v14490_v54  ;;  %v1233_v3 = vcombine.low %v810_v7, %v14480_v36 }
  0xef   : > { %v6814_v4 = vcombine.high %v6812_v51, %v6812_v51  ;;  %v7220_v5 = vrot.slane %v7206_v59, %v13795_v10  ;;  %v7222_v6 = vcombine.low %v6813_v57, %v6812_v51  ;;  %v1240_v8 = vrot.slane %v1232_v47, %v13795_v10 }
  0xf0   : > { %12601 = vmatmul.mubr.msk.bf16.gmra.mrb[24].mxu1 %vm396_vm1, %v1424_v62  ;;  %v7239_v11 = vcombine.low %v6830_v0, %v6829_v61  ;;  %v1247_v44 = vrot.slane %v1233_v3, %v13795_v10  ;;  %v7568_v21 = vcombine.high %v7496_v56, %v7496_v56  ;;  %v7575_v13 = vrot.slane %v7496_v56, %v13795_v10  ;;  %v480_v62 = vld [vmem:[#allocation2 + $0xa8] sm:$0x3f] }
  0xf1   : > { %v7221_v18 = vcombine.low %v7213_v12, %v7220_v5  ;;  %v7223_v19 = vcombine.low %v6814_v4, %v6822_v49  ;;  %v7230_v24 = vrot.slane %v7222_v6, %v13795_v10  ;;  %12604 = vmatprep.mubr.msk.bf16.mxu1 %vm13652_vm0, %v13651_v2  ;;  %v8029_v25 = vcombine.low %v14300_v30, %v14329_v1 }
  0xf2   : > { %v14509_v26 = vrot.slane %v7239_v11, %v13795_v10  ;;  %v1248_v22 = vcombine.low %v1240_v8, %v1247_v44  ;;  %v7582_v20 = vrot.slane %v7568_v21, %v13795_v10  ;;  %v7583_v31 = vcombine.high %v7575_v13, %v7575_v13  ;;  %v481_v11 = vld [vmem:[#allocation2 + $0xb0] sm:$0xff] }
  0xf3   : > { %v7237_v32 = vrot.slane %v7223_v19, %v13795_v10  ;;  %v812_v12 = vcombine.high %v14463_v58, %v14463_v58  ;;  %v827_v7 = vcombine.high %v14480_v36, %v14480_v36  ;;  %v829_v34 = vcombine.high %v478_v15, %v478_v15 }
  0xf4   : > { %v7284_v30 = vpack.c.bf16 %v14509_v26, %v14509_v26  ;;  %v1425_v1 = vpack.c.bf16 %v1248_v22, %v1231_v48  ;;  %v8030_v39 = vcombine.low %v7575_v13, %v7583_v31  ;;  %v8031_v41 = vcombine.low %v7582_v20, %v14318_v55  ;;  %v7500_v26 = vld [vmem:[#allocation2 + $0x48] sm:$0x3f] }
  0xf5   : > { %v7238_v42 = vcombine.low %v7230_v24, %v7237_v32  ;;  %v826_v9 = vrot.slane %v812_v12, %v13795_v10  ;;  %v836_v43 = vrot.slane %v478_v15, %v13795_v10  ;;  %v843_v45 = vrot.slane %v829_v34, %v13795_v10 }
  0xf6   : > { %v8038_v58 = vrot.slane %v8030_v39, %v13795_v10  ;;  %v8045_v46 = vrot.slane %v8031_v41, %v13795_v10  ;;  %v852_v49 = vrot.slane %v479_v33, %v13795_v10  ;;  %v7601_v52 = vcombine.high %v7498_v38, %v7498_v38 }
  0xf7   : > { %v7283_v53 = vpack.c.bf16 %v7238_v42, %v7221_v18  ;;  %v14526_v47 = vcombine.high %v826_v9, %v826_v9  ;;  %v844_v51 = vcombine.high %v836_v43, %v836_v43  ;;  %v1249_v57 = vcombine.low %v827_v7, %v826_v9 }
  0xf8   : > { %12605 = vmatmul.mubr.msk.bf16.gmra.mrb[28].mxu1 %vm396_vm1, %v1425_v1  ;;  %v8046_v55 = vcombine.low %v8038_v58, %v8045_v46  ;;  %v860_v59 = vcombine.high %v852_v49, %v852_v49  ;;  %v7608_v61 = vrot.slane %v7498_v38, %v13795_v10  ;;  %v7615_v56 = vrot.slane %v7601_v52, %v13795_v10 }
  0xf9   : > { %12837 = vmatmul.mubr.msk.bf16.gmra.mrb[44].mxu0 %vm396_vm1, %v7283_v53  ;;  %12608 = vmatprep.mubr.msk.bf16.mxu1 %vm13652_vm0, %v13651_v2  ;;  %v1250_v0 = vcombine.low %v14526_v47, %v836_v43  ;;  %v14536_v48 = vrot.slane %v1249_v57, %v13795_v10  ;;  %v1266_v3 = vcombine.low %v844_v51, %v843_v45 }
  0xfa   : > { %12840 = vmatprep.mubr.msk.bf16.mxu0 %vm13652_vm0, %v13651_v2  ;;  %v14540_v4 = vpack.c.bf16 %v8046_v55, %v8029_v25  ;;  %v1267_v5 = vcombine.low %v852_v49, %v860_v59  ;;  %v7616_v6 = vcombine.high %v7608_v61, %v7608_v61  ;;  %v8048_v8 = vcombine.low %v14337_v16, %v7608_v61  ;;  %v482_v49 = vld [vmem:[#allocation2 + $0xb8] sm:$0x3f] }
  0xfb   : > { %v1264_v44 = vrot.slane %v1250_v0, %v13795_v10  ;;  %v1274_v21 = vrot.slane %v1266_v3, %v13795_v10  ;;  %v845_v13 = vcombine.high %v479_v33, %v479_v33  ;;  %v862_v15 = vcombine.high %v480_v62, %v480_v62 }
  0xfc   : > { %v14546_v18 = vrot.slane %v1267_v5, %v13795_v10  ;;  %v8062_v19 = vrot.slane %v8048_v8, %v13795_v10  ;;  %v8064_v24 = vcombine.low %v7616_v6, %v7615_v56  ;;  %v869_v25 = vrot.slane %v480_v62, %v13795_v10 }
  0xfd   : > { %v1265_v22 = vcombine.low %v14536_v48, %v1264_v44  ;;  %v859_v16 = vrot.slane %v845_v13, %v13795_v10  ;;  %v876_v20 = vrot.slane %v862_v15, %v13795_v10  ;;  %v878_v31 = vcombine.high %v481_v11, %v481_v11  ;;  %v13487_v44 = vld [vmem:[%s15766_s3 + $0x38] sm:$0xff]  }
  0xfe   : > { %v1282_v32 = vcombine.low %v1274_v21, %v14546_v18  ;;  %v8063_v33 = vcombine.low %v14341_v17, %v8062_v19  ;;  %v8072_v12 = vrot.slane %v8064_v24, %v13795_v10  ;;  %v877_v7 = vcombine.high %v869_v25, %v869_v25 }
  0xff   : > { %v861_v34 = vcombine.high %v859_v16, %v859_v16  ;;  %v14557_v38 = vrot.slane %v481_v11, %v13795_v10  ;;  %v892_v1 = vrot.slane %v878_v31, %v13795_v10  ;;  %v7634_v39 = vcombine.high %v7500_v26, %v7500_v26  ;;  %v7502_v11 = vld [vmem:[#allocation2 + $0x58] sm:$0x3f] }
 0x100   : > { %v1426_v41 = vpack.c.bf16 %v1282_v32, %v1265_v22  ;;  %v8080_v42 = vcombine.low %v8072_v12, %v14364_v63  ;;  %v1284_v9 = vcombine.low %v869_v25, %v877_v7  ;;  %v7641_v43 = vrot.slane %v7500_v26, %v13795_v10 }
 0x101   : > { %12841 = vmatmul.mubr.msk.bf16.gmra.mrb[48].mxu0 %vm396_vm1, %v7284_v30  ;;  %v893_v17 = vcombine.high %v14557_v38, %v14557_v38  ;;  %v1283_v45 = vcombine.low %v859_v16, %v861_v34  ;;  %v1300_v58 = vcombine.low %v876_v20, %v14557_v38  ;;  %v7648_v46 = vrot.slane %v7634_v39, %v13795_v10  ;;  %v483_v30 = vld [vmem:[#allocation2 + $0xc0] sm:$0xff]  ;;  %v484_v34 = vld [vmem:[#allocation2 + $0xc8] sm:$0x3f] }
 0x102   : > { %12846 = vmatprep.mubr.msk.bf16.mxu0 %vm13652_vm0, %v13651_v2  ;;  %12609 = vmatmul.mubr.msk.bf16.gmra.mrb[32].mxu1 %vm396_vm1, %v1426_v41  ;;  %v14570_v63 = vpack.c.bf16 %v8080_v42, %v8063_v33  ;;  %v1298_v52 = vrot.slane %v1284_v9, %v13795_v10  ;;  %v7649_v53 = vcombine.high %v7641_v43, %v7641_v43  ;;  %v485_v9 = vld [vmem:[#allocation2 + $0xd0] sm:$0xff] }
 0x103   : > { %12612 = vmatprep.mubr.msk.bf16.mxu1 %vm13652_vm0, %v13651_v2  ;;  %v14576_v51 = vrot.slane %v1283_v45, %v13795_v10  ;;  %v1301_v57 = vcombine.low %v893_v17, %v892_v1  ;;  %v1308_v55 = vrot.slane %v1300_v58, %v13795_v10  ;;  %v8098_v59 = vcombine.low %v7648_v46, %v14381_v23 }
 0x104   : > { %v8082_v61 = vcombine.low %v7641_v43, %v7649_v53  ;;  %v14580_v56 = vcombine.high %v892_v1, %v892_v1  ;;  %v895_v62 = vcombine.high %v482_v49, %v482_v49  ;;  %v902_v0 = vrot.slane %v482_v49, %v13795_v10  ;;  %v486_v43 = vld [vmem:[#allocation2 + $0xd8] sm:$0x3f]  ;;  %v7504_v49 = vld [vmem:[#allocation2 + $0x68] sm:$0x3f] }
 0x105   : > { %v1299_v3 = vcombine.low %v14576_v51, %v1298_v52  ;;  %v14585_v5 = vrot.slane %v1301_v57, %v13795_v10  ;;  %v8106_v6 = vrot.slane %v8098_v59, %v13795_v10  ;;  %v911_v8 = vcombine.high %v483_v30, %v483_v30 }
 0x106   : > { %v8096_v23 = vrot.slane %v8082_v61, %v13795_v10  ;;  %v909_v21 = vrot.slane %v895_v62, %v13795_v10  ;;  %v910_v13 = vcombine.high %v902_v0, %v902_v0  ;;  %v918_v15 = vrot.slane %v483_v30, %v13795_v10 }
 0x107   : > { %v1316_v19 = vcombine.low %v1308_v55, %v14585_v5  ;;  %v8114_v24 = vcombine.low %v8106_v6, %v14400_v37  ;;  %v925_v25 = vrot.slane %v911_v8, %v13795_v10  ;;  %v1317_v26 = vcombine.low %v14580_v56, %v902_v0 }
 0x108   : > { %v8097_v22 = vcombine.low %v14367_v40, %v8096_v23  ;;  %v926_v16 = vcombine.high %v918_v15, %v918_v15  ;;  %v1318_v20 = vcombine.low %v910_v13, %v909_v21  ;;  %v7667_v31 = vcombine.high %v7502_v11, %v7502_v11 }
 0x109   : > { %12847 = vmatmul.mubr.msk.bf16.vlgmr.msra.gmra.mrb[0].mxu0 %vm396_vm1, %v14540_v4  ;;  %v1427_v32 = vpack.c.bf16 %v1316_v19, %v1299_v3  ;;  %v927_v33 = vcombine.high %v925_v25, %v925_v25  ;;  %v1325_v12 = vrot.slane %v1317_v26, %v13795_v10  ;;  %v7674_v7 = vrot.slane %v7502_v11, %v13795_v10  ;;  %v7506_v11 = vld [vmem:[#allocation2 + $0x78] sm:$0x3f] }
 0x10a   : > { %12899 = vmatpush3.bf16.msra.mxu0 %v13487_v44  ;;  %12850 = vmatprep.mubr.msk.bf16.mxu0 %vm13652_vm0, %v13651_v2  ;;  %v14605_v37 = vpack.c.bf16 %v8114_v24, %v8097_v22  ;;  %v1332_v40 = vrot.slane %v1318_v20, %v13795_v10  ;;  %v1334_v1 = vcombine.low %v918_v15, %v926_v16 }
 0x10b   : > { %12613 = vmatmul.mubr.msk.bf16.gmra.mrb[36].mxu1 %vm396_vm1, %v1427_v32  ;;  %v1335_v39 = vcombine.low %v925_v25, %v927_v33  ;;  %v7681_v4 = vrot.slane %v7667_v31, %v13795_v10  ;;  %v7682_v41 = vcombine.high %v7674_v7, %v7674_v7  ;;  %v8115_v42 = vcombine.low %v14390_v35, %v7674_v7  ;;  %v7508_v7 = vld [vmem:[#allocation2 + $0x88] sm:$0x3f] }
 0x10c   : > { %12616 = vmatprep.mubr.msk.bf16.mxu1 %vm13652_vm0, %v13651_v2  ;;  %v1333_v17 = vcombine.low %v1325_v12, %v1332_v40  ;;  %v14614_v45 = vrot.slane %v1334_v1, %v13795_v10  ;;  %v8148_v58 = vcombine.low %v14434_v28, %v14437_v50  ;;  %v928_v46 = vcombine.high %v484_v34, %v484_v34 }
 0x10d   : > { %v14619_v52 = vrot.slane %v1335_v39, %v13795_v10  ;;  %v8116_v53 = vcombine.low %v7682_v41, %v7681_v4  ;;  %v8123_v35 = vrot.slane %v8115_v42, %v13795_v10  ;;  %v935_v30 = vrot.slane %v484_v34, %v13795_v10  ;;  %12952 = vmatprep.subr.bf16.mxu0 %v13651_v2  ;;  %v2770_v34 = vld [vmem:[#allocation2 + $0x2] sm:$0xff] }
 0x10e   : > { %v942_v57 = vrot.slane %v928_v46, %v13795_v10  ;;  %v944_v55 = vcombine.high %v485_v9, %v485_v9  ;;  %v14626_v59 = vrot.slane %v485_v9, %v13795_v10  ;;  %v968_v28 = vrot.slane %v486_v43, %v13795_v10  ;;  %v2771_v46 = vld [vmem:[#allocation2 + $0xa] sm:$0x3f] }
 0x10f   : > { %v1350_v50 = vcombine.low %v14614_v45, %v14619_v52  ;;  %v8130_v61 = vrot.slane %v8116_v53, %v13795_v10  ;;  %v943_v62 = vcombine.high %v935_v30, %v935_v30  ;;  %v7700_v0 = vcombine.high %v7504_v49, %v7504_v49 }
 0x110   : > { %v958_v3 = vrot.slane %v944_v55, %v13795_v10  ;;  %v959_v6 = vcombine.high %v14626_v59, %v14626_v59  ;;  %v1352_v8 = vcombine.low %v942_v57, %v14626_v59  ;;  %v7707_v44 = vrot.slane %v7504_v49, %v13795_v10 }
 0x111   : > { %12851 = vmatmul.mubr.msk.bf16.gmra.mrb[4].mxu0 %vm396_vm1, %v14570_v63  ;;  %v1428_v23 = vpack.c.bf16 %v1350_v50, %v1333_v17  ;;  %v8131_v21 = vcombine.low %v8123_v35, %v8130_v61  ;;  %v1351_v13 = vcombine.low %v935_v30, %v943_v62  ;;  %v7714_v15 = vrot.slane %v7700_v0, %v13795_v10 }
 0x112   : > { %12854 = vmatprep.mubr.msk.bf16.mxu0 %vm13652_vm0, %v13651_v2  ;;  %v14642_v19 = vcombine.high %v958_v3, %v958_v3  ;;  %v1366_v24 = vrot.slane %v1352_v8, %v13795_v10  ;;  %v1368_v25 = vcombine.low %v959_v6, %v958_v3  ;;  %v7715_v26 = vcombine.high %v7707_v44, %v7707_v44  ;;  %v2772_v3 = vld [vmem:[#allocation2 + $0x12] sm:$0xff] }
 0x113   : > { %12617 = vmatmul.mubr.msk.bf16.gmra.mrb[40].mxu1 %vm396_vm1, %v1428_v23  ;;  %v14646_v22 = vpack.c.bf16 %v8148_v58, %v8131_v21  ;;  %v1359_v63 = vrot.slane %v1351_v13, %v13795_v10  ;;  %v7740_v16 = vrot.slane %v7506_v11, %v13795_v10  ;;  %v8150_v20 = vcombine.low %v7714_v15, %v14444_v60 }
 0x114   : > { %12620 = vmatprep.mubr.msk.bf16.mxu1 %vm13652_vm0, %v13651_v2  ;;  %v1369_v31 = vcombine.low %v14642_v19, %v968_v28  ;;  %v14655_v32 = vrot.slane %v1368_v25, %v13795_v10  ;;  %v8149_v33 = vcombine.low %v7707_v44, %v7715_v26  ;;  %v961_v12 = vcombine.high %v486_v43, %v486_v43 }
 0x115   : > { %v1367_v40 = vcombine.low %v1359_v63, %v1366_v24  ;;  %v8164_v1 = vrot.slane %v8150_v20, %v13795_v10  ;;  %v8167_v39 = vcombine.low %v14461_v14, %v7740_v16  ;;  %v976_v4 = vcombine.high %v968_v28, %v968_v28 }
 0x116   : > { %v1383_v60 = vrot.slane %v1369_v31, %v13795_v10  ;;  %v8157_v41 = vrot.slane %v8149_v33, %v13795_v10  ;;  %v975_v42 = vrot.slane %v961_v12, %v13795_v10  ;;  %v7733_v9 = vcombine.high %v7506_v11, %v7506_v11 }
 0x117   : > { %v8181_v17 = vrot.slane %v8167_v39, %v13795_v10  ;;  %v7748_v58 = vcombine.high %v7740_v16, %v7740_v16  ;;  %v7773_v43 = vrot.slane %v7508_v7, %v13795_v10  ;;  %v2826_v49 = vcombine.high %v2770_v34, %v2770_v34 }
 0x118   : > { %v1384_v53 = vcombine.low %v14655_v32, %v1383_v60  ;;  %v8165_v35 = vcombine.low %v8157_v41, %v8164_v1  ;;  %v1385_v30 = vcombine.low %v976_v4, %v975_v42  ;;  %v7747_v14 = vrot.slane %v7733_v9, %v13795_v10 }
 0x119   : > { %12855 = vmatmul.mubr.msk.bf16.gmra.mrb[8].mxu0 %vm396_vm1, %v14605_v37  ;;  %v8182_v57 = vcombine.low %v14473_v27, %v8181_v17  ;;  %v7781_v55 = vcombine.high %v7773_v43, %v7773_v43  ;;  %v2833_v28 = vrot.slane %v2770_v34, %v13795_v10  ;;  %v2840_v50 = vrot.slane %v2826_v49, %v13795_v10  ;;  %v7510_v27 = vld [vmem:[#allocation2 + $0x98] sm:$0x3f]  ;;  %v2774_v49 = vld [vmem:[#allocation2 + $0x22] sm:$0xff] }
 0x11a   : > { %12858 = vmatprep.mubr.msk.bf16.mxu0 %vm13652_vm0, %v13651_v2  ;;  %v1429_v61 = vpack.c.bf16 %v1384_v53, %v1367_v40  ;;  %v1392_v62 = vrot.slane %v1385_v30, %v13795_v10  ;;  %v8183_v0 = vcombine.low %v7748_v58, %v7747_v14  ;;  %v2843_v6 = vcombine.high %v2771_v46, %v2771_v46 }
 0x11b   : > { %v14674_v8 = vpack.c.bf16 %v8182_v57, %v8165_v35  ;;  %v8201_v11 = vcombine.low %v7773_v43, %v7781_v55  ;;  %v2841_v37 = vcombine.high %v2833_v28, %v2833_v28  ;;  %v2842_v44 = vcombine.high %v2840_v50, %v2840_v50 }
 0x11c   : > { %12621 = vmatmul.mubr.msk.bf16.gmra.mrb[44].mxu1 %vm396_vm1, %v1429_v61  ;;  %v1430_v23 = vpack.c.bf16 %v1392_v62, %v1392_v62  ;;  %v8191_v21 = vrot.slane %v8183_v0, %v13795_v10  ;;  %v2850_v13 = vrot.slane %v2771_v46, %v13795_v10  ;;  %v2857_v15 = vrot.slane %v2843_v6, %v13795_v10 }
 0x11d   : > { %12624 = vmatprep.mubr.msk.bf16.mxu1 %vm13652_vm0, %v13651_v2  ;;  %v8215_v24 = vrot.slane %v8201_v11, %v13795_v10  ;;  %v2866_v25 = vrot.slane %v2772_v3, %v13795_v10  ;;  %v3288_v26 = vcombine.low %v2833_v28, %v2841_v37  ;;  %v3289_v63 = vcombine.low %v2840_v50, %v2842_v44  ;;  %v7512_v50 = vld [vmem:[#allocation2 + $0xa8] sm:$0x3f] }
 0x11e   : > { %v14685_v16 = vcombine.low %v8191_v21, %v14487_v29  ;;  %v2858_v20 = vcombine.high %v2850_v13, %v2850_v13  ;;  %v7766_v31 = vcombine.high %v7508_v7, %v7508_v7  ;;  %v7799_v33 = vcombine.high %v7510_v27, %v7510_v27  ;;  %v2773_v29 = vld [vmem:[#allocation2 + $0x1a] sm:$0x3f]  ;;  %v2775_v21 = vld [vmem:[#allocation2 + $0x2a] sm:$0x3f] }
 0x11f   : > { %v14688_v12 = vcombine.low %v14490_v54, %v8215_v24  ;;  %v3296_v34 = vrot.slane %v3288_v26, %v13795_v10  ;;  %v3303_v40 = vrot.slane %v3289_v63, %v13795_v10  ;;  %v3306_v1 = vcombine.low %v2857_v15, %v2866_v25 }
 0x120   : > { %v3305_v39 = vcombine.low %v2850_v13, %v2858_v20  ;;  %v7780_v4 = vrot.slane %v7766_v31, %v13795_v10  ;;  %v7806_v60 = vrot.slane %v7510_v27, %v13795_v10  ;;  %v7813_v41 = vrot.slane %v7799_v33, %v13795_v10  ;;  %v13509_v20 = vld [vmem:[%s15766_s3 + $0x18] sm:$0xff]  }
 0x121   : > { %12859 = vmatmul.mubr.msk.bf16.gmra.mrb[12].mxu0 %vm396_vm1, %v14646_v22  ;;  %v8459_v54 = vpack.c.bf16 %v14688_v12, %v14685_v16  ;;  %v3304_v7 = vcombine.low %v3296_v34, %v3303_v40  ;;  %v3320_v42 = vrot.slane %v3306_v1, %v13795_v10  ;;  %v2859_v9 = vcombine.high %v2772_v3, %v2772_v3  ;;  %v2776_v33 = vld [vmem:[#allocation2 + $0x32] sm:$0xff] }
 0x122   : > { %12862 = vmatprep.mubr.msk.bf16.mxu0 %vm13652_vm0, %v13651_v2  ;;  %v3313_v17 = vrot.slane %v3305_v39, %v13795_v10  ;;  %v7814_v58 = vcombine.high %v7806_v60, %v7806_v60  ;;  %v8217_v43 = vcombine.low %v7780_v4, %v14480_v36  ;;  %v8234_v46 = vcombine.low %v14526_v47, %v7806_v60 }
 0x123   : > { %v2873_v22 = vrot.slane %v2859_v9, %v13795_v10  ;;  %v2874_v53 = vcombine.high %v2866_v25, %v2866_v25  ;;  %v2876_v35 = vcombine.high %v2773_v29, %v2773_v29  ;;  %v2883_v30 = vrot.slane %v2773_v29, %v13795_v10 }
 0x124   : > { %12625 = vmatmul.mubr.msk.bf16.gmra.mrb[48].mxu1 %vm396_vm1, %v1430_v23  ;;  %v3321_v14 = vcombine.low %v3313_v17, %v3320_v42  ;;  %v8225_v57 = vrot.slane %v8217_v43, %v13795_v10  ;;  %v8235_v55 = vcombine.low %v7814_v58, %v7813_v41  ;;  %v8242_v28 = vrot.slane %v8234_v46, %v13795_v10  ;;  %v7514_v42 = vld [vmem:[#allocation2 + $0xb8] sm:$0x3f] }
 0x125   : > { %12630 = vmatprep.mubr.msk.bf16.mxu1 %vm13652_vm0, %v13651_v2  ;;  %v2875_v36 = vcombine.high %v2873_v22, %v2873_v22  ;;  %v2890_v47 = vrot.slane %v2876_v35, %v13795_v10  ;;  %v2891_v61 = vcombine.high %v2883_v30, %v2883_v30  ;;  %v2899_v62 = vrot.slane %v2774_v49, %v13795_v10 }
 0x126   : > { %v3729_v0 = vpack.c.bf16 %v3321_v14, %v3304_v7  ;;  %v8233_v3 = vcombine.low %v8225_v57, %v14536_v48  ;;  %v8249_v6 = vrot.slane %v8235_v55, %v13795_v10  ;;  %v3322_v11 = vcombine.low %v2874_v53, %v2873_v22 }
 0x127   : > { %v2907_v37 = vcombine.high %v2899_v62, %v2899_v62  ;;  %v3323_v44 = vcombine.low %v2875_v36, %v2883_v30  ;;  %v3339_v27 = vcombine.low %v2891_v61, %v2890_v47  ;;  %v7832_v23 = vcombine.high %v7512_v50, %v7512_v50 }
 0x128   : > { %v8250_v13 = vcombine.low %v8242_v28, %v8249_v6  ;;  %v3330_v15 = vrot.slane %v3322_v11, %v13795_v10  ;;  %v7839_v24 = vrot.slane %v7512_v50, %v13795_v10  ;;  %v8267_v25 = vcombine.low %v14546_v18, %v14576_v51  ;;  %v2777_v50 = vld [vmem:[#allocation2 + $0x3a] sm:$0x3f] }
 0x129   : > { %12863 = vmatmul.mubr.msk.bf16.gmra.mrb[16].mxu0 %vm396_vm1, %v14674_v8  ;;  %v3337_v48 = vrot.slane %v3323_v44, %v13795_v10  ;;  %v3340_v26 = vcombine.low %v2899_v62, %v2907_v37  ;;  %v3347_v63 = vrot.slane %v3339_v27, %v13795_v10  ;;  %v7846_v31 = vrot.slane %v7832_v23, %v13795_v10 }
 0x12a   : > { %12866 = vmatprep.mubr.msk.bf16.mxu0 %vm13652_vm0, %v13651_v2  ;;  %v14730_v34 = vpack.c.bf16 %v8250_v13, %v8233_v3  ;;  %v7847_v18 = vcombine.high %v7839_v24, %v7839_v24  ;;  %v2892_v51 = vcombine.high %v2774_v49, %v2774_v49  ;;  %v2909_v8 = vcombine.high %v2775_v21, %v2775_v21  ;;  %v7516_v13 = vld [vmem:[#allocation2 + $0xc8] sm:$0x3f] }
 0x12b   : > { %v3338_v40 = vcombine.low %v3330_v15, %v3337_v48  ;;  %v3354_v1 = vrot.slane %v3340_v26, %v13795_v10  ;;  %v8269_v39 = vcombine.low %v7846_v31, %v14557_v38  ;;  %v2916_v4 = vrot.slane %v2775_v21, %v13795_v10 }
 0x12c   : > { %12631 = vmatmul.mubr.msk.bf16.vlgmr.msra.gmra.mrb[0].mxu1 %vm396_vm1, %v3729_v0  ;;  %v8268_v60 = vcombine.low %v7839_v24, %v7847_v18  ;;  %v2906_v41 = vrot.slane %v2892_v51, %v13795_v10  ;;  %v2923_v29 = vrot.slane %v2909_v8, %v13795_v10  ;;  %v2925_v7 = vcombine.high %v2776_v33, %v2776_v33  ;;  %v2778_v0 = vld [vmem:[#allocation2 + $0x42] sm:$0xff] }
 0x12d   : > { %12634 = vmatprep.mubr.msk.bf16.mxu1 %vm13652_vm0, %v13651_v2  ;;  %v3355_v9 = vcombine.low %v3347_v63, %v3354_v1  ;;  %12683 = vmatpush3.bf16.msra.mxu1 %v13509_v20  ;;  %v8283_v17 = vrot.slane %v8269_v39, %v13795_v10  ;;  %v2924_v58 = vcombine.high %v2916_v4, %v2916_v4 }
 0x12e   : > { %v8276_v38 = vrot.slane %v8268_v60, %v13795_v10  ;;  %v2908_v43 = vcombine.high %v2906_v41, %v2906_v41  ;;  %v2932_v46 = vrot.slane %v2776_v33, %v13795_v10  ;;  %v2939_v49 = vrot.slane %v2925_v7, %v13795_v10  ;;  %13006 = vmatprep.subr.bf16.mxu1 %v13651_v2  ;;  %v2780_v60 = vld [vmem:[#allocation2 + $0x52] sm:$0xff] }
 0x12f   : > { %v3730_v22 = vpack.c.bf16 %v3355_v9, %v3338_v40  ;;  %v3357_v53 = vcombine.low %v2916_v4, %v2924_v58  ;;  %v7865_v35 = vcombine.high %v7514_v42, %v7514_v42  ;;  %v7872_v30 = vrot.slane %v7514_v42, %v13795_v10  ;;  %v2779_v40 = vld [vmem:[#allocation2 + $0x4a] sm:$0x3f] }
 0x130   : > { %v8284_v14 = vcombine.low %v8276_v38, %v8283_v17  ;;  %v2940_v57 = vcombine.high %v2932_v46, %v2932_v46  ;;  %v3356_v55 = vcombine.low %v2906_v41, %v2908_v43  ;;  %v3373_v28 = vcombine.low %v2923_v29, %v2932_v46  ;;  %v2781_v46 = vld [vmem:[#allocation2 + $0x5a] sm:$0x3f] }
 0x131   : > { %12867 = vmatmul.mubr.msk.bf16.gmra.mrb[20].mxu0 %vm396_vm1, %v8459_v54  ;;  %v3371_v36 = vrot.slane %v3357_v53, %v13795_v10  ;;  %v7879_v47 = vrot.slane %v7865_v35, %v13795_v10  ;;  %v7880_v61 = vcombine.high %v7872_v30, %v7872_v30  ;;  %v8286_v62 = vcombine.low %v14580_v56, %v7872_v30 }
 0x132   : > { %12870 = vmatprep.mubr.msk.bf16.mxu0 %vm13652_vm0, %v13651_v2  ;;  %v14755_v3 = vpack.c.bf16 %v8284_v14, %v8267_v25  ;;  %v3364_v6 = vrot.slane %v3356_v55, %v13795_v10  ;;  %v3374_v11 = vcombine.low %v2940_v57, %v2939_v49  ;;  %v3381_v16 = vrot.slane %v3373_v28, %v13795_v10 }
 0x133   : > { %v8300_v12 = vrot.slane %v8286_v62, %v13795_v10  ;;  %v8302_v54 = vcombine.low %v7880_v61, %v7879_v47  ;;  %v2941_v37 = vcombine.high %v2939_v49, %v2939_v49  ;;  %v2942_v44 = vcombine.high %v2777_v50, %v2777_v50 }
 0x134   : > { %12635 = vmatmul.mubr.msk.bf16.gmra.mrb[4].mxu1 %vm396_vm1, %v3730_v22  ;;  %v3372_v27 = vcombine.low %v3364_v6, %v3371_v36  ;;  %v3388_v56 = vrot.slane %v3374_v11, %v13795_v10  ;;  %v2949_v23 = vrot.slane %v2777_v50, %v13795_v10  ;;  %v2958_v21 = vcombine.high %v2778_v0, %v2778_v0  ;;  %v7518_v22 = vld [vmem:[#allocation2 + $0xd8] sm:$0x3f] }
 0x135   : > { %12638 = vmatprep.mubr.msk.bf16.mxu1 %vm13652_vm0, %v13651_v2  ;;  %v8301_v15 = vcombine.low %v14585_v5, %v8300_v12  ;;  %v8310_v24 = vrot.slane %v8302_v54, %v13795_v10  ;;  %v2956_v25 = vrot.slane %v2942_v44, %v13795_v10  ;;  %v2965_v48 = vrot.slane %v2778_v0, %v13795_v10 }
 0x136   : > { %v3389_v26 = vcombine.low %v3381_v16, %v3388_v56  ;;  %v2957_v63 = vcombine.high %v2949_v23, %v2949_v23  ;;  %v2972_v20 = vrot.slane %v2958_v21, %v13795_v10  ;;  %v3390_v31 = vcombine.low %v2941_v37, %v2949_v23  ;;  %v7519_v16 = vld [vmem:[#allocation2 + $0xe0] sm:$0xff] }
 0x137   : > { %v8318_v33 = vcombine.low %v8310_v24, %v14614_v45  ;;  %v2973_v18 = vcombine.high %v2965_v48, %v2965_v48  ;;  %v7898_v51 = vcombine.high %v7516_v13, %v7516_v13  ;;  %v7905_v8 = vrot.slane %v7516_v13, %v13795_v10 }
 0x138   : > { %v3731_v1 = vpack.c.bf16 %v3389_v26, %v3372_v27  ;;  %v2974_v5 = vcombine.high %v2972_v20, %v2972_v20  ;;  %v3391_v39 = vcombine.low %v2957_v63, %v2956_v25  ;;  %v3398_v4 = vrot.slane %v3390_v31, %v13795_v10 }
 0x139   : > { %12871 = vmatmul.mubr.msk.bf16.gmra.mrb[24].mxu0 %vm396_vm1, %v14730_v34  ;;  %v14775_v41 = vpack.c.bf16 %v8318_v33, %v8301_v15  ;;  %v3407_v29 = vcombine.low %v2965_v48, %v2973_v18  ;;  %v7912_v7 = vrot.slane %v7898_v51, %v13795_v10  ;;  %v7913_v45 = vcombine.high %v7905_v8, %v7905_v8  ;;  %v2782_v48 = vld [vmem:[#allocation2 + $0x62] sm:$0xff]  ;;  %v14812_v18 = vld [vmem:[#allocation2 + $0x6a] sm:$0x3f] }
 0x13a   : > { %12874 = vmatprep.mubr.msk.bf16.mxu0 %vm13652_vm0, %v13651_v2  ;;  %v3405_v42 = vrot.slane %v3391_v39, %v13795_v10  ;;  %v3408_v9 = vcombine.low %v2972_v20, %v2974_v5  ;;  %v2975_v17 = vcombine.high %v2779_v40, %v2779_v40  ;;  %v2982_v58 = vrot.slane %v2779_v40, %v13795_v10 }
 0x13b   : > { %v3415_v38 = vrot.slane %v3407_v29, %v13795_v10  ;;  %v8320_v43 = vcombine.low %v7905_v8, %v7913_v45  ;;  %v8336_v34 = vcombine.low %v7912_v7, %v14626_v59  ;;  %v2991_v49 = vcombine.high %v2780_v60, %v2780_v60 }
 0x13c   : > { %12639 = vmatmul.mubr.msk.bf16.gmra.mrb[8].mxu1 %vm396_vm1, %v3731_v1  ;;  %v3406_v53 = vcombine.low %v3398_v4, %v3405_v42  ;;  %v3422_v35 = vrot.slane %v3408_v9, %v13795_v10  ;;  %v2989_v30 = vrot.slane %v2975_v17, %v13795_v10  ;;  %v2990_v14 = vcombine.high %v2982_v58, %v2982_v58  ;;  %v7521_v9 = vld [vmem:[#allocation2 + $0xf0] sm:$0xff] }
 0x13d   : > { %12642 = vmatprep.mubr.msk.bf16.mxu1 %vm13652_vm0, %v13651_v2  ;;  %v8334_v57 = vrot.slane %v8320_v43, %v13795_v10  ;;  %v8344_v55 = vrot.slane %v8336_v34, %v13795_v10  ;;  %v2998_v59 = vrot.slane %v2780_v60, %v13795_v10  ;;  %v3005_v28 = vrot.slane %v2991_v49, %v13795_v10  ;;  %v7520_v60 = vld [vmem:[#allocation2 + $0xe8] sm:$0x3f] }
 0x13e   : > { %v3423_v50 = vcombine.low %v3415_v38, %v3422_v35  ;;  %v3015_v36 = vrot.slane %v2781_v46, %v13795_v10  ;;  %v3424_v47 = vcombine.low %v2982_v58, %v2990_v14  ;;  %v7931_v61 = vcombine.high %v7518_v22, %v7518_v22 }
 0x13f   : > { %v8335_v62 = vcombine.low %v14619_v52, %v8334_v57  ;;  %v8352_v0 = vcombine.low %v8344_v55, %v14655_v32  ;;  %v3006_v6 = vcombine.high %v2998_v59, %v2998_v59  ;;  %v3007_v11 = vcombine.high %v3005_v28, %v3005_v28 }
 0x140   : > { %v3732_v12 = vpack.c.bf16 %v3423_v50, %v3406_v53  ;;  %v3425_v54 = vcombine.low %v2989_v30, %v2998_v59  ;;  %v3432_v37 = vrot.slane %v3424_v47, %v13795_v10  ;;  %v7938_v44 = vrot.slane %v7518_v22, %v13795_v10  ;;  %v7522_v30 = vld [vmem:[#allocation2 + $0xf8] sm:$0x3f] }
 0x141   : > { %12875 = vmatmul.mubr.msk.bf16.gmra.mrb[28].mxu0 %vm396_vm1, %v14755_v3  ;;  %v14800_v27 = vpack.c.bf16 %v8352_v0, %v8335_v62  ;;  %v3441_v56 = vcombine.low %v3006_v6, %v3005_v28  ;;  %v3442_v23 = vcombine.low %v3007_v11, %v3015_v36  ;;  %v7945_v52 = vrot.slane %v7931_v61, %v13795_v10 }
 0x142   : > { %12878 = vmatprep.mubr.msk.bf16.mxu0 %vm13652_vm0, %v13651_v2  ;;  %v3439_v32 = vrot.slane %v3425_v54, %v13795_v10  ;;  %v7946_v21 = vcombine.high %v7938_v44, %v7938_v44  ;;  %v7947_v13 = vcombine.high %v7519_v16, %v7519_v16  ;;  %v7954_v15 = vrot.slane %v7519_v16, %v13795_v10  ;;  %v2784_v16 = vld [vmem:[#allocation2 + $0x72] sm:$0xff] }
 0x143   : > { %v3449_v24 = vrot.slane %v3441_v56, %v13795_v10  ;;  %v3456_v25 = vrot.slane %v3442_v23, %v13795_v10  ;;  %v8353_v3 = vcombine.low %v14642_v19, %v7938_v44  ;;  %v3008_v26 = vcombine.high %v2781_v46, %v2781_v46 }
 0x144   : > { %12643 = vmatmul.mubr.msk.bf16.gmra.mrb[12].mxu1 %vm396_vm1, %v3732_v12  ;;  %v3440_v63 = vcombine.low %v3432_v37, %v3439_v32  ;;  %v7961_v20 = vrot.slane %v7947_v13, %v13795_v10  ;;  %v7962_v31 = vcombine.high %v7954_v15, %v7954_v15  ;;  %v8354_v33 = vcombine.low %v7946_v21, %v7945_v52  ;;  %v2785_v32 = vld [vmem:[#allocation2 + $0x7a] sm:$0x3f] }
 0x145   : > { %12646 = vmatprep.mubr.msk.bf16.mxu1 %vm13652_vm0, %v13651_v2  ;;  %v3457_v51 = vcombine.low %v3449_v24, %v3456_v25  ;;  %v8361_v8 = vrot.slane %v8353_v3, %v13795_v10  ;;  %v3022_v40 = vrot.slane %v3008_v26, %v13795_v10  ;;  %v3023_v19 = vcombine.high %v3015_v36, %v3015_v36 }
 0x146   : > { %v7963_v1 = vcombine.high %v7961_v20, %v7961_v20  ;;  %v8368_v5 = vrot.slane %v8354_v33, %v13795_v10  ;;  %v8370_v39 = vcombine.low %v7954_v15, %v7962_v31  ;;  %v3024_v4 = vcombine.high %v2782_v48, %v2782_v48 }
 0x147   : > { %v3733_v29 = vpack.c.bf16 %v3457_v51, %v3440_v63  ;;  %v3031_v7 = vrot.slane %v2782_v48, %v13795_v10  ;;  %v3048_v45 = vrot.slane %v14812_v18, %v13795_v10  ;;  %v3458_v42 = vcombine.low %v3023_v19, %v3022_v40  ;;  %v2786_v19 = vld [vmem:[#allocation2 + $0x82] sm:$0xff] }
 0x148   : > { %v14822_v17 = vcombine.low %v8361_v8, %v8368_v5  ;;  %v8371_v58 = vcombine.low %v7961_v20, %v7963_v1  ;;  %v8378_v38 = vrot.slane %v8370_v39, %v13795_v10  ;;  %v3038_v43 = vrot.slane %v3024_v4, %v13795_v10 }
 0x149   : > { %12879 = vmatmul.mubr.msk.bf16.gmra.mrb[32].mxu0 %vm396_vm1, %v14775_v41  ;;  %v3039_v34 = vcombine.high %v3031_v7, %v3031_v7  ;;  %v3056_v46 = vcombine.high %v3048_v45, %v3048_v45  ;;  %v3466_v49 = vrot.slane %v3458_v42, %v13795_v10  ;;  %v7964_v22 = vcombine.high %v7520_v60, %v7520_v60 }
 0x14a   : > { %12882 = vmatprep.mubr.msk.bf16.mxu0 %vm13652_vm0, %v13651_v2  ;;  %v8385_v53 = vrot.slane %v8371_v58, %v13795_v10  ;;  %v3040_v35 = vcombine.high %v3038_v43, %v3038_v43  ;;  %v7971_v14 = vrot.slane %v7520_v60, %v13795_v10  ;;  %v7980_v57 = vcombine.high %v7521_v9, %v7521_v9  ;;  %v2787_v60 = vld [vmem:[#allocation2 + $0x8a] sm:$0x3f] }
 0x14b   : > { %v3459_v55 = vcombine.low %v3031_v7, %v3039_v34  ;;  %v3476_v59 = vcombine.low %v3048_v45, %v3056_v46  ;;  %v7978_v28 = vrot.slane %v7964_v22, %v13795_v10  ;;  %v7987_v41 = vrot.slane %v7521_v9, %v13795_v10  ;;  %v2788_v46 = vld [vmem:[#allocation2 + $0x92] sm:$0xff] }
 0x14c   : > { %12647 = vmatmul.mubr.msk.bf16.gmra.mrb[16].mxu1 %vm396_vm1, %v3733_v29  ;;  %v14836_v50 = vcombine.low %v8378_v38, %v8385_v53  ;;  %v3475_v36 = vcombine.low %v3038_v43, %v3040_v35  ;;  %v7979_v47 = vcombine.high %v7971_v14, %v7971_v14  ;;  %v7994_v61 = vrot.slane %v7980_v57, %v13795_v10  ;;  %v8676_v57 = vld [vmem:[#allocation2 + $0x21] sm:$0xff] }
 0x14d   : > { %12650 = vmatprep.mubr.msk.bf16.mxu1 %vm13652_vm0, %v13651_v2  ;;  %v3473_v62 = vrot.slane %v3459_v55, %v13795_v10  ;;  %v3490_v0 = vrot.slane %v3476_v59, %v13795_v10  ;;  %v7995_v6 = vcombine.high %v7987_v41, %v7987_v41  ;;  %v8004_v11 = vrot.slane %v7522_v30, %v13795_v10 }
 0x14e   : > { %v8464_v12 = vpack.c.bf16 %v14836_v50, %v14822_v17  ;;  %v3483_v54 = vrot.slane %v3475_v36, %v13795_v10  ;;  %v7996_v37 = vcombine.high %v7994_v61, %v7994_v61  ;;  %v8387_v44 = vcombine.low %v7971_v14, %v7979_v47 }
 0x14f   : > { %v3474_v56 = vcombine.low %v3466_v49, %v3473_v62  ;;  %v8388_v23 = vcombine.low %v7978_v28, %v7987_v41  ;;  %v8404_v52 = vcombine.low %v7995_v6, %v7994_v61  ;;  %v3041_v21 = vcombine.high %v14812_v18, %v14812_v18  ;;  %v8677_v6 = vld [vmem:[#allocation2 + $0x29] sm:$0x3f] }
 0x150   : > { %v3491_v13 = vcombine.low %v3483_v54, %v3490_v0  ;;  %v8395_v15 = vrot.slane %v8387_v44, %v13795_v10  ;;  %v8405_v24 = vcombine.low %v7996_v37, %v8004_v11  ;;  %v3057_v25 = vcombine.high %v2784_v16, %v2784_v16 }
 0x151   : > { %12883 = vmatmul.mubr.msk.bf16.gmra.mrb[36].mxu0 %vm396_vm1, %v14800_v27  ;;  %v8402_v3 = vrot.slane %v8388_v23, %v13795_v10  ;;  %v8412_v48 = vrot.slane %v8404_v52, %v13795_v10  ;;  %v3055_v26 = vrot.slane %v3041_v21, %v13795_v10  ;;  %v3064_v63 = vrot.slane %v2784_v16, %v13795_v10 }
 0x152   : > { %12886 = vmatprep.mubr.msk.bf16.mxu0 %vm13652_vm0, %v13651_v2  ;;  %v3734_v20 = vpack.c.bf16 %v3491_v13, %v3474_v56  ;;  %v8419_v31 = vrot.slane %v8405_v24, %v13795_v10  ;;  %v3071_v33 = vrot.slane %v3057_v25, %v13795_v10  ;;  %v3074_v18 = vcombine.high %v2785_v32, %v2785_v32  ;;  %v8678_v56 = vld [vmem:[#allocation2 + $0x31] sm:$0xff] }
 0x153   : > { %v14860_v51 = vcombine.low %v8395_v15, %v8402_v3  ;;  %v3072_v27 = vcombine.high %v3064_v63, %v3064_v63  ;;  %v3081_v8 = vrot.slane %v2785_v32, %v13795_v10  ;;  %v3492_v40 = vcombine.low %v3055_v26, %v3064_v63 }
 0x154   : > { %12651 = vmatmul.mubr.msk.bf16.gmra.mrb[20].mxu1 %vm396_vm1, %v3734_v20  ;;  %v14864_v1 = vcombine.low %v8412_v48, %v8419_v31  ;;  %v3073_v5 = vcombine.high %v3071_v33, %v3071_v33  ;;  %v3088_v39 = vrot.slane %v3074_v18, %v13795_v10  ;;  %v7997_v4 = vcombine.high %v7522_v30, %v7522_v30  ;;  %v2789_v20 = vld [vmem:[#allocation2 + $0x9a] sm:$0x3f] }
 0x155   : > { %12654 = vmatprep.mubr.msk.bf16.mxu1 %vm13652_vm0, %v13651_v2  ;;  %v3089_v29 = vcombine.high %v3081_v8, %v3081_v8  ;;  %v3493_v7 = vcombine.low %v3072_v27, %v3071_v33  ;;  %v3500_v45 = vrot.slane %v3492_v40, %v13795_v10  ;;  %v8012_v42 = vcombine.high %v8004_v11, %v8004_v11 }
 0x156   : > { %v8465_v9 = vpack.c.bf16 %v14864_v1, %v14860_v51  ;;  %v3509_v17 = vcombine.low %v3073_v5, %v3081_v8  ;;  %v8011_v58 = vrot.slane %v7997_v4, %v13795_v10  ;;  %v3090_v38 = vcombine.high %v2786_v19, %v2786_v19  ;;  %v14901_v51 = vld [vmem:[#allocation2 + $0xa2] sm:$0xff] }
 0x157   : > { %v3507_v43 = vrot.slane %v3493_v7, %v13795_v10  ;;  %v3510_v34 = vcombine.low %v3089_v29, %v3088_v39  ;;  %v3097_v49 = vrot.slane %v2786_v19, %v13795_v10  ;;  %v3107_v22 = vcombine.high %v2787_v60, %v2787_v60 }
 0x158   : > { %v3517_v53 = vrot.slane %v3509_v17, %v13795_v10  ;;  %v8421_v35 = vcombine.low %v8012_v42, %v8011_v58  ;;  %v3104_v30 = vrot.slane %v3090_v38, %v13795_v10  ;;  %v3114_v14 = vrot.slane %v2787_v60, %v13795_v10 }
 0x159   : > { %12887 = vmatmul.mubr.msk.bf16.gmra.mrb[40].mxu0 %vm396_vm1, %v8464_v12  ;;  %v3508_v55 = vcombine.low %v3500_v45, %v3507_v43  ;;  %v3524_v59 = vrot.slane %v3510_v34, %v13795_v10  ;;  %v3105_v28 = vcombine.high %v3097_v49, %v3097_v49  ;;  %v3121_v41 = vrot.slane %v3107_v22, %v13795_v10  ;;  %v8679_v43 = vld [vmem:[#allocation2 + $0x39] sm:$0x3f] }
 0x15a   : > { %12890 = vmatprep.mubr.msk.bf16.mxu0 %vm13652_vm0, %v13651_v2  ;;  %v14884_v50 = vrot.slane %v8421_v35, %v13795_v10  ;;  %v3106_v36 = vcombine.high %v3104_v30, %v3104_v30  ;;  %v3122_v47 = vcombine.high %v3114_v14, %v3114_v14  ;;  %v3130_v61 = vrot.slane %v2788_v46, %v13795_v10 }
 0x15b   : > { %v3525_v62 = vcombine.low %v3517_v53, %v3524_v59  ;;  %v3526_v0 = vcombine.low %v3097_v49, %v3105_v28  ;;  %v8732_v11 = vcombine.high %v8676_v57, %v8676_v57  ;;  %v8739_v16 = vrot.slane %v8676_v57, %v13795_v10  ;;  %v14915_v53 = vld [vmem:[#allocation2 + $0x41] sm:$0xff] }
 0x15c   : > { %v8466_v12 = vpack.c.bf16 %v14884_v50, %v14884_v50  ;;  %v3527_v54 = vcombine.low %v3104_v30, %v3106_v36  ;;  %v3543_v37 = vcombine.low %v3114_v14, %v3122_v47  ;;  %v3544_v44 = vcombine.low %v3121_v41, %v3130_v61 }
 0x15d   : > { %v3735_v23 = vpack.c.bf16 %v3525_v62, %v3508_v55  ;;  %v3534_v52 = vrot.slane %v3526_v0, %v13795_v10  ;;  %v8746_v32 = vrot.slane %v8732_v11, %v13795_v10  ;;  %v8747_v21 = vcombine.high %v8739_v16, %v8739_v16  ;;  %v2791_v0 = vld [vmem:[#allocation2 + $0xaa] sm:$0x3f] }
 0x15e   : > { %v3541_v13 = vrot.slane %v3527_v54, %v13795_v10  ;;  %v3551_v15 = vrot.slane %v3543_v37, %v13795_v10  ;;  %v3558_v24 = vrot.slane %v3544_v44, %v13795_v10  ;;  %v8749_v25 = vcombine.high %v8677_v6, %v8677_v6 }
 0x15f   : > { %12655 = vmatmul.mubr.msk.bf16.gmra.mrb[24].mxu1 %vm396_vm1, %v3735_v23  ;;  %v8748_v3 = vcombine.high %v8746_v32, %v8746_v32  ;;  %v8756_v48 = vrot.slane %v8677_v6, %v13795_v10  ;;  %v8772_v26 = vrot.slane %v8678_v56, %v13795_v10  ;;  %v9194_v63 = vcombine.low %v8739_v16, %v8747_v21 }
 0x160   : > { %12658 = vmatprep.mubr.msk.bf16.mxu1 %vm13652_vm0, %v13651_v2  ;;  %v3542_v31 = vcombine.low %v3534_v52, %v3541_v13  ;;  %v3559_v33 = vcombine.low %v3551_v15, %v3558_v24  ;;  %v8763_v18 = vrot.slane %v8749_v25, %v13795_v10  ;;  %v3123_v27 = vcombine.high %v2788_v46, %v2788_v46  ;;  %v2792_v24 = vld [vmem:[#allocation2 + $0xb2] sm:$0xff] }
 0x161   : > { %12891 = vmatmul.mubr.msk.bf16.gmra.mrb[44].mxu0 %vm396_vm1, %v8465_v9  ;;  %v8764_v8 = vcombine.high %v8756_v48, %v8756_v48  ;;  %v9195_v40 = vcombine.low %v8746_v32, %v8748_v3  ;;  %v9202_v19 = vrot.slane %v9194_v63, %v13795_v10  ;;  %v3138_v1 = vcombine.high %v3130_v61, %v3130_v61 }
 0x162   : > { %12894 = vmatprep.mubr.msk.bf16.mxu0 %vm13652_vm0, %v13651_v2  ;;  %v3736_v5 = vpack.c.bf16 %v3559_v33, %v3542_v31  ;;  %v9212_v39 = vcombine.low %v8763_v18, %v8772_v26  ;;  %v3137_v4 = vrot.slane %v3123_v27, %v13795_v10  ;;  %v3140_v60 = vcombine.high %v2789_v20, %v2789_v20  ;;  %v13534_v31 = vld [vmem:[%s15766_s3 + $0x40] sm:$0xff]  }
 0x163   : > { %v9209_v29 = vrot.slane %v9195_v40, %v13795_v10  ;;  %v9211_v7 = vcombine.low %v8756_v48, %v8764_v8  ;;  %v3147_v45 = vrot.slane %v2789_v20, %v13795_v10  ;;  %v3163_v42 = vrot.slane %v14901_v51, %v13795_v10  ;;  %v8681_v20 = vld [vmem:[#allocation2 + $0x49] sm:$0x3f] }
 0x164   : > { %v9226_v9 = vrot.slane %v9212_v39, %v13795_v10  ;;  %v3139_v17 = vcombine.high %v3137_v4, %v3137_v4  ;;  %v3154_v58 = vrot.slane %v3140_v60, %v13795_v10  ;;  %v3560_v38 = vcombine.low %v3138_v1, %v3137_v4 }
 0x165   : > { %v9210_v34 = vcombine.low %v9202_v19, %v9209_v29  ;;  %v9219_v46 = vrot.slane %v9211_v7, %v13795_v10  ;;  %v3155_v49 = vcombine.high %v3147_v45, %v3147_v45  ;;  %v3171_v22 = vcombine.high %v3163_v42, %v3163_v42 }
 0x166   : > { %v3561_v35 = vcombine.low %v3139_v17, %v3147_v45  ;;  %v3568_v30 = vrot.slane %v3560_v38, %v13795_v10  ;;  %v8765_v14 = vcombine.high %v8678_v56, %v8678_v56  ;;  %v8780_v57 = vcombine.high %v8772_v26, %v8772_v26 }
 0x167   : > { %12659 = vmatmul.mubr.msk.bf16.gmra.mrb[28].mxu1 %vm396_vm1, %v3736_v5  ;;  %v9227_v55 = vcombine.low %v9219_v46, %v9226_v9  ;;  %v3577_v59 = vcombine.low %v3155_v49, %v3154_v58  ;;  %v3578_v28 = vcombine.low %v3163_v42, %v3171_v22  ;;  %v8782_v41 = vcombine.high %v8679_v43, %v8679_v43  ;;  %v8682_v9 = vld [vmem:[#allocation2 + $0x51] sm:$0xff] }
 0x168   : > { %12662 = vmatprep.mubr.msk.bf16.mxu1 %vm13652_vm0, %v13651_v2  ;;  %v3575_v36 = vrot.slane %v3561_v35, %v13795_v10  ;;  %v8779_v47 = vrot.slane %v8765_v14, %v13795_v10  ;;  %v8789_v61 = vrot.slane %v8679_v43, %v13795_v10  ;;  %v8805_v62 = vrot.slane %v14915_v53, %v13795_v10  ;;  %v2793_v14 = vld [vmem:[#allocation2 + $0xba] sm:$0x3f] }
 0x169   : > { %12895 = vmatmul.mubr.msk.bf16.gmra.mrb[48].mxu0 %vm396_vm1, %v8466_v12  ;;  %v9635_v6 = vpack.c.bf16 %v9227_v55, %v9210_v34  ;;  %v3585_v11 = vrot.slane %v3577_v59, %v13795_v10  ;;  %v3592_v16 = vrot.slane %v3578_v28, %v13795_v10  ;;  %v8796_v54 = vrot.slane %v8782_v41, %v13795_v10  ;;  %v2794_v28 = vld [vmem:[#allocation2 + $0xc2] sm:$0xff] }
 0x16a   : > { %12900 = vmatprep.mubr.msk.bf16.mxu0 %vm13652_vm0, %v13651_v2  ;;  %v3576_v37 = vcombine.low %v3568_v30, %v3575_v36  ;;  %v8781_v44 = vcombine.high %v8779_v47, %v8779_v47  ;;  %v8797_v56 = vcombine.high %v8789_v61, %v8789_v61  ;;  %v8813_v23 = vcombine.high %v8805_v62, %v8805_v62 }
 0x16b   : > { %v3593_v52 = vcombine.low %v3585_v11, %v3592_v16  ;;  %v9228_v32 = vcombine.low %v8780_v57, %v8779_v47  ;;  %v3156_v50 = vcombine.high %v14901_v51, %v14901_v51  ;;  %v3173_v12 = vcombine.high %v2791_v0, %v2791_v0 }
 0x16c   : > { %v9229_v21 = vcombine.low %v8781_v44, %v8789_v61  ;;  %v9245_v13 = vcombine.low %v8797_v56, %v8796_v54  ;;  %v9246_v15 = vcombine.low %v8805_v62, %v8813_v23  ;;  %v3180_v25 = vrot.slane %v2791_v0, %v13795_v10  ;;  %v8683_v23 = vld [vmem:[#allocation2 + $0x59] sm:$0x3f] }
 0x16d   : > { %v3737_v3 = vpack.c.bf16 %v3593_v52, %v3576_v37  ;;  %v9236_v48 = vrot.slane %v9228_v32, %v13795_v10  ;;  %v3170_v26 = vrot.slane %v3156_v50, %v13795_v10  ;;  %v3187_v63 = vrot.slane %v3173_v12, %v13795_v10 }
 0x16e   : > { %v9243_v33 = vrot.slane %v9229_v21, %v13795_v10  ;;  %v9253_v18 = vrot.slane %v9245_v13, %v13795_v10  ;;  %v9260_v51 = vrot.slane %v9246_v15, %v13795_v10  ;;  %v3188_v27 = vcombine.high %v3180_v25, %v3180_v25 }
 0x16f   : > { %12663 = vmatmul.mubr.msk.bf16.gmra.mrb[32].mxu1 %vm396_vm1, %v3737_v3  ;;  %v3172_v8 = vcombine.high %v3170_v26, %v3170_v26  ;;  %v3189_v40 = vcombine.high %v2792_v24, %v2792_v24  ;;  %v3196_v19 = vrot.slane %v2792_v24, %v13795_v10  ;;  %v8798_v1 = vcombine.high %v14915_v53, %v14915_v53 }
 0x170   : > { %v9244_v5 = vcombine.low %v9236_v48, %v9243_v33  ;;  %v9261_v39 = vcombine.low %v9253_v18, %v9260_v51  ;;  %12666 = vmatprep.mubr.msk.bf16.mxu1 %vm13652_vm0, %v13651_v2  ;;  %v3595_v4 = vcombine.low %v3180_v25, %v3188_v27  ;;  %v8815_v60 = vcombine.high %v8681_v20, %v8681_v20  ;;  %v8684_v25 = vld [vmem:[#allocation2 + $0x61] sm:$0xff] }
 0x171   : > { %12901 = vmatmul.mubr.msk.bf16.vlgmr.msra.gmra.mrb[0].mxu0 %vm396_vm1, %v9635_v6  ;;  %v3203_v29 = vrot.slane %v3189_v40, %v13795_v10  ;;  %v3204_v7 = vcombine.high %v3196_v19, %v3196_v19  ;;  %v3594_v45 = vcombine.low %v3170_v26, %v3172_v8  ;;  %v3611_v42 = vcombine.low %v3187_v63, %v3196_v19  ;;  %v2795_v19 = vld [vmem:[#allocation2 + $0xca] sm:$0x3f] }
 0x172   : > { %12953 = vmatpush3.bf16.msra.mxu0 %v13534_v31  ;;  %12904 = vmatprep.mubr.msk.bf16.mxu0 %vm13652_vm0, %v13651_v2  ;;  %v9636_v17 = vpack.c.bf16 %v9261_v39, %v9244_v5  ;;  %v3609_v58 = vrot.slane %v3595_v4, %v13795_v10  ;;  %v8812_v38 = vrot.slane %v8798_v1, %v13795_v10 }
 0x173   : > { %v3602_v43 = vrot.slane %v3594_v45, %v13795_v10  ;;  %v3612_v34 = vcombine.low %v3204_v7, %v3203_v29  ;;  %v3619_v46 = vrot.slane %v3611_v42, %v13795_v10  ;;  %v8822_v49 = vrot.slane %v8681_v20, %v13795_v10  ;;  %v2796_v42 = vld [vmem:[#allocation2 + $0xd2] sm:$0xff] }
 0x174   : > { %v8814_v22 = vcombine.high %v8812_v38, %v8812_v38  ;;  %v8829_v53 = vrot.slane %v8815_v60, %v13795_v10  ;;  %v8831_v35 = vcombine.high %v8682_v9, %v8682_v9  ;;  %v8838_v30 = vrot.slane %v8682_v9, %v13795_v10 }
 0x175   : > { %v3610_v57 = vcombine.low %v3602_v43, %v3609_v58  ;;  %v3626_v55 = vrot.slane %v3612_v34, %v13795_v10  ;;  %v8830_v59 = vcombine.high %v8822_v49, %v8822_v49  ;;  %v3205_v41 = vcombine.high %v3203_v29, %v3203_v29 }
 0x176   : > { %v8845_v36 = vrot.slane %v8831_v35, %v13795_v10  ;;  %v8846_v47 = vcombine.high %v8838_v30, %v8838_v30  ;;  %v9262_v61 = vcombine.low %v8812_v38, %v8814_v22  ;;  %v9279_v62 = vcombine.low %v8829_v53, %v8838_v30 }
 0x177   : > { %v3627_v0 = vcombine.low %v3619_v46, %v3626_v55  ;;  %v9263_v6 = vcombine.low %v8822_v49, %v8830_v59  ;;  %v3206_v11 = vcombine.high %v2793_v14, %v2793_v14  ;;  %v3213_v16 = vrot.slane %v2793_v14, %v13795_v10  ;;  %v2797_v49 = vld [vmem:[#allocation2 + $0xda] sm:$0x3f] }
 0x178   : > { %v9270_v54 = vrot.slane %v9262_v61, %v13795_v10  ;;  %v9280_v37 = vcombine.low %v8846_v47, %v8845_v36  ;;  %v9287_v44 = vrot.slane %v9279_v62, %v13795_v10  ;;  %v3222_v56 = vcombine.high %v2794_v28, %v2794_v28 }
 0x179   : > { %12905 = vmatmul.mubr.msk.bf16.gmra.mrb[4].mxu0 %vm396_vm1, %v9636_v17  ;;  %v3738_v52 = vpack.c.bf16 %v3627_v0, %v3610_v57  ;;  %v9277_v32 = vrot.slane %v9263_v6, %v13795_v10  ;;  %v3220_v50 = vrot.slane %v3206_v11, %v13795_v10  ;;  %v3221_v12 = vcombine.high %v3213_v16, %v3213_v16  ;;  %v8686_v0 = vld [vmem:[#allocation2 + $0x71] sm:$0xff] }
 0x17a   : > { %12908 = vmatprep.mubr.msk.bf16.mxu0 %vm13652_vm0, %v13651_v2  ;;  %v9294_v21 = vrot.slane %v9280_v37, %v13795_v10  ;;  %v3229_v13 = vrot.slane %v2794_v28, %v13795_v10  ;;  %v3236_v15 = vrot.slane %v3222_v56, %v13795_v10  ;;  %v3628_v24 = vcombine.low %v3205_v41, %v3213_v16  ;;  %v8685_v41 = vld [vmem:[#allocation2 + $0x69] sm:$0x3f] }
 0x17b   : > { %12667 = vmatmul.mubr.msk.bf16.gmra.mrb[36].mxu1 %vm396_vm1, %v3738_v52  ;;  %v9278_v3 = vcombine.low %v9270_v54, %v9277_v32  ;;  %v3629_v48 = vcombine.low %v3221_v12, %v3220_v50  ;;  %v8847_v26 = vcombine.high %v8845_v36, %v8845_v36  ;;  %v8848_v63 = vcombine.high %v8683_v23, %v8683_v23  ;;  %v8687_v12 = vld [vmem:[#allocation2 + $0x79] sm:$0x3f] }
 0x17c   : > { %v9295_v20 = vcombine.low %v9287_v44, %v9294_v21  ;;  %12670 = vmatprep.mubr.msk.bf16.mxu1 %vm13652_vm0, %v13651_v2  ;;  %v3237_v31 = vcombine.high %v3229_v13, %v3229_v13  ;;  %v3238_v33 = vcombine.high %v3236_v15, %v3236_v15  ;;  %v3636_v18 = vrot.slane %v3628_v24, %v13795_v10 }
 0x17d   : > { %v3643_v51 = vrot.slane %v3629_v48, %v13795_v10  ;;  %v8855_v27 = vrot.slane %v8683_v23, %v13795_v10  ;;  %v8862_v8 = vrot.slane %v8848_v63, %v13795_v10  ;;  %v8864_v40 = vcombine.high %v8684_v25, %v8684_v25 }
 0x17e   : > { %v9637_v1 = vpack.c.bf16 %v9295_v20, %v9278_v3  ;;  %v3645_v5 = vcombine.low %v3229_v13, %v3237_v31  ;;  %v3646_v39 = vcombine.low %v3236_v15, %v3238_v33  ;;  %v8871_v4 = vrot.slane %v8684_v25, %v13795_v10 }
 0x17f   : > { %v3644_v60 = vcombine.low %v3636_v18, %v3643_v51  ;;  %v8863_v29 = vcombine.high %v8855_v27, %v8855_v27  ;;  %v8878_v7 = vrot.slane %v8864_v40, %v13795_v10  ;;  %v9296_v45 = vcombine.low %v8847_v26, %v8855_v27 }
 0x180   : > { %v3653_v9 = vrot.slane %v3645_v5, %v13795_v10  ;;  %v3660_v17 = vrot.slane %v3646_v39, %v13795_v10  ;;  %v8879_v58 = vcombine.high %v8871_v4, %v8871_v4  ;;  %v3239_v38 = vcombine.high %v2795_v19, %v2795_v19 }
 0x181   : > { %12909 = vmatmul.mubr.msk.bf16.gmra.mrb[8].mxu0 %vm396_vm1, %v9637_v1  ;;  %v8880_v43 = vcombine.high %v8878_v7, %v8878_v7  ;;  %v9297_v34 = vcombine.low %v8863_v29, %v8862_v8  ;;  %v9304_v46 = vrot.slane %v9296_v45, %v13795_v10  ;;  %v3246_v22 = vrot.slane %v2795_v19, %v13795_v10  ;;  %v8688_v19 = vld [vmem:[#allocation2 + $0x81] sm:$0xff] }
 0x182   : > { %v3661_v53 = vcombine.low %v3653_v9, %v3660_v17  ;;  %12912 = vmatprep.mubr.msk.bf16.mxu0 %vm13652_vm0, %v13651_v2  ;;  %v9313_v35 = vcombine.low %v8871_v4, %v8879_v58  ;;  %v3253_v30 = vrot.slane %v3239_v38, %v13795_v10  ;;  %v3255_v14 = vcombine.high %v2796_v42, %v2796_v42 }
 0x183   : > { %v9311_v57 = vrot.slane %v9297_v34, %v13795_v10  ;;  %v9314_v55 = vcombine.low %v8878_v7, %v8880_v43  ;;  %v3254_v59 = vcombine.high %v3246_v22, %v3246_v22  ;;  %v3262_v28 = vrot.slane %v2796_v42, %v13795_v10  ;;  %v8689_v42 = vld [vmem:[#allocation2 + $0x89] sm:$0x3f]  ;;  %v3951_v43 = vld [vmem:[#allocation2 + $0x10] sm:$0xff] }
 0x184   : > { %v3739_v36 = vpack.c.bf16 %v3661_v53, %v3644_v60  ;;  %v9321_v47 = vrot.slane %v9313_v35, %v13795_v10  ;;  %v3269_v61 = vrot.slane %v3255_v14, %v13795_v10  ;;  %v3279_v62 = vrot.slane %v2797_v49, %v13795_v10 }
 0x185   : > { %v9312_v6 = vcombine.low %v9304_v46, %v9311_v57  ;;  %v9328_v11 = vrot.slane %v9314_v55, %v13795_v10  ;;  %v3270_v16 = vcombine.high %v3262_v28, %v3262_v28  ;;  %v3662_v54 = vcombine.low %v3246_v22, %v3254_v59  ;;  %v3952_v59 = vld [vmem:[#allocation2 + $0x18] sm:$0x3f] }
 0x186   : > { %12671 = vmatmul.mubr.msk.bf16.gmra.mrb[40].mxu1 %vm396_vm1, %v3739_v36  ;;  %v3271_v37 = vcombine.high %v3269_v61, %v3269_v61  ;;  %v3663_v44 = vcombine.low %v3253_v30, %v3262_v28  ;;  %v8881_v56 = vcombine.high %v8685_v41, %v8685_v41  ;;  %v8888_v23 = vrot.slane %v8685_v41, %v13795_v10 }
 0x187   : > { %v9329_v52 = vcombine.low %v9321_v47, %v9328_v11  ;;  %12674 = vmatprep.mubr.msk.bf16.mxu1 %vm13652_vm0, %v13651_v2  ;;  %v3670_v32 = vrot.slane %v3662_v54, %v13795_v10  ;;  %v3679_v50 = vcombine.low %v3270_v16, %v3269_v61  ;;  %v8897_v21 = vcombine.high %v8686_v0, %v8686_v0 }
 0x188   : > { %v3677_v13 = vrot.slane %v3663_v44, %v13795_v10  ;;  %v3680_v15 = vcombine.low %v3271_v37, %v3279_v62  ;;  %v8895_v24 = vrot.slane %v8881_v56, %v13795_v10  ;;  %v8896_v25 = vcombine.high %v8888_v23, %v8888_v23 }
 0x189   : > { %v9638_v3 = vpack.c.bf16 %v9329_v52, %v9312_v6  ;;  %v3687_v48 = vrot.slane %v3679_v50, %v13795_v10  ;;  %v8904_v26 = vrot.slane %v8686_v0, %v13795_v10  ;;  %v8911_v63 = vrot.slane %v8897_v21, %v13795_v10  ;;  %v3953_v0 = vld [vmem:[#allocation2 + $0x20] sm:$0xff]  ;;  %v8690_v21 = vld [vmem:[#allocation2 + $0x91] sm:$0xff] }
 0x18a   : > { %v3678_v20 = vcombine.low %v3670_v32, %v3677_v13  ;;  %v3694_v31 = vrot.slane %v3680_v15, %v13795_v10  ;;  %v8921_v33 = vrot.slane %v8687_v12, %v13795_v10  ;;  %v9330_v18 = vcombine.low %v8888_v23, %v8896_v25 }
 0x18b   : > { %12913 = vmatmul.mubr.msk.bf16.gmra.mrb[12].mxu0 %vm396_vm1, %v9638_v3  ;;  %v8912_v51 = vcombine.high %v8904_v26, %v8904_v26  ;;  %v8913_v27 = vcombine.high %v8911_v63, %v8911_v63  ;;  %v9331_v8 = vcombine.low %v8895_v24, %v8904_v26  ;;  %v3272_v40 = vcombine.high %v2797_v49, %v2797_v49 }
 0x18c   : > { %v3695_v1 = vcombine.low %v3687_v48, %v3694_v31  ;;  %12916 = vmatprep.mubr.msk.bf16.mxu0 %vm13652_vm0, %v13651_v2  ;;  %v9338_v5 = vrot.slane %v9330_v18, %v13795_v10  ;;  %v3287_v39 = vcombine.high %v3279_v62, %v3279_v62  ;;  %v8914_v4 = vcombine.high %v8687_v12, %v8687_v12 }
 0x18d   : > { %v9345_v60 = vrot.slane %v9331_v8, %v13795_v10  ;;  %v9347_v29 = vcombine.low %v8912_v51, %v8911_v63  ;;  %v9348_v7 = vcombine.low %v8913_v27, %v8921_v33  ;;  %v3286_v45 = vrot.slane %v3272_v40, %v13795_v10  ;;  %v8691_v63 = vld [vmem:[#allocation2 + $0x99] sm:$0x3f] }
 0x18e   : > { %v3740_v9 = vpack.c.bf16 %v3695_v1, %v3678_v20  ;;  %v8928_v17 = vrot.slane %v8914_v4, %v13795_v10  ;;  %v8929_v58 = vcombine.high %v8921_v33, %v8921_v33  ;;  %v8930_v38 = vcombine.high %v8688_v19, %v8688_v19 }
 0x18f   : > { %v9346_v34 = vcombine.low %v9338_v5, %v9345_v60  ;;  %v9355_v46 = vrot.slane %v9347_v29, %v13795_v10  ;;  %v9362_v49 = vrot.slane %v9348_v7, %v13795_v10  ;;  %v3696_v22 = vcombine.low %v3287_v39, %v3286_v45 }
 0x190   : > { %12675 = vmatmul.mubr.msk.bf16.gmra.mrb[44].mxu1 %vm396_vm1, %v3740_v9  ;;  %v8937_v53 = vrot.slane %v8688_v19, %v13795_v10  ;;  %v8944_v35 = vrot.slane %v8930_v38, %v13795_v10  ;;  %v8954_v30 = vrot.slane %v8689_v42, %v13795_v10  ;;  %v9364_v14 = vcombine.low %v8929_v58, %v8928_v17 }
 0x191   : > { %v9363_v57 = vcombine.low %v9355_v46, %v9362_v49  ;;  %12678 = vmatprep.mubr.msk.bf16.mxu1 %vm13652_vm0, %v13651_v2  ;;  %v3703_v55 = vrot.slane %v3696_v22, %v13795_v10  ;;  %v4007_v28 = vcombine.high %v3951_v43, %v3951_v43  ;;  %v4014_v41 = vrot.slane %v3951_v43, %v13795_v10  ;;  %v3955_v49 = vld [vmem:[#allocation2 + $0x30] sm:$0xff] }
 0x192   : > { %v8945_v36 = vcombine.high %v8937_v53, %v8937_v53  ;;  %v8946_v47 = vcombine.high %v8944_v35, %v8944_v35  ;;  %v8962_v61 = vcombine.high %v8954_v30, %v8954_v30  ;;  %v9372_v62 = vrot.slane %v9364_v14, %v13795_v10 }
 0x193   : > { %v9639_v6 = vpack.c.bf16 %v9363_v57, %v9346_v34  ;;  %v3741_v11 = vpack.c.bf16 %v3703_v55, %v3703_v55  ;;  %v4021_v16 = vrot.slane %v4007_v28, %v13795_v10  ;;  %v4022_v54 = vcombine.high %v4014_v41, %v4014_v41 }
 0x194   : > { %v9365_v37 = vcombine.low %v8937_v53, %v8945_v36  ;;  %v9381_v44 = vcombine.low %v8944_v35, %v8946_v47  ;;  %v9382_v56 = vcombine.low %v8954_v30, %v8962_v61  ;;  %v4024_v23 = vcombine.high %v3952_v59, %v3952_v59 }
 0x195   : > { %12917 = vmatmul.mubr.msk.bf16.gmra.mrb[16].mxu0 %vm396_vm1, %v9639_v6  ;;  %v4023_v52 = vcombine.high %v4021_v16, %v4021_v16  ;;  %v4031_v32 = vrot.slane %v3952_v59, %v13795_v10  ;;  %v4047_v50 = vrot.slane %v3953_v0, %v13795_v10  ;;  %v4469_v12 = vcombine.low %v4014_v41, %v4022_v54  ;;  %v8692_v41 = vld [vmem:[#allocation2 + $0xa1] sm:$0xff]  ;;  %v8693_v54 = vld [vmem:[#allocation2 + $0xa9] sm:$0x3f] }
 0x196   : > { %12920 = vmatprep.mubr.msk.bf16.mxu0 %vm13652_vm0, %v13651_v2  ;;  %v9379_v13 = vrot.slane %v9365_v37, %v13795_v10  ;;  %v9389_v15 = vrot.slane %v9381_v44, %v13795_v10  ;;  %v9396_v24 = vrot.slane %v9382_v56, %v13795_v10  ;;  %v4038_v25 = vrot.slane %v4024_v23, %v13795_v10  ;;  %v13642_v56 = vld [vmem:[%s15766_s3 + $0x20] sm:$0xff]  }
 0x197   : > { %v4039_v3 = vcombine.high %v4031_v32, %v4031_v32  ;;  %v4470_v48 = vcombine.low %v4021_v16, %v4023_v52  ;;  %v4477_v26 = vrot.slane %v4469_v12, %v13795_v10  ;;  %v8947_v20 = vcombine.high %v8689_v42, %v8689_v42  ;;  %v3954_v42 = vld [vmem:[#allocation2 + $0x28] sm:$0x3f] }
 0x198   : > { %12679 = vmatmul.mubr.msk.bf16.gmra.mrb[48].mxu1 %vm396_vm1, %v3741_v11  ;;  %v9380_v31 = vcombine.low %v9372_v62, %v9379_v13  ;;  %v9397_v33 = vcombine.low %v9389_v15, %v9396_v24  ;;  %v4487_v18 = vcombine.low %v4038_v25, %v4047_v50  ;;  %v8963_v51 = vcombine.high %v8690_v21, %v8690_v21  ;;  %v8694_v15 = vld [vmem:[#allocation2 + $0xb1] sm:$0xff] }
 0x199   : > { %12684 = vmatprep.mubr.msk.bf16.mxu1 %vm13652_vm0, %v13651_v2  ;;  %v4484_v27 = vrot.slane %v4470_v48, %v13795_v10  ;;  %v4486_v8 = vcombine.low %v4031_v32, %v4039_v3  ;;  %v8961_v40 = vrot.slane %v8947_v20, %v13795_v10  ;;  %v8970_v19 = vrot.slane %v8690_v21, %v13795_v10  ;;  %v3956_v20 = vld [vmem:[#allocation2 + $0x38] sm:$0x3f] }
 0x19a   : > { %v9640_v1 = vpack.c.bf16 %v9397_v33, %v9380_v31  ;;  %v4501_v5 = vrot.slane %v4487_v18, %v13795_v10  ;;  %v8977_v39 = vrot.slane %v8963_v51, %v13795_v10  ;;  %v8980_v4 = vcombine.high %v8691_v63, %v8691_v63 }
 0x19b   : > { %v4485_v60 = vcombine.low %v4477_v26, %v4484_v27  ;;  %v4494_v29 = vrot.slane %v4486_v8, %v13795_v10  ;;  %v8978_v7 = vcombine.high %v8970_v19, %v8970_v19  ;;  %v8987_v45 = vrot.slane %v8691_v63, %v13795_v10 }
 0x19c   : > { %v8979_v9 = vcombine.high %v8977_v39, %v8977_v39  ;;  %v8994_v17 = vrot.slane %v8980_v4, %v13795_v10  ;;  %v9398_v58 = vcombine.low %v8961_v40, %v8970_v19  ;;  %v4040_v38 = vcombine.high %v3953_v0, %v3953_v0 }
 0x19d   : > { %12921 = vmatmul.mubr.msk.bf16.gmra.mrb[20].mxu0 %vm396_vm1, %v9640_v1  ;;  %v4502_v43 = vcombine.low %v4494_v29, %v4501_v5  ;;  %v8995_v34 = vcombine.high %v8987_v45, %v8987_v45  ;;  %v9399_v46 = vcombine.low %v8978_v7, %v8977_v39  ;;  %v4055_v22 = vcombine.high %v4047_v50, %v4047_v50  ;;  %v3957_v39 = vld [vmem:[#allocation2 + $0x40] sm:$0xff] }
 0x19e   : > { %12924 = vmatprep.mubr.msk.bf16.mxu0 %vm13652_vm0, %v13651_v2  ;;  %v9406_v53 = vrot.slane %v9398_v58, %v13795_v10  ;;  %v9415_v35 = vcombine.low %v8979_v9, %v8987_v45  ;;  %v4054_v30 = vrot.slane %v4040_v38, %v13795_v10  ;;  %v4057_v14 = vcombine.high %v3954_v42, %v3954_v42 }
 0x19f   : > { %v4910_v57 = vpack.c.bf16 %v4502_v43, %v4485_v60  ;;  %v9413_v55 = vrot.slane %v9399_v46, %v13795_v10  ;;  %v9416_v59 = vcombine.low %v8995_v34, %v8994_v17  ;;  %v4064_v28 = vrot.slane %v3954_v42, %v13795_v10 }
 0x1a0   : > { %v9423_v36 = vrot.slane %v9415_v35, %v13795_v10  ;;  %v4056_v47 = vcombine.high %v4054_v30, %v4054_v30  ;;  %v4071_v61 = vrot.slane %v4057_v14, %v13795_v10  ;;  %v4080_v62 = vrot.slane %v3955_v49, %v13795_v10 }
 0x1a1   : > { %12685 = vmatmul.mubr.msk.bf16.vlgmr.msra.gmra.mrb[0].mxu1 %vm396_vm1, %v4910_v57  ;;  %v9414_v0 = vcombine.low %v9406_v53, %v9413_v55  ;;  %v9430_v6 = vrot.slane %v9416_v59, %v13795_v10  ;;  %v4072_v11 = vcombine.high %v4064_v28, %v4064_v28  ;;  %v4503_v16 = vcombine.low %v4055_v22, %v4054_v30  ;;  %v8695_v30 = vld [vmem:[#allocation2 + $0xb9] sm:$0x3f] }
 0x1a2   : > { %12688 = vmatprep.mubr.msk.bf16.mxu1 %vm13652_vm0, %v13651_v2  ;;  %v4088_v37 = vcombine.high %v4080_v62, %v4080_v62  ;;  %v4504_v44 = vcombine.low %v4056_v47, %v4064_v28  ;;  %13007 = vmatpush3.bf16.msra.mxu1 %v13642_v56  ;;  %v8996_v23 = vcombine.high %v8692_v41, %v8692_v41  ;;  %v8696_v28 = vld [vmem:[#allocation2 + $0xc1] sm:$0xff] }
 0x1a3   : > { %v9431_v52 = vcombine.low %v9423_v36, %v9430_v6  ;;  %v4511_v32 = vrot.slane %v4503_v16, %v13795_v10  ;;  %v4520_v50 = vcombine.low %v4072_v11, %v4071_v61  ;;  %v9003_v12 = vrot.slane %v8692_v41, %v13795_v10 }
 0x1a4   : > { %v4518_v21 = vrot.slane %v4504_v44, %v13795_v10  ;;  %v4521_v13 = vcombine.low %v4080_v62, %v4088_v37  ;;  %v9010_v24 = vrot.slane %v8996_v23, %v13795_v10  ;;  %v9013_v25 = vcombine.high %v8693_v54, %v8693_v54  ;;  %v3958_v23 = vld [vmem:[#allocation2 + $0x48] sm:$0x3f] }
 0x1a5   : > { %v9641_v3 = vpack.c.bf16 %v9431_v52, %v9414_v0  ;;  %v4528_v48 = vrot.slane %v4520_v50, %v13795_v10  ;;  %v9011_v26 = vcombine.high %v9003_v12, %v9003_v12  ;;  %v9020_v63 = vrot.slane %v8693_v54, %v13795_v10 }
 0x1a6   : > { %v4519_v31 = vcombine.low %v4511_v32, %v4518_v21  ;;  %v4535_v33 = vrot.slane %v4521_v13, %v13795_v10  ;;  %v9012_v18 = vcombine.high %v9010_v24, %v9010_v24  ;;  %v9027_v51 = vrot.slane %v9013_v25, %v13795_v10  ;;  %v3959_v21 = vld [vmem:[#allocation2 + $0x50] sm:$0xff] }
 0x1a7   : > { %12925 = vmatmul.mubr.msk.bf16.gmra.mrb[24].mxu0 %vm396_vm1, %v9641_v3  ;;  %v9028_v27 = vcombine.high %v9020_v63, %v9020_v63  ;;  %v9036_v8 = vrot.slane %v8694_v15, %v13795_v10  ;;  %v9432_v40 = vcombine.low %v9003_v12, %v9011_v26  ;;  %v4073_v19 = vcombine.high %v3955_v49, %v3955_v49 }
 0x1a8   : > { %v4536_v1 = vcombine.low %v4528_v48, %v4535_v33  ;;  %12928 = vmatprep.mubr.msk.bf16.mxu0 %vm13652_vm0, %v13651_v2  ;;  %v9433_v5 = vcombine.low %v9010_v24, %v9012_v18  ;;  %v4090_v4 = vcombine.high %v3956_v20, %v3956_v20  ;;  %v4097_v60 = vrot.slane %v3956_v20, %v13795_v10 }
 0x1a9   : > { %v9440_v29 = vrot.slane %v9432_v40, %v13795_v10  ;;  %v9449_v7 = vcombine.low %v9020_v63, %v9028_v27  ;;  %v9450_v45 = vcombine.low %v9027_v51, %v9036_v8  ;;  %v4087_v42 = vrot.slane %v4073_v19, %v13795_v10  ;;  %v8697_v19 = vld [vmem:[#allocation2 + $0xc9] sm:$0x3f] }
 0x1aa   : > { %v4911_v9 = vpack.c.bf16 %v4536_v1, %v4519_v31  ;;  %v9447_v17 = vrot.slane %v9433_v5, %v13795_v10  ;;  %v4104_v58 = vrot.slane %v4090_v4, %v13795_v10  ;;  %v4105_v38 = vcombine.high %v4097_v60, %v4097_v60 }
 0x1ab   : > { %v9457_v43 = vrot.slane %v9449_v7, %v13795_v10  ;;  %v9464_v34 = vrot.slane %v9450_v45, %v13795_v10  ;;  %v4089_v46 = vcombine.high %v4087_v42, %v4087_v42  ;;  %v4106_v49 = vcombine.high %v3957_v39, %v3957_v39 }
 0x1ac   : > { %12689 = vmatmul.mubr.msk.bf16.gmra.mrb[4].mxu1 %vm396_vm1, %v4911_v9  ;;  %v9448_v22 = vcombine.low %v9440_v29, %v9447_v17  ;;  %v4113_v53 = vrot.slane %v3957_v39, %v13795_v10  ;;  %v4538_v35 = vcombine.low %v4097_v60, %v4105_v38  ;;  %v9029_v14 = vcombine.high %v8694_v15, %v8694_v15  ;;  %v8698_v17 = vld [vmem:[#allocation2 + $0xd1] sm:$0xff] }
 0x1ad   : > { %v9465_v57 = vcombine.low %v9457_v43, %v9464_v34  ;;  %12692 = vmatprep.mubr.msk.bf16.mxu1 %vm13652_vm0, %v13651_v2  ;;  %v4120_v55 = vrot.slane %v4106_v49, %v13795_v10  ;;  %v4537_v59 = vcombine.low %v4087_v42, %v4089_v46  ;;  %v9044_v41 = vcombine.high %v9036_v8, %v9036_v8 }
 0x1ae   : > { %v4121_v36 = vcombine.high %v4113_v53, %v4113_v53  ;;  %v4552_v47 = vrot.slane %v4538_v35, %v13795_v10  ;;  %v4554_v61 = vcombine.low %v4104_v58, %v4113_v53  ;;  %v9043_v62 = vrot.slane %v9029_v14, %v13795_v10 }
 0x1af   : > { %v9642_v0 = vpack.c.bf16 %v9465_v57, %v9448_v22  ;;  %v4545_v6 = vrot.slane %v4537_v59, %v13795_v10  ;;  %v9046_v11 = vcombine.high %v8695_v30, %v8695_v30  ;;  %v9053_v16 = vrot.slane %v8695_v30, %v13795_v10  ;;  %v3960_v22 = vld [vmem:[#allocation2 + $0x58] sm:$0x3f]  ;;  %v3961_v57 = vld [vmem:[#allocation2 + $0x60] sm:$0xff] }
 0x1b0   : > { %v4555_v54 = vcombine.low %v4121_v36, %v4120_v55  ;;  %v4562_v37 = vrot.slane %v4554_v61, %v13795_v10  ;;  %v9045_v44 = vcombine.high %v9043_v62, %v9043_v62  ;;  %v9069_v56 = vrot.slane %v8696_v28, %v13795_v10 }
 0x1b1   : > { %12929 = vmatmul.mubr.msk.bf16.gmra.mrb[28].mxu0 %vm396_vm1, %v9642_v0  ;;  %v4553_v52 = vcombine.low %v4545_v6, %v4552_v47  ;;  %v9060_v32 = vrot.slane %v9046_v11, %v13795_v10  ;;  %v9061_v50 = vcombine.high %v9053_v16, %v9053_v16  ;;  %v9466_v12 = vcombine.low %v9044_v41, %v9043_v62 }
 0x1b2   : > { %v4569_v13 = vrot.slane %v4555_v54, %v13795_v10  ;;  %12932 = vmatprep.mubr.msk.bf16.mxu0 %vm13652_vm0, %v13651_v2  ;;  %v9077_v15 = vcombine.high %v9069_v56, %v9069_v56  ;;  %v9467_v24 = vcombine.low %v9045_v44, %v9053_v16  ;;  %v4122_v25 = vcombine.high %v4120_v55, %v4120_v55 }
 0x1b3   : > { %v9474_v3 = vrot.slane %v9466_v12, %v13795_v10  ;;  %v9483_v48 = vcombine.low %v9061_v50, %v9060_v32  ;;  %v4123_v26 = vcombine.high %v3958_v23, %v3958_v23  ;;  %v4130_v63 = vrot.slane %v3958_v23, %v13795_v10  ;;  %v3962_v23 = vld [vmem:[#allocation2 + $0x68] sm:$0x3f] }
 0x1b4   : > { %v4570_v20 = vcombine.low %v4562_v37, %v4569_v13  ;;  %v9481_v31 = vrot.slane %v9467_v24, %v13795_v10  ;;  %v9484_v33 = vcombine.low %v9069_v56, %v9077_v15  ;;  %v4139_v18 = vcombine.high %v3959_v21, %v3959_v21 }
 0x1b5   : > { %v9491_v51 = vrot.slane %v9483_v48, %v13795_v10  ;;  %v4137_v27 = vrot.slane %v4123_v26, %v13795_v10  ;;  %v4138_v8 = vcombine.high %v4130_v63, %v4130_v63  ;;  %v4146_v40 = vrot.slane %v3959_v21, %v13795_v10 }
 0x1b6   : > { %v4912_v1 = vpack.c.bf16 %v4570_v20, %v4553_v52  ;;  %v9482_v5 = vcombine.low %v9474_v3, %v9481_v31  ;;  %v9498_v39 = vrot.slane %v9484_v33, %v13795_v10  ;;  %v4153_v4 = vrot.slane %v4139_v18, %v13795_v10  ;;  %v8700_v20 = vld [vmem:[#allocation2 + $0xe1] sm:$0xff] }
 0x1b7   : > { %v4154_v60 = vcombine.high %v4146_v40, %v4146_v40  ;;  %v4571_v29 = vcombine.low %v4122_v25, %v4130_v63  ;;  %v4572_v7 = vcombine.low %v4138_v8, %v4137_v27  ;;  %v9062_v45 = vcombine.high %v8696_v28, %v8696_v28  ;;  %v8699_v25 = vld [vmem:[#allocation2 + $0xd9] sm:$0x3f] }
 0x1b8   : > { %12693 = vmatmul.mubr.msk.bf16.gmra.mrb[8].mxu1 %vm396_vm1, %v4912_v1  ;;  %v9499_v42 = vcombine.low %v9491_v51, %v9498_v39  ;;  %v4155_v9 = vcombine.high %v4153_v4, %v4153_v4  ;;  %v9079_v58 = vcombine.high %v8697_v19, %v8697_v19  ;;  %v9086_v38 = vrot.slane %v8697_v19, %v13795_v10 }
 0x1b9   : > { %12696 = vmatprep.mubr.msk.bf16.mxu1 %vm13652_vm0, %v13651_v2  ;;  %v4579_v43 = vrot.slane %v4571_v29, %v13795_v10  ;;  %v4586_v34 = vrot.slane %v4572_v7, %v13795_v10  ;;  %v4588_v46 = vcombine.low %v4146_v40, %v4154_v60  ;;  %v9076_v49 = vrot.slane %v9062_v45, %v13795_v10 }
 0x1ba   : > { %v9643_v53 = vpack.c.bf16 %v9499_v42, %v9482_v5  ;;  %v4589_v35 = vcombine.low %v4153_v4, %v4155_v9  ;;  %v9093_v30 = vrot.slane %v9079_v58, %v13795_v10  ;;  %v9094_v14 = vcombine.high %v9086_v38, %v9086_v38  ;;  %v3963_v42 = vld [vmem:[#allocation2 + $0x70] sm:$0xff] }
 0x1bb   : > { %v4587_v55 = vcombine.low %v4579_v43, %v4586_v34  ;;  %v4596_v59 = vrot.slane %v4588_v46, %v13795_v10  ;;  %v9078_v28 = vcombine.high %v9076_v49, %v9076_v49  ;;  %v9095_v41 = vcombine.high %v8698_v17, %v8698_v17 }
 0x1bc   : > { %12933 = vmatmul.mubr.msk.bf16.gmra.mrb[32].mxu0 %vm396_vm1, %v9643_v53  ;;  %v4603_v36 = vrot.slane %v4589_v35, %v13795_v10  ;;  %v9102_v47 = vrot.slane %v8698_v17, %v13795_v10  ;;  %v9501_v61 = vcombine.low %v9086_v38, %v9094_v14  ;;  %v4156_v62 = vcombine.high %v3960_v22, %v3960_v22  ;;  %v3964_v35 = vld [vmem:[#allocation2 + $0x78] sm:$0x3f] }
 0x1bd   : > { %12936 = vmatprep.mubr.msk.bf16.mxu0 %vm13652_vm0, %v13651_v2  ;;  %v9109_v0 = vrot.slane %v9095_v41, %v13795_v10  ;;  %v9500_v6 = vcombine.low %v9076_v49, %v9078_v28  ;;  %v4163_v11 = vrot.slane %v3960_v22, %v13795_v10  ;;  %v4172_v16 = vcombine.high %v3961_v57, %v3961_v57  ;;  %v8701_v41 = vld [vmem:[#allocation2 + $0xe9] sm:$0x3f] }
 0x1be   : > { %v4604_v54 = vcombine.low %v4596_v59, %v4603_v36  ;;  %v9110_v37 = vcombine.high %v9102_v47, %v9102_v47  ;;  %v9515_v44 = vrot.slane %v9501_v61, %v13795_v10  ;;  %v9517_v56 = vcombine.low %v9093_v30, %v9102_v47 }
 0x1bf   : > { %v9508_v52 = vrot.slane %v9500_v6, %v13795_v10  ;;  %v4170_v32 = vrot.slane %v4156_v62, %v13795_v10  ;;  %v4171_v50 = vcombine.high %v4163_v11, %v4163_v11  ;;  %v4179_v12 = vrot.slane %v3961_v57, %v13795_v10 }
 0x1c0   : > { %v4913_v21 = vpack.c.bf16 %v4604_v54, %v4587_v55  ;;  %v9518_v13 = vcombine.low %v9110_v37, %v9109_v0  ;;  %v9525_v15 = vrot.slane %v9517_v56, %v13795_v10  ;;  %v4186_v24 = vrot.slane %v4172_v16, %v13795_v10 }
 0x1c1   : > { %v9516_v3 = vcombine.low %v9508_v52, %v9515_v44  ;;  %v4187_v48 = vcombine.high %v4179_v12, %v4179_v12  ;;  %v4196_v26 = vrot.slane %v3962_v23, %v13795_v10  ;;  %v4605_v63 = vcombine.low %v4163_v11, %v4171_v50  ;;  %v8703_v50 = vld [vmem:[#allocation2 + $0xf9] sm:$0x3f] }
 0x1c2   : > { %12697 = vmatmul.mubr.msk.bf16.gmra.mrb[12].mxu1 %vm396_vm1, %v4913_v21  ;;  %v9532_v31 = vrot.slane %v9518_v13, %v13795_v10  ;;  %v4188_v33 = vcombine.high %v4186_v24, %v4186_v24  ;;  %v4606_v18 = vcombine.low %v4170_v32, %v4179_v12  ;;  %v9111_v51 = vcombine.high %v9109_v0, %v9109_v0  ;;  %v8702_v0 = vld [vmem:[#allocation2 + $0xf1] sm:$0xff] }
 0x1c3   : > { %12700 = vmatprep.mubr.msk.bf16.mxu1 %vm13652_vm0, %v13651_v2  ;;  %v4613_v27 = vrot.slane %v4605_v63, %v13795_v10  ;;  %v4622_v8 = vcombine.low %v4187_v48, %v4186_v24  ;;  %v9112_v40 = vcombine.high %v8699_v25, %v8699_v25  ;;  %v9119_v19 = vrot.slane %v8699_v25, %v13795_v10 }
 0x1c4   : > { %v9533_v1 = vcombine.low %v9525_v15, %v9532_v31  ;;  %v4620_v5 = vrot.slane %v4606_v18, %v13795_v10  ;;  %v4623_v39 = vcombine.low %v4188_v33, %v4196_v26  ;;  %v9128_v4 = vcombine.high %v8700_v20, %v8700_v20 }
 0x1c5   : > { %v4630_v60 = vrot.slane %v4622_v8, %v13795_v10  ;;  %v9126_v29 = vrot.slane %v9112_v40, %v13795_v10  ;;  %v9127_v7 = vcombine.high %v9119_v19, %v9119_v19  ;;  %v9135_v45 = vrot.slane %v8700_v20, %v13795_v10  ;;  %v3965_v20 = vld [vmem:[#allocation2 + $0x80] sm:$0xff] }
 0x1c6   : > { %v9644_v9 = vpack.c.bf16 %v9533_v1, %v9516_v3  ;;  %v4621_v17 = vcombine.low %v4613_v27, %v4620_v5  ;;  %v4637_v58 = vrot.slane %v4623_v39, %v13795_v10  ;;  %v9142_v38 = vrot.slane %v9128_v4, %v13795_v10  ;;  %v3966_v39 = vld [vmem:[#allocation2 + $0x88] sm:$0x3f] }
 0x1c7   : > { %v9143_v43 = vcombine.high %v9135_v45, %v9135_v45  ;;  %v9534_v34 = vcombine.low %v9111_v51, %v9119_v19  ;;  %v9535_v46 = vcombine.low %v9127_v7, %v9126_v29  ;;  %v4189_v49 = vcombine.high %v3962_v23, %v3962_v23 }
 0x1c8   : > { %12937 = vmatmul.mubr.msk.bf16.gmra.mrb[36].mxu0 %vm396_vm1, %v9644_v9  ;;  %v4638_v22 = vcombine.low %v4630_v60, %v4637_v58  ;;  %v9144_v53 = vcombine.high %v9142_v38, %v9142_v38  ;;  %v4204_v30 = vcombine.high %v4196_v26, %v4196_v26  ;;  %v4205_v14 = vcombine.high %v3963_v42, %v3963_v42 }
 0x1c9   : > { %12940 = vmatprep.mubr.msk.bf16.mxu0 %vm13652_vm0, %v13651_v2  ;;  %v9542_v57 = vrot.slane %v9534_v34, %v13795_v10  ;;  %v9549_v55 = vrot.slane %v9535_v46, %v13795_v10  ;;  %v9551_v59 = vcombine.low %v9135_v45, %v9143_v43  ;;  %v4203_v28 = vrot.slane %v4189_v49, %v13795_v10 }
 0x1ca   : > { %v4914_v36 = vpack.c.bf16 %v4638_v22, %v4621_v17  ;;  %v9552_v47 = vcombine.low %v9142_v38, %v9144_v53  ;;  %v4212_v61 = vrot.slane %v3963_v42, %v13795_v10  ;;  %v4219_v62 = vrot.slane %v4205_v14, %v13795_v10  ;;  %v3967_v14 = vld [vmem:[#allocation2 + $0x90] sm:$0xff] }
 0x1cb   : > { %v9550_v6 = vcombine.low %v9542_v57, %v9549_v55  ;;  %v9559_v11 = vrot.slane %v9551_v59, %v13795_v10  ;;  %v4229_v16 = vrot.slane %v3964_v35, %v13795_v10  ;;  %v4639_v54 = vcombine.low %v4204_v30, %v4203_v28 }
 0x1cc   : > { %12701 = vmatmul.mubr.msk.bf16.gmra.mrb[16].mxu1 %vm396_vm1, %v4914_v36  ;;  %v9566_v37 = vrot.slane %v9552_v47, %v13795_v10  ;;  %v4220_v44 = vcombine.high %v4212_v61, %v4212_v61  ;;  %v4221_v56 = vcombine.high %v4219_v62, %v4219_v62  ;;  %v9145_v23 = vcombine.high %v8701_v41, %v8701_v41 }
 0x1cd   : > { %12704 = vmatprep.mubr.msk.bf16.mxu1 %vm13652_vm0, %v13651_v2  ;;  %v4237_v52 = vcombine.high %v4229_v16, %v4229_v16  ;;  %v4647_v32 = vrot.slane %v4639_v54, %v13795_v10  ;;  %v9152_v12 = vrot.slane %v8701_v41, %v13795_v10  ;;  %v9161_v21 = vcombine.high %v8702_v0, %v8702_v0 }
 0x1ce   : > { %v9567_v13 = vcombine.low %v9559_v11, %v9566_v37  ;;  %v4640_v15 = vcombine.low %v4212_v61, %v4220_v44  ;;  %v4656_v24 = vcombine.low %v4219_v62, %v4221_v56  ;;  %v9159_v25 = vrot.slane %v9145_v23, %v13795_v10  ;;  %v3968_v62 = vld [vmem:[#allocation2 + $0x98] sm:$0x3f] }
 0x1cf   : > { %v4657_v3 = vcombine.low %v4229_v16, %v4237_v52  ;;  %v9160_v48 = vcombine.high %v9152_v12, %v9152_v12  ;;  %v9168_v26 = vrot.slane %v8702_v0, %v13795_v10  ;;  %v9175_v63 = vrot.slane %v9161_v21, %v13795_v10  ;;  %v15187_v16 = vld [vmem:[#allocation2 + $0xa0] sm:$0xff] }
 0x1d0   : > { %v9645_v31 = vpack.c.bf16 %v9567_v13, %v9550_v6  ;;  %v4654_v33 = vrot.slane %v4640_v15, %v13795_v10  ;;  %v4664_v18 = vrot.slane %v4656_v24, %v13795_v10  ;;  %v9185_v51 = vrot.slane %v8703_v50, %v13795_v10  ;;  %v9857_v21 = vld [vmem:[#allocation2 + $0x22] sm:$0xff] }
 0x1d1   : > { %v4671_v27 = vrot.slane %v4657_v3, %v13795_v10  ;;  %v9176_v8 = vcombine.high %v9168_v26, %v9168_v26  ;;  %v9177_v40 = vcombine.high %v9175_v63, %v9175_v63  ;;  %v9568_v19 = vcombine.low %v9152_v12, %v9160_v48 }
 0x1d2   : > { %12941 = vmatmul.mubr.msk.bf16.gmra.mrb[40].mxu0 %vm396_vm1, %v9645_v31  ;;  %v4655_v1 = vcombine.low %v4647_v32, %v4654_v33  ;;  %v9569_v5 = vcombine.low %v9159_v25, %v9168_v26  ;;  %v4222_v4 = vcombine.high %v3964_v35, %v3964_v35  ;;  %v4238_v60 = vcombine.high %v3965_v20, %v3965_v20  ;;  %v9858_v33 = vld [vmem:[#allocation2 + $0x2a] sm:$0x3f] }
 0x1d3   : > { %v4672_v29 = vcombine.low %v4664_v18, %v4671_v27  ;;  %12944 = vmatprep.mubr.msk.bf16.mxu0 %vm13652_vm0, %v13651_v2  ;;  %v9576_v7 = vrot.slane %v9568_v19, %v13795_v10  ;;  %v9585_v45 = vcombine.low %v9176_v8, %v9175_v63  ;;  %v9586_v42 = vcombine.low %v9177_v40, %v9185_v51 }
 0x1d4   : > { %v9583_v9 = vrot.slane %v9569_v5, %v13795_v10  ;;  %v4236_v17 = vrot.slane %v4222_v4, %v13795_v10  ;;  %v4245_v58 = vrot.slane %v3965_v20, %v13795_v10  ;;  %v4252_v38 = vrot.slane %v4238_v60, %v13795_v10 }
 0x1d5   : > { %v4915_v43 = vpack.c.bf16 %v4672_v29, %v4655_v1  ;;  %v9593_v34 = vrot.slane %v9585_v45, %v13795_v10  ;;  %v9600_v46 = vrot.slane %v9586_v42, %v13795_v10  ;;  %v4255_v49 = vcombine.high %v3966_v39, %v3966_v39  ;;  %v9859_v1 = vld [vmem:[#allocation2 + $0x32] sm:$0xff] }
 0x1d6   : > { %v9584_v22 = vcombine.low %v9576_v7, %v9583_v9  ;;  %v4253_v53 = vcombine.high %v4245_v58, %v4245_v58  ;;  %v4254_v35 = vcombine.high %v4252_v38, %v4252_v38  ;;  %v4262_v30 = vrot.slane %v3966_v39, %v13795_v10 }
 0x1d7   : > { %12705 = vmatmul.mubr.msk.bf16.gmra.mrb[20].mxu1 %vm396_vm1, %v4915_v43  ;;  %v9601_v57 = vcombine.low %v9593_v34, %v9600_v46  ;;  %v4269_v55 = vrot.slane %v4255_v49, %v13795_v10  ;;  %v4673_v59 = vcombine.low %v4236_v17, %v4245_v58  ;;  %v9178_v28 = vcombine.high %v8703_v50, %v8703_v50  ;;  %v3970_v43 = vld [vmem:[#allocation2 + $0xa8] sm:$0x3f] }
 0x1d8   : > { %12708 = vmatprep.mubr.msk.bf16.mxu1 %vm13652_vm0, %v13651_v2  ;;  %v4270_v41 = vcombine.high %v4262_v30, %v4262_v30  ;;  %v4674_v36 = vcombine.low %v4253_v53, %v4252_v38  ;;  %v4690_v47 = vcombine.low %v4254_v35, %v4262_v30  ;;  %v9193_v61 = vcombine.high %v9185_v51, %v9185_v51  ;;  %v3971_v30 = vld [vmem:[#allocation2 + $0xb0] sm:$0xff] }
 0x1d9   : > { %v9646_v0 = vpack.c.bf16 %v9601_v57, %v9584_v22  ;;  %v4681_v6 = vrot.slane %v4673_v59, %v13795_v10  ;;  %v9192_v11 = vrot.slane %v9178_v28, %v13795_v10  ;;  %v4271_v54 = vcombine.high %v3967_v14, %v3967_v14 }
 0x1da   : > { %v4688_v37 = vrot.slane %v4674_v36, %v13795_v10  ;;  %v4691_v44 = vcombine.low %v4270_v41, %v4269_v55  ;;  %v4698_v56 = vrot.slane %v4690_v47, %v13795_v10  ;;  %v4278_v23 = vrot.slane %v3967_v14, %v13795_v10 }
 0x1db   : > { %12945 = vmatmul.mubr.msk.bf16.gmra.mrb[44].mxu0 %vm396_vm1, %v9646_v0  ;;  %v9602_v52 = vcombine.low %v9193_v61, %v9192_v11  ;;  %v4285_v32 = vrot.slane %v4271_v54, %v13795_v10  ;;  %v4288_v50 = vcombine.high %v3968_v62, %v3968_v62  ;;  %v4295_v12 = vrot.slane %v3968_v62, %v13795_v10  ;;  %v9860_v11 = vld [vmem:[#allocation2 + $0x3a] sm:$0x3f] }
 0x1dc   : > { %v4689_v13 = vcombine.low %v4681_v6, %v4688_v37  ;;  %v4705_v15 = vrot.slane %v4691_v44, %v13795_v10  ;;  %12948 = vmatprep.mubr.msk.bf16.mxu0 %vm13652_vm0, %v13651_v2  ;;  %v4286_v24 = vcombine.high %v4278_v23, %v4278_v23  ;;  %v4311_v25 = vrot.slane %v15187_v16, %v13795_v10 }
 0x1dd   : > { %v9609_v3 = vrot.slane %v9602_v52, %v13795_v10  ;;  %v4287_v48 = vcombine.high %v4285_v32, %v4285_v32  ;;  %v4302_v26 = vrot.slane %v4288_v50, %v13795_v10  ;;  %v4303_v63 = vcombine.high %v4295_v12, %v4295_v12 }
 0x1de   : > { %v4706_v20 = vcombine.low %v4698_v56, %v4705_v15  ;;  %v4707_v31 = vcombine.low %v4278_v23, %v4286_v24  ;;  %v9913_v18 = vcombine.high %v9857_v21, %v9857_v21  ;;  %v9920_v51 = vrot.slane %v9857_v21, %v13795_v10  ;;  %v9861_v15 = vld [vmem:[#allocation2 + $0x42] sm:$0xff] }
 0x1df   : > { %v9647_v27 = vpack.c.bf16 %v9609_v3, %v9609_v3  ;;  %v4708_v8 = vcombine.low %v4285_v32, %v4287_v48  ;;  %v4724_v40 = vcombine.low %v4295_v12, %v4303_v63  ;;  %v4725_v19 = vcombine.low %v4302_v26, %v4311_v25  ;;  %v3972_v63 = vld [vmem:[#allocation2 + $0xb8] sm:$0x3f] }
 0x1e0   : > { %v4916_v5 = vpack.c.bf16 %v4706_v20, %v4689_v13  ;;  %v4715_v39 = vrot.slane %v4707_v31, %v13795_v10  ;;  %v9927_v4 = vrot.slane %v9913_v18, %v13795_v10  ;;  %v9928_v60 = vcombine.high %v9920_v51, %v9920_v51 }
 0x1e1   : > { %v4722_v29 = vrot.slane %v4708_v8, %v13795_v10  ;;  %v4732_v7 = vrot.slane %v4724_v40, %v13795_v10  ;;  %v4739_v45 = vrot.slane %v4725_v19, %v13795_v10  ;;  %v9930_v42 = vcombine.high %v9858_v33, %v9858_v33 }
 0x1e2   : > { %12709 = vmatmul.mubr.msk.bf16.gmra.mrb[24].mxu1 %vm396_vm1, %v4916_v5  ;;  %v9929_v9 = vcombine.high %v9927_v4, %v9927_v4  ;;  %v9937_v17 = vrot.slane %v9858_v33, %v13795_v10  ;;  %v9953_v58 = vrot.slane %v9859_v1, %v13795_v10  ;;  %v10375_v38 = vcombine.low %v9920_v51, %v9928_v60  ;;  %v3973_v5 = vld [vmem:[#allocation2 + $0xc0] sm:$0xff] }
 0x1e3   : > { %12949 = vmatmul.mubr.msk.bf16.gmra.mrb[48].mxu0 %vm396_vm1, %v9647_v27  ;;  %12712 = vmatprep.mubr.msk.bf16.mxu1 %vm13652_vm0, %v13651_v2  ;;  %v4723_v34 = vcombine.low %v4715_v39, %v4722_v29  ;;  %v4740_v46 = vcombine.low %v4732_v7, %v4739_v45  ;;  %v9944_v49 = vrot.slane %v9930_v42, %v13795_v10 }
 0x1e4   : > { %12954 = vmatprep.mubr.msk.bf16.mxu0 %vm13652_vm0, %v13651_v2  ;;  %v9945_v22 = vcombine.high %v9937_v17, %v9937_v17  ;;  %v10376_v53 = vcombine.low %v9927_v4, %v9929_v9  ;;  %v10383_v35 = vrot.slane %v10375_v38, %v13795_v10  ;;  %v4304_v14 = vcombine.high %v15187_v16, %v15187_v16  ;;  %v9862_v38 = vld [vmem:[#allocation2 + $0x4a] sm:$0x3f] }
 0x1e5   : > { %v4917_v57 = vpack.c.bf16 %v4740_v46, %v4723_v34  ;;  %v10393_v55 = vcombine.low %v9944_v49, %v9953_v58  ;;  %v4319_v59 = vcombine.high %v4311_v25, %v4311_v25  ;;  %v4321_v28 = vcombine.high %v3970_v43, %v3970_v43 }
 0x1e6   : > { %v10390_v41 = vrot.slane %v10376_v53, %v13795_v10  ;;  %v10392_v36 = vcombine.low %v9937_v17, %v9945_v22  ;;  %v4318_v47 = vrot.slane %v4304_v14, %v13795_v10  ;;  %v4328_v61 = vrot.slane %v3970_v43, %v13795_v10 }
 0x1e7   : > { %v10407_v62 = vrot.slane %v10393_v55, %v13795_v10  ;;  %v4335_v0 = vrot.slane %v4321_v28, %v13795_v10  ;;  %v4344_v6 = vrot.slane %v3971_v30, %v13795_v10  ;;  %v9946_v54 = vcombine.high %v9859_v1, %v9859_v1 }
 0x1e8   : > { %v10391_v16 = vcombine.low %v10383_v35, %v10390_v41  ;;  %v10400_v37 = vrot.slane %v10392_v36, %v13795_v10  ;;  %v4320_v44 = vcombine.high %v4318_v47, %v4318_v47  ;;  %v4336_v56 = vcombine.high %v4328_v61, %v4328_v61 }
 0x1e9   : > { %v4352_v23 = vcombine.high %v4344_v6, %v4344_v6  ;;  %v4741_v52 = vcombine.low %v4319_v59, %v4318_v47  ;;  %v9960_v32 = vrot.slane %v9946_v54, %v13795_v10  ;;  %v9961_v50 = vcombine.high %v9953_v58, %v9953_v58 }
 0x1ea   : > { %12713 = vmatmul.mubr.msk.bf16.gmra.mrb[28].mxu1 %vm396_vm1, %v4917_v57  ;;  %v10408_v12 = vcombine.low %v10400_v37, %v10407_v62  ;;  %v4742_v21 = vcombine.low %v4320_v44, %v4328_v61  ;;  %v4758_v13 = vcombine.low %v4336_v56, %v4335_v0  ;;  %v9963_v24 = vcombine.high %v9860_v11, %v9860_v11  ;;  %v9863_v61 = vld [vmem:[#allocation2 + $0x52] sm:$0xff]  ;;  %v3974_v56 = vld [vmem:[#allocation2 + $0xc8] sm:$0x3f] }
 0x1eb   : > { %12716 = vmatprep.mubr.msk.bf16.mxu1 %vm13652_vm0, %v13651_v2  ;;  %v4749_v25 = vrot.slane %v4741_v52, %v13795_v10  ;;  %v4759_v3 = vcombine.low %v4344_v6, %v4352_v23  ;;  %v9962_v48 = vcombine.high %v9960_v32, %v9960_v32  ;;  %v9970_v26 = vrot.slane %v9860_v11, %v13795_v10 }
 0x1ec   : > { %v10816_v20 = vpack.c.bf16 %v10408_v12, %v10391_v16  ;;  %v4756_v31 = vrot.slane %v4742_v21, %v13795_v10  ;;  %v4766_v33 = vrot.slane %v4758_v13, %v13795_v10  ;;  %v9977_v18 = vrot.slane %v9963_v24, %v13795_v10 }
 0x1ed   : > { %v4773_v51 = vrot.slane %v4759_v3, %v13795_v10  ;;  %v9978_v27 = vcombine.high %v9970_v26, %v9970_v26  ;;  %v9986_v8 = vrot.slane %v9861_v15, %v13795_v10  ;;  %v10409_v40 = vcombine.low %v9961_v50, %v9960_v32 }
 0x1ee   : > { %12955 = vmatmul.mubr.msk.bf16.vlgmr.msra.gmra.mrb[0].mxu0 %vm396_vm1, %v10816_v20  ;;  %v4757_v19 = vcombine.low %v4749_v25, %v4756_v31  ;;  %v10410_v1 = vcombine.low %v9962_v48, %v9970_v26  ;;  %v4337_v39 = vcombine.high %v3971_v30, %v3971_v30  ;;  %v4354_v4 = vcombine.high %v3972_v63, %v3972_v63 }
 0x1ef   : > { %v4774_v60 = vcombine.low %v4766_v33, %v4773_v51  ;;  %12958 = vmatprep.mubr.msk.bf16.mxu0 %vm13652_vm0, %v13651_v2  ;;  %v9994_v29 = vcombine.high %v9986_v8, %v9986_v8  ;;  %v10417_v7 = vrot.slane %v10409_v40, %v13795_v10  ;;  %v10426_v45 = vcombine.low %v9978_v27, %v9977_v18  ;;  %v9864_v40 = vld [vmem:[#allocation2 + $0x5a] sm:$0x3f] }
 0x1f0   : > { %v10424_v42 = vrot.slane %v10410_v1, %v13795_v10  ;;  %v4351_v9 = vrot.slane %v4337_v39, %v13795_v10  ;;  %v4361_v17 = vrot.slane %v3972_v63, %v13795_v10  ;;  %v4368_v58 = vrot.slane %v4354_v4, %v13795_v10 }
 0x1f1   : > { %v4918_v43 = vpack.c.bf16 %v4774_v60, %v4757_v19  ;;  %v10427_v34 = vcombine.low %v9986_v8, %v9994_v29  ;;  %v10434_v46 = vrot.slane %v10426_v45, %v13795_v10  ;;  %v4370_v49 = vcombine.high %v3973_v5, %v3973_v5  ;;  %v9865_v45 = vld [vmem:[#allocation2 + $0x62] sm:$0xff] }
 0x1f2   : > { %v10425_v22 = vcombine.low %v10417_v7, %v10424_v42  ;;  %v4353_v53 = vcombine.high %v4351_v9, %v4351_v9  ;;  %v4369_v35 = vcombine.high %v4361_v17, %v4361_v17  ;;  %v4377_v30 = vrot.slane %v3973_v5, %v13795_v10 }
 0x1f3   : > { %12717 = vmatmul.mubr.msk.bf16.gmra.mrb[32].mxu1 %vm396_vm1, %v4918_v43  ;;  %v10441_v14 = vrot.slane %v10427_v34, %v13795_v10  ;;  %v4384_v57 = vrot.slane %v4370_v49, %v13795_v10  ;;  %v9979_v55 = vcombine.high %v9861_v15, %v9861_v15  ;;  %v9996_v59 = vcombine.high %v9862_v38, %v9862_v38  ;;  %v3975_v15 = vld [vmem:[#allocation2 + $0xd0] sm:$0xff] }
 0x1f4   : > { %12720 = vmatprep.mubr.msk.bf16.mxu1 %vm13652_vm0, %v13651_v2  ;;  %v4385_v28 = vcombine.high %v4377_v30, %v4377_v30  ;;  %v4775_v41 = vcombine.low %v4351_v9, %v4353_v53  ;;  %v4776_v36 = vcombine.low %v4361_v17, %v4369_v35  ;;  %v4792_v47 = vcombine.low %v4368_v58, %v4377_v30 }
 0x1f5   : > { %v10442_v62 = vcombine.low %v10434_v46, %v10441_v14  ;;  %v9993_v0 = vrot.slane %v9979_v55, %v13795_v10  ;;  %v10003_v6 = vrot.slane %v9862_v38, %v13795_v10  ;;  %v10010_v11 = vrot.slane %v9996_v59, %v13795_v10  ;;  %v3976_v59 = vld [vmem:[#allocation2 + $0xd8] sm:$0x3f] }
 0x1f6   : > { %v4783_v54 = vrot.slane %v4775_v41, %v13795_v10  ;;  %v4790_v16 = vrot.slane %v4776_v36, %v13795_v10  ;;  %v4793_v37 = vcombine.low %v4385_v28, %v4384_v57  ;;  %v4800_v44 = vrot.slane %v4792_v47, %v13795_v10 }
 0x1f7   : > { %v10817_v23 = vpack.c.bf16 %v10442_v62, %v10425_v22  ;;  %v9995_v52 = vcombine.high %v9993_v0, %v9993_v0  ;;  %v10011_v32 = vcombine.high %v10003_v6, %v10003_v6  ;;  %v10012_v50 = vcombine.high %v9863_v61, %v9863_v61 }
 0x1f8   : > { %v4791_v12 = vcombine.low %v4783_v54, %v4790_v16  ;;  %v4807_v21 = vrot.slane %v4793_v37, %v13795_v10  ;;  %v10019_v13 = vrot.slane %v9863_v61, %v13795_v10  ;;  %v4386_v24 = vcombine.high %v4384_v57, %v4384_v57  ;;  %v3977_v61 = vld [vmem:[#allocation2 + $0xe0] sm:$0xff] }
 0x1f9   : > { %12959 = vmatmul.mubr.msk.bf16.gmra.mrb[4].mxu0 %vm396_vm1, %v10817_v23  ;;  %v10026_v25 = vrot.slane %v10012_v50, %v13795_v10  ;;  %v10443_v3 = vcombine.low %v9993_v0, %v9995_v52  ;;  %v10444_v48 = vcombine.low %v10003_v6, %v10011_v32  ;;  %v4387_v26 = vcombine.high %v3974_v56, %v3974_v56  ;;  %v3978_v32 = vld [vmem:[#allocation2 + $0xe8] sm:$0x3f] }
 0x1fa   : > { %v4808_v63 = vcombine.low %v4800_v44, %v4807_v21  ;;  %12962 = vmatprep.mubr.msk.bf16.mxu0 %vm13652_vm0, %v13651_v2  ;;  %v10027_v20 = vcombine.high %v10019_v13, %v10019_v13  ;;  %v10460_v31 = vcombine.low %v10010_v11, %v10019_v13  ;;  %v4394_v33 = vrot.slane %v3974_v56, %v13795_v10 }
 0x1fb   : > { %v10451_v18 = vrot.slane %v10443_v3, %v13795_v10  ;;  %v10458_v51 = vrot.slane %v10444_v48, %v13795_v10  ;;  %v4401_v27 = vrot.slane %v4387_v26, %v13795_v10  ;;  %v4403_v8 = vcombine.high %v3975_v15, %v3975_v15 }
 0x1fc   : > { %v4919_v19 = vpack.c.bf16 %v4808_v63, %v4791_v12  ;;  %v10461_v1 = vcombine.low %v10027_v20, %v10026_v25  ;;  %v10468_v5 = vrot.slane %v10460_v31, %v13795_v10  ;;  %v4402_v39 = vcombine.high %v4394_v33, %v4394_v33  ;;  %v9867_v63 = vld [vmem:[#allocation2 + $0x72] sm:$0xff] }
 0x1fd   : > { %v10459_v4 = vcombine.low %v10451_v18, %v10458_v51  ;;  %v4410_v60 = vrot.slane %v3975_v15, %v13795_v10  ;;  %v4417_v29 = vrot.slane %v4403_v8, %v13795_v10  ;;  %v4809_v7 = vcombine.low %v4386_v24, %v4394_v33  ;;  %v9866_v24 = vld [vmem:[#allocation2 + $0x6a] sm:$0x3f] }
 0x1fe   : > { %12721 = vmatmul.mubr.msk.bf16.gmra.mrb[36].mxu1 %vm396_vm1, %v4919_v19  ;;  %v10475_v42 = vrot.slane %v10461_v1, %v13795_v10  ;;  %v4810_v9 = vcombine.low %v4402_v39, %v4401_v27  ;;  %v10028_v17 = vcombine.high %v10026_v25, %v10026_v25  ;;  %v10029_v58 = vcombine.high %v9864_v40, %v9864_v40  ;;  %v9868_v39 = vld [vmem:[#allocation2 + $0x7a] sm:$0x3f] }
 0x1ff   : > { %12724 = vmatprep.mubr.msk.bf16.mxu1 %vm13652_vm0, %v13651_v2  ;;  %v4418_v38 = vcombine.high %v4410_v60, %v4410_v60  ;;  %v4419_v43 = vcombine.high %v4417_v29, %v4417_v29  ;;  %v4817_v34 = vrot.slane %v4809_v7, %v13795_v10  ;;  %v10036_v46 = vrot.slane %v9864_v40, %v13795_v10 }
 0x200   : > { %v10476_v49 = vcombine.low %v10468_v5, %v10475_v42  ;;  %v4824_v22 = vrot.slane %v4810_v9, %v13795_v10  ;;  %v10043_v53 = vrot.slane %v10029_v58, %v13795_v10  ;;  %v10045_v35 = vcombine.high %v9865_v45, %v9865_v45 }
 0x201   : > { %v4826_v30 = vcombine.low %v4410_v60, %v4418_v38  ;;  %v4827_v14 = vcombine.low %v4417_v29, %v4419_v43  ;;  %v10044_v57 = vcombine.high %v10036_v46, %v10036_v46  ;;  %v10052_v55 = vrot.slane %v9865_v45, %v13795_v10 }
 0x202   : > { %v10818_v28 = vpack.c.bf16 %v10476_v49, %v10459_v4  ;;  %v4825_v41 = vcombine.low %v4817_v34, %v4824_v22  ;;  %v10059_v36 = vrot.slane %v10045_v35, %v13795_v10  ;;  %v10477_v47 = vcombine.low %v10028_v17, %v10036_v46 }
 0x203   : > { %v4834_v62 = vrot.slane %v4826_v30, %v13795_v10  ;;  %v4841_v0 = vrot.slane %v4827_v14, %v13795_v10  ;;  %v10060_v6 = vcombine.high %v10052_v55, %v10052_v55  ;;  %v10478_v11 = vcombine.low %v10044_v57, %v10043_v53  ;;  %v9869_v30 = vld [vmem:[#allocation2 + $0x82] sm:$0xff] }
 0x204   : > { %12963 = vmatmul.mubr.msk.bf16.gmra.mrb[8].mxu0 %vm396_vm1, %v10818_v28  ;;  %v10061_v54 = vcombine.high %v10059_v36, %v10059_v36  ;;  %v10485_v16 = vrot.slane %v10477_v47, %v13795_v10  ;;  %v4420_v37 = vcombine.high %v3976_v59, %v3976_v59  ;;  %v4427_v44 = vrot.slane %v3976_v59, %v13795_v10 }
 0x205   : > { %v4842_v56 = vcombine.low %v4834_v62, %v4841_v0  ;;  %12966 = vmatprep.mubr.msk.bf16.mxu0 %vm13652_vm0, %v13651_v2  ;;  %v10492_v23 = vrot.slane %v10478_v11, %v13795_v10  ;;  %v10494_v52 = vcombine.low %v10052_v55, %v10060_v6  ;;  %v4436_v50 = vcombine.high %v3977_v61, %v3977_v61 }
 0x206   : > { %v10495_v12 = vcombine.low %v10059_v36, %v10061_v54  ;;  %v4434_v21 = vrot.slane %v4420_v37, %v13795_v10  ;;  %v4435_v13 = vcombine.high %v4427_v44, %v4427_v44  ;;  %v4443_v15 = vrot.slane %v3977_v61, %v13795_v10  ;;  %v9870_v61 = vld [vmem:[#allocation2 + $0x8a] sm:$0x3f]  ;;  %v5148_v54 = vld [vmem:[#allocation2 + $0x91] sm:$0xff] }
 0x207   : > { %v4920_v25 = vpack.c.bf16 %v4842_v56, %v4825_v41  ;;  %v10493_v3 = vcombine.low %v10485_v16, %v10492_v23  ;;  %v10502_v48 = vrot.slane %v10494_v52, %v13795_v10  ;;  %v4450_v26 = vrot.slane %v4436_v50, %v13795_v10 }
 0x208   : > { %v10509_v20 = vrot.slane %v10495_v12, %v13795_v10  ;;  %v4451_v31 = vcombine.high %v4443_v15, %v4443_v15  ;;  %v4460_v33 = vrot.slane %v3978_v32, %v13795_v10  ;;  %v4843_v18 = vcombine.low %v4427_v44, %v4435_v13  ;;  %v5149_v13 = vld [vmem:[#allocation2 + $0x99] sm:$0x3f] }
 0x209   : > { %12725 = vmatmul.mubr.msk.bf16.gmra.mrb[40].mxu1 %vm396_vm1, %v4920_v25  ;;  %v4452_v51 = vcombine.high %v4450_v26, %v4450_v26  ;;  %v4844_v27 = vcombine.low %v4434_v21, %v4443_v15  ;;  %v10062_v8 = vcombine.high %v9866_v24, %v9866_v24  ;;  %v10069_v40 = vrot.slane %v9866_v24, %v13795_v10 }
 0x20a   : > { %v10510_v19 = vcombine.low %v10502_v48, %v10509_v20  ;;  %12728 = vmatprep.mubr.msk.bf16.mxu1 %vm13652_vm0, %v13651_v2  ;;  %v4851_v1 = vrot.slane %v4843_v18, %v13795_v10  ;;  %v4860_v5 = vcombine.low %v4451_v31, %v4450_v26  ;;  %v10078_v4 = vcombine.high %v9867_v63, %v9867_v63 }
 0x20b   : > { %v4858_v60 = vrot.slane %v4844_v27, %v13795_v10  ;;  %v4861_v29 = vcombine.low %v4452_v51, %v4460_v33  ;;  %v10076_v7 = vrot.slane %v10062_v8, %v13795_v10  ;;  %v10077_v45 = vcombine.high %v10069_v40, %v10069_v40 }
 0x20c   : > { %v10819_v42 = vpack.c.bf16 %v10510_v19, %v10493_v3  ;;  %v4868_v9 = vrot.slane %v4860_v5, %v13795_v10  ;;  %v10085_v17 = vrot.slane %v9867_v63, %v13795_v10  ;;  %v10092_v58 = vrot.slane %v10078_v4, %v13795_v10  ;;  %v5150_v63 = vld [vmem:[#allocation2 + $0xa1] sm:$0xff]  ;;  %v9871_v4 = vld [vmem:[#allocation2 + $0x92] sm:$0xff] }
 0x20d   : > { %v4859_v38 = vcombine.low %v4851_v1, %v4858_v60  ;;  %v4875_v43 = vrot.slane %v4861_v29, %v13795_v10  ;;  %v10102_v34 = vrot.slane %v9868_v39, %v13795_v10  ;;  %v10511_v46 = vcombine.low %v10069_v40, %v10077_v45 }
 0x20e   : > { %12967 = vmatmul.mubr.msk.bf16.gmra.mrb[12].mxu0 %vm396_vm1, %v10819_v42  ;;  %v10093_v49 = vcombine.high %v10085_v17, %v10085_v17  ;;  %v10094_v22 = vcombine.high %v10092_v58, %v10092_v58  ;;  %v10512_v53 = vcombine.low %v10076_v7, %v10085_v17  ;;  %v4453_v35 = vcombine.high %v3978_v32, %v3978_v32 }
 0x20f   : > { %v4876_v14 = vcombine.low %v4868_v9, %v4875_v43  ;;  %12970 = vmatprep.mubr.msk.bf16.mxu0 %vm13652_vm0, %v13651_v2  ;;  %v10519_v57 = vrot.slane %v10511_v46, %v13795_v10  ;;  %v4468_v55 = vcombine.high %v4460_v33, %v4460_v33  ;;  %v10095_v59 = vcombine.high %v9868_v39, %v9868_v39 }
 0x210   : > { %v10526_v28 = vrot.slane %v10512_v53, %v13795_v10  ;;  %v10528_v41 = vcombine.low %v10093_v49, %v10092_v58  ;;  %v10529_v36 = vcombine.low %v10094_v22, %v10102_v34  ;;  %v4467_v47 = vrot.slane %v4453_v35, %v13795_v10  ;;  %v9872_v58 = vld [vmem:[#allocation2 + $0x9a] sm:$0x3f] }
 0x211   : > { %v4921_v62 = vpack.c.bf16 %v4876_v14, %v4859_v38  ;;  %v10109_v0 = vrot.slane %v10095_v59, %v13795_v10  ;;  %v10110_v6 = vcombine.high %v10102_v34, %v10102_v34  ;;  %v10111_v11 = vcombine.high %v9869_v30, %v9869_v30 }
 0x212   : > { %v10527_v16 = vcombine.low %v10519_v57, %v10526_v28  ;;  %v10536_v37 = vrot.slane %v10528_v41, %v13795_v10  ;;  %v10543_v44 = vrot.slane %v10529_v36, %v13795_v10  ;;  %v4877_v56 = vcombine.low %v4468_v55, %v4467_v47 }
 0x213   : > { %12729 = vmatmul.mubr.msk.bf16.gmra.mrb[44].mxu1 %vm396_vm1, %v4921_v62  ;;  %v10118_v23 = vrot.slane %v9869_v30, %v13795_v10  ;;  %v10125_v52 = vrot.slane %v10111_v11, %v13795_v10  ;;  %v10135_v32 = vrot.slane %v9870_v61, %v13795_v10  ;;  %v10545_v50 = vcombine.low %v10110_v6, %v10109_v0 }
 0x214   : > { %v10544_v12 = vcombine.low %v10536_v37, %v10543_v44  ;;  %12732 = vmatprep.mubr.msk.bf16.mxu1 %vm13652_vm0, %v13651_v2  ;;  %v4884_v21 = vrot.slane %v4877_v56, %v13795_v10  ;;  %v5452_v15 = vcombine.high %v5148_v54, %v5148_v54  ;;  %v5459_v24 = vrot.slane %v5148_v54, %v13795_v10  ;;  %v5152_v44 = vld [vmem:[#allocation2 + $0xb1] sm:$0xff] }
 0x215   : > { %v10126_v25 = vcombine.high %v10118_v23, %v10118_v23  ;;  %v10127_v3 = vcombine.high %v10125_v52, %v10125_v52  ;;  %v10143_v48 = vcombine.high %v10135_v32, %v10135_v32  ;;  %v10553_v26 = vrot.slane %v10545_v50, %v13795_v10 }
 0x216   : > { %v10820_v20 = vpack.c.bf16 %v10544_v12, %v10527_v16  ;;  %v4922_v31 = vpack.c.bf16 %v4884_v21, %v4884_v21  ;;  %v5466_v33 = vrot.slane %v5452_v15, %v13795_v10  ;;  %v5467_v18 = vcombine.high %v5459_v24, %v5459_v24 }
 0x217   : > { %v10546_v51 = vcombine.low %v10118_v23, %v10126_v25  ;;  %v10562_v27 = vcombine.low %v10125_v52, %v10127_v3  ;;  %v10563_v8 = vcombine.low %v10135_v32, %v10143_v48  ;;  %v5469_v40 = vcombine.high %v5149_v13, %v5149_v13 }
 0x218   : > { %12971 = vmatmul.mubr.msk.bf16.gmra.mrb[16].mxu0 %vm396_vm1, %v10820_v20  ;;  %v5468_v19 = vcombine.high %v5466_v33, %v5466_v33  ;;  %v5476_v1 = vrot.slane %v5149_v13, %v13795_v10  ;;  %v5492_v5 = vrot.slane %v5150_v63, %v13795_v10  ;;  %v5888_v39 = vcombine.low %v5459_v24, %v5467_v18  ;;  %v9873_v24 = vld [vmem:[#allocation2 + $0xa2] sm:$0xff] }
 0x219   : > { %12974 = vmatprep.mubr.msk.bf16.mxu0 %vm13652_vm0, %v13651_v2  ;;  %v10560_v60 = vrot.slane %v10546_v51, %v13795_v10  ;;  %v10570_v29 = vrot.slane %v10562_v27, %v13795_v10  ;;  %v10577_v7 = vrot.slane %v10563_v8, %v13795_v10  ;;  %v5483_v45 = vrot.slane %v5469_v40, %v13795_v10 }
 0x21a   : > { %v5484_v42 = vcombine.high %v5476_v1, %v5476_v1  ;;  %v5889_v9 = vcombine.low %v5466_v33, %v5468_v19  ;;  %v5896_v17 = vrot.slane %v5888_v39, %v13795_v10  ;;  %v10128_v38 = vcombine.high %v9870_v61, %v9870_v61  ;;  %v5151_v61 = vld [vmem:[#allocation2 + $0xa9] sm:$0x3f]  ;;  %v9875_v39 = vld [vmem:[#allocation2 + $0xb2] sm:$0xff] }
 0x21b   : > { %12733 = vmatmul.mubr.msk.bf16.gmra.mrb[48].mxu1 %vm396_vm1, %v4922_v31  ;;  %v10561_v43 = vcombine.low %v10553_v26, %v10560_v60  ;;  %v10578_v34 = vcombine.low %v10570_v29, %v10577_v7  ;;  %v5906_v46 = vcombine.low %v5483_v45, %v5492_v5  ;;  %v10144_v49 = vcombine.high %v9871_v4, %v9871_v4 }
 0x21c   : > { %12766 = vmatprep.mubr.msk.bf16.mxu1 %vm13652_vm0, %v13651_v2  ;;  %v5903_v22 = vrot.slane %v5889_v9, %v13795_v10  ;;  %v5905_v53 = vcombine.low %v5476_v1, %v5484_v42  ;;  %v10142_v35 = vrot.slane %v10128_v38, %v13795_v10  ;;  %v10151_v30 = vrot.slane %v9871_v4, %v13795_v10  ;;  %v5153_v42 = vld [vmem:[#allocation2 + $0xb9] sm:$0x3f] }
 0x21d   : > { %v10821_v14 = vpack.c.bf16 %v10578_v34, %v10561_v43  ;;  %v5920_v57 = vrot.slane %v5906_v46, %v13795_v10  ;;  %v10158_v55 = vrot.slane %v10144_v49, %v13795_v10  ;;  %v10161_v59 = vcombine.high %v9872_v58, %v9872_v58 }
 0x21e   : > { %v5904_v28 = vcombine.low %v5896_v17, %v5903_v22  ;;  %v5913_v41 = vrot.slane %v5905_v53, %v13795_v10  ;;  %v10159_v36 = vcombine.high %v10151_v30, %v10151_v30  ;;  %v10168_v47 = vrot.slane %v9872_v58, %v13795_v10 }
 0x21f   : > { %v10160_v62 = vcombine.high %v10158_v55, %v10158_v55  ;;  %v10175_v0 = vrot.slane %v10161_v59, %v13795_v10  ;;  %v10579_v6 = vcombine.low %v10142_v35, %v10151_v30  ;;  %v5485_v11 = vcombine.high %v5150_v63, %v5150_v63  ;;  %v9874_v63 = vld [vmem:[#allocation2 + $0xaa] sm:$0x3f]  ;;  %v5154_v59 = vld [vmem:[#allocation2 + $0xc1] sm:$0xff] }
 0x220   : > { %12975 = vmatmul.mubr.msk.bf16.gmra.mrb[20].mxu0 %vm396_vm1, %v10821_v14  ;;  %v5921_v54 = vcombine.low %v5913_v41, %v5920_v57  ;;  %v10176_v16 = vcombine.high %v10168_v47, %v10168_v47  ;;  %v10580_v37 = vcombine.low %v10159_v36, %v10158_v55  ;;  %v5500_v56 = vcombine.high %v5492_v5, %v5492_v5 }
 0x221   : > { %12978 = vmatprep.mubr.msk.bf16.mxu0 %vm13652_vm0, %v13651_v2  ;;  %v10587_v23 = vrot.slane %v10579_v6, %v13795_v10  ;;  %v10596_v52 = vcombine.low %v10160_v62, %v10168_v47  ;;  %v5499_v32 = vrot.slane %v5485_v11, %v13795_v10  ;;  %v5502_v50 = vcombine.high %v5151_v61, %v5151_v61 }
 0x222   : > { %v6098_v12 = vpack.c.bf16 %v5921_v54, %v5904_v28  ;;  %v10594_v21 = vrot.slane %v10580_v37, %v13795_v10  ;;  %v10597_v13 = vcombine.low %v10176_v16, %v10175_v0  ;;  %v5509_v15 = vrot.slane %v5151_v61, %v13795_v10 }
 0x223   : > { %v10604_v25 = vrot.slane %v10596_v52, %v13795_v10  ;;  %v5501_v3 = vcombine.high %v5499_v32, %v5499_v32  ;;  %v5516_v48 = vrot.slane %v5502_v50, %v13795_v10  ;;  %v5525_v26 = vrot.slane %v5152_v44, %v13795_v10 }
 0x224   : > { %12767 = vmatmul.mubr.msk.bf16.vlgmr.msra.gmra.mrb[28].mxu1 %vm396_vm1, %v6098_v12  ;;  %v10595_v20 = vcombine.low %v10587_v23, %v10594_v21  ;;  %v10611_v31 = vrot.slane %v10597_v13, %v13795_v10  ;;  %v5517_v33 = vcombine.high %v5509_v15, %v5509_v15  ;;  %v5922_v18 = vcombine.low %v5500_v56, %v5499_v32  ;;  %v9876_v56 = vld [vmem:[#allocation2 + $0xba] sm:$0x3f] }
 0x225   : > { %12770 = vmatprep.mubr.msk.bf16.mxu1 %vm13652_vm0, %v13651_v2  ;;  %v5533_v51 = vcombine.high %v5525_v26, %v5525_v26  ;;  %v5923_v27 = vcombine.low %v5501_v3, %v5509_v15  ;;  %v10177_v8 = vcombine.high %v9873_v24, %v9873_v24  ;;  %v10184_v40 = vrot.slane %v9873_v24, %v13795_v10  ;;  %v9877_v24 = vld [vmem:[#allocation2 + $0xc2] sm:$0xff] }
 0x226   : > { %v10612_v19 = vcombine.low %v10604_v25, %v10611_v31  ;;  %v5930_v1 = vrot.slane %v5922_v18, %v13795_v10  ;;  %v5939_v5 = vcombine.low %v5517_v33, %v5516_v48  ;;  %v10194_v4 = vcombine.high %v9874_v63, %v9874_v63  ;;  %v5155_v18 = vld [vmem:[#allocation2 + $0xc9] sm:$0x3f] }
 0x227   : > { %v5937_v60 = vrot.slane %v5923_v27, %v13795_v10  ;;  %v5940_v29 = vcombine.low %v5525_v26, %v5533_v51  ;;  %v10191_v7 = vrot.slane %v10177_v8, %v13795_v10  ;;  %v10192_v45 = vcombine.high %v10184_v40, %v10184_v40 }
 0x228   : > { %v10822_v9 = vpack.c.bf16 %v10612_v19, %v10595_v20  ;;  %v5947_v17 = vrot.slane %v5939_v5, %v13795_v10  ;;  %v10201_v58 = vrot.slane %v9874_v63, %v13795_v10  ;;  %v10208_v38 = vrot.slane %v10194_v4, %v13795_v10  ;;  %v5156_v4 = vld [vmem:[#allocation2 + $0xd1] sm:$0xff] }
 0x229   : > { %v5938_v43 = vcombine.low %v5930_v1, %v5937_v60  ;;  %v5954_v34 = vrot.slane %v5940_v29, %v13795_v10  ;;  %v10193_v46 = vcombine.high %v10191_v7, %v10191_v7  ;;  %v10217_v49 = vrot.slane %v9875_v39, %v13795_v10 }
 0x22a   : > { %12979 = vmatmul.mubr.msk.bf16.gmra.mrb[24].mxu0 %vm396_vm1, %v10822_v9  ;;  %v10209_v22 = vcombine.high %v10201_v58, %v10201_v58  ;;  %v10613_v53 = vcombine.low %v10184_v40, %v10192_v45  ;;  %v5518_v35 = vcombine.high %v5152_v44, %v5152_v44  ;;  %v5535_v30 = vcombine.high %v5153_v42, %v5153_v42 }
 0x22b   : > { %v5955_v14 = vcombine.low %v5947_v17, %v5954_v34  ;;  %12982 = vmatprep.mubr.msk.bf16.mxu0 %vm13652_vm0, %v13651_v2  ;;  %v10614_v57 = vcombine.low %v10191_v7, %v10193_v46  ;;  %v10631_v55 = vcombine.low %v10208_v38, %v10217_v49  ;;  %v5542_v28 = vrot.slane %v5153_v42, %v13795_v10 }
 0x22c   : > { %v10621_v41 = vrot.slane %v10613_v53, %v13795_v10  ;;  %v10630_v36 = vcombine.low %v10201_v58, %v10209_v22  ;;  %v5532_v47 = vrot.slane %v5518_v35, %v13795_v10  ;;  %v5549_v61 = vrot.slane %v5535_v30, %v13795_v10 }
 0x22d   : > { %v6099_v62 = vpack.c.bf16 %v5955_v14, %v5938_v43  ;;  %v10628_v0 = vrot.slane %v10614_v57, %v13795_v10  ;;  %v10645_v6 = vrot.slane %v10631_v55, %v13795_v10  ;;  %v5550_v11 = vcombine.high %v5542_v28, %v5542_v28 }
 0x22e   : > { %v10638_v54 = vrot.slane %v10630_v36, %v13795_v10  ;;  %v5534_v16 = vcombine.high %v5532_v47, %v5532_v47  ;;  %v5551_v37 = vcombine.high %v5154_v59, %v5154_v59  ;;  %v5558_v44 = vrot.slane %v5154_v59, %v13795_v10  ;;  %v9879_v36 = vld [vmem:[#allocation2 + $0xd2] sm:$0xff] }
 0x22f   : > { %12771 = vmatmul.mubr.msk.bf16.gmra.mrb[32].mxu1 %vm396_vm1, %v6099_v62  ;;  %v10629_v23 = vcombine.low %v10621_v41, %v10628_v0  ;;  %v5957_v52 = vcombine.low %v5542_v28, %v5550_v11  ;;  %v10210_v32 = vcombine.high %v9875_v39, %v9875_v39  ;;  %v10225_v50 = vcombine.high %v10217_v49, %v10217_v49  ;;  %v9878_v49 = vld [vmem:[#allocation2 + $0xca] sm:$0x3f] }
 0x230   : > { %v10646_v12 = vcombine.low %v10638_v54, %v10645_v6  ;;  %12774 = vmatprep.mubr.msk.bf16.mxu1 %vm13652_vm0, %v13651_v2  ;;  %v5565_v21 = vrot.slane %v5551_v37, %v13795_v10  ;;  %v5566_v13 = vcombine.high %v5558_v44, %v5558_v44  ;;  %v5956_v15 = vcombine.low %v5532_v47, %v5534_v16 }
 0x231   : > { %v5971_v25 = vrot.slane %v5957_v52, %v13795_v10  ;;  %v5973_v3 = vcombine.low %v5549_v61, %v5558_v44  ;;  %v10224_v48 = vrot.slane %v10210_v32, %v13795_v10  ;;  %v10227_v26 = vcombine.high %v9876_v56, %v9876_v56 }
 0x232   : > { %v10823_v63 = vpack.c.bf16 %v10646_v12, %v10629_v23  ;;  %v5964_v20 = vrot.slane %v5956_v15, %v13795_v10  ;;  %v5974_v31 = vcombine.low %v5566_v13, %v5565_v21  ;;  %v10234_v33 = vrot.slane %v9876_v56, %v13795_v10  ;;  %v5157_v56 = vld [vmem:[#allocation2 + $0xd9] sm:$0x3f] }
 0x233   : > { %v5981_v51 = vrot.slane %v5973_v3, %v13795_v10  ;;  %v10226_v27 = vcombine.high %v10224_v48, %v10224_v48  ;;  %v10241_v8 = vrot.slane %v10227_v26, %v13795_v10  ;;  %v10250_v40 = vrot.slane %v9877_v24, %v13795_v10 }
 0x234   : > { %12983 = vmatmul.mubr.msk.bf16.gmra.mrb[28].mxu0 %vm396_vm1, %v10823_v63  ;;  %v5972_v19 = vcombine.low %v5964_v20, %v5971_v25  ;;  %v5988_v1 = vrot.slane %v5974_v31, %v13795_v10  ;;  %v10242_v5 = vcombine.high %v10234_v33, %v10234_v33  ;;  %v10647_v39 = vcombine.low %v10225_v50, %v10224_v48 }
 0x235   : > { %12986 = vmatprep.mubr.msk.bf16.mxu0 %vm13652_vm0, %v13651_v2  ;;  %v10258_v60 = vcombine.high %v10250_v40, %v10250_v40  ;;  %v10648_v29 = vcombine.low %v10226_v27, %v10234_v33  ;;  %v5567_v7 = vcombine.high %v5565_v21, %v5565_v21  ;;  %v5568_v45 = vcombine.high %v5155_v18, %v5155_v18  ;;  %v5159_v33 = vld [vmem:[#allocation2 + $0xe9] sm:$0x3f] }
 0x236   : > { %v5989_v42 = vcombine.low %v5981_v51, %v5988_v1  ;;  %v10655_v9 = vrot.slane %v10647_v39, %v13795_v10  ;;  %v10664_v17 = vcombine.low %v10242_v5, %v10241_v8  ;;  %v5575_v58 = vrot.slane %v5155_v18, %v13795_v10 }
 0x237   : > { %v10662_v38 = vrot.slane %v10648_v29, %v13795_v10  ;;  %v10665_v43 = vcombine.low %v10250_v40, %v10258_v60  ;;  %v5582_v34 = vrot.slane %v5568_v45, %v13795_v10  ;;  %v5584_v46 = vcombine.high %v5156_v4, %v5156_v4 }
 0x238   : > { %v6100_v22 = vpack.c.bf16 %v5989_v42, %v5972_v19  ;;  %v10672_v53 = vrot.slane %v10664_v17, %v13795_v10  ;;  %v5583_v35 = vcombine.high %v5575_v58, %v5575_v58  ;;  %v5591_v30 = vrot.slane %v5156_v4, %v13795_v10  ;;  %v9880_v4 = vld [vmem:[#allocation2 + $0xda] sm:$0x3f]  ;;  %v9881_v42 = vld [vmem:[#allocation2 + $0xe2] sm:$0xff] }
 0x239   : > { %v10663_v14 = vcombine.low %v10655_v9, %v10662_v38  ;;  %v10679_v57 = vrot.slane %v10665_v43, %v13795_v10  ;;  %v5598_v55 = vrot.slane %v5584_v46, %v13795_v10  ;;  %v5990_v59 = vcombine.low %v5567_v7, %v5575_v58 }
 0x23a   : > { %12775 = vmatmul.mubr.msk.bf16.gmra.mrb[36].mxu1 %vm396_vm1, %v6100_v22  ;;  %v5599_v28 = vcombine.high %v5591_v30, %v5591_v30  ;;  %v5991_v41 = vcombine.low %v5583_v35, %v5582_v34  ;;  %v10243_v47 = vcombine.high %v9877_v24, %v9877_v24  ;;  %v10260_v61 = vcombine.high %v9878_v49, %v9878_v49  ;;  %v5158_v24 = vld [vmem:[#allocation2 + $0xe1] sm:$0xff] }
 0x23b   : > { %v10680_v62 = vcombine.low %v10672_v53, %v10679_v57  ;;  %12778 = vmatprep.mubr.msk.bf16.mxu1 %vm13652_vm0, %v13651_v2  ;;  %v5600_v0 = vcombine.high %v5598_v55, %v5598_v55  ;;  %v5998_v6 = vrot.slane %v5990_v59, %v13795_v10  ;;  %v10267_v11 = vrot.slane %v9878_v49, %v13795_v10 }
 0x23c   : > { %v6005_v54 = vrot.slane %v5991_v41, %v13795_v10  ;;  %v6007_v16 = vcombine.low %v5591_v30, %v5599_v28  ;;  %v10257_v37 = vrot.slane %v10243_v47, %v13795_v10  ;;  %v10274_v44 = vrot.slane %v10260_v61, %v13795_v10  ;;  %v9882_v61 = vld [vmem:[#allocation2 + $0xea] sm:$0x3f] }
 0x23d   : > { %v10824_v23 = vpack.c.bf16 %v10680_v62, %v10663_v14  ;;  %v6008_v52 = vcombine.low %v5598_v55, %v5600_v0  ;;  %v10275_v32 = vcombine.high %v10267_v11, %v10267_v11  ;;  %v10276_v50 = vcombine.high %v9879_v36, %v9879_v36 }
 0x23e   : > { %v6006_v12 = vcombine.low %v5998_v6, %v6005_v54  ;;  %v6015_v21 = vrot.slane %v6007_v16, %v13795_v10  ;;  %v10259_v13 = vcombine.high %v10257_v37, %v10257_v37  ;;  %v10283_v15 = vrot.slane %v9879_v36, %v13795_v10 }
 0x23f   : > { %12987 = vmatmul.mubr.msk.bf16.gmra.mrb[32].mxu0 %vm396_vm1, %v10824_v23  ;;  %v6022_v25 = vrot.slane %v6008_v52, %v13795_v10  ;;  %v10290_v3 = vrot.slane %v10276_v50, %v13795_v10  ;;  %v10682_v48 = vcombine.low %v10267_v11, %v10275_v32  ;;  %v5601_v26 = vcombine.high %v5157_v56, %v5157_v56 }
 0x240   : > { %12990 = vmatprep.mubr.msk.bf16.mxu0 %vm13652_vm0, %v13651_v2  ;;  %v10291_v63 = vcombine.high %v10283_v15, %v10283_v15  ;;  %v10681_v20 = vcombine.low %v10257_v37, %v10259_v13  ;;  %v10698_v31 = vcombine.low %v10274_v44, %v10283_v15  ;;  %v5608_v18 = vrot.slane %v5157_v56, %v13795_v10  ;;  %v9883_v56 = vld [vmem:[#allocation2 + $0xf2] sm:$0xff] }
 0x241   : > { %v6023_v51 = vcombine.low %v6015_v21, %v6022_v25  ;;  %v10696_v27 = vrot.slane %v10682_v48, %v13795_v10  ;;  %v5615_v8 = vrot.slane %v5601_v26, %v13795_v10  ;;  %v5617_v40 = vcombine.high %v5158_v24, %v5158_v24 }
 0x242   : > { %v10689_v19 = vrot.slane %v10681_v20, %v13795_v10  ;;  %v10699_v1 = vcombine.low %v10291_v63, %v10290_v3  ;;  %v10706_v5 = vrot.slane %v10698_v31, %v13795_v10  ;;  %v5616_v39 = vcombine.high %v5608_v18, %v5608_v18 }
 0x243   : > { %v6101_v60 = vpack.c.bf16 %v6023_v51, %v6006_v12  ;;  %v5624_v29 = vrot.slane %v5158_v24, %v13795_v10  ;;  %v5631_v7 = vrot.slane %v5617_v40, %v13795_v10  ;;  %v5641_v45 = vrot.slane %v5159_v33, %v13795_v10  ;;  %v9884_v24 = vld [vmem:[#allocation2 + $0xfa] sm:$0x3f] }
 0x244   : > { %v10697_v9 = vcombine.low %v10689_v19, %v10696_v27  ;;  %v10713_v17 = vrot.slane %v10699_v1, %v13795_v10  ;;  %v6024_v58 = vcombine.low %v5608_v18, %v5616_v39  ;;  %v10292_v38 = vcombine.high %v10290_v3, %v10290_v3 }
 0x245   : > { %12779 = vmatmul.mubr.msk.bf16.gmra.mrb[40].mxu1 %vm396_vm1, %v6101_v60  ;;  %v5632_v43 = vcombine.high %v5624_v29, %v5624_v29  ;;  %v5633_v34 = vcombine.high %v5631_v7, %v5631_v7  ;;  %v6025_v46 = vcombine.low %v5615_v8, %v5624_v29  ;;  %v10293_v49 = vcombine.high %v9880_v4, %v9880_v4 }
 0x246   : > { %v10714_v22 = vcombine.low %v10706_v5, %v10713_v17  ;;  %12782 = vmatprep.mubr.msk.bf16.mxu1 %vm13652_vm0, %v13651_v2  ;;  %v6032_v53 = vrot.slane %v6024_v58, %v13795_v10  ;;  %v10300_v35 = vrot.slane %v9880_v4, %v13795_v10  ;;  %v10309_v30 = vcombine.high %v9881_v42, %v9881_v42 }
 0x247   : > { %v6039_v14 = vrot.slane %v6025_v46, %v13795_v10  ;;  %v6041_v57 = vcombine.low %v5632_v43, %v5631_v7  ;;  %v6042_v55 = vcombine.low %v5633_v34, %v5641_v45  ;;  %v10307_v59 = vrot.slane %v10293_v49, %v13795_v10 }
 0x248   : > { %v10825_v28 = vpack.c.bf16 %v10714_v22, %v10697_v9  ;;  %v10308_v41 = vcombine.high %v10300_v35, %v10300_v35  ;;  %v10316_v36 = vrot.slane %v9881_v42, %v13795_v10  ;;  %v10323_v47 = vrot.slane %v10309_v30, %v13795_v10 }
 0x249   : > { %v6040_v62 = vcombine.low %v6032_v53, %v6039_v14  ;;  %v6049_v0 = vrot.slane %v6041_v57, %v13795_v10  ;;  %v6056_v6 = vrot.slane %v6042_v55, %v13795_v10  ;;  %v10715_v11 = vcombine.low %v10292_v38, %v10300_v35 }
 0x24a   : > { %12991 = vmatmul.mubr.msk.bf16.gmra.mrb[36].mxu0 %vm396_vm1, %v10825_v28  ;;  %v10324_v54 = vcombine.high %v10316_v36, %v10316_v36  ;;  %v10325_v16 = vcombine.high %v10323_v47, %v10323_v47  ;;  %v10716_v37 = vcombine.low %v10308_v41, %v10307_v59  ;;  %v5634_v44 = vcombine.high %v5159_v33, %v5159_v33 }
 0x24b   : > { %v6057_v23 = vcombine.low %v6049_v0, %v6056_v6  ;;  %12994 = vmatprep.mubr.msk.bf16.mxu0 %vm13652_vm0, %v13651_v2  ;;  %v10723_v52 = vrot.slane %v10715_v11, %v13795_v10  ;;  %v5649_v32 = vcombine.high %v5641_v45, %v5641_v45  ;;  %v10326_v50 = vcombine.high %v9882_v61, %v9882_v61 }
 0x24c   : > { %v10730_v12 = vrot.slane %v10716_v37, %v13795_v10  ;;  %v10732_v21 = vcombine.low %v10316_v36, %v10324_v54  ;;  %v10733_v13 = vcombine.low %v10323_v47, %v10325_v16  ;;  %v5648_v15 = vrot.slane %v5634_v44, %v13795_v10 }
 0x24d   : > { %v6102_v25 = vpack.c.bf16 %v6057_v23, %v6040_v62  ;;  %v10333_v3 = vrot.slane %v9882_v61, %v13795_v10  ;;  %v10340_v48 = vrot.slane %v10326_v50, %v13795_v10  ;;  %v10342_v26 = vcombine.high %v9883_v56, %v9883_v56 }
 0x24e   : > { %v10731_v63 = vcombine.low %v10723_v52, %v10730_v12  ;;  %v10740_v20 = vrot.slane %v10732_v21, %v13795_v10  ;;  %v10747_v31 = vrot.slane %v10733_v13, %v13795_v10  ;;  %v6058_v33 = vcombine.low %v5649_v32, %v5648_v15 }
 0x24f   : > { %12783 = vmatmul.mubr.msk.bf16.gmra.mrb[44].mxu1 %vm396_vm1, %v6102_v25  ;;  %v10341_v18 = vcombine.high %v10333_v3, %v10333_v3  ;;  %v10349_v51 = vrot.slane %v9883_v56, %v13795_v10  ;;  %v10356_v27 = vrot.slane %v10342_v26, %v13795_v10  ;;  %v10366_v8 = vrot.slane %v9884_v24, %v13795_v10 }
 0x250   : > { %v10748_v40 = vcombine.low %v10740_v20, %v10747_v31  ;;  %12786 = vmatprep.mubr.msk.bf16.mxu1 %vm13652_vm0, %v13651_v2  ;;  %v6065_v19 = vrot.slane %v6058_v33, %v13795_v10  ;;  %v10359_v1 = vcombine.high %v9884_v24, %v9884_v24 }
 0x251   : > { %v10357_v5 = vcombine.high %v10349_v51, %v10349_v51  ;;  %v10358_v39 = vcombine.high %v10356_v27, %v10356_v27  ;;  %v10749_v4 = vcombine.low %v10333_v3, %v10341_v18  ;;  %v10750_v60 = vcombine.low %v10340_v48, %v10349_v51 }
 0x252   : > { %v10826_v29 = vpack.c.bf16 %v10748_v40, %v10731_v63  ;;  %v6103_v7 = vpack.c.bf16 %v6065_v19, %v6065_v19  ;;  %v10373_v58 = vrot.slane %v10359_v1, %v13795_v10  ;;  %v10374_v38 = vcombine.high %v10366_v8, %v10366_v8 }
 0x253   : > { %v10757_v45 = vrot.slane %v10749_v4, %v13795_v10  ;;  %v10764_v42 = vrot.slane %v10750_v60, %v13795_v10  ;;  %v10766_v9 = vcombine.low %v10357_v5, %v10356_v27  ;;  %v10767_v17 = vcombine.low %v10358_v39, %v10366_v8 }
 0x254   : > { %12995 = vmatmul.mubr.msk.bf16.gmra.mrb[40].mxu0 %vm396_vm1, %v10826_v29  ;;  %v10783_v22 = vcombine.low %v10374_v38, %v10373_v58 }
 0x255   : > { %12998 = vmatprep.mubr.msk.bf16.mxu0 %vm13652_vm0, %v13651_v2  ;;  %v10765_v43 = vcombine.low %v10757_v45, %v10764_v42  ;;  %v10774_v34 = vrot.slane %v10766_v9, %v13795_v10  ;;  %v10781_v46 = vrot.slane %v10767_v17, %v13795_v10 }
 0x256   : > { %v10790_v35 = vrot.slane %v10783_v22, %v13795_v10 }
 0x257   : > { %12787 = vmatmul.mubr.msk.bf16.gmra.mrb[48].mxu1 %vm396_vm1, %v6103_v7  ;;  %v10782_v49 = vcombine.low %v10774_v34, %v10781_v46 }
 0x258   : > { %v10828_v30 = vpack.c.bf16 %v10790_v35, %v10790_v35 }
 0x259   : > { %v10827_v53 = vpack.c.bf16 %v10782_v49, %v10765_v43 }
 0x25c   : > { %12999 = vmatmul.mubr.msk.bf16.gmra.mrb[44].mxu0 %vm396_vm1, %v10827_v53 }
 0x25d   : > { %13002 = vmatprep.mubr.msk.bf16.mxu0 %vm13652_vm0, %v13651_v2 }
 0x264   : > { %13003 = vmatmul.mubr.msk.bf16.gmra.mrb[48].mxu0 %vm396_vm1, %v10828_v30 }
 0x274   : > { %v5005_v14 = vpop.f32.mrb[0].mxu1 }
 0x275   : > { %v12686_v57 = vpop.f32.mrb[1].mxu1 }
 0x276   : > { %v5008_v55 = vpop.f32.mrb[2].mxu1 }
 0x277   : > { %v12687_v59 = vpop.f32.mrb[3].mxu1 }
 0x27f   : > { %v5013_v28 = vpop.f32.mrb[4].mxu1 }
 0x280   : > { %v12690_v41 = vpop.f32.mrb[5].mxu1 }
 0x281   : > { %v15471_v36 = vpop.f32.mrb[6].mxu1 }
 0x282   : > { %v12691_v47 = vpop.f32.mrb[7].mxu1 }
 0x28b   : > { %v15473_v61 = vpop.f32.mrb[8].mxu1 }
 0x28c   : > { %v12694_v62 = vpop.f32.mrb[9].mxu1 }
 0x28d   : > { %v15475_v0 = vpop.f32.mrb[10].mxu1 }
 0x28e   : > { %v12695_v6 = vpop.f32.mrb[11].mxu1 }
 0x295   : > { %v15477_v11 = vpop.f32.mrb[12].mxu1 }
 0x296   : > { %v12698_v2 = vpop.f32.mrb[13].mxu1 }
 0x297   : > { %v15479_v54 = vpop.f32.mrb[14].mxu1 }
 0x298   : > { %v12699_v16 = vpop.f32.mrb[15].mxu1 }
 0x29f   : > { %v15481_v37 = vpop.f32.mrb[16].mxu1 }
 0x2a0   : > { %v12702_v44 = vpop.f32.mrb[17].mxu1 }
 0x2a1   : > { %v15483_v56 = vpop.f32.mrb[18].mxu1 }
 0x2a2   : > { %v12703_v23 = vpop.f32.mrb[19].mxu1 }
 0x2aa   : > { %v15485_v52 = vpop.f32.mrb[20].mxu1 }
 0x2ab   : > { %v12706_v32 = vpop.f32.mrb[21].mxu1 }
 0x2ac   : > { %v15487_v50 = vpop.f32.mrb[22].mxu1 }
 0x2ad   : > { %v12707_v12 = vpop.f32.mrb[23].mxu1 }
 0x2b5   : > { %v15489_v21 = vpop.f32.mrb[24].mxu1 }
 0x2b6   : > { %v12710_v13 = vpop.f32.mrb[25].mxu1 }
 0x2b7   : > { %v15491_v15 = vpop.f32.mrb[26].mxu1 }
 0x2b8   : > { %v12711_v24 = vpop.f32.mrb[27].mxu1 }
 0x2c1   : > { %v10911_v25 = vpop.f32.mrb[0].mxu0 }
 0x2c2   : > { %v13008_v3 = vadd.f32 %v10911_v25, %v5005_v14  ;;  %v12956_v48 = vpop.f32.mrb[1].mxu0 }
 0x2c3   : > { %v10914_v26 = vpop.f32.mrb[2].mxu0 }
 0x2c4   : > { %v11063_v63 = vcombine.high %v13008_v3, %v13008_v3  ;;  %v11070_v20 = vrot.slane %v13008_v3, %v13795_v10  ;;  %v12957_v31 = vpop.f32.mrb[3].mxu0  ;;  %v12055_v33 = vmul.f32 %v13008_v3, %v13008_v3  ;;  %v13009_v18 = vadd.f32 %v10914_v26, %v5008_v55 }
 0x2c5   : > { %v11997_v8 = vsel %vm396_vm1, %v13008_v3, 0.0 }
 0x2c6   : > { %v11077_v51 = vrot.slane %v11063_v63, %v13795_v10  ;;  %v11078_v27 = vcombine.high %v11070_v20, %v11070_v20  ;;  %v11080_v40 = vcombine.high %v13009_v18, %v13009_v18  ;;  %v11087_v19 = vrot.slane %v13009_v18, %v13795_v10 }
 0x2c7   : > { %v11998_v1 = vsel %vm396_vm1, %v13009_v18, 0.0  ;;  %v12056_v5 = vmul.f32 %v13009_v18, %v13009_v18  ;;  %v12080_v29 = vsel %vm396_vm1, %v12055_v33, 0.0 }
 0x2c8   : > { %v11079_v39 = vcombine.high %v11077_v51, %v11077_v51  ;;  %v11479_v4 = vcombine.low %v11070_v20, %v11078_v27  ;;  %v11999_v60 = vadd.f32 %v11998_v1, %v11997_v8  ;;  %v11094_v7 = vrot.slane %v11080_v40, %v13795_v10 }
 0x2c9   : > { %v11095_v45 = vcombine.high %v11087_v19, %v11087_v19  ;;  %v12081_v42 = vsel %vm396_vm1, %v12056_v5, 0.0 }
 0x2ca   : > { %v11480_v9 = vcombine.low %v11077_v51, %v11079_v39  ;;  %v12082_v17 = vadd.f32 %v12081_v42, %v12080_v29  ;;  %v11487_v38 = vrot.slane %v11479_v4, %v13795_v10  ;;  %v11510_v49 = vrot.slane %v11094_v7, %v13795_v10 }
 0x2cb   : > { %v11496_v58 = vcombine.low %v11087_v19, %v11095_v45  ;;  %v11096_v30 = vcombine.high %v11094_v7, %v11094_v7 }
 0x2cc   : > { %v11494_v43 = vrot.slane %v11480_v9, %v13795_v10  ;;  %v10919_v34 = vpop.f32.mrb[4].mxu0 }
 0x2cd   : > { %v11503_v46 = vrot.slane %v11496_v58, %v13795_v10  ;;  %v13010_v22 = vadd.f32 %v10919_v34, %v5013_v28  ;;  %v12960_v53 = vpop.f32.mrb[5].mxu0 }
 0x2ce   : > { %v11495_v35 = vcombine.low %v11487_v38, %v11494_v43  ;;  %v10922_v14 = vpop.f32.mrb[6].mxu0 }
 0x2cf   : > { %v11511_v57 = vcombine.low %v11503_v46, %v11510_v49  ;;  %v11097_v55 = vcombine.high %v13010_v22, %v13010_v22  ;;  %v11104_v59 = vrot.slane %v13010_v22, %v13795_v10  ;;  %v12000_v41 = vsel %vm396_vm1, %v13010_v22, 0.0  ;;  %v12961_v47 = vpop.f32.mrb[7].mxu0 }
 0x2d0   : > { %11969 = vst.msk [vmem:[%s15508_s14] sm:$0xff] %vm396_vm1, %v11495_v35  ;;  %v12001_v62 = vadd.f32 %v12000_v41, %v11999_v60  ;;  %v12057_v6 = vmul.f32 %v13010_v22, %v13010_v22  ;;  %v13011_v2 = vadd.f32 %v10922_v14, %v15471_v36 }
 0x2d1   : > { %11970 = vst.msk [vmem:[%s15508_s14 + $0x8] sm:$0x3f] %vm431_vm2, %v11511_v57  ;;  %v11111_v28 = vrot.slane %v11097_v55, %v13795_v10  ;;  %v11112_v16 = vcombine.high %v11104_v59, %v11104_v59  ;;  %v11512_v44 = vcombine.low %v11096_v30, %v11104_v59 }
 0x2d2   : > { %v12083_v23 = vsel %vm396_vm1, %v12057_v6, 0.0  ;;  %v11114_v32 = vcombine.high %v13011_v2, %v13011_v2  ;;  %v11121_v12 = vrot.slane %v13011_v2, %v13795_v10  ;;  %v12002_v13 = vsel %vm396_vm1, %v13011_v2, 0.0 }
 0x2d3   : > { %v11513_v24 = vcombine.low %v11112_v16, %v11111_v28  ;;  %v12084_v25 = vadd.f32 %v12083_v23, %v12082_v17  ;;  %v11113_v3 = vcombine.high %v11111_v28, %v11111_v28  ;;  %v12003_v26 = vadd.f32 %v12002_v13, %v12001_v62 }
 0x2d4   : > { %v11128_v48 = vrot.slane %v11114_v32, %v13795_v10  ;;  %v11129_v36 = vcombine.high %v11121_v12, %v11121_v12  ;;  %v12058_v63 = vmul.f32 %v13011_v2, %v13011_v2  ;;  %v11520_v20 = vrot.slane %v11512_v44, %v13795_v10 }
 0x2d5   : > { %v11527_v31 = vrot.slane %v11513_v24, %v13795_v10  ;;  %v11529_v33 = vcombine.low %v11113_v3, %v11121_v12 }
 0x2d6   : > { %v12085_v18 = vsel %vm396_vm1, %v12058_v63, 0.0  ;;  %v11543_v8 = vrot.slane %v11129_v36, %v13795_v10  ;;  %v11130_v1 = vcombine.high %v11128_v48, %v11128_v48 }
 0x2d7   : > { %v11528_v51 = vcombine.low %v11520_v20, %v11527_v31  ;;  %v11536_v27 = vrot.slane %v11529_v33, %v13795_v10  ;;  %v12086_v40 = vadd.f32 %v12085_v18, %v12084_v25  ;;  %v10927_v19 = vpop.f32.mrb[8].mxu0 }
 0x2d8   : > { %v13012_v5 = vadd.f32 %v10927_v19, %v15473_v61  ;;  %v12964_v39 = vpop.f32.mrb[9].mxu0  ;;  %v11545_v38 = vcombine.low %v11128_v48, %v11130_v1 }
 0x2d9   : > { %11971 = vst.msk [vmem:[%s15508_s14 + $0x10] sm:$0xff] %vm396_vm1, %v11528_v51  ;;  %v11544_v4 = vcombine.low %v11536_v27, %v11543_v8  ;;  %v10930_v60 = vpop.f32.mrb[10].mxu0 }
 0x2da   : > { %v11131_v29 = vcombine.high %v13012_v5, %v13012_v5  ;;  %v11138_v7 = vrot.slane %v13012_v5, %v13795_v10  ;;  %v12004_v45 = vsel %vm396_vm1, %v13012_v5, 0.0  ;;  %v12965_v42 = vpop.f32.mrb[11].mxu0  ;;  %v12059_v17 = vmul.f32 %v13012_v5, %v13012_v5 }
 0x2db   : > { %11972 = vst.msk [vmem:[%s15508_s14 + $0x18] sm:$0x3f] %vm431_vm2, %v11544_v4  ;;  %v12005_v9 = vadd.f32 %v12004_v45, %v12003_v26  ;;  %v13013_v58 = vadd.f32 %v10930_v60, %v15475_v0  ;;  %v11553_v59 = vrot.slane %v11545_v38, %v13795_v10 }
 0x2dc   : > { %v11145_v61 = vrot.slane %v11131_v29, %v13795_v10  ;;  %v11146_v43 = vcombine.high %v11138_v7, %v11138_v7  ;;  %v12087_v34 = vsel %vm396_vm1, %v12059_v17, 0.0 }
 0x2dd   : > { %v11148_v46 = vcombine.high %v13013_v58, %v13013_v58  ;;  %v11155_v49 = vrot.slane %v13013_v58, %v13795_v10  ;;  %v12006_v22 = vsel %vm396_vm1, %v13013_v58, 0.0  ;;  %v12088_v30 = vadd.f32 %v12087_v34, %v12086_v40 }
 0x2de   : > { %v11147_v53 = vcombine.high %v11145_v61, %v11145_v61  ;;  %v11546_v35 = vcombine.low %v11138_v7, %v11146_v43  ;;  %v12007_v14 = vadd.f32 %v12006_v22, %v12005_v9  ;;  %v12060_v0 = vmul.f32 %v13013_v58, %v13013_v58 }
 0x2df   : > { %v11162_v57 = vrot.slane %v11148_v46, %v13795_v10  ;;  %v11163_v55 = vcombine.high %v11155_v49, %v11155_v49  ;;  %v11576_v62 = vrot.slane %v11155_v49, %v13795_v10 }
 0x2e0   : > { %v11560_v41 = vrot.slane %v11546_v35, %v13795_v10  ;;  %v11562_v47 = vcombine.low %v11145_v61, %v11147_v53  ;;  %v12089_v2 = vsel %vm396_vm1, %v12060_v0, 0.0 }
 0x2e1   : > { %v11578_v6 = vcombine.low %v11163_v55, %v11162_v57  ;;  %v10935_v28 = vpop.f32.mrb[12].mxu0  ;;  %v12090_v23 = vadd.f32 %v12089_v2, %v12088_v30  ;;  %v11164_v13 = vcombine.high %v11162_v57, %v11162_v57 }
 0x2e2   : > { %v11561_v16 = vcombine.low %v11553_v59, %v11560_v41  ;;  %v11569_v44 = vrot.slane %v11562_v47, %v13795_v10  ;;  %v13014_v32 = vadd.f32 %v10935_v28, %v15477_v11  ;;  %v12968_v12 = vpop.f32.mrb[13].mxu0 }
 0x2e3   : > { %v10938_v24 = vpop.f32.mrb[14].mxu0  ;;  %v11586_v33 = vrot.slane %v11578_v6, %v13795_v10 }
 0x2e4   : > { %11973 = vst.msk [vmem:[%s15508_s14 + $0x20] sm:$0xff] %vm396_vm1, %v11561_v16  ;;  %v11577_v25 = vcombine.low %v11569_v44, %v11576_v62  ;;  %v11165_v3 = vcombine.high %v13014_v32, %v13014_v32  ;;  %v11172_v48 = vrot.slane %v13014_v32, %v13795_v10  ;;  %v12008_v36 = vsel %vm396_vm1, %v13014_v32, 0.0  ;;  %v12969_v26 = vpop.f32.mrb[15].mxu0 }
 0x2e5   : > { %v12009_v63 = vadd.f32 %v12008_v36, %v12007_v14  ;;  %v12061_v20 = vmul.f32 %v13014_v32, %v13014_v32  ;;  %v13015_v31 = vadd.f32 %v10938_v24, %v15479_v54 }
 0x2e6   : > { %11974 = vst.msk [vmem:[%s15508_s14 + $0x28] sm:$0x3f] %vm431_vm2, %v11577_v25  ;;  %v11179_v11 = vrot.slane %v11165_v3, %v13795_v10  ;;  %v11180_v18 = vcombine.high %v11172_v48, %v11172_v48  ;;  %v11579_v51 = vcombine.low %v11164_v13, %v11172_v48 }
 0x2e7   : > { %v12091_v27 = vsel %vm396_vm1, %v12061_v20, 0.0  ;;  %v11182_v8 = vcombine.high %v13015_v31, %v13015_v31  ;;  %v11189_v40 = vrot.slane %v13015_v31, %v13795_v10  ;;  %v12010_v19 = vsel %vm396_vm1, %v13015_v31, 0.0 }
 0x2e8   : > { %v11181_v1 = vcombine.high %v11179_v11, %v11179_v11  ;;  %v11593_v5 = vrot.slane %v11579_v51, %v13795_v10  ;;  %v11595_v54 = vcombine.low %v11180_v18, %v11179_v11  ;;  %v12092_v39 = vadd.f32 %v12091_v27, %v12090_v23 }
 0x2e9   : > { %v11196_v4 = vrot.slane %v11182_v8, %v13795_v10  ;;  %v11197_v60 = vcombine.high %v11189_v40, %v11189_v40  ;;  %v12011_v29 = vadd.f32 %v12010_v19, %v12009_v63  ;;  %v12062_v7 = vmul.f32 %v13015_v31, %v13015_v31 }
 0x2ea   : > { %v11594_v45 = vcombine.low %v11586_v33, %v11593_v5  ;;  %v11602_v42 = vrot.slane %v11595_v54, %v13795_v10  ;;  %v11609_v9 = vrot.slane %v11181_v1, %v13795_v10 }
 0x2eb   : > { %v11198_v17 = vcombine.high %v11196_v4, %v11196_v4  ;;  %v11611_v58 = vcombine.low %v11189_v40, %v11197_v60  ;;  %v12093_v38 = vsel %vm396_vm1, %v12062_v7, 0.0  ;;  %v10943_v61 = vpop.f32.mrb[16].mxu0 }
 0x2ec   : > { %v11610_v43 = vcombine.low %v11602_v42, %v11609_v9  ;;  %11975 = vst.msk [vmem:[%s15508_s14 + $0x30] sm:$0xff] %vm396_vm1, %v11594_v45  ;;  %v12094_v34 = vadd.f32 %v12093_v38, %v12092_v39  ;;  %v13016_v46 = vadd.f32 %v10943_v61, %v15481_v37  ;;  %v12972_v49 = vpop.f32.mrb[17].mxu0 }
 0x2ed   : > { %v11612_v22 = vcombine.low %v11196_v4, %v11198_v17  ;;  %v10946_v53 = vpop.f32.mrb[18].mxu0  ;;  %v11619_v0 = vrot.slane %v11611_v58, %v13795_v10 }
 0x2ee   : > { %11976 = vst.msk [vmem:[%s15508_s14 + $0x38] sm:$0x3f] %vm431_vm2, %v11610_v43  ;;  %v11199_v35 = vcombine.high %v13016_v46, %v13016_v46  ;;  %v11206_v30 = vrot.slane %v13016_v46, %v13795_v10  ;;  %v12012_v14 = vsel %vm396_vm1, %v13016_v46, 0.0  ;;  %v12063_v57 = vmul.f32 %v13016_v46, %v13016_v46  ;;  %v12973_v55 = vpop.f32.mrb[19].mxu0 }
 0x2ef   : > { %v11626_v59 = vrot.slane %v11612_v22, %v13795_v10  ;;  %v12013_v41 = vadd.f32 %v12012_v14, %v12011_v29  ;;  %v13017_v37 = vadd.f32 %v10946_v53, %v15483_v56 }
 0x2f0   : > { %v11213_v47 = vrot.slane %v11199_v35, %v13795_v10  ;;  %v11214_v62 = vcombine.high %v11206_v30, %v11206_v30  ;;  %v12095_v6 = vsel %vm396_vm1, %v12063_v57, 0.0 }
 0x2f1   : > { %v11627_v2 = vcombine.low %v11619_v0, %v11626_v59  ;;  %v12096_v28 = vadd.f32 %v12095_v6, %v12094_v34  ;;  %v11216_v16 = vcombine.high %v13017_v37, %v13017_v37  ;;  %v11223_v44 = vrot.slane %v13017_v37, %v13795_v10 }
 0x2f2   : > { %v11628_v23 = vcombine.low %v11206_v30, %v11214_v62  ;;  %v11215_v32 = vcombine.high %v11213_v47, %v11213_v47  ;;  %v12014_v12 = vsel %vm396_vm1, %v13017_v37, 0.0  ;;  %v12064_v25 = vmul.f32 %v13017_v37, %v13017_v37 }
 0x2f3   : > { %11977 = vst.msk [vmem:[%s15508_s14 + $0x40] sm:$0xff] %vm396_vm1, %v11627_v2  ;;  %v11230_v13 = vrot.slane %v11216_v16, %v13795_v10  ;;  %v11231_v24 = vcombine.high %v11223_v44, %v11223_v44  ;;  %v12015_v56 = vadd.f32 %v12014_v12, %v12013_v41  ;;  %v10951_v3 = vpop.f32.mrb[20].mxu0  ;;  %v11642_v36 = vrot.slane %v11213_v47, %v13795_v10 }
 0x2f4   : > { %v11635_v48 = vrot.slane %v11628_v23, %v13795_v10  ;;  %v11644_v26 = vcombine.low %v11215_v32, %v11223_v44  ;;  %v13018_v63 = vadd.f32 %v10951_v3, %v15485_v52  ;;  %v12976_v20 = vpop.f32.mrb[21].mxu0  ;;  %v12097_v33 = vsel %vm396_vm1, %v12064_v25, 0.0 }
 0x2f5   : > { %v11645_v31 = vcombine.low %v11231_v24, %v11230_v13  ;;  %v11232_v11 = vcombine.high %v11230_v13, %v11230_v13  ;;  %v10954_v18 = vpop.f32.mrb[22].mxu0  ;;  %v12098_v8 = vadd.f32 %v12097_v33, %v12096_v28 }
 0x2f6   : > { %v11643_v51 = vcombine.low %v11635_v48, %v11642_v36  ;;  %v11652_v27 = vrot.slane %v11644_v26, %v13795_v10  ;;  %v11233_v40 = vcombine.high %v13018_v63, %v13018_v63  ;;  %v12977_v19 = vpop.f32.mrb[23].mxu0  ;;  %v11240_v5 = vrot.slane %v13018_v63, %v13795_v10 }
 0x2f7   : > { %v11659_v1 = vrot.slane %v11645_v31, %v13795_v10  ;;  %v12016_v54 = vsel %vm396_vm1, %v13018_v63, 0.0  ;;  %v12065_v52 = vmul.f32 %v13018_v63, %v13018_v63  ;;  %v15590_v39 = vpop.f32.mrb[28].mxu1  ;;  %v13019_v29 = vadd.f32 %v10954_v18, %v15487_v50 }
 0x2f8   : > { %11978 = vst.msk [vmem:[%s15508_s14 + $0x48] sm:$0x3f] %vm431_vm2, %v11643_v51  ;;  %v11247_v4 = vrot.slane %v11233_v40, %v13795_v10  ;;  %v12017_v60 = vadd.f32 %v12016_v54, %v12015_v56  ;;  %v12768_v7 = vpop.f32.mrb[29].mxu1  ;;  %v11248_v42 = vcombine.high %v11240_v5, %v11240_v5  ;;  %v11661_v9 = vcombine.low %v11232_v11, %v11240_v5 }
 0x2f9   : > { %v11660_v45 = vcombine.low %v11652_v27, %v11659_v1  ;;  %v12099_v17 = vsel %vm396_vm1, %v12065_v52, 0.0  ;;  %v15597_v58 = vpop.f32.mrb[30].mxu1  ;;  %v11250_v43 = vcombine.high %v13019_v29, %v13019_v29  ;;  %v11257_v34 = vrot.slane %v13019_v29, %v13795_v10 }
 0x2fa   : > { %v11249_v38 = vcombine.high %v11247_v4, %v11247_v4  ;;  %v12100_v61 = vadd.f32 %v12099_v17, %v12098_v8  ;;  %v12769_v46 = vpop.f32.mrb[31].mxu1  ;;  %v11668_v49 = vrot.slane %v11661_v9, %v13795_v10  ;;  %v11675_v50 = vrot.slane %v11248_v42, %v13795_v10 }
 0x2fb   : > { %11979 = vst.msk [vmem:[%s15508_s14 + $0x50] sm:$0xff] %vm396_vm1, %v11660_v45  ;;  %v12018_v22 = vsel %vm396_vm1, %v13019_v29, 0.0  ;;  %v12066_v53 = vmul.f32 %v13019_v29, %v13019_v29  ;;  %v11264_v30 = vrot.slane %v11250_v43, %v13795_v10  ;;  %v11265_v14 = vcombine.high %v11257_v34, %v11257_v34 }
 0x2fc   : > { %v11677_v35 = vcombine.low %v11247_v4, %v11249_v38  ;;  %v12019_v57 = vadd.f32 %v12018_v22, %v12017_v60  ;;  %v11676_v55 = vcombine.low %v11668_v49, %v11675_v50 }
 0x2fd   : > { %v12101_v0 = vsel %vm396_vm1, %v12066_v53, 0.0  ;;  %v10959_v59 = vpop.f32.mrb[24].mxu0  ;;  %v11266_v37 = vcombine.high %v11264_v30, %v11264_v30  ;;  %v11678_v47 = vcombine.low %v11257_v34, %v11265_v14 }
 0x2fe   : > { %v11685_v41 = vrot.slane %v11677_v35, %v13795_v10  ;;  %v12102_v62 = vadd.f32 %v12101_v0, %v12100_v61  ;;  %v12980_v6 = vpop.f32.mrb[25].mxu0  ;;  %11980 = vst.msk [vmem:[%s15508_s14 + $0x58] sm:$0x3f] %vm431_vm2, %v11676_v55  ;;  %v13020_v2 = vadd.f32 %v10959_v59, %v15489_v21 }
 0x2ff   : > { %v10962_v28 = vpop.f32.mrb[26].mxu0  ;;  %v11692_v16 = vrot.slane %v11678_v47, %v13795_v10  ;;  %v11694_v44 = vcombine.low %v11264_v30, %v11266_v37 }
 0x300   : > { %v13021_v23 = vadd.f32 %v10962_v28, %v15491_v15  ;;  %v12981_v32 = vpop.f32.mrb[27].mxu0  ;;  %v11267_v12 = vcombine.high %v13020_v2, %v13020_v2  ;;  %v11274_v13 = vrot.slane %v13020_v2, %v13795_v10  ;;  %v12020_v24 = vsel %vm396_vm1, %v13020_v2, 0.0 }
 0x301   : > { %v12067_v56 = vmul.f32 %v13020_v2, %v13020_v2  ;;  %v11693_v25 = vcombine.low %v11685_v41, %v11692_v16  ;;  %v11701_v3 = vrot.slane %v11694_v44, %v13795_v10  ;;  %v12021_v48 = vadd.f32 %v12020_v24, %v12019_v57 }
 0x302   : > { %v11284_v36 = vcombine.high %v13021_v23, %v13021_v23  ;;  %v15616_v21 = vpop.f32.mrb[32].mxu1  ;;  %v11281_v26 = vrot.slane %v11267_v12, %v13795_v10  ;;  %v11282_v63 = vcombine.high %v11274_v13, %v11274_v13  ;;  %v11708_v15 = vrot.slane %v11274_v13, %v13795_v10 }
 0x303   : > { %v12103_v20 = vsel %vm396_vm1, %v12067_v56, 0.0  ;;  %v12772_v31 = vpop.f32.mrb[33].mxu1  ;;  %11981 = vst.msk [vmem:[%s15508_s14 + $0x60] sm:$0xff] %vm396_vm1, %v11693_v25  ;;  %v11291_v11 = vrot.slane %v13021_v23, %v13795_v10  ;;  %v12022_v51 = vsel %vm396_vm1, %v13021_v23, 0.0  ;;  %v12068_v4 = vmul.f32 %v13021_v23, %v13021_v23 }
 0x304   : > { %v12104_v33 = vadd.f32 %v12103_v20, %v12102_v62  ;;  %v11298_v18 = vrot.slane %v11284_v36, %v13795_v10  ;;  %v15626_v27 = vpop.f32.mrb[34].mxu1  ;;  %v11709_v8 = vcombine.low %v11701_v3, %v11708_v15  ;;  %v11710_v40 = vcombine.low %v11282_v63, %v11281_v26 }
 0x305   : > { %v11283_v19 = vcombine.high %v11281_v26, %v11281_v26  ;;  %v12023_v1 = vadd.f32 %v12022_v51, %v12021_v48  ;;  %v12773_v5 = vpop.f32.mrb[35].mxu1  ;;  %v11299_v54 = vcombine.high %v11291_v11, %v11291_v11  ;;  %v12105_v42 = vsel %vm396_vm1, %v12068_v4, 0.0 }
 0x306   : > { %v11300_v52 = vcombine.high %v11298_v18, %v11298_v18  ;;  %11982 = vst.msk [vmem:[%s15508_s14 + $0x68] sm:$0x3f] %vm431_vm2, %v11709_v8  ;;  %v11718_v38 = vrot.slane %v11710_v40, %v13795_v10  ;;  %v12106_v43 = vadd.f32 %v12105_v42, %v12104_v33 }
 0x307   : > { %v11711_v60 = vcombine.low %v11283_v19, %v11291_v11  ;;  %v10967_v29 = vpop.f32.mrb[28].mxu0  ;;  %v11727_v7 = vcombine.low %v11299_v54, %v11298_v18 }
 0x308   : > { %v11741_v45 = vrot.slane %v11300_v52, %v13795_v10  ;;  %v13022_v9 = vadd.f32 %v10967_v29, %v15590_v39  ;;  %v12984_v17 = vpop.f32.mrb[29].mxu0 }
 0x309   : > { %v11725_v61 = vrot.slane %v11711_v60, %v13795_v10  ;;  %v10970_v34 = vpop.f32.mrb[30].mxu0  ;;  %v11734_v46 = vrot.slane %v11727_v7, %v13795_v10 }
 0x30a   : > { %v11301_v49 = vcombine.high %v13022_v9, %v13022_v9  ;;  %v11308_v50 = vrot.slane %v13022_v9, %v13795_v10  ;;  %v12024_v22 = vsel %vm396_vm1, %v13022_v9, 0.0  ;;  %v12985_v53 = vpop.f32.mrb[31].mxu0  ;;  %v12069_v39 = vmul.f32 %v13022_v9, %v13022_v9 }
 0x30b   : > { %v11726_v35 = vcombine.low %v11718_v38, %v11725_v61  ;;  %v12025_v30 = vadd.f32 %v12024_v22, %v12023_v1  ;;  %v13023_v14 = vadd.f32 %v10970_v34, %v15597_v58  ;;  %v11742_v57 = vcombine.low %v11734_v46, %v11741_v45 }
 0x30c   : > { %v11315_v55 = vrot.slane %v11301_v49, %v13795_v10  ;;  %v11316_v0 = vcombine.high %v11308_v50, %v11308_v50  ;;  %v12107_v59 = vsel %vm396_vm1, %v12069_v39, 0.0 }
 0x30d   : > { %11983 = vst.msk [vmem:[%s15508_s14 + $0x70] sm:$0xff] %vm396_vm1, %v11726_v35  ;;  %v11318_v41 = vcombine.high %v13023_v14, %v13023_v14  ;;  %v11325_v37 = vrot.slane %v13023_v14, %v13795_v10  ;;  %v12026_v47 = vsel %vm396_vm1, %v13023_v14, 0.0  ;;  %v15645_v62 = vpop.f32.mrb[36].mxu1  ;;  %v12108_v58 = vadd.f32 %v12107_v59, %v12106_v43 }
 0x30e   : > { %11984 = vst.msk [vmem:[%s15508_s14 + $0x78] sm:$0x3f] %vm431_vm2, %v11742_v57  ;;  %v11317_v6 = vcombine.high %v11315_v55, %v11315_v55  ;;  %v11743_v2 = vcombine.low %v11308_v50, %v11316_v0  ;;  %v12027_v28 = vadd.f32 %v12026_v47, %v12025_v30  ;;  %v12776_v16 = vpop.f32.mrb[37].mxu1  ;;  %v12070_v32 = vmul.f32 %v13023_v14, %v13023_v14 }
 0x30f   : > { %v11332_v44 = vrot.slane %v11318_v41, %v13795_v10  ;;  %v11333_v23 = vcombine.high %v11325_v37, %v11325_v37  ;;  %v15650_v12 = vpop.f32.mrb[38].mxu1 }
 0x310   : > { %v11744_v13 = vcombine.low %v11315_v55, %v11317_v6  ;;  %v12777_v24 = vpop.f32.mrb[39].mxu1  ;;  %v12109_v25 = vsel %vm396_vm1, %v12070_v32, 0.0  ;;  %v11751_v3 = vrot.slane %v11743_v2, %v13795_v10 }
 0x311   : > { %v11760_v56 = vcombine.low %v11325_v37, %v11333_v23  ;;  %v12110_v36 = vadd.f32 %v12109_v25, %v12108_v58  ;;  %v11774_v15 = vrot.slane %v11332_v44, %v13795_v10  ;;  %v11334_v11 = vcombine.high %v11332_v44, %v11332_v44 }
 0x312   : > { %v11758_v48 = vrot.slane %v11744_v13, %v13795_v10  ;;  %v10975_v26 = vpop.f32.mrb[32].mxu0 }
 0x313   : > { %v11767_v63 = vrot.slane %v11760_v56, %v13795_v10  ;;  %v13024_v20 = vadd.f32 %v10975_v26, %v15616_v21  ;;  %v12988_v31 = vpop.f32.mrb[33].mxu0 }
 0x314   : > { %v11759_v33 = vcombine.low %v11751_v3, %v11758_v48  ;;  %v10978_v18 = vpop.f32.mrb[34].mxu0 }
 0x315   : > { %v11775_v51 = vcombine.low %v11767_v63, %v11774_v15  ;;  %v11335_v8 = vcombine.high %v13024_v20, %v13024_v20  ;;  %v11342_v40 = vrot.slane %v13024_v20, %v13795_v10  ;;  %v12028_v19 = vsel %vm396_vm1, %v13024_v20, 0.0  ;;  %v12989_v1 = vpop.f32.mrb[35].mxu0 }
 0x316   : > { %11985 = vst.msk [vmem:[%s15508_s14 + $0x80] sm:$0xff] %vm396_vm1, %v11759_v33  ;;  %v12029_v5 = vadd.f32 %v12028_v19, %v12027_v28  ;;  %v12071_v54 = vmul.f32 %v13024_v20, %v13024_v20  ;;  %v13025_v52 = vadd.f32 %v10978_v18, %v15626_v27 }
 0x317   : > { %11986 = vst.msk [vmem:[%s15508_s14 + $0x88] sm:$0x3f] %vm431_vm2, %v11775_v51  ;;  %v11349_v21 = vrot.slane %v11335_v8, %v13795_v10  ;;  %v11350_v4 = vcombine.high %v11342_v40, %v11342_v40  ;;  %v11776_v60 = vcombine.low %v11334_v11, %v11342_v40 }
 0x318   : > { %v12111_v29 = vsel %vm396_vm1, %v12071_v54, 0.0  ;;  %v11352_v7 = vcombine.high %v13025_v52, %v13025_v52  ;;  %v11359_v45 = vrot.slane %v13025_v52, %v13795_v10  ;;  %v12030_v42 = vsel %vm396_vm1, %v13025_v52, 0.0  ;;  %v6266_v9 = vpop.f32.mrb[40].mxu1 }
 0x319   : > { %v11777_v17 = vcombine.low %v11350_v4, %v11349_v21  ;;  %v12112_v38 = vadd.f32 %v12111_v29, %v12110_v36  ;;  %v11351_v61 = vcombine.high %v11349_v21, %v11349_v21  ;;  %v12780_v43 = vpop.f32.mrb[41].mxu1  ;;  %v12031_v46 = vadd.f32 %v12030_v42, %v12029_v5 }
 0x31a   : > { %v11366_v27 = vrot.slane %v11352_v7, %v13795_v10  ;;  %v11367_v34 = vcombine.high %v11359_v45, %v11359_v45  ;;  %v12072_v49 = vmul.f32 %v13025_v52, %v13025_v52  ;;  %v15670_v50 = vpop.f32.mrb[42].mxu1  ;;  %v11784_v22 = vrot.slane %v11776_v60, %v13795_v10 }
 0x31b   : > { %v11791_v53 = vrot.slane %v11777_v17, %v13795_v10  ;;  %v11793_v35 = vcombine.low %v11351_v61, %v11359_v45  ;;  %v12781_v30 = vpop.f32.mrb[43].mxu1 }
 0x31c   : > { %v12113_v39 = vsel %vm396_vm1, %v12072_v49, 0.0  ;;  %v11807_v55 = vrot.slane %v11367_v34, %v13795_v10  ;;  %v11368_v41 = vcombine.high %v11366_v27, %v11366_v27 }
 0x31d   : > { %v11792_v14 = vcombine.low %v11784_v22, %v11791_v53  ;;  %v11800_v57 = vrot.slane %v11793_v35, %v13795_v10  ;;  %v12114_v0 = vadd.f32 %v12113_v39, %v12112_v38  ;;  %v10983_v59 = vpop.f32.mrb[36].mxu0 }
 0x31e   : > { %v13026_v37 = vadd.f32 %v10983_v59, %v15645_v62  ;;  %v12992_v47 = vpop.f32.mrb[37].mxu0  ;;  %v11809_v24 = vcombine.low %v11366_v27, %v11368_v41 }
 0x31f   : > { %11987 = vst.msk [vmem:[%s15508_s14 + $0x90] sm:$0xff] %vm396_vm1, %v11792_v14  ;;  %v11808_v6 = vcombine.low %v11800_v57, %v11807_v55  ;;  %v10986_v2 = vpop.f32.mrb[38].mxu0 }
 0x320   : > { %v11369_v58 = vcombine.high %v13026_v37, %v13026_v37  ;;  %v11376_v28 = vrot.slane %v13026_v37, %v13795_v10  ;;  %v12032_v16 = vsel %vm396_vm1, %v13026_v37, 0.0  ;;  %v12993_v44 = vpop.f32.mrb[39].mxu0  ;;  %v12073_v32 = vmul.f32 %v13026_v37, %v13026_v37 }
 0x321   : > { %11988 = vst.msk [vmem:[%s15508_s14 + $0x98] sm:$0x3f] %vm431_vm2, %v11808_v6  ;;  %v12033_v23 = vadd.f32 %v12032_v16, %v12031_v46  ;;  %v13027_v13 = vadd.f32 %v10986_v2, %v15650_v12  ;;  %v11817_v40 = vrot.slane %v11809_v24, %v13795_v10 }
 0x322   : > { %v11383_v62 = vrot.slane %v11369_v58, %v13795_v10  ;;  %v11384_v56 = vcombine.high %v11376_v28, %v11376_v28  ;;  %v15686_v25 = vpop.f32.mrb[44].mxu1  ;;  %v12115_v3 = vsel %vm396_vm1, %v12073_v32, 0.0 }
 0x323   : > { %v11386_v48 = vcombine.high %v13027_v13, %v13027_v13  ;;  %v11393_v36 = vrot.slane %v13027_v13, %v13795_v10  ;;  %v12034_v26 = vsel %vm396_vm1, %v13027_v13, 0.0  ;;  %v12784_v63 = vpop.f32.mrb[45].mxu1  ;;  %v12116_v31 = vadd.f32 %v12115_v3, %v12114_v0 }
 0x324   : > { %v11385_v15 = vcombine.high %v11383_v62, %v11383_v62  ;;  %v11810_v20 = vcombine.low %v11376_v28, %v11384_v56  ;;  %v12035_v33 = vadd.f32 %v12034_v26, %v12033_v23  ;;  %v15691_v11 = vpop.f32.mrb[46].mxu1  ;;  %v12074_v51 = vmul.f32 %v13027_v13, %v13027_v13 }
 0x325   : > { %v11400_v12 = vrot.slane %v11386_v48, %v13795_v10  ;;  %v11401_v18 = vcombine.high %v11393_v36, %v11393_v36  ;;  %v12785_v8 = vpop.f32.mrb[47].mxu1  ;;  %v11840_v5 = vrot.slane %v11393_v36, %v13795_v10 }
 0x326   : > { %v11824_v19 = vrot.slane %v11810_v20, %v13795_v10  ;;  %v11826_v1 = vcombine.low %v11383_v62, %v11385_v15  ;;  %v12117_v52 = vsel %vm396_vm1, %v12074_v51, 0.0 }
 0x327   : > { %v11842_v54 = vcombine.low %v11401_v18, %v11400_v12  ;;  %v10991_v21 = vpop.f32.mrb[40].mxu0  ;;  %v12118_v29 = vadd.f32 %v12117_v52, %v12116_v31  ;;  %v11402_v42 = vcombine.high %v11400_v12, %v11400_v12 }
 0x328   : > { %v11825_v4 = vcombine.low %v11817_v40, %v11824_v19  ;;  %v11833_v60 = vrot.slane %v11826_v1, %v13795_v10  ;;  %v13028_v7 = vadd.f32 %v10991_v21, %v6266_v9  ;;  %v12996_v45 = vpop.f32.mrb[41].mxu0 }
 0x329   : > { %v10994_v17 = vpop.f32.mrb[42].mxu0  ;;  %v11850_v35 = vrot.slane %v11842_v54, %v13795_v10 }
 0x32a   : > { %11989 = vst.msk [vmem:[%s15508_s14 + $0xa0] sm:$0xff] %vm396_vm1, %v11825_v4  ;;  %v11841_v38 = vcombine.low %v11833_v60, %v11840_v5  ;;  %v11403_v61 = vcombine.high %v13028_v7, %v13028_v7  ;;  %v11410_v43 = vrot.slane %v13028_v7, %v13795_v10  ;;  %v12036_v27 = vsel %vm396_vm1, %v13028_v7, 0.0  ;;  %v12997_v34 = vpop.f32.mrb[43].mxu0  ;;  %v15703_v46 = vpop.f32.mrb[48].mxu1 }
 0x32b   : > { %v12037_v49 = vadd.f32 %v12036_v27, %v12035_v33  ;;  %v12075_v22 = vmul.f32 %v13028_v7, %v13028_v7  ;;  %v13029_v53 = vadd.f32 %v10994_v17, %v15670_v50  ;;  %v12788_v9 = vpop.f32.mrb[49].mxu1 }
 0x32c   : > { %11990 = vst.msk [vmem:[%s15508_s14 + $0xa8] sm:$0x3f] %vm431_vm2, %v11841_v38  ;;  %v11417_v30 = vrot.slane %v11403_v61, %v13795_v10  ;;  %v11418_v39 = vcombine.high %v11410_v43, %v11410_v43  ;;  %v11843_v14 = vcombine.low %v11402_v42, %v11410_v43  ;;  %v6285_v57 = vpop.f32.mrb[50].mxu1 }
 0x32d   : > { %v12119_v55 = vsel %vm396_vm1, %v12075_v22, 0.0  ;;  %v11420_v0 = vcombine.high %v13029_v53, %v13029_v53  ;;  %v11427_v59 = vrot.slane %v13029_v53, %v13795_v10  ;;  %v12038_v41 = vsel %vm396_vm1, %v13029_v53, 0.0  ;;  %v12789_v37 = vpop.f32.mrb[51].mxu1 }
 0x32e   : > { %v11419_v47 = vcombine.high %v11417_v30, %v11417_v30  ;;  %v11857_v50 = vrot.slane %v11843_v14, %v13795_v10  ;;  %v11859_v6 = vcombine.low %v11418_v39, %v11417_v30  ;;  %v12120_v2 = vadd.f32 %v12119_v55, %v12118_v29 }
 0x32f   : > { %v11434_v58 = vrot.slane %v11420_v0, %v13795_v10  ;;  %v11435_v28 = vcombine.high %v11427_v59, %v11427_v59  ;;  %v12039_v16 = vadd.f32 %v12038_v41, %v12037_v49  ;;  %v12076_v44 = vmul.f32 %v13029_v53, %v13029_v53  ;;  %v10999_v23 = vpop.f32.mrb[44].mxu0 }
 0x330   : > { %v11858_v32 = vcombine.low %v11850_v35, %v11857_v50  ;;  %v11866_v13 = vrot.slane %v11859_v6, %v13795_v10  ;;  %v11873_v24 = vrot.slane %v11419_v47, %v13795_v10  ;;  %v13030_v62 = vadd.f32 %v10999_v23, %v15686_v25  ;;  %v13000_v56 = vpop.f32.mrb[45].mxu0 }
 0x331   : > { %v11436_v3 = vcombine.high %v11434_v58, %v11434_v58  ;;  %v11875_v48 = vcombine.low %v11427_v59, %v11435_v28  ;;  %v12121_v36 = vsel %vm396_vm1, %v12076_v44, 0.0  ;;  %v11002_v26 = vpop.f32.mrb[46].mxu0 }
 0x332   : > { %v11874_v63 = vcombine.low %v11866_v13, %v11873_v24  ;;  %11991 = vst.msk [vmem:[%s15508_s14 + $0xb0] sm:$0xff] %vm396_vm1, %v11858_v32  ;;  %v12122_v15 = vadd.f32 %v12121_v36, %v12120_v2  ;;  %v11437_v20 = vcombine.high %v13030_v62, %v13030_v62  ;;  %v11444_v31 = vrot.slane %v13030_v62, %v13795_v10  ;;  %v13001_v33 = vpop.f32.mrb[47].mxu0 }
 0x333   : > { %v11876_v12 = vcombine.low %v11434_v58, %v11436_v3  ;;  %v12040_v18 = vsel %vm396_vm1, %v13030_v62, 0.0  ;;  %v12077_v51 = vmul.f32 %v13030_v62, %v13030_v62  ;;  %v13031_v19 = vadd.f32 %v11002_v26, %v15691_v11 }
 0x334   : > { %11992 = vst.msk [vmem:[%s15508_s14 + $0xb8] sm:$0x3f] %vm431_vm2, %v11874_v63  ;;  %v11451_v25 = vrot.slane %v11437_v20, %v13795_v10  ;;  %v11452_v8 = vcombine.high %v11444_v31, %v11444_v31  ;;  %v12041_v40 = vadd.f32 %v12040_v18, %v12039_v16  ;;  %v11883_v1 = vrot.slane %v11875_v48, %v13795_v10 }
 0x335   : > { %v11890_v5 = vrot.slane %v11876_v12, %v13795_v10  ;;  %v12123_v54 = vsel %vm396_vm1, %v12077_v51, 0.0  ;;  %v11454_v7 = vcombine.high %v13031_v19, %v13031_v19  ;;  %v11461_v45 = vrot.slane %v13031_v19, %v13795_v10 }
 0x336   : > { %v11892_v52 = vcombine.low %v11444_v31, %v11452_v8  ;;  %v11906_v21 = vrot.slane %v11451_v25, %v13795_v10  ;;  %v12124_v4 = vadd.f32 %v12123_v54, %v12122_v15  ;;  %v11453_v60 = vcombine.high %v11451_v25, %v11451_v25 }
 0x337   : > { %v11891_v29 = vcombine.low %v11883_v1, %v11890_v5  ;;  %v12042_v42 = vsel %vm396_vm1, %v13031_v19, 0.0  ;;  %v11007_v11 = vpop.f32.mrb[48].mxu0  ;;  %v12078_v38 = vmul.f32 %v13031_v19, %v13031_v19  ;;  %v11468_v34 = vrot.slane %v11454_v7, %v13795_v10 }
 0x338   : > { %v11899_v17 = vrot.slane %v11892_v52, %v13795_v10  ;;  %v13032_v61 = vadd.f32 %v11007_v11, %v15703_v46  ;;  %v12043_v43 = vadd.f32 %v12042_v42, %v12041_v40  ;;  %v13004_v27 = vpop.f32.mrb[49].mxu0  ;;  %v11469_v49 = vcombine.high %v11461_v45, %v11461_v45 }
 0x339   : > { %11993 = vst.msk [vmem:[%s15508_s14 + $0xc0] sm:$0xff] %vm396_vm1, %v11891_v29  ;;  %v11908_v22 = vcombine.low %v11453_v60, %v11461_v45  ;;  %v11010_v53 = vpop.f32.mrb[50].mxu0  ;;  %v12125_v35 = vsel %vm396_vm1, %v12078_v38, 0.0  ;;  %v11470_v55 = vcombine.high %v11468_v34, %v11468_v34 }
 0x33a   : > { %v11907_v9 = vcombine.low %v11899_v17, %v11906_v21  ;;  %v11477_v30 = vrot.slane %v13032_v61, %v13795_v10  ;;  %v12045_v39 = vsel %vm12044_vm3, %v13032_v61, 0.0  ;;  %v13005_v14 = vpop.f32.mrb[51].mxu0  ;;  %v11909_v57 = vcombine.low %v11469_v49, %v11468_v34 }
 0x33b   : > { %v11916_v46 = vrot.slane %v11908_v22, %v13795_v10  ;;  %v12046_v0 = vadd.f32 %v12045_v39, %v12043_v43  ;;  %v12079_v41 = vmul.f32 %v13032_v61, %v13032_v61  ;;  %v12126_v37 = vadd.f32 %v12125_v35, %v12124_v4 }
 0x33c   : > { %11994 = vst.msk [vmem:[%s15508_s14 + $0xc8] sm:$0x3f] %vm431_vm2, %v11907_v9  ;;  %v11478_v59 = vcombine.high %v11477_v30, %v11477_v30  ;;  %v11923_v47 = vrot.slane %v11909_v57, %v13795_v10  ;;  %v11925_v50 = vcombine.low %v11470_v55, %v11477_v30 }
 0x33d   : > { %v12047_v6 = vrot.slane %v12046_v0, 4  ;;  %v12127_v58 = vsel %vm12044_vm3, %v12079_v41, 0.0 }
 0x33e   : > { %v11939_v2 = vrot.slane %v11478_v59, %v13795_v10  ;;  %v11924_v28 = vcombine.low %v11916_v46, %v11923_v47  ;;  %v11932_v16 = vrot.slane %v11925_v50, %v13795_v10  ;;  %v12128_v23 = vadd.f32 %v12127_v58, %v12126_v37 }
 0x33f   : > { %v12048_v44 = vadd.f32 %v12047_v6, %v12046_v0 }
 0x340   : > { %11995 = vst.msk [vmem:[%s15508_s14 + $0xd0] sm:$0xff] %vm396_vm1, %v11924_v28  ;;  %v11940_v32 = vcombine.low %v11932_v16, %v11939_v2  ;;  %v12129_v24 = vrot.slane %v12128_v23, 4 }
 0x341   : > { %v12049_v13 = vrot.slane %v12048_v44, 2 }
 0x342   : > { %11996 = vst.msk [vmem:[%s15508_s14 + $0xd8] sm:$0x3f] %vm431_vm2, %v11940_v32  ;;  %v12130_v56 = vadd.f32 %v12129_v24, %v12128_v23 }
 0x343   : > { %v12050_v62 = vadd.f32 %v12049_v13, %v12048_v44 }
 0x344   : > { %v12131_v48 = vrot.slane %v12130_v56, 2 }
 0x345   : > { %v12051_v3 = vrot.slane %v12050_v62, 1 }
 0x346   : > { %v12132_v36 = vadd.f32 %v12131_v48, %v12130_v56 }
 0x347   : > { %v12052_v10 = vadd.f32 %v12051_v3, %v12050_v62 }
 0x348   : > { %v12133_v26 = vrot.slane %v12132_v36, 1 }
 0x349   : > { %12054 = vst.msk [vmem:[%s265_s16] sm:$0x1] %vm12053_vm4, %v12052_v10 }
 0x34a   : > { %v12134_v63 = vadd.f32 %v12133_v26, %v12132_v36 }
 0x34c   : > { %12135 = vst.msk [vmem:[%s268_s19] sm:$0x1] %vm12053_vm4, %v12134_v63 }
 0x34d PF: > { %s17_s21 = sadd.s32 1, %s13649_s21  }
 0x34e   : > { %p14_p4 = scmp.ge.s32.totalorder %s17_s21, 4  }
 0x350   :  { %16 = sbr.rel (!%p14_p4) target bundleno = 1 (0x1), region = 100 }

</bundles_post_ra>
